<compile_context>
chip_gen: v7x
topology: tpu7x:2x2x1
jax: 0.10.0
libtpu: 0.0.40
codegen_flags: <defaults>
</compile_context>

<pallas_src>
import functools

import jax
import jax.numpy as jnp
from jax.experimental import pallas as pl
from jax.experimental.pallas import tpu as pltpu

NUM_CLASSES = 45


def _round_up(x, m):
    return (x + m - 1) // m * m


def _pick_tile(padded, candidates):
    # padded is always a multiple of 128, so the 128 candidate always divides.
    for t in candidates:
        if padded % t == 0:
            return t
    return candidates[-1]


# ---------------------------------------------------------------------------
# Pallas kernel: out = act(A @ W + b [+ residual]) with K-tiled accumulation
# ---------------------------------------------------------------------------
def _fused_mm_kernel(*refs, act, has_res):
    if has_res:
        a_ref, w_ref, b_ref, r_ref, o_ref, acc_ref = refs
    else:
        a_ref, w_ref, b_ref, o_ref, acc_ref = refs
        r_ref = None

    k = pl.program_id(2)

    @pl.when(k == 0)
    def _init():
        acc_ref[...] = jnp.zeros_like(acc_ref)

    # bf16 x bf16 -> f32 accumulate on the MXU.
    acc_ref[...] += jnp.dot(a_ref[...], w_ref[...],
                            preferred_element_type=jnp.float32)

    @pl.when(k == pl.num_programs(2) - 1)
    def _finalize():
        acc = acc_ref[...] + b_ref[...]          # f32 epilogue
        if r_ref is not None:
            acc = acc + r_ref[...].astype(jnp.float32)   # fused residual add
        if act == "relu":
            acc = jnp.maximum(acc, 0.0)
        elif act == "sigmoid":
            acc = jax.nn.sigmoid(acc)
        o_ref[...] = acc.astype(o_ref.dtype)


def pallas_matmul_bias_act(a, w, b, act="none", residual=None,
                           out_dtype=jnp.bfloat16):
    """act(A:(M,K) @ W:(K,N) + b:(N,) [+ residual:(M,N)]) on the MXU."""
    M, K = a.shape
    _, N = w.shape

    TM = min(128, _round_up(M, 16))           # 16-aligned for bf16 sublane packing
    Mp = _round_up(M, TM)
    Np = _round_up(N, 128)
    TN = _pick_tile(Np, (256, 128))
    Kp = _round_up(K, 128)
    TK = _pick_tile(Kp, (512, 384, 256, 128))

    a_p = jnp.pad(a.astype(jnp.bfloat16), ((0, Mp - M), (0, Kp - K)))
    w_p = jnp.pad(w.astype(jnp.bfloat16), ((0, Kp - K), (0, Np - N)))
    b_p = jnp.pad(b.astype(jnp.float32).reshape(1, N), ((0, 0), (0, Np - N)))

    inputs = [a_p, w_p, b_p]
    in_specs = [
        pl.BlockSpec((TM, TK), lambda i, j, k: (i, k)),
        pl.BlockSpec((TK, TN), lambda i, j, k: (k, j)),
        pl.BlockSpec((1, TN), lambda i, j, k: (0, j)),
    ]
    has_res = residual is not None
    if has_res:
        r_p = jnp.pad(residual.astype(jnp.bfloat16),
                      ((0, Mp - M), (0, Np - N)))
        inputs.append(r_p)
        in_specs.append(pl.BlockSpec((TM, TN), lambda i, j, k: (i, j)))

    out = pl.pallas_call(
        functools.partial(_fused_mm_kernel, act=act, has_res=has_res),
        out_shape=jax.ShapeDtypeStruct((Mp, Np), out_dtype),
        grid_spec=pltpu.PrefetchScalarGridSpec(
            num_scalar_prefetch=0,
            grid=(Mp // TM, Np // TN, Kp // TK),
            in_specs=in_specs,
            out_specs=pl.BlockSpec((TM, TN), lambda i, j, k: (i, j)),
            scratch_shapes=[pltpu.VMEM((TM, TN), jnp.float32)],
        ),
        compiler_params=pltpu.CompilerParams(
            dimension_semantics=("parallel", "parallel", "arbitrary"),
            vmem_limit_bytes=24 * 1024 * 1024,
        ),
    )(*inputs)
    return out[:M, :N]


# ---------------------------------------------------------------------------
# Conv (im2col) + folded BatchNorm + activation [+ fused residual]
# ---------------------------------------------------------------------------
def _im2col(x, kh, kw, stride, pad):
    # x: (N, H, W, C) bf16 -> (N*Ho*Wo, kh*kw*C), patch rows ordered (kh, kw, C)
    # TODO(synk): replace with an implicit-GEMM (shifted-window BlockSpec /
    # in-kernel window reads) to avoid the kh*kw HBM blow-up at large inputs.
    N, H, W, C = x.shape
    xp = jnp.pad(x, ((0, 0), (pad, pad), (pad, pad), (0, 0)))
    Ho = (H + 2 * pad - kh) // stride + 1
    Wo = (W + 2 * pad - kw) // stride + 1
    cols = []
    for i in range(kh):
        for j in range(kw):
            cols.append(xp[:, i:i + stride * Ho:stride, j:j + stride * Wo:stride, :])
    patches = jnp.stack(cols, axis=3)  # (N, Ho, Wo, kh*kw, C)
    return patches.reshape(N * Ho * Wo, kh * kw * C), N, Ho, Wo


def conv_bn_act(x, p, stride, pad, act, residual=None):
    # p["w"]: PyTorch conv layout (Cout, Cin, kh, kw); BN running stats folded.
    w = p["w"]
    cout, cin, kh, kw = w.shape
    scale = p["gamma"] / jnp.sqrt(p["var"] + 1e-5)
    w_folded = w * scale[:, None, None, None]
    b_folded = p["beta"] - p["mean"] * scale
    w2d = jnp.transpose(w_folded, (2, 3, 1, 0)).reshape(kh * kw * cin, cout)
    a, n, ho, wo = _im2col(x, kh, kw, stride, pad)
    res2d = None if residual is None else residual.reshape(n * ho * wo, cout)
    y = pallas_matmul_bias_act(a, w2d, b_folded, act=act, residual=res2d)
    return y.reshape(n, ho, wo, cout)


def maxpool2d(x, k=3, stride=2, pad=1):
    # small glue op (not the hot path): windowed max reduction in XLA
    return jax.lax.reduce_window(
        x, jnp.array(-jnp.inf, dtype=x.dtype), jax.lax.max,
        window_dimensions=(1, k, k, 1),
        window_strides=(1, stride, stride, 1),
        padding=((0, 0), (pad, pad), (pad, pad), (0, 0)),
    )


# ---------------------------------------------------------------------------
# Deterministic ResNet-18 parameter construction (synthetic weights)
# ---------------------------------------------------------------------------
class _Rng:
    def __init__(self, seed):
        self.key = jax.random.PRNGKey(seed)

    def next(self):
        self.key, sub = jax.random.split(self.key)
        return sub


def _conv_bn_params(rng, cout, cin, k):
    return {
        "w": 0.05 * jax.random.normal(rng.next(), (cout, cin, k, k), jnp.float32),
        "gamma": 1.0 + 0.1 * jax.random.normal(rng.next(), (cout,), jnp.float32),
        "beta": 0.1 * jax.random.normal(rng.next(), (cout,), jnp.float32),
        "mean": 0.1 * jax.random.normal(rng.next(), (cout,), jnp.float32),
        "var": jnp.abs(1.0 + 0.1 * jax.random.normal(rng.next(), (cout,), jnp.float32)),
    }


def init_resnet18_params(seed=0):
    rng = _Rng(seed)
    params = {"conv1": _conv_bn_params(rng, 64, 3, 7)}
    layers = []
    in_c = 64
    for out_c, stride in [(64, 1), (128, 2), (256, 2), (512, 2)]:
        blocks = []
        for bi in range(2):
            s = stride if bi == 0 else 1
            blk = {
                "conv1": _conv_bn_params(rng, out_c, in_c, 3),
                "conv2": _conv_bn_params(rng, out_c, out_c, 3),
            }
            if s != 1 or in_c != out_c:
                blk["down"] = _conv_bn_params(rng, out_c, in_c, 1)
            blocks.append(blk)
            in_c = out_c
        layers.append(blocks)
    params["layers"] = layers
    params["fc_w"] = 0.05 * jax.random.normal(rng.next(), (512, NUM_CLASSES), jnp.float32)
    params["fc_b"] = jnp.zeros((NUM_CLASSES,), jnp.float32)
    return params


# ---------------------------------------------------------------------------
# Forward pass (McModel with default resnet18 backbone + sigmoid)
# ---------------------------------------------------------------------------
def _basic_block(x, blk, stride):
    identity = x
    out = conv_bn_act(x, blk["conv1"], stride, 1, act="relu")
    if "down" in blk:
        identity = conv_bn_act(x, blk["down"], stride, 0, act="none")
    # conv2 + BN + residual add + final ReLU fused into one Pallas epilogue
    return conv_bn_act(out, blk["conv2"], 1, 1, act="relu", residual=identity)


def mc_model_forward(x_nchw, params):
    # accept PyTorch NCHW, compute in NHWC / bf16
    x = jnp.transpose(x_nchw, (0, 2, 3, 1)).astype(jnp.bfloat16)
    x = conv_bn_act(x, params["conv1"], 2, 3, act="relu")
    x = maxpool2d(x, 3, 2, 1)
    strides = [1, 2, 2, 2]
    for li, blocks in enumerate(params["layers"]):
        for bi, blk in enumerate(blocks):
            s = strides[li] if bi == 0 else 1
            x = _basic_block(x, blk, s)
    x = jnp.mean(x.astype(jnp.float32), axis=(1, 2))  # global avg pool -> (N, 512)
    # final Linear(512 -> 45) + Sigmoid fused in the Pallas kernel, f32 output
    return pallas_matmul_bias_act(x, params["fc_w"], params["fc_b"],
                                  act="sigmoid", out_dtype=jnp.float32)


if __name__ == "__main__":
    key = jax.random.PRNGKey(0)
    x = jax.random.normal(key, (2, 3, 32, 32), jnp.float32)  # NCHW, like PyTorch
    params = init_resnet18_params(seed=0)

    fwd = jax.jit(lambda inp: mc_model_forward(inp, params))
    out = jax.block_until_ready(fwd(x))

    assert out.shape == (2, NUM_CLASSES), out.shape
    assert out.dtype == jnp.float32
    assert bool(jnp.all((out >= 0.0) & (out <= 1.0)))
    print("KERNEL_OK")
</pallas_src>

<mosaic_0001>
module attributes {stable_mosaic.version = 11 : i64} {
  func.func @_fused_mm_kernel(%arg0: i32, %arg1: i32, %arg2: i32, %arg3: memref<128x256xbf16, #tpu.memory_space<vmem>>, %arg4: memref<256x128xbf16, #tpu.memory_space<vmem>>, %arg5: memref<1x128xf32, #tpu.memory_space<vmem>>, %arg6: memref<128x128xbf16, #tpu.memory_space<vmem>>, %arg7: memref<128x128xf32, #tpu.memory_space<vmem>>) attributes {dimension_semantics = [#tpu.dimension_semantics<parallel>, #tpu.dimension_semantics<parallel>, #tpu.dimension_semantics<arbitrary>], iteration_bounds = array<i64: 4, 1, 1>, scalar_prefetch = 0 : i64, scratch_operands = 1 : i64, tpu.core_type = #tpu.core_type<tc>, window_params = [{transform_indices = @transform_0, window_bounds = array<i64: 128, 256>}, {transform_indices = @transform_1, window_bounds = array<i64: 256, 128>}, {transform_indices = @transform_2, window_bounds = array<i64: 1, 128>}, {transform_indices = @transform_3, window_bounds = array<i64: 128, 128>}]} {
    %c0_i32 = arith.constant 0 : i32
    %0 = arith.cmpi eq, %arg2, %c0_i32 : i32
    %1 = arith.extui %0 : i1 to i32
    %c0_i32_0 = arith.constant 0 : i32
    %2 = arith.cmpi ne, %1, %c0_i32_0 : i32
    scf.if %2 {
      %cst_10 = arith.constant 0.000000e+00 : f32
      %12 = vector.broadcast %cst_10 : f32 to vector<128x128xf32>
      %c0_11 = arith.constant 0 : index
      %c0_12 = arith.constant 0 : index
      %13 = vector.load %arg7[%c0_11, %c0_12] : memref<128x128xf32, #tpu.memory_space<vmem>>, vector<128x128xf32>
      tpu.vector_store %arg7[%c0_11, %c0_12], %12 {strides = array<i32>} : memref<128x128xf32, #tpu.memory_space<vmem>>, vector<128x128xf32>,
    } else {
    }
    %c0 = arith.constant 0 : index
    %c0_1 = arith.constant 0 : index
    %3 = vector.load %arg7[%c0, %c0_1] : memref<128x128xf32, #tpu.memory_space<vmem>>, vector<128x128xf32>
    %c0_2 = arith.constant 0 : index
    %c0_3 = arith.constant 0 : index
    %4 = vector.load %arg3[%c0_2, %c0_3] : memref<128x256xbf16, #tpu.memory_space<vmem>>, vector<128x256xbf16>
    %c0_4 = arith.constant 0 : index
    %c0_5 = arith.constant 0 : index
    %5 = vector.load %arg4[%c0_4, %c0_5] : memref<256x128xbf16, #tpu.memory_space<vmem>>, vector<256x128xbf16>
    %cst = arith.constant dense<0.000000e+00> : vector<128x128xf32>
    %6 = tpu.matmul %4, %5, %cst {dimension_numbers = #tpu.dot_dimension_numbers<[1], [0], [0], [1], [0, 0, 1, 1], [], []>} : vector<128x256xbf16>, vector<256x128xbf16>, vector<128x128xf32> -> vector<128x128xf32>
    %7 = arith.addf %3, %6 : vector<128x128xf32>
    %c0_6 = arith.constant 0 : index
    %c0_7 = arith.constant 0 : index
    %8 = vector.load %arg7[%c0_6, %c0_7] : memref<128x128xf32, #tpu.memory_space<vmem>>, vector<128x128xf32>
    tpu.vector_store %arg7[%c0_6, %c0_7], %7 {strides = array<i32>} : memref<128x128xf32, #tpu.memory_space<vmem>>, vector<128x128xf32>,
    %c0_i32_8 = arith.constant 0 : i32
    %9 = arith.cmpi eq, %arg2, %c0_i32_8 : i32
    %10 = arith.extui %9 : i1 to i32
    %c0_i32_9 = arith.constant 0 : i32
    %11 = arith.cmpi ne, %10, %c0_i32_9 : i32
    scf.if %11 {
      %c0_10 = arith.constant 0 : index
      %c0_11 = arith.constant 0 : index
      %12 = vector.load %arg7[%c0_10, %c0_11] : memref<128x128xf32, #tpu.memory_space<vmem>>, vector<128x128xf32>
      %c0_12 = arith.constant 0 : index
      %c0_13 = arith.constant 0 : index
      %13 = vector.load %arg5[%c0_12, %c0_13] : memref<1x128xf32, #tpu.memory_space<vmem>>, vector<1x128xf32>
      %14 = vector.broadcast %13 : vector<1x128xf32> to vector<128x128xf32>
      %15 = arith.addf %12, %14 : vector<128x128xf32>
      %cst_14 = arith.constant 0.000000e+00 : f32
      %16 = vector.broadcast %cst_14 : f32 to vector<128x128xf32>
      %17 = arith.maximumf %15, %16 : vector<128x128xf32>
      %18 = arith.truncf %17 : vector<128x128xf32> to vector<128x128xbf16>
      %c0_15 = arith.constant 0 : index
      %c0_16 = arith.constant 0 : index
      %19 = vector.load %arg6[%c0_15, %c0_16] : memref<128x128xbf16, #tpu.memory_space<vmem>>, vector<128x128xbf16>
      tpu.vector_store %arg6[%c0_15, %c0_16], %18 {strides = array<i32>} : memref<128x128xbf16, #tpu.memory_space<vmem>>, vector<128x128xbf16>,
    } else {
    }
    return
  }
  func.func @transform_0(%arg0: i32, %arg1: i32, %arg2: i32) -> (i32, i32) {
    %c0_i32 = arith.constant 0 : i32
    return %arg0, %arg2 : i32, i32
  }
  func.func @transform_1(%arg0: i32, %arg1: i32, %arg2: i32) -> (i32, i32) {
    %c0_i32 = arith.constant 0 : i32
    return %arg2, %arg1 : i32, i32
  }
  func.func @transform_2(%arg0: i32, %arg1: i32, %arg2: i32) -> (i32, i32) {
    %c0_i32 = arith.constant 0 : i32
    %c0_i32_0 = arith.constant 0 : i32
    return %c0_i32, %arg1 : i32, i32
  }
  func.func @transform_3(%arg0: i32, %arg1: i32, %arg2: i32) -> (i32, i32) {
    %c0_i32 = arith.constant 0 : i32
    return %arg0, %arg1 : i32, i32
  }
}

module attributes {stable_mosaic.version = 11 : i64} {
  func.func @_fused_mm_kernel(%arg0: i32, %arg1: i32, %arg2: i32, %arg3: memref<128x128xbf16, #tpu.memory_space<vmem>>, %arg4: memref<128x128xbf16, #tpu.memory_space<vmem>>, %arg5: memref<1x128xf32, #tpu.memory_space<vmem>>, %arg6: memref<128x128xbf16, #tpu.memory_space<vmem>>, %arg7: memref<128x128xf32, #tpu.memory_space<vmem>>) attributes {dimension_semantics = [#tpu.dimension_semantics<parallel>, #tpu.dimension_semantics<parallel>, #tpu.dimension_semantics<arbitrary>], iteration_bounds = array<i64: 1, 1, 5>, scalar_prefetch = 0 : i64, scratch_operands = 1 : i64, tpu.core_type = #tpu.core_type<tc>, window_params = [{transform_indices = @transform_0, window_bounds = array<i64: 128, 128>}, {transform_indices = @transform_1, window_bounds = array<i64: 128, 128>}, {transform_indices = @transform_2, window_bounds = array<i64: 1, 128>}, {transform_indices = @transform_3, window_bounds = array<i64: 128, 128>}]} {
    %c0_i32 = arith.constant 0 : i32
    %0 = arith.cmpi eq, %arg2, %c0_i32 : i32
    %1 = arith.extui %0 : i1 to i32
    %c0_i32_0 = arith.constant 0 : i32
    %2 = arith.cmpi ne, %1, %c0_i32_0 : i32
    scf.if %2 {
      %cst_9 = arith.constant 0.000000e+00 : f32
      %12 = vector.broadcast %cst_9 : f32 to vector<128x128xf32>
      %c0_10 = arith.constant 0 : index
      %c0_11 = arith.constant 0 : index
      %13 = vector.load %arg7[%c0_10, %c0_11] : memref<128x128xf32, #tpu.memory_space<vmem>>, vector<128x128xf32>
      tpu.vector_store %arg7[%c0_10, %c0_11], %12 {strides = array<i32>} : memref<128x128xf32, #tpu.memory_space<vmem>>, vector<128x128xf32>,
    } else {
    }
    %c0 = arith.constant 0 : index
    %c0_1 = arith.constant 0 : index
    %3 = vector.load %arg7[%c0, %c0_1] : memref<128x128xf32, #tpu.memory_space<vmem>>, vector<128x128xf32>
    %c0_2 = arith.constant 0 : index
    %c0_3 = arith.constant 0 : index
    %4 = vector.load %arg3[%c0_2, %c0_3] : memref<128x128xbf16, #tpu.memory_space<vmem>>, vector<128x128xbf16>
    %c0_4 = arith.constant 0 : index
    %c0_5 = arith.constant 0 : index
    %5 = vector.load %arg4[%c0_4, %c0_5] : memref<128x128xbf16, #tpu.memory_space<vmem>>, vector<128x128xbf16>
    %cst = arith.constant dense<0.000000e+00> : vector<128x128xf32>
    %6 = tpu.matmul %4, %5, %cst {dimension_numbers = #tpu.dot_dimension_numbers<[1], [0], [0], [1], [0, 0, 1, 1], [], []>} : vector<128x128xbf16>, vector<128x128xbf16>, vector<128x128xf32> -> vector<128x128xf32>
    %7 = arith.addf %3, %6 : vector<128x128xf32>
    %c0_6 = arith.constant 0 : index
    %c0_7 = arith.constant 0 : index
    %8 = vector.load %arg7[%c0_6, %c0_7] : memref<128x128xf32, #tpu.memory_space<vmem>>, vector<128x128xf32>
    tpu.vector_store %arg7[%c0_6, %c0_7], %7 {strides = array<i32>} : memref<128x128xf32, #tpu.memory_space<vmem>>, vector<128x128xf32>,
    %c4_i32 = arith.constant 4 : i32
    %9 = arith.cmpi eq, %arg2, %c4_i32 : i32
    %10 = arith.extui %9 : i1 to i32
    %c0_i32_8 = arith.constant 0 : i32
    %11 = arith.cmpi ne, %10, %c0_i32_8 : i32
    scf.if %11 {
      %c0_9 = arith.constant 0 : index
      %c0_10 = arith.constant 0 : index
      %12 = vector.load %arg7[%c0_9, %c0_10] : memref<128x128xf32, #tpu.memory_space<vmem>>, vector<128x128xf32>
      %c0_11 = arith.constant 0 : index
      %c0_12 = arith.constant 0 : index
      %13 = vector.load %arg5[%c0_11, %c0_12] : memref<1x128xf32, #tpu.memory_space<vmem>>, vector<1x128xf32>
      %14 = vector.broadcast %13 : vector<1x128xf32> to vector<128x128xf32>
      %15 = arith.addf %12, %14 : vector<128x128xf32>
      %cst_13 = arith.constant 0.000000e+00 : f32
      %16 = vector.broadcast %cst_13 : f32 to vector<128x128xf32>
      %17 = arith.maximumf %15, %16 : vector<128x128xf32>
      %18 = arith.truncf %17 : vector<128x128xf32> to vector<128x128xbf16>
      %c0_14 = arith.constant 0 : index
      %c0_15 = arith.constant 0 : index
      %19 = vector.load %arg6[%c0_14, %c0_15] : memref<128x128xbf16, #tpu.memory_space<vmem>>, vector<128x128xbf16>
      tpu.vector_store %arg6[%c0_14, %c0_15], %18 {strides = array<i32>} : memref<128x128xbf16, #tpu.memory_space<vmem>>, vector<128x128xbf16>,
    } else {
    }
    return
  }
  func.func @transform_0(%arg0: i32, %arg1: i32, %arg2: i32) -> (i32, i32) {
    %c0_i32 = arith.constant 0 : i32
    return %arg0, %arg2 : i32, i32
  }
  func.func @transform_1(%arg0: i32, %arg1: i32, %arg2: i32) -> (i32, i32) {
    %c0_i32 = arith.constant 0 : i32
    return %arg2, %arg1 : i32, i32
  }
  func.func @transform_2(%arg0: i32, %arg1: i32, %arg2: i32) -> (i32, i32) {
    %c0_i32 = arith.constant 0 : i32
    %c0_i32_0 = arith.constant 0 : i32
    return %c0_i32, %arg1 : i32, i32
  }
  func.func @transform_3(%arg0: i32, %arg1: i32, %arg2: i32) -> (i32, i32) {
    %c0_i32 = arith.constant 0 : i32
    return %arg0, %arg1 : i32, i32
  }
}

module attributes {stable_mosaic.version = 11 : i64} {
  func.func @_fused_mm_kernel(%arg0: i32, %arg1: i32, %arg2: i32, %arg3: memref<128x128xbf16, #tpu.memory_space<vmem>>, %arg4: memref<128x128xbf16, #tpu.memory_space<vmem>>, %arg5: memref<1x128xf32, #tpu.memory_space<vmem>>, %arg6: memref<128x128xbf16, #tpu.memory_space<vmem>>, %arg7: memref<128x128xbf16, #tpu.memory_space<vmem>>, %arg8: memref<128x128xf32, #tpu.memory_space<vmem>>) attributes {dimension_semantics = [#tpu.dimension_semantics<parallel>, #tpu.dimension_semantics<parallel>, #tpu.dimension_semantics<arbitrary>], iteration_bounds = array<i64: 1, 1, 5>, scalar_prefetch = 0 : i64, scratch_operands = 1 : i64, tpu.core_type = #tpu.core_type<tc>, window_params = [{transform_indices = @transform_0, window_bounds = array<i64: 128, 128>}, {transform_indices = @transform_1, window_bounds = array<i64: 128, 128>}, {transform_indices = @transform_2, window_bounds = array<i64: 1, 128>}, {transform_indices = @transform_3, window_bounds = array<i64: 128, 128>}, {transform_indices = @transform_4, window_bounds = array<i64: 128, 128>}]} {
    %c0_i32 = arith.constant 0 : i32
    %0 = arith.cmpi eq, %arg2, %c0_i32 : i32
    %1 = arith.extui %0 : i1 to i32
    %c0_i32_0 = arith.constant 0 : i32
    %2 = arith.cmpi ne, %1, %c0_i32_0 : i32
    scf.if %2 {
      %cst_9 = arith.constant 0.000000e+00 : f32
      %12 = vector.broadcast %cst_9 : f32 to vector<128x128xf32>
      %c0_10 = arith.constant 0 : index
      %c0_11 = arith.constant 0 : index
      %13 = vector.load %arg8[%c0_10, %c0_11] : memref<128x128xf32, #tpu.memory_space<vmem>>, vector<128x128xf32>
      tpu.vector_store %arg8[%c0_10, %c0_11], %12 {strides = array<i32>} : memref<128x128xf32, #tpu.memory_space<vmem>>, vector<128x128xf32>,
    } else {
    }
    %c0 = arith.constant 0 : index
    %c0_1 = arith.constant 0 : index
    %3 = vector.load %arg8[%c0, %c0_1] : memref<128x128xf32, #tpu.memory_space<vmem>>, vector<128x128xf32>
    %c0_2 = arith.constant 0 : index
    %c0_3 = arith.constant 0 : index
    %4 = vector.load %arg3[%c0_2, %c0_3] : memref<128x128xbf16, #tpu.memory_space<vmem>>, vector<128x128xbf16>
    %c0_4 = arith.constant 0 : index
    %c0_5 = arith.constant 0 : index
    %5 = vector.load %arg4[%c0_4, %c0_5] : memref<128x128xbf16, #tpu.memory_space<vmem>>, vector<128x128xbf16>
    %cst = arith.constant dense<0.000000e+00> : vector<128x128xf32>
    %6 = tpu.matmul %4, %5, %cst {dimension_numbers = #tpu.dot_dimension_numbers<[1], [0], [0], [1], [0, 0, 1, 1], [], []>} : vector<128x128xbf16>, vector<128x128xbf16>, vector<128x128xf32> -> vector<128x128xf32>
    %7 = arith.addf %3, %6 : vector<128x128xf32>
    %c0_6 = arith.constant 0 : index
    %c0_7 = arith.constant 0 : index
    %8 = vector.load %arg8[%c0_6, %c0_7] : memref<128x128xf32, #tpu.memory_space<vmem>>, vector<128x128xf32>
    tpu.vector_store %arg8[%c0_6, %c0_7], %7 {strides = array<i32>} : memref<128x128xf32, #tpu.memory_space<vmem>>, vector<128x128xf32>,
    %c4_i32 = arith.constant 4 : i32
    %9 = arith.cmpi eq, %arg2, %c4_i32 : i32
    %10 = arith.extui %9 : i1 to i32
    %c0_i32_8 = arith.constant 0 : i32
    %11 = arith.cmpi ne, %10, %c0_i32_8 : i32
    scf.if %11 {
      %c0_9 = arith.constant 0 : index
      %c0_10 = arith.constant 0 : index
      %12 = vector.load %arg8[%c0_9, %c0_10] : memref<128x128xf32, #tpu.memory_space<vmem>>, vector<128x128xf32>
      %c0_11 = arith.constant 0 : index
      %c0_12 = arith.constant 0 : index
      %13 = vector.load %arg5[%c0_11, %c0_12] : memref<1x128xf32, #tpu.memory_space<vmem>>, vector<1x128xf32>
      %14 = vector.broadcast %13 : vector<1x128xf32> to vector<128x128xf32>
      %15 = arith.addf %12, %14 : vector<128x128xf32>
      %c0_13 = arith.constant 0 : index
      %c0_14 = arith.constant 0 : index
      %16 = vector.load %arg6[%c0_13, %c0_14] : memref<128x128xbf16, #tpu.memory_space<vmem>>, vector<128x128xbf16>
      %17 = arith.extf %16 : vector<128x128xbf16> to vector<128x128xf32>
      %18 = arith.addf %15, %17 : vector<128x128xf32>
      %cst_15 = arith.constant 0.000000e+00 : f32
      %19 = vector.broadcast %cst_15 : f32 to vector<128x128xf32>
      %20 = arith.maximumf %18, %19 : vector<128x128xf32>
      %21 = arith.truncf %20 : vector<128x128xf32> to vector<128x128xbf16>
      %c0_16 = arith.constant 0 : index
      %c0_17 = arith.constant 0 : index
      %22 = vector.load %arg7[%c0_16, %c0_17] : memref<128x128xbf16, #tpu.memory_space<vmem>>, vector<128x128xbf16>
      tpu.vector_store %arg7[%c0_16, %c0_17], %21 {strides = array<i32>} : memref<128x128xbf16, #tpu.memory_space<vmem>>, vector<128x128xbf16>,
    } else {
    }
    return
  }
  func.func @transform_0(%arg0: i32, %arg1: i32, %arg2: i32) -> (i32, i32) {
    %c0_i32 = arith.constant 0 : i32
    return %arg0, %arg2 : i32, i32
  }
  func.func @transform_1(%arg0: i32, %arg1: i32, %arg2: i32) -> (i32, i32) {
    %c0_i32 = arith.constant 0 : i32
    return %arg2, %arg1 : i32, i32
  }
  func.func @transform_2(%arg0: i32, %arg1: i32, %arg2: i32) -> (i32, i32) {
    %c0_i32 = arith.constant 0 : i32
    %c0_i32_0 = arith.constant 0 : i32
    return %c0_i32, %arg1 : i32, i32
  }
  func.func @transform_3(%arg0: i32, %arg1: i32, %arg2: i32) -> (i32, i32) {
    %c0_i32 = arith.constant 0 : i32
    return %arg0, %arg1 : i32, i32
  }
  func.func @transform_4(%arg0: i32, %arg1: i32, %arg2: i32) -> (i32, i32) {
    %c0_i32 = arith.constant 0 : i32
    return %arg0, %arg1 : i32, i32
  }
}

module attributes {stable_mosaic.version = 11 : i64} {
  func.func @_fused_mm_kernel(%arg0: i32, %arg1: i32, %arg2: i32, %arg3: memref<32x128xbf16, #tpu.memory_space<vmem>>, %arg4: memref<128x128xbf16, #tpu.memory_space<vmem>>, %arg5: memref<1x128xf32, #tpu.memory_space<vmem>>, %arg6: memref<32x128xbf16, #tpu.memory_space<vmem>>, %arg7: memref<32x128xf32, #tpu.memory_space<vmem>>) attributes {dimension_semantics = [#tpu.dimension_semantics<parallel>, #tpu.dimension_semantics<parallel>, #tpu.dimension_semantics<arbitrary>], iteration_bounds = array<i64: 1, 1, 5>, scalar_prefetch = 0 : i64, scratch_operands = 1 : i64, tpu.core_type = #tpu.core_type<tc>, window_params = [{transform_indices = @transform_0, window_bounds = array<i64: 32, 128>}, {transform_indices = @transform_1, window_bounds = array<i64: 128, 128>}, {transform_indices = @transform_2, window_bounds = array<i64: 1, 128>}, {transform_indices = @transform_3, window_bounds = array<i64: 32, 128>}]} {
    %c0_i32 = arith.constant 0 : i32
    %0 = arith.cmpi eq, %arg2, %c0_i32 : i32
    %1 = arith.extui %0 : i1 to i32
    %c0_i32_0 = arith.constant 0 : i32
    %2 = arith.cmpi ne, %1, %c0_i32_0 : i32
    scf.if %2 {
      %cst_9 = arith.constant 0.000000e+00 : f32
      %12 = vector.broadcast %cst_9 : f32 to vector<32x128xf32>
      %c0_10 = arith.constant 0 : index
      %c0_11 = arith.constant 0 : index
      %13 = vector.load %arg7[%c0_10, %c0_11] : memref<32x128xf32, #tpu.memory_space<vmem>>, vector<32x128xf32>
      tpu.vector_store %arg7[%c0_10, %c0_11], %12 {strides = array<i32>} : memref<32x128xf32, #tpu.memory_space<vmem>>, vector<32x128xf32>,
    } else {
    }
    %c0 = arith.constant 0 : index
    %c0_1 = arith.constant 0 : index
    %3 = vector.load %arg7[%c0, %c0_1] : memref<32x128xf32, #tpu.memory_space<vmem>>, vector<32x128xf32>
    %c0_2 = arith.constant 0 : index
    %c0_3 = arith.constant 0 : index
    %4 = vector.load %arg3[%c0_2, %c0_3] : memref<32x128xbf16, #tpu.memory_space<vmem>>, vector<32x128xbf16>
    %c0_4 = arith.constant 0 : index
    %c0_5 = arith.constant 0 : index
    %5 = vector.load %arg4[%c0_4, %c0_5] : memref<128x128xbf16, #tpu.memory_space<vmem>>, vector<128x128xbf16>
    %cst = arith.constant dense<0.000000e+00> : vector<32x128xf32>
    %6 = tpu.matmul %4, %5, %cst {dimension_numbers = #tpu.dot_dimension_numbers<[1], [0], [0], [1], [0, 0, 1, 1], [], []>} : vector<32x128xbf16>, vector<128x128xbf16>, vector<32x128xf32> -> vector<32x128xf32>
    %7 = arith.addf %3, %6 : vector<32x128xf32>
    %c0_6 = arith.constant 0 : index
    %c0_7 = arith.constant 0 : index
    %8 = vector.load %arg7[%c0_6, %c0_7] : memref<32x128xf32, #tpu.memory_space<vmem>>, vector<32x128xf32>
    tpu.vector_store %arg7[%c0_6, %c0_7], %7 {strides = array<i32>} : memref<32x128xf32, #tpu.memory_space<vmem>>, vector<32x128xf32>,
    %c4_i32 = arith.constant 4 : i32
    %9 = arith.cmpi eq, %arg2, %c4_i32 : i32
    %10 = arith.extui %9 : i1 to i32
    %c0_i32_8 = arith.constant 0 : i32
    %11 = arith.cmpi ne, %10, %c0_i32_8 : i32
    scf.if %11 {
      %c0_9 = arith.constant 0 : index
      %c0_10 = arith.constant 0 : index
      %12 = vector.load %arg7[%c0_9, %c0_10] : memref<32x128xf32, #tpu.memory_space<vmem>>, vector<32x128xf32>
      %c0_11 = arith.constant 0 : index
      %c0_12 = arith.constant 0 : index
      %13 = vector.load %arg5[%c0_11, %c0_12] : memref<1x128xf32, #tpu.memory_space<vmem>>, vector<1x128xf32>
      %14 = vector.broadcast %13 : vector<1x128xf32> to vector<32x128xf32>
      %15 = arith.addf %12, %14 : vector<32x128xf32>
      %cst_13 = arith.constant 0.000000e+00 : f32
      %16 = vector.broadcast %cst_13 : f32 to vector<32x128xf32>
      %17 = arith.maximumf %15, %16 : vector<32x128xf32>
      %18 = arith.truncf %17 : vector<32x128xf32> to vector<32x128xbf16>
      %c0_14 = arith.constant 0 : index
      %c0_15 = arith.constant 0 : index
      %19 = vector.load %arg6[%c0_14, %c0_15] : memref<32x128xbf16, #tpu.memory_space<vmem>>, vector<32x128xbf16>
      tpu.vector_store %arg6[%c0_14, %c0_15], %18 {strides = array<i32>} : memref<32x128xbf16, #tpu.memory_space<vmem>>, vector<32x128xbf16>,
    } else {
    }
    return
  }
  func.func @transform_0(%arg0: i32, %arg1: i32, %arg2: i32) -> (i32, i32) {
    %c0_i32 = arith.constant 0 : i32
    return %arg0, %arg2 : i32, i32
  }
  func.func @transform_1(%arg0: i32, %arg1: i32, %arg2: i32) -> (i32, i32) {
    %c0_i32 = arith.constant 0 : i32
    return %arg2, %arg1 : i32, i32
  }
  func.func @transform_2(%arg0: i32, %arg1: i32, %arg2: i32) -> (i32, i32) {
    %c0_i32 = arith.constant 0 : i32
    %c0_i32_0 = arith.constant 0 : i32
    return %c0_i32, %arg1 : i32, i32
  }
  func.func @transform_3(%arg0: i32, %arg1: i32, %arg2: i32) -> (i32, i32) {
    %c0_i32 = arith.constant 0 : i32
    return %arg0, %arg1 : i32, i32
  }
}

module attributes {stable_mosaic.version = 11 : i64} {
  func.func @_fused_mm_kernel(%arg0: i32, %arg1: i32, %arg2: i32, %arg3: memref<32x384xbf16, #tpu.memory_space<vmem>>, %arg4: memref<384x128xbf16, #tpu.memory_space<vmem>>, %arg5: memref<1x128xf32, #tpu.memory_space<vmem>>, %arg6: memref<32x128xbf16, #tpu.memory_space<vmem>>, %arg7: memref<32x128xbf16, #tpu.memory_space<vmem>>, %arg8: memref<32x128xf32, #tpu.memory_space<vmem>>) attributes {dimension_semantics = [#tpu.dimension_semantics<parallel>, #tpu.dimension_semantics<parallel>, #tpu.dimension_semantics<arbitrary>], iteration_bounds = array<i64: 1, 1, 3>, scalar_prefetch = 0 : i64, scratch_operands = 1 : i64, tpu.core_type = #tpu.core_type<tc>, window_params = [{transform_indices = @transform_0, window_bounds = array<i64: 32, 384>}, {transform_indices = @transform_1, window_bounds = array<i64: 384, 128>}, {transform_indices = @transform_2, window_bounds = array<i64: 1, 128>}, {transform_indices = @transform_3, window_bounds = array<i64: 32, 128>}, {transform_indices = @transform_4, window_bounds = array<i64: 32, 128>}]} {
    %c0_i32 = arith.constant 0 : i32
    %0 = arith.cmpi eq, %arg2, %c0_i32 : i32
    %1 = arith.extui %0 : i1 to i32
    %c0_i32_0 = arith.constant 0 : i32
    %2 = arith.cmpi ne, %1, %c0_i32_0 : i32
    scf.if %2 {
      %cst_9 = arith.constant 0.000000e+00 : f32
      %12 = vector.broadcast %cst_9 : f32 to vector<32x128xf32>
      %c0_10 = arith.constant 0 : index
      %c0_11 = arith.constant 0 : index
      %13 = vector.load %arg8[%c0_10, %c0_11] : memref<32x128xf32, #tpu.memory_space<vmem>>, vector<32x128xf32>
      tpu.vector_store %arg8[%c0_10, %c0_11], %12 {strides = array<i32>} : memref<32x128xf32, #tpu.memory_space<vmem>>, vector<32x128xf32>,
    } else {
    }
    %c0 = arith.constant 0 : index
    %c0_1 = arith.constant 0 : index
    %3 = vector.load %arg8[%c0, %c0_1] : memref<32x128xf32, #tpu.memory_space<vmem>>, vector<32x128xf32>
    %c0_2 = arith.constant 0 : index
    %c0_3 = arith.constant 0 : index
    %4 = vector.load %arg3[%c0_2, %c0_3] : memref<32x384xbf16, #tpu.memory_space<vmem>>, vector<32x384xbf16>
    %c0_4 = arith.constant 0 : index
    %c0_5 = arith.constant 0 : index
    %5 = vector.load %arg4[%c0_4, %c0_5] : memref<384x128xbf16, #tpu.memory_space<vmem>>, vector<384x128xbf16>
    %cst = arith.constant dense<0.000000e+00> : vector<32x128xf32>
    %6 = tpu.matmul %4, %5, %cst {dimension_numbers = #tpu.dot_dimension_numbers<[1], [0], [0], [1], [0, 0, 1, 1], [], []>} : vector<32x384xbf16>, vector<384x128xbf16>, vector<32x128xf32> -> vector<32x128xf32>
    %7 = arith.addf %3, %6 : vector<32x128xf32>
    %c0_6 = arith.constant 0 : index
    %c0_7 = arith.constant 0 : index
    %8 = vector.load %arg8[%c0_6, %c0_7] : memref<32x128xf32, #tpu.memory_space<vmem>>, vector<32x128xf32>
    tpu.vector_store %arg8[%c0_6, %c0_7], %7 {strides = array<i32>} : memref<32x128xf32, #tpu.memory_space<vmem>>, vector<32x128xf32>,
    %c2_i32 = arith.constant 2 : i32
    %9 = arith.cmpi eq, %arg2, %c2_i32 : i32
    %10 = arith.extui %9 : i1 to i32
    %c0_i32_8 = arith.constant 0 : i32
    %11 = arith.cmpi ne, %10, %c0_i32_8 : i32
    scf.if %11 {
      %c0_9 = arith.constant 0 : index
      %c0_10 = arith.constant 0 : index
      %12 = vector.load %arg8[%c0_9, %c0_10] : memref<32x128xf32, #tpu.memory_space<vmem>>, vector<32x128xf32>
      %c0_11 = arith.constant 0 : index
      %c0_12 = arith.constant 0 : index
      %13 = vector.load %arg5[%c0_11, %c0_12] : memref<1x128xf32, #tpu.memory_space<vmem>>, vector<1x128xf32>
      %14 = vector.broadcast %13 : vector<1x128xf32> to vector<32x128xf32>
      %15 = arith.addf %12, %14 : vector<32x128xf32>
      %c0_13 = arith.constant 0 : index
      %c0_14 = arith.constant 0 : index
      %16 = vector.load %arg6[%c0_13, %c0_14] : memref<32x128xbf16, #tpu.memory_space<vmem>>, vector<32x128xbf16>
      %17 = arith.extf %16 : vector<32x128xbf16> to vector<32x128xf32>
      %18 = arith.addf %15, %17 : vector<32x128xf32>
      %cst_15 = arith.constant 0.000000e+00 : f32
      %19 = vector.broadcast %cst_15 : f32 to vector<32x128xf32>
      %20 = arith.maximumf %18, %19 : vector<32x128xf32>
      %21 = arith.truncf %20 : vector<32x128xf32> to vector<32x128xbf16>
      %c0_16 = arith.constant 0 : index
      %c0_17 = arith.constant 0 : index
      %22 = vector.load %arg7[%c0_16, %c0_17] : memref<32x128xbf16, #tpu.memory_space<vmem>>, vector<32x128xbf16>
      tpu.vector_store %arg7[%c0_16, %c0_17], %21 {strides = array<i32>} : memref<32x128xbf16, #tpu.memory_space<vmem>>, vector<32x128xbf16>,
    } else {
    }
    return
  }
  func.func @transform_0(%arg0: i32, %arg1: i32, %arg2: i32) -> (i32, i32) {
    %c0_i32 = arith.constant 0 : i32
    return %arg0, %arg2 : i32, i32
  }
  func.func @transform_1(%arg0: i32, %arg1: i32, %arg2: i32) -> (i32, i32) {
    %c0_i32 = arith.constant 0 : i32
    return %arg2, %arg1 : i32, i32
  }
  func.func @transform_2(%arg0: i32, %arg1: i32, %arg2: i32) -> (i32, i32) {
    %c0_i32 = arith.constant 0 : i32
    %c0_i32_0 = arith.constant 0 : i32
    return %c0_i32, %arg1 : i32, i32
  }
  func.func @transform_3(%arg0: i32, %arg1: i32, %arg2: i32) -> (i32, i32) {
    %c0_i32 = arith.constant 0 : i32
    return %arg0, %arg1 : i32, i32
  }
  func.func @transform_4(%arg0: i32, %arg1: i32, %arg2: i32) -> (i32, i32) {
    %c0_i32 = arith.constant 0 : i32
    return %arg0, %arg1 : i32, i32
  }
}

module attributes {stable_mosaic.version = 11 : i64} {
  func.func @_fused_mm_kernel(%arg0: i32, %arg1: i32, %arg2: i32, %arg3: memref<32x384xbf16, #tpu.memory_space<vmem>>, %arg4: memref<384x128xbf16, #tpu.memory_space<vmem>>, %arg5: memref<1x128xf32, #tpu.memory_space<vmem>>, %arg6: memref<32x128xbf16, #tpu.memory_space<vmem>>, %arg7: memref<32x128xf32, #tpu.memory_space<vmem>>) attributes {dimension_semantics = [#tpu.dimension_semantics<parallel>, #tpu.dimension_semantics<parallel>, #tpu.dimension_semantics<arbitrary>], iteration_bounds = array<i64: 1, 1, 3>, scalar_prefetch = 0 : i64, scratch_operands = 1 : i64, tpu.core_type = #tpu.core_type<tc>, window_params = [{transform_indices = @transform_0, window_bounds = array<i64: 32, 384>}, {transform_indices = @transform_1, window_bounds = array<i64: 384, 128>}, {transform_indices = @transform_2, window_bounds = array<i64: 1, 128>}, {transform_indices = @transform_3, window_bounds = array<i64: 32, 128>}]} {
    %c0_i32 = arith.constant 0 : i32
    %0 = arith.cmpi eq, %arg2, %c0_i32 : i32
    %1 = arith.extui %0 : i1 to i32
    %c0_i32_0 = arith.constant 0 : i32
    %2 = arith.cmpi ne, %1, %c0_i32_0 : i32
    scf.if %2 {
      %cst_9 = arith.constant 0.000000e+00 : f32
      %12 = vector.broadcast %cst_9 : f32 to vector<32x128xf32>
      %c0_10 = arith.constant 0 : index
      %c0_11 = arith.constant 0 : index
      %13 = vector.load %arg7[%c0_10, %c0_11] : memref<32x128xf32, #tpu.memory_space<vmem>>, vector<32x128xf32>
      tpu.vector_store %arg7[%c0_10, %c0_11], %12 {strides = array<i32>} : memref<32x128xf32, #tpu.memory_space<vmem>>, vector<32x128xf32>,
    } else {
    }
    %c0 = arith.constant 0 : index
    %c0_1 = arith.constant 0 : index
    %3 = vector.load %arg7[%c0, %c0_1] : memref<32x128xf32, #tpu.memory_space<vmem>>, vector<32x128xf32>
    %c0_2 = arith.constant 0 : index
    %c0_3 = arith.constant 0 : index
    %4 = vector.load %arg3[%c0_2, %c0_3] : memref<32x384xbf16, #tpu.memory_space<vmem>>, vector<32x384xbf16>
    %c0_4 = arith.constant 0 : index
    %c0_5 = arith.constant 0 : index
    %5 = vector.load %arg4[%c0_4, %c0_5] : memref<384x128xbf16, #tpu.memory_space<vmem>>, vector<384x128xbf16>
    %cst = arith.constant dense<0.000000e+00> : vector<32x128xf32>
    %6 = tpu.matmul %4, %5, %cst {dimension_numbers = #tpu.dot_dimension_numbers<[1], [0], [0], [1], [0, 0, 1, 1], [], []>} : vector<32x384xbf16>, vector<384x128xbf16>, vector<32x128xf32> -> vector<32x128xf32>
    %7 = arith.addf %3, %6 : vector<32x128xf32>
    %c0_6 = arith.constant 0 : index
    %c0_7 = arith.constant 0 : index
    %8 = vector.load %arg7[%c0_6, %c0_7] : memref<32x128xf32, #tpu.memory_space<vmem>>, vector<32x128xf32>
    tpu.vector_store %arg7[%c0_6, %c0_7], %7 {strides = array<i32>} : memref<32x128xf32, #tpu.memory_space<vmem>>, vector<32x128xf32>,
    %c2_i32 = arith.constant 2 : i32
    %9 = arith.cmpi eq, %arg2, %c2_i32 : i32
    %10 = arith.extui %9 : i1 to i32
    %c0_i32_8 = arith.constant 0 : i32
    %11 = arith.cmpi ne, %10, %c0_i32_8 : i32
    scf.if %11 {
      %c0_9 = arith.constant 0 : index
      %c0_10 = arith.constant 0 : index
      %12 = vector.load %arg7[%c0_9, %c0_10] : memref<32x128xf32, #tpu.memory_space<vmem>>, vector<32x128xf32>
      %c0_11 = arith.constant 0 : index
      %c0_12 = arith.constant 0 : index
      %13 = vector.load %arg5[%c0_11, %c0_12] : memref<1x128xf32, #tpu.memory_space<vmem>>, vector<1x128xf32>
      %14 = vector.broadcast %13 : vector<1x128xf32> to vector<32x128xf32>
      %15 = arith.addf %12, %14 : vector<32x128xf32>
      %cst_13 = arith.constant 0.000000e+00 : f32
      %16 = vector.broadcast %cst_13 : f32 to vector<32x128xf32>
      %17 = arith.maximumf %15, %16 : vector<32x128xf32>
      %18 = arith.truncf %17 : vector<32x128xf32> to vector<32x128xbf16>
      %c0_14 = arith.constant 0 : index
      %c0_15 = arith.constant 0 : index
      %19 = vector.load %arg6[%c0_14, %c0_15] : memref<32x128xbf16, #tpu.memory_space<vmem>>, vector<32x128xbf16>
      tpu.vector_store %arg6[%c0_14, %c0_15], %18 {strides = array<i32>} : memref<32x128xbf16, #tpu.memory_space<vmem>>, vector<32x128xbf16>,
    } else {
    }
    return
  }
  func.func @transform_0(%arg0: i32, %arg1: i32, %arg2: i32) -> (i32, i32) {
    %c0_i32 = arith.constant 0 : i32
    return %arg0, %arg2 : i32, i32
  }
  func.func @transform_1(%arg0: i32, %arg1: i32, %arg2: i32) -> (i32, i32) {
    %c0_i32 = arith.constant 0 : i32
    return %arg2, %arg1 : i32, i32
  }
  func.func @transform_2(%arg0: i32, %arg1: i32, %arg2: i32) -> (i32, i32) {
    %c0_i32 = arith.constant 0 : i32
    %c0_i32_0 = arith.constant 0 : i32
    return %c0_i32, %arg1 : i32, i32
  }
  func.func @transform_3(%arg0: i32, %arg1: i32, %arg2: i32) -> (i32, i32) {
    %c0_i32 = arith.constant 0 : i32
    return %arg0, %arg1 : i32, i32
  }
}

module attributes {stable_mosaic.version = 11 : i64} {
  func.func @_fused_mm_kernel(%arg0: i32, %arg1: i32, %arg2: i32, %arg3: memref<32x128xbf16, #tpu.memory_space<vmem>>, %arg4: memref<128x128xbf16, #tpu.memory_space<vmem>>, %arg5: memref<1x128xf32, #tpu.memory_space<vmem>>, %arg6: memref<32x128xbf16, #tpu.memory_space<vmem>>, %arg7: memref<32x128xf32, #tpu.memory_space<vmem>>) attributes {dimension_semantics = [#tpu.dimension_semantics<parallel>, #tpu.dimension_semantics<parallel>, #tpu.dimension_semantics<arbitrary>], iteration_bounds = array<i64: 1, 1, 1>, scalar_prefetch = 0 : i64, scratch_operands = 1 : i64, tpu.core_type = #tpu.core_type<tc>, window_params = [{transform_indices = @transform_0, window_bounds = array<i64: 32, 128>}, {transform_indices = @transform_1, window_bounds = array<i64: 128, 128>}, {transform_indices = @transform_2, window_bounds = array<i64: 1, 128>}, {transform_indices = @transform_3, window_bounds = array<i64: 32, 128>}]} {
    %c0_i32 = arith.constant 0 : i32
    %0 = arith.cmpi eq, %arg2, %c0_i32 : i32
    %1 = arith.extui %0 : i1 to i32
    %c0_i32_0 = arith.constant 0 : i32
    %2 = arith.cmpi ne, %1, %c0_i32_0 : i32
    scf.if %2 {
      %cst_10 = arith.constant 0.000000e+00 : f32
      %12 = vector.broadcast %cst_10 : f32 to vector<32x128xf32>
      %c0_11 = arith.constant 0 : index
      %c0_12 = arith.constant 0 : index
      %13 = vector.load %arg7[%c0_11, %c0_12] : memref<32x128xf32, #tpu.memory_space<vmem>>, vector<32x128xf32>
      tpu.vector_store %arg7[%c0_11, %c0_12], %12 {strides = array<i32>} : memref<32x128xf32, #tpu.memory_space<vmem>>, vector<32x128xf32>,
    } else {
    }
    %c0 = arith.constant 0 : index
    %c0_1 = arith.constant 0 : index
    %3 = vector.load %arg7[%c0, %c0_1] : memref<32x128xf32, #tpu.memory_space<vmem>>, vector<32x128xf32>
    %c0_2 = arith.constant 0 : index
    %c0_3 = arith.constant 0 : index
    %4 = vector.load %arg3[%c0_2, %c0_3] : memref<32x128xbf16, #tpu.memory_space<vmem>>, vector<32x128xbf16>
    %c0_4 = arith.constant 0 : index
    %c0_5 = arith.constant 0 : index
    %5 = vector.load %arg4[%c0_4, %c0_5] : memref<128x128xbf16, #tpu.memory_space<vmem>>, vector<128x128xbf16>
    %cst = arith.constant dense<0.000000e+00> : vector<32x128xf32>
    %6 = tpu.matmul %4, %5, %cst {dimension_numbers = #tpu.dot_dimension_numbers<[1], [0], [0], [1], [0, 0, 1, 1], [], []>} : vector<32x128xbf16>, vector<128x128xbf16>, vector<32x128xf32> -> vector<32x128xf32>
    %7 = arith.addf %3, %6 : vector<32x128xf32>
    %c0_6 = arith.constant 0 : index
    %c0_7 = arith.constant 0 : index
    %8 = vector.load %arg7[%c0_6, %c0_7] : memref<32x128xf32, #tpu.memory_space<vmem>>, vector<32x128xf32>
    tpu.vector_store %arg7[%c0_6, %c0_7], %7 {strides = array<i32>} : memref<32x128xf32, #tpu.memory_space<vmem>>, vector<32x128xf32>,
    %c0_i32_8 = arith.constant 0 : i32
    %9 = arith.cmpi eq, %arg2, %c0_i32_8 : i32
    %10 = arith.extui %9 : i1 to i32
    %c0_i32_9 = arith.constant 0 : i32
    %11 = arith.cmpi ne, %10, %c0_i32_9 : i32
    scf.if %11 {
      %c0_10 = arith.constant 0 : index
      %c0_11 = arith.constant 0 : index
      %12 = vector.load %arg7[%c0_10, %c0_11] : memref<32x128xf32, #tpu.memory_space<vmem>>, vector<32x128xf32>
      %c0_12 = arith.constant 0 : index
      %c0_13 = arith.constant 0 : index
      %13 = vector.load %arg5[%c0_12, %c0_13] : memref<1x128xf32, #tpu.memory_space<vmem>>, vector<1x128xf32>
      %14 = vector.broadcast %13 : vector<1x128xf32> to vector<32x128xf32>
      %15 = arith.addf %12, %14 : vector<32x128xf32>
      %16 = arith.truncf %15 : vector<32x128xf32> to vector<32x128xbf16>
      %c0_14 = arith.constant 0 : index
      %c0_15 = arith.constant 0 : index
      %17 = vector.load %arg6[%c0_14, %c0_15] : memref<32x128xbf16, #tpu.memory_space<vmem>>, vector<32x128xbf16>
      tpu.vector_store %arg6[%c0_14, %c0_15], %16 {strides = array<i32>} : memref<32x128xbf16, #tpu.memory_space<vmem>>, vector<32x128xbf16>,
    } else {
    }
    return
  }
  func.func @transform_0(%arg0: i32, %arg1: i32, %arg2: i32) -> (i32, i32) {
    %c0_i32 = arith.constant 0 : i32
    return %arg0, %arg2 : i32, i32
  }
  func.func @transform_1(%arg0: i32, %arg1: i32, %arg2: i32) -> (i32, i32) {
    %c0_i32 = arith.constant 0 : i32
    return %arg2, %arg1 : i32, i32
  }
  func.func @transform_2(%arg0: i32, %arg1: i32, %arg2: i32) -> (i32, i32) {
    %c0_i32 = arith.constant 0 : i32
    %c0_i32_0 = arith.constant 0 : i32
    return %c0_i32, %arg1 : i32, i32
  }
  func.func @transform_3(%arg0: i32, %arg1: i32, %arg2: i32) -> (i32, i32) {
    %c0_i32 = arith.constant 0 : i32
    return %arg0, %arg1 : i32, i32
  }
}

module attributes {stable_mosaic.version = 11 : i64} {
  func.func @_fused_mm_kernel(%arg0: i32, %arg1: i32, %arg2: i32, %arg3: memref<16x384xbf16, #tpu.memory_space<vmem>>, %arg4: memref<384x256xbf16, #tpu.memory_space<vmem>>, %arg5: memref<1x256xf32, #tpu.memory_space<vmem>>, %arg6: memref<16x256xbf16, #tpu.memory_space<vmem>>, %arg7: memref<16x256xf32, #tpu.memory_space<vmem>>) attributes {dimension_semantics = [#tpu.dimension_semantics<parallel>, #tpu.dimension_semantics<parallel>, #tpu.dimension_semantics<arbitrary>], iteration_bounds = array<i64: 1, 1, 3>, scalar_prefetch = 0 : i64, scratch_operands = 1 : i64, tpu.core_type = #tpu.core_type<tc>, window_params = [{transform_indices = @transform_0, window_bounds = array<i64: 16, 384>}, {transform_indices = @transform_1, window_bounds = array<i64: 384, 256>}, {transform_indices = @transform_2, window_bounds = array<i64: 1, 256>}, {transform_indices = @transform_3, window_bounds = array<i64: 16, 256>}]} {
    %c0_i32 = arith.constant 0 : i32
    %0 = arith.cmpi eq, %arg2, %c0_i32 : i32
    %1 = arith.extui %0 : i1 to i32
    %c0_i32_0 = arith.constant 0 : i32
    %2 = arith.cmpi ne, %1, %c0_i32_0 : i32
    scf.if %2 {
      %cst_9 = arith.constant 0.000000e+00 : f32
      %12 = vector.broadcast %cst_9 : f32 to vector<16x256xf32>
      %c0_10 = arith.constant 0 : index
      %c0_11 = arith.constant 0 : index
      %13 = vector.load %arg7[%c0_10, %c0_11] : memref<16x256xf32, #tpu.memory_space<vmem>>, vector<16x256xf32>
      tpu.vector_store %arg7[%c0_10, %c0_11], %12 {strides = array<i32>} : memref<16x256xf32, #tpu.memory_space<vmem>>, vector<16x256xf32>,
    } else {
    }
    %c0 = arith.constant 0 : index
    %c0_1 = arith.constant 0 : index
    %3 = vector.load %arg7[%c0, %c0_1] : memref<16x256xf32, #tpu.memory_space<vmem>>, vector<16x256xf32>
    %c0_2 = arith.constant 0 : index
    %c0_3 = arith.constant 0 : index
    %4 = vector.load %arg3[%c0_2, %c0_3] : memref<16x384xbf16, #tpu.memory_space<vmem>>, vector<16x384xbf16>
    %c0_4 = arith.constant 0 : index
    %c0_5 = arith.constant 0 : index
    %5 = vector.load %arg4[%c0_4, %c0_5] : memref<384x256xbf16, #tpu.memory_space<vmem>>, vector<384x256xbf16>
    %cst = arith.constant dense<0.000000e+00> : vector<16x256xf32>
    %6 = tpu.matmul %4, %5, %cst {dimension_numbers = #tpu.dot_dimension_numbers<[1], [0], [0], [1], [0, 0, 1, 1], [], []>} : vector<16x384xbf16>, vector<384x256xbf16>, vector<16x256xf32> -> vector<16x256xf32>
    %7 = arith.addf %3, %6 : vector<16x256xf32>
    %c0_6 = arith.constant 0 : index
    %c0_7 = arith.constant 0 : index
    %8 = vector.load %arg7[%c0_6, %c0_7] : memref<16x256xf32, #tpu.memory_space<vmem>>, vector<16x256xf32>
    tpu.vector_store %arg7[%c0_6, %c0_7], %7 {strides = array<i32>} : memref<16x256xf32, #tpu.memory_space<vmem>>, vector<16x256xf32>,
    %c2_i32 = arith.constant 2 : i32
    %9 = arith.cmpi eq, %arg2, %c2_i32 : i32
    %10 = arith.extui %9 : i1 to i32
    %c0_i32_8 = arith.constant 0 : i32
    %11 = arith.cmpi ne, %10, %c0_i32_8 : i32
    scf.if %11 {
      %c0_9 = arith.constant 0 : index
      %c0_10 = arith.constant 0 : index
      %12 = vector.load %arg7[%c0_9, %c0_10] : memref<16x256xf32, #tpu.memory_space<vmem>>, vector<16x256xf32>
      %c0_11 = arith.constant 0 : index
      %c0_12 = arith.constant 0 : index
      %13 = vector.load %arg5[%c0_11, %c0_12] : memref<1x256xf32, #tpu.memory_space<vmem>>, vector<1x256xf32>
      %14 = vector.broadcast %13 : vector<1x256xf32> to vector<16x256xf32>
      %15 = arith.addf %12, %14 : vector<16x256xf32>
      %cst_13 = arith.constant 0.000000e+00 : f32
      %16 = vector.broadcast %cst_13 : f32 to vector<16x256xf32>
      %17 = arith.maximumf %15, %16 : vector<16x256xf32>
      %18 = arith.truncf %17 : vector<16x256xf32> to vector<16x256xbf16>
      %c0_14 = arith.constant 0 : index
      %c0_15 = arith.constant 0 : index
      %19 = vector.load %arg6[%c0_14, %c0_15] : memref<16x256xbf16, #tpu.memory_space<vmem>>, vector<16x256xbf16>
      tpu.vector_store %arg6[%c0_14, %c0_15], %18 {strides = array<i32>} : memref<16x256xbf16, #tpu.memory_space<vmem>>, vector<16x256xbf16>,
    } else {
    }
    return
  }
  func.func @transform_0(%arg0: i32, %arg1: i32, %arg2: i32) -> (i32, i32) {
    %c0_i32 = arith.constant 0 : i32
    return %arg0, %arg2 : i32, i32
  }
  func.func @transform_1(%arg0: i32, %arg1: i32, %arg2: i32) -> (i32, i32) {
    %c0_i32 = arith.constant 0 : i32
    return %arg2, %arg1 : i32, i32
  }
  func.func @transform_2(%arg0: i32, %arg1: i32, %arg2: i32) -> (i32, i32) {
    %c0_i32 = arith.constant 0 : i32
    %c0_i32_0 = arith.constant 0 : i32
    return %c0_i32, %arg1 : i32, i32
  }
  func.func @transform_3(%arg0: i32, %arg1: i32, %arg2: i32) -> (i32, i32) {
    %c0_i32 = arith.constant 0 : i32
    return %arg0, %arg1 : i32, i32
  }
}

module attributes {stable_mosaic.version = 11 : i64} {
  func.func @_fused_mm_kernel(%arg0: i32, %arg1: i32, %arg2: i32, %arg3: memref<16x128xbf16, #tpu.memory_space<vmem>>, %arg4: memref<128x256xbf16, #tpu.memory_space<vmem>>, %arg5: memref<1x256xf32, #tpu.memory_space<vmem>>, %arg6: memref<16x256xbf16, #tpu.memory_space<vmem>>, %arg7: memref<16x256xf32, #tpu.memory_space<vmem>>) attributes {dimension_semantics = [#tpu.dimension_semantics<parallel>, #tpu.dimension_semantics<parallel>, #tpu.dimension_semantics<arbitrary>], iteration_bounds = array<i64: 1, 1, 1>, scalar_prefetch = 0 : i64, scratch_operands = 1 : i64, tpu.core_type = #tpu.core_type<tc>, window_params = [{transform_indices = @transform_0, window_bounds = array<i64: 16, 128>}, {transform_indices = @transform_1, window_bounds = array<i64: 128, 256>}, {transform_indices = @transform_2, window_bounds = array<i64: 1, 256>}, {transform_indices = @transform_3, window_bounds = array<i64: 16, 256>}]} {
    %c0_i32 = arith.constant 0 : i32
    %0 = arith.cmpi eq, %arg2, %c0_i32 : i32
    %1 = arith.extui %0 : i1 to i32
    %c0_i32_0 = arith.constant 0 : i32
    %2 = arith.cmpi ne, %1, %c0_i32_0 : i32
    scf.if %2 {
      %cst_10 = arith.constant 0.000000e+00 : f32
      %12 = vector.broadcast %cst_10 : f32 to vector<16x256xf32>
      %c0_11 = arith.constant 0 : index
      %c0_12 = arith.constant 0 : index
      %13 = vector.load %arg7[%c0_11, %c0_12] : memref<16x256xf32, #tpu.memory_space<vmem>>, vector<16x256xf32>
      tpu.vector_store %arg7[%c0_11, %c0_12], %12 {strides = array<i32>} : memref<16x256xf32, #tpu.memory_space<vmem>>, vector<16x256xf32>,
    } else {
    }
    %c0 = arith.constant 0 : index
    %c0_1 = arith.constant 0 : index
    %3 = vector.load %arg7[%c0, %c0_1] : memref<16x256xf32, #tpu.memory_space<vmem>>, vector<16x256xf32>
    %c0_2 = arith.constant 0 : index
    %c0_3 = arith.constant 0 : index
    %4 = vector.load %arg3[%c0_2, %c0_3] : memref<16x128xbf16, #tpu.memory_space<vmem>>, vector<16x128xbf16>
    %c0_4 = arith.constant 0 : index
    %c0_5 = arith.constant 0 : index
    %5 = vector.load %arg4[%c0_4, %c0_5] : memref<128x256xbf16, #tpu.memory_space<vmem>>, vector<128x256xbf16>
    %cst = arith.constant dense<0.000000e+00> : vector<16x256xf32>
    %6 = tpu.matmul %4, %5, %cst {dimension_numbers = #tpu.dot_dimension_numbers<[1], [0], [0], [1], [0, 0, 1, 1], [], []>} : vector<16x128xbf16>, vector<128x256xbf16>, vector<16x256xf32> -> vector<16x256xf32>
    %7 = arith.addf %3, %6 : vector<16x256xf32>
    %c0_6 = arith.constant 0 : index
    %c0_7 = arith.constant 0 : index
    %8 = vector.load %arg7[%c0_6, %c0_7] : memref<16x256xf32, #tpu.memory_space<vmem>>, vector<16x256xf32>
    tpu.vector_store %arg7[%c0_6, %c0_7], %7 {strides = array<i32>} : memref<16x256xf32, #tpu.memory_space<vmem>>, vector<16x256xf32>,
    %c0_i32_8 = arith.constant 0 : i32
    %9 = arith.cmpi eq, %arg2, %c0_i32_8 : i32
    %10 = arith.extui %9 : i1 to i32
    %c0_i32_9 = arith.constant 0 : i32
    %11 = arith.cmpi ne, %10, %c0_i32_9 : i32
    scf.if %11 {
      %c0_10 = arith.constant 0 : index
      %c0_11 = arith.constant 0 : index
      %12 = vector.load %arg7[%c0_10, %c0_11] : memref<16x256xf32, #tpu.memory_space<vmem>>, vector<16x256xf32>
      %c0_12 = arith.constant 0 : index
      %c0_13 = arith.constant 0 : index
      %13 = vector.load %arg5[%c0_12, %c0_13] : memref<1x256xf32, #tpu.memory_space<vmem>>, vector<1x256xf32>
      %14 = vector.broadcast %13 : vector<1x256xf32> to vector<16x256xf32>
      %15 = arith.addf %12, %14 : vector<16x256xf32>
      %16 = arith.truncf %15 : vector<16x256xf32> to vector<16x256xbf16>
      %c0_14 = arith.constant 0 : index
      %c0_15 = arith.constant 0 : index
      %17 = vector.load %arg6[%c0_14, %c0_15] : memref<16x256xbf16, #tpu.memory_space<vmem>>, vector<16x256xbf16>
      tpu.vector_store %arg6[%c0_14, %c0_15], %16 {strides = array<i32>} : memref<16x256xbf16, #tpu.memory_space<vmem>>, vector<16x256xbf16>,
    } else {
    }
    return
  }
  func.func @transform_0(%arg0: i32, %arg1: i32, %arg2: i32) -> (i32, i32) {
    %c0_i32 = arith.constant 0 : i32
    return %arg0, %arg2 : i32, i32
  }
  func.func @transform_1(%arg0: i32, %arg1: i32, %arg2: i32) -> (i32, i32) {
    %c0_i32 = arith.constant 0 : i32
    return %arg2, %arg1 : i32, i32
  }
  func.func @transform_2(%arg0: i32, %arg1: i32, %arg2: i32) -> (i32, i32) {
    %c0_i32 = arith.constant 0 : i32
    %c0_i32_0 = arith.constant 0 : i32
    return %c0_i32, %arg1 : i32, i32
  }
  func.func @transform_3(%arg0: i32, %arg1: i32, %arg2: i32) -> (i32, i32) {
    %c0_i32 = arith.constant 0 : i32
    return %arg0, %arg1 : i32, i32
  }
}

module attributes {stable_mosaic.version = 11 : i64} {
  func.func @_fused_mm_kernel(%arg0: i32, %arg1: i32, %arg2: i32, %arg3: memref<16x384xbf16, #tpu.memory_space<vmem>>, %arg4: memref<384x256xbf16, #tpu.memory_space<vmem>>, %arg5: memref<1x256xf32, #tpu.memory_space<vmem>>, %arg6: memref<16x256xbf16, #tpu.memory_space<vmem>>, %arg7: memref<16x256xbf16, #tpu.memory_space<vmem>>, %arg8: memref<16x256xf32, #tpu.memory_space<vmem>>) attributes {dimension_semantics = [#tpu.dimension_semantics<parallel>, #tpu.dimension_semantics<parallel>, #tpu.dimension_semantics<arbitrary>], iteration_bounds = array<i64: 1, 1, 6>, scalar_prefetch = 0 : i64, scratch_operands = 1 : i64, tpu.core_type = #tpu.core_type<tc>, window_params = [{transform_indices = @transform_0, window_bounds = array<i64: 16, 384>}, {transform_indices = @transform_1, window_bounds = array<i64: 384, 256>}, {transform_indices = @transform_2, window_bounds = array<i64: 1, 256>}, {transform_indices = @transform_3, window_bounds = array<i64: 16, 256>}, {transform_indices = @transform_4, window_bounds = array<i64: 16, 256>}]} {
    %c0_i32 = arith.constant 0 : i32
    %0 = arith.cmpi eq, %arg2, %c0_i32 : i32
    %1 = arith.extui %0 : i1 to i32
    %c0_i32_0 = arith.constant 0 : i32
    %2 = arith.cmpi ne, %1, %c0_i32_0 : i32
    scf.if %2 {
      %cst_9 = arith.constant 0.000000e+00 : f32
      %12 = vector.broadcast %cst_9 : f32 to vector<16x256xf32>
      %c0_10 = arith.constant 0 : index
      %c0_11 = arith.constant 0 : index
      %13 = vector.load %arg8[%c0_10, %c0_11] : memref<16x256xf32, #tpu.memory_space<vmem>>, vector<16x256xf32>
      tpu.vector_store %arg8[%c0_10, %c0_11], %12 {strides = array<i32>} : memref<16x256xf32, #tpu.memory_space<vmem>>, vector<16x256xf32>,
    } else {
    }
    %c0 = arith.constant 0 : index
    %c0_1 = arith.constant 0 : index
    %3 = vector.load %arg8[%c0, %c0_1] : memref<16x256xf32, #tpu.memory_space<vmem>>, vector<16x256xf32>
    %c0_2 = arith.constant 0 : index
    %c0_3 = arith.constant 0 : index
    %4 = vector.load %arg3[%c0_2, %c0_3] : memref<16x384xbf16, #tpu.memory_space<vmem>>, vector<16x384xbf16>
    %c0_4 = arith.constant 0 : index
    %c0_5 = arith.constant 0 : index
    %5 = vector.load %arg4[%c0_4, %c0_5] : memref<384x256xbf16, #tpu.memory_space<vmem>>, vector<384x256xbf16>
    %cst = arith.constant dense<0.000000e+00> : vector<16x256xf32>
    %6 = tpu.matmul %4, %5, %cst {dimension_numbers = #tpu.dot_dimension_numbers<[1], [0], [0], [1], [0, 0, 1, 1], [], []>} : vector<16x384xbf16>, vector<384x256xbf16>, vector<16x256xf32> -> vector<16x256xf32>
    %7 = arith.addf %3, %6 : vector<16x256xf32>
    %c0_6 = arith.constant 0 : index
    %c0_7 = arith.constant 0 : index
    %8 = vector.load %arg8[%c0_6, %c0_7] : memref<16x256xf32, #tpu.memory_space<vmem>>, vector<16x256xf32>
    tpu.vector_store %arg8[%c0_6, %c0_7], %7 {strides = array<i32>} : memref<16x256xf32, #tpu.memory_space<vmem>>, vector<16x256xf32>,
    %c5_i32 = arith.constant 5 : i32
    %9 = arith.cmpi eq, %arg2, %c5_i32 : i32
    %10 = arith.extui %9 : i1 to i32
    %c0_i32_8 = arith.constant 0 : i32
    %11 = arith.cmpi ne, %10, %c0_i32_8 : i32
    scf.if %11 {
      %c0_9 = arith.constant 0 : index
      %c0_10 = arith.constant 0 : index
      %12 = vector.load %arg8[%c0_9, %c0_10] : memref<16x256xf32, #tpu.memory_space<vmem>>, vector<16x256xf32>
      %c0_11 = arith.constant 0 : index
      %c0_12 = arith.constant 0 : index
      %13 = vector.load %arg5[%c0_11, %c0_12] : memref<1x256xf32, #tpu.memory_space<vmem>>, vector<1x256xf32>
      %14 = vector.broadcast %13 : vector<1x256xf32> to vector<16x256xf32>
      %15 = arith.addf %12, %14 : vector<16x256xf32>
      %c0_13 = arith.constant 0 : index
      %c0_14 = arith.constant 0 : index
      %16 = vector.load %arg6[%c0_13, %c0_14] : memref<16x256xbf16, #tpu.memory_space<vmem>>, vector<16x256xbf16>
      %17 = arith.extf %16 : vector<16x256xbf16> to vector<16x256xf32>
      %18 = arith.addf %15, %17 : vector<16x256xf32>
      %cst_15 = arith.constant 0.000000e+00 : f32
      %19 = vector.broadcast %cst_15 : f32 to vector<16x256xf32>
      %20 = arith.maximumf %18, %19 : vector<16x256xf32>
      %21 = arith.truncf %20 : vector<16x256xf32> to vector<16x256xbf16>
      %c0_16 = arith.constant 0 : index
      %c0_17 = arith.constant 0 : index
      %22 = vector.load %arg7[%c0_16, %c0_17] : memref<16x256xbf16, #tpu.memory_space<vmem>>, vector<16x256xbf16>
      tpu.vector_store %arg7[%c0_16, %c0_17], %21 {strides = array<i32>} : memref<16x256xbf16, #tpu.memory_space<vmem>>, vector<16x256xbf16>,
    } else {
    }
    return
  }
  func.func @transform_0(%arg0: i32, %arg1: i32, %arg2: i32) -> (i32, i32) {
    %c0_i32 = arith.constant 0 : i32
    return %arg0, %arg2 : i32, i32
  }
  func.func @transform_1(%arg0: i32, %arg1: i32, %arg2: i32) -> (i32, i32) {
    %c0_i32 = arith.constant 0 : i32
    return %arg2, %arg1 : i32, i32
  }
  func.func @transform_2(%arg0: i32, %arg1: i32, %arg2: i32) -> (i32, i32) {
    %c0_i32 = arith.constant 0 : i32
    %c0_i32_0 = arith.constant 0 : i32
    return %c0_i32, %arg1 : i32, i32
  }
  func.func @transform_3(%arg0: i32, %arg1: i32, %arg2: i32) -> (i32, i32) {
    %c0_i32 = arith.constant 0 : i32
    return %arg0, %arg1 : i32, i32
  }
  func.func @transform_4(%arg0: i32, %arg1: i32, %arg2: i32) -> (i32, i32) {
    %c0_i32 = arith.constant 0 : i32
    return %arg0, %arg1 : i32, i32
  }
}

module attributes {stable_mosaic.version = 11 : i64} {
  func.func @_fused_mm_kernel(%arg0: i32, %arg1: i32, %arg2: i32, %arg3: memref<16x384xbf16, #tpu.memory_space<vmem>>, %arg4: memref<384x256xbf16, #tpu.memory_space<vmem>>, %arg5: memref<1x256xf32, #tpu.memory_space<vmem>>, %arg6: memref<16x256xbf16, #tpu.memory_space<vmem>>, %arg7: memref<16x256xf32, #tpu.memory_space<vmem>>) attributes {dimension_semantics = [#tpu.dimension_semantics<parallel>, #tpu.dimension_semantics<parallel>, #tpu.dimension_semantics<arbitrary>], iteration_bounds = array<i64: 1, 1, 6>, scalar_prefetch = 0 : i64, scratch_operands = 1 : i64, tpu.core_type = #tpu.core_type<tc>, window_params = [{transform_indices = @transform_0, window_bounds = array<i64: 16, 384>}, {transform_indices = @transform_1, window_bounds = array<i64: 384, 256>}, {transform_indices = @transform_2, window_bounds = array<i64: 1, 256>}, {transform_indices = @transform_3, window_bounds = array<i64: 16, 256>}]} {
    %c0_i32 = arith.constant 0 : i32
    %0 = arith.cmpi eq, %arg2, %c0_i32 : i32
    %1 = arith.extui %0 : i1 to i32
    %c0_i32_0 = arith.constant 0 : i32
    %2 = arith.cmpi ne, %1, %c0_i32_0 : i32
    scf.if %2 {
      %cst_9 = arith.constant 0.000000e+00 : f32
      %12 = vector.broadcast %cst_9 : f32 to vector<16x256xf32>
      %c0_10 = arith.constant 0 : index
      %c0_11 = arith.constant 0 : index
      %13 = vector.load %arg7[%c0_10, %c0_11] : memref<16x256xf32, #tpu.memory_space<vmem>>, vector<16x256xf32>
      tpu.vector_store %arg7[%c0_10, %c0_11], %12 {strides = array<i32>} : memref<16x256xf32, #tpu.memory_space<vmem>>, vector<16x256xf32>,
    } else {
    }
    %c0 = arith.constant 0 : index
    %c0_1 = arith.constant 0 : index
    %3 = vector.load %arg7[%c0, %c0_1] : memref<16x256xf32, #tpu.memory_space<vmem>>, vector<16x256xf32>
    %c0_2 = arith.constant 0 : index
    %c0_3 = arith.constant 0 : index
    %4 = vector.load %arg3[%c0_2, %c0_3] : memref<16x384xbf16, #tpu.memory_space<vmem>>, vector<16x384xbf16>
    %c0_4 = arith.constant 0 : index
    %c0_5 = arith.constant 0 : index
    %5 = vector.load %arg4[%c0_4, %c0_5] : memref<384x256xbf16, #tpu.memory_space<vmem>>, vector<384x256xbf16>
    %cst = arith.constant dense<0.000000e+00> : vector<16x256xf32>
    %6 = tpu.matmul %4, %5, %cst {dimension_numbers = #tpu.dot_dimension_numbers<[1], [0], [0], [1], [0, 0, 1, 1], [], []>} : vector<16x384xbf16>, vector<384x256xbf16>, vector<16x256xf32> -> vector<16x256xf32>
    %7 = arith.addf %3, %6 : vector<16x256xf32>
    %c0_6 = arith.constant 0 : index
    %c0_7 = arith.constant 0 : index
    %8 = vector.load %arg7[%c0_6, %c0_7] : memref<16x256xf32, #tpu.memory_space<vmem>>, vector<16x256xf32>
    tpu.vector_store %arg7[%c0_6, %c0_7], %7 {strides = array<i32>} : memref<16x256xf32, #tpu.memory_space<vmem>>, vector<16x256xf32>,
    %c5_i32 = arith.constant 5 : i32
    %9 = arith.cmpi eq, %arg2, %c5_i32 : i32
    %10 = arith.extui %9 : i1 to i32
    %c0_i32_8 = arith.constant 0 : i32
    %11 = arith.cmpi ne, %10, %c0_i32_8 : i32
    scf.if %11 {
      %c0_9 = arith.constant 0 : index
      %c0_10 = arith.constant 0 : index
      %12 = vector.load %arg7[%c0_9, %c0_10] : memref<16x256xf32, #tpu.memory_space<vmem>>, vector<16x256xf32>
      %c0_11 = arith.constant 0 : index
      %c0_12 = arith.constant 0 : index
      %13 = vector.load %arg5[%c0_11, %c0_12] : memref<1x256xf32, #tpu.memory_space<vmem>>, vector<1x256xf32>
      %14 = vector.broadcast %13 : vector<1x256xf32> to vector<16x256xf32>
      %15 = arith.addf %12, %14 : vector<16x256xf32>
      %cst_13 = arith.constant 0.000000e+00 : f32
      %16 = vector.broadcast %cst_13 : f32 to vector<16x256xf32>
      %17 = arith.maximumf %15, %16 : vector<16x256xf32>
      %18 = arith.truncf %17 : vector<16x256xf32> to vector<16x256xbf16>
      %c0_14 = arith.constant 0 : index
      %c0_15 = arith.constant 0 : index
      %19 = vector.load %arg6[%c0_14, %c0_15] : memref<16x256xbf16, #tpu.memory_space<vmem>>, vector<16x256xbf16>
      tpu.vector_store %arg6[%c0_14, %c0_15], %18 {strides = array<i32>} : memref<16x256xbf16, #tpu.memory_space<vmem>>, vector<16x256xbf16>,
    } else {
    }
    return
  }
  func.func @transform_0(%arg0: i32, %arg1: i32, %arg2: i32) -> (i32, i32) {
    %c0_i32 = arith.constant 0 : i32
    return %arg0, %arg2 : i32, i32
  }
  func.func @transform_1(%arg0: i32, %arg1: i32, %arg2: i32) -> (i32, i32) {
    %c0_i32 = arith.constant 0 : i32
    return %arg2, %arg1 : i32, i32
  }
  func.func @transform_2(%arg0: i32, %arg1: i32, %arg2: i32) -> (i32, i32) {
    %c0_i32 = arith.constant 0 : i32
    %c0_i32_0 = arith.constant 0 : i32
    return %c0_i32, %arg1 : i32, i32
  }
  func.func @transform_3(%arg0: i32, %arg1: i32, %arg2: i32) -> (i32, i32) {
    %c0_i32 = arith.constant 0 : i32
    return %arg0, %arg1 : i32, i32
  }
}

module attributes {stable_mosaic.version = 11 : i64} {
  func.func @_fused_mm_kernel(%arg0: i32, %arg1: i32, %arg2: i32, %arg3: memref<16x384xbf16, #tpu.memory_space<vmem>>, %arg4: memref<384x256xbf16, #tpu.memory_space<vmem>>, %arg5: memref<1x256xf32, #tpu.memory_space<vmem>>, %arg6: memref<16x256xbf16, #tpu.memory_space<vmem>>, %arg7: memref<16x256xf32, #tpu.memory_space<vmem>>) attributes {dimension_semantics = [#tpu.dimension_semantics<parallel>, #tpu.dimension_semantics<parallel>, #tpu.dimension_semantics<arbitrary>], iteration_bounds = array<i64: 1, 2, 6>, scalar_prefetch = 0 : i64, scratch_operands = 1 : i64, tpu.core_type = #tpu.core_type<tc>, window_params = [{transform_indices = @transform_0, window_bounds = array<i64: 16, 384>}, {transform_indices = @transform_1, window_bounds = array<i64: 384, 256>}, {transform_indices = @transform_2, window_bounds = array<i64: 1, 256>}, {transform_indices = @transform_3, window_bounds = array<i64: 16, 256>}]} {
    %c0_i32 = arith.constant 0 : i32
    %0 = arith.cmpi eq, %arg2, %c0_i32 : i32
    %1 = arith.extui %0 : i1 to i32
    %c0_i32_0 = arith.constant 0 : i32
    %2 = arith.cmpi ne, %1, %c0_i32_0 : i32
    scf.if %2 {
      %cst_9 = arith.constant 0.000000e+00 : f32
      %12 = vector.broadcast %cst_9 : f32 to vector<16x256xf32>
      %c0_10 = arith.constant 0 : index
      %c0_11 = arith.constant 0 : index
      %13 = vector.load %arg7[%c0_10, %c0_11] : memref<16x256xf32, #tpu.memory_space<vmem>>, vector<16x256xf32>
      tpu.vector_store %arg7[%c0_10, %c0_11], %12 {strides = array<i32>} : memref<16x256xf32, #tpu.memory_space<vmem>>, vector<16x256xf32>,
    } else {
    }
    %c0 = arith.constant 0 : index
    %c0_1 = arith.constant 0 : index
    %3 = vector.load %arg7[%c0, %c0_1] : memref<16x256xf32, #tpu.memory_space<vmem>>, vector<16x256xf32>
    %c0_2 = arith.constant 0 : index
    %c0_3 = arith.constant 0 : index
    %4 = vector.load %arg3[%c0_2, %c0_3] : memref<16x384xbf16, #tpu.memory_space<vmem>>, vector<16x384xbf16>
    %c0_4 = arith.constant 0 : index
    %c0_5 = arith.constant 0 : index
    %5 = vector.load %arg4[%c0_4, %c0_5] : memref<384x256xbf16, #tpu.memory_space<vmem>>, vector<384x256xbf16>
    %cst = arith.constant dense<0.000000e+00> : vector<16x256xf32>
    %6 = tpu.matmul %4, %5, %cst {dimension_numbers = #tpu.dot_dimension_numbers<[1], [0], [0], [1], [0, 0, 1, 1], [], []>} : vector<16x384xbf16>, vector<384x256xbf16>, vector<16x256xf32> -> vector<16x256xf32>
    %7 = arith.addf %3, %6 : vector<16x256xf32>
    %c0_6 = arith.constant 0 : index
    %c0_7 = arith.constant 0 : index
    %8 = vector.load %arg7[%c0_6, %c0_7] : memref<16x256xf32, #tpu.memory_space<vmem>>, vector<16x256xf32>
    tpu.vector_store %arg7[%c0_6, %c0_7], %7 {strides = array<i32>} : memref<16x256xf32, #tpu.memory_space<vmem>>, vector<16x256xf32>,
    %c5_i32 = arith.constant 5 : i32
    %9 = arith.cmpi eq, %arg2, %c5_i32 : i32
    %10 = arith.extui %9 : i1 to i32
    %c0_i32_8 = arith.constant 0 : i32
    %11 = arith.cmpi ne, %10, %c0_i32_8 : i32
    scf.if %11 {
      %c0_9 = arith.constant 0 : index
      %c0_10 = arith.constant 0 : index
      %12 = vector.load %arg7[%c0_9, %c0_10] : memref<16x256xf32, #tpu.memory_space<vmem>>, vector<16x256xf32>
      %c0_11 = arith.constant 0 : index
      %c0_12 = arith.constant 0 : index
      %13 = vector.load %arg5[%c0_11, %c0_12] : memref<1x256xf32, #tpu.memory_space<vmem>>, vector<1x256xf32>
      %14 = vector.broadcast %13 : vector<1x256xf32> to vector<16x256xf32>
      %15 = arith.addf %12, %14 : vector<16x256xf32>
      %cst_13 = arith.constant 0.000000e+00 : f32
      %16 = vector.broadcast %cst_13 : f32 to vector<16x256xf32>
      %17 = arith.maximumf %15, %16 : vector<16x256xf32>
      %18 = arith.truncf %17 : vector<16x256xf32> to vector<16x256xbf16>
      %c0_14 = arith.constant 0 : index
      %c0_15 = arith.constant 0 : index
      %19 = vector.load %arg6[%c0_14, %c0_15] : memref<16x256xbf16, #tpu.memory_space<vmem>>, vector<16x256xbf16>
      tpu.vector_store %arg6[%c0_14, %c0_15], %18 {strides = array<i32>} : memref<16x256xbf16, #tpu.memory_space<vmem>>, vector<16x256xbf16>,
    } else {
    }
    return
  }
  func.func @transform_0(%arg0: i32, %arg1: i32, %arg2: i32) -> (i32, i32) {
    %c0_i32 = arith.constant 0 : i32
    return %arg0, %arg2 : i32, i32
  }
  func.func @transform_1(%arg0: i32, %arg1: i32, %arg2: i32) -> (i32, i32) {
    %c0_i32 = arith.constant 0 : i32
    return %arg2, %arg1 : i32, i32
  }
  func.func @transform_2(%arg0: i32, %arg1: i32, %arg2: i32) -> (i32, i32) {
    %c0_i32 = arith.constant 0 : i32
    %c0_i32_0 = arith.constant 0 : i32
    return %c0_i32, %arg1 : i32, i32
  }
  func.func @transform_3(%arg0: i32, %arg1: i32, %arg2: i32) -> (i32, i32) {
    %c0_i32 = arith.constant 0 : i32
    return %arg0, %arg1 : i32, i32
  }
}

module attributes {stable_mosaic.version = 11 : i64} {
  func.func @_fused_mm_kernel(%arg0: i32, %arg1: i32, %arg2: i32, %arg3: memref<16x256xbf16, #tpu.memory_space<vmem>>, %arg4: memref<256x256xbf16, #tpu.memory_space<vmem>>, %arg5: memref<1x256xf32, #tpu.memory_space<vmem>>, %arg6: memref<16x256xbf16, #tpu.memory_space<vmem>>, %arg7: memref<16x256xf32, #tpu.memory_space<vmem>>) attributes {dimension_semantics = [#tpu.dimension_semantics<parallel>, #tpu.dimension_semantics<parallel>, #tpu.dimension_semantics<arbitrary>], iteration_bounds = array<i64: 1, 2, 1>, scalar_prefetch = 0 : i64, scratch_operands = 1 : i64, tpu.core_type = #tpu.core_type<tc>, window_params = [{transform_indices = @transform_0, window_bounds = array<i64: 16, 256>}, {transform_indices = @transform_1, window_bounds = array<i64: 256, 256>}, {transform_indices = @transform_2, window_bounds = array<i64: 1, 256>}, {transform_indices = @transform_3, window_bounds = array<i64: 16, 256>}]} {
    %c0_i32 = arith.constant 0 : i32
    %0 = arith.cmpi eq, %arg2, %c0_i32 : i32
    %1 = arith.extui %0 : i1 to i32
    %c0_i32_0 = arith.constant 0 : i32
    %2 = arith.cmpi ne, %1, %c0_i32_0 : i32
    scf.if %2 {
      %cst_10 = arith.constant 0.000000e+00 : f32
      %12 = vector.broadcast %cst_10 : f32 to vector<16x256xf32>
      %c0_11 = arith.constant 0 : index
      %c0_12 = arith.constant 0 : index
      %13 = vector.load %arg7[%c0_11, %c0_12] : memref<16x256xf32, #tpu.memory_space<vmem>>, vector<16x256xf32>
      tpu.vector_store %arg7[%c0_11, %c0_12], %12 {strides = array<i32>} : memref<16x256xf32, #tpu.memory_space<vmem>>, vector<16x256xf32>,
    } else {
    }
    %c0 = arith.constant 0 : index
    %c0_1 = arith.constant 0 : index
    %3 = vector.load %arg7[%c0, %c0_1] : memref<16x256xf32, #tpu.memory_space<vmem>>, vector<16x256xf32>
    %c0_2 = arith.constant 0 : index
    %c0_3 = arith.constant 0 : index
    %4 = vector.load %arg3[%c0_2, %c0_3] : memref<16x256xbf16, #tpu.memory_space<vmem>>, vector<16x256xbf16>
    %c0_4 = arith.constant 0 : index
    %c0_5 = arith.constant 0 : index
    %5 = vector.load %arg4[%c0_4, %c0_5] : memref<256x256xbf16, #tpu.memory_space<vmem>>, vector<256x256xbf16>
    %cst = arith.constant dense<0.000000e+00> : vector<16x256xf32>
    %6 = tpu.matmul %4, %5, %cst {dimension_numbers = #tpu.dot_dimension_numbers<[1], [0], [0], [1], [0, 0, 1, 1], [], []>} : vector<16x256xbf16>, vector<256x256xbf16>, vector<16x256xf32> -> vector<16x256xf32>
    %7 = arith.addf %3, %6 : vector<16x256xf32>
    %c0_6 = arith.constant 0 : index
    %c0_7 = arith.constant 0 : index
    %8 = vector.load %arg7[%c0_6, %c0_7] : memref<16x256xf32, #tpu.memory_space<vmem>>, vector<16x256xf32>
    tpu.vector_store %arg7[%c0_6, %c0_7], %7 {strides = array<i32>} : memref<16x256xf32, #tpu.memory_space<vmem>>, vector<16x256xf32>,
    %c0_i32_8 = arith.constant 0 : i32
    %9 = arith.cmpi eq, %arg2, %c0_i32_8 : i32
    %10 = arith.extui %9 : i1 to i32
    %c0_i32_9 = arith.constant 0 : i32
    %11 = arith.cmpi ne, %10, %c0_i32_9 : i32
    scf.if %11 {
      %c0_10 = arith.constant 0 : index
      %c0_11 = arith.constant 0 : index
      %12 = vector.load %arg7[%c0_10, %c0_11] : memref<16x256xf32, #tpu.memory_space<vmem>>, vector<16x256xf32>
      %c0_12 = arith.constant 0 : index
      %c0_13 = arith.constant 0 : index
      %13 = vector.load %arg5[%c0_12, %c0_13] : memref<1x256xf32, #tpu.memory_space<vmem>>, vector<1x256xf32>
      %14 = vector.broadcast %13 : vector<1x256xf32> to vector<16x256xf32>
      %15 = arith.addf %12, %14 : vector<16x256xf32>
      %16 = arith.truncf %15 : vector<16x256xf32> to vector<16x256xbf16>
      %c0_14 = arith.constant 0 : index
      %c0_15 = arith.constant 0 : index
      %17 = vector.load %arg6[%c0_14, %c0_15] : memref<16x256xbf16, #tpu.memory_space<vmem>>, vector<16x256xbf16>
      tpu.vector_store %arg6[%c0_14, %c0_15], %16 {strides = array<i32>} : memref<16x256xbf16, #tpu.memory_space<vmem>>, vector<16x256xbf16>,
    } else {
    }
    return
  }
  func.func @transform_0(%arg0: i32, %arg1: i32, %arg2: i32) -> (i32, i32) {
    %c0_i32 = arith.constant 0 : i32
    return %arg0, %arg2 : i32, i32
  }
  func.func @transform_1(%arg0: i32, %arg1: i32, %arg2: i32) -> (i32, i32) {
    %c0_i32 = arith.constant 0 : i32
    return %arg2, %arg1 : i32, i32
  }
  func.func @transform_2(%arg0: i32, %arg1: i32, %arg2: i32) -> (i32, i32) {
    %c0_i32 = arith.constant 0 : i32
    %c0_i32_0 = arith.constant 0 : i32
    return %c0_i32, %arg1 : i32, i32
  }
  func.func @transform_3(%arg0: i32, %arg1: i32, %arg2: i32) -> (i32, i32) {
    %c0_i32 = arith.constant 0 : i32
    return %arg0, %arg1 : i32, i32
  }
}

module attributes {stable_mosaic.version = 11 : i64} {
  func.func @_fused_mm_kernel(%arg0: i32, %arg1: i32, %arg2: i32, %arg3: memref<16x512xbf16, #tpu.memory_space<vmem>>, %arg4: memref<512x256xbf16, #tpu.memory_space<vmem>>, %arg5: memref<1x256xf32, #tpu.memory_space<vmem>>, %arg6: memref<16x256xbf16, #tpu.memory_space<vmem>>, %arg7: memref<16x256xbf16, #tpu.memory_space<vmem>>, %arg8: memref<16x256xf32, #tpu.memory_space<vmem>>) attributes {dimension_semantics = [#tpu.dimension_semantics<parallel>, #tpu.dimension_semantics<parallel>, #tpu.dimension_semantics<arbitrary>], iteration_bounds = array<i64: 1, 2, 9>, scalar_prefetch = 0 : i64, scratch_operands = 1 : i64, tpu.core_type = #tpu.core_type<tc>, window_params = [{transform_indices = @transform_0, window_bounds = array<i64: 16, 512>}, {transform_indices = @transform_1, window_bounds = array<i64: 512, 256>}, {transform_indices = @transform_2, window_bounds = array<i64: 1, 256>}, {transform_indices = @transform_3, window_bounds = array<i64: 16, 256>}, {transform_indices = @transform_4, window_bounds = array<i64: 16, 256>}]} {
    %c0_i32 = arith.constant 0 : i32
    %0 = arith.cmpi eq, %arg2, %c0_i32 : i32
    %1 = arith.extui %0 : i1 to i32
    %c0_i32_0 = arith.constant 0 : i32
    %2 = arith.cmpi ne, %1, %c0_i32_0 : i32
    scf.if %2 {
      %cst_9 = arith.constant 0.000000e+00 : f32
      %12 = vector.broadcast %cst_9 : f32 to vector<16x256xf32>
      %c0_10 = arith.constant 0 : index
      %c0_11 = arith.constant 0 : index
      %13 = vector.load %arg8[%c0_10, %c0_11] : memref<16x256xf32, #tpu.memory_space<vmem>>, vector<16x256xf32>
      tpu.vector_store %arg8[%c0_10, %c0_11], %12 {strides = array<i32>} : memref<16x256xf32, #tpu.memory_space<vmem>>, vector<16x256xf32>,
    } else {
    }
    %c0 = arith.constant 0 : index
    %c0_1 = arith.constant 0 : index
    %3 = vector.load %arg8[%c0, %c0_1] : memref<16x256xf32, #tpu.memory_space<vmem>>, vector<16x256xf32>
    %c0_2 = arith.constant 0 : index
    %c0_3 = arith.constant 0 : index
    %4 = vector.load %arg3[%c0_2, %c0_3] : memref<16x512xbf16, #tpu.memory_space<vmem>>, vector<16x512xbf16>
    %c0_4 = arith.constant 0 : index
    %c0_5 = arith.constant 0 : index
    %5 = vector.load %arg4[%c0_4, %c0_5] : memref<512x256xbf16, #tpu.memory_space<vmem>>, vector<512x256xbf16>
    %cst = arith.constant dense<0.000000e+00> : vector<16x256xf32>
    %6 = tpu.matmul %4, %5, %cst {dimension_numbers = #tpu.dot_dimension_numbers<[1], [0], [0], [1], [0, 0, 1, 1], [], []>} : vector<16x512xbf16>, vector<512x256xbf16>, vector<16x256xf32> -> vector<16x256xf32>
    %7 = arith.addf %3, %6 : vector<16x256xf32>
    %c0_6 = arith.constant 0 : index
    %c0_7 = arith.constant 0 : index
    %8 = vector.load %arg8[%c0_6, %c0_7] : memref<16x256xf32, #tpu.memory_space<vmem>>, vector<16x256xf32>
    tpu.vector_store %arg8[%c0_6, %c0_7], %7 {strides = array<i32>} : memref<16x256xf32, #tpu.memory_space<vmem>>, vector<16x256xf32>,
    %c8_i32 = arith.constant 8 : i32
    %9 = arith.cmpi eq, %arg2, %c8_i32 : i32
    %10 = arith.extui %9 : i1 to i32
    %c0_i32_8 = arith.constant 0 : i32
    %11 = arith.cmpi ne, %10, %c0_i32_8 : i32
    scf.if %11 {
      %c0_9 = arith.constant 0 : index
      %c0_10 = arith.constant 0 : index
      %12 = vector.load %arg8[%c0_9, %c0_10] : memref<16x256xf32, #tpu.memory_space<vmem>>, vector<16x256xf32>
      %c0_11 = arith.constant 0 : index
      %c0_12 = arith.constant 0 : index
      %13 = vector.load %arg5[%c0_11, %c0_12] : memref<1x256xf32, #tpu.memory_space<vmem>>, vector<1x256xf32>
      %14 = vector.broadcast %13 : vector<1x256xf32> to vector<16x256xf32>
      %15 = arith.addf %12, %14 : vector<16x256xf32>
      %c0_13 = arith.constant 0 : index
      %c0_14 = arith.constant 0 : index
      %16 = vector.load %arg6[%c0_13, %c0_14] : memref<16x256xbf16, #tpu.memory_space<vmem>>, vector<16x256xbf16>
      %17 = arith.extf %16 : vector<16x256xbf16> to vector<16x256xf32>
      %18 = arith.addf %15, %17 : vector<16x256xf32>
      %cst_15 = arith.constant 0.000000e+00 : f32
      %19 = vector.broadcast %cst_15 : f32 to vector<16x256xf32>
      %20 = arith.maximumf %18, %19 : vector<16x256xf32>
      %21 = arith.truncf %20 : vector<16x256xf32> to vector<16x256xbf16>
      %c0_16 = arith.constant 0 : index
      %c0_17 = arith.constant 0 : index
      %22 = vector.load %arg7[%c0_16, %c0_17] : memref<16x256xbf16, #tpu.memory_space<vmem>>, vector<16x256xbf16>
      tpu.vector_store %arg7[%c0_16, %c0_17], %21 {strides = array<i32>} : memref<16x256xbf16, #tpu.memory_space<vmem>>, vector<16x256xbf16>,
    } else {
    }
    return
  }
  func.func @transform_0(%arg0: i32, %arg1: i32, %arg2: i32) -> (i32, i32) {
    %c0_i32 = arith.constant 0 : i32
    return %arg0, %arg2 : i32, i32
  }
  func.func @transform_1(%arg0: i32, %arg1: i32, %arg2: i32) -> (i32, i32) {
    %c0_i32 = arith.constant 0 : i32
    return %arg2, %arg1 : i32, i32
  }
  func.func @transform_2(%arg0: i32, %arg1: i32, %arg2: i32) -> (i32, i32) {
    %c0_i32 = arith.constant 0 : i32
    %c0_i32_0 = arith.constant 0 : i32
    return %c0_i32, %arg1 : i32, i32
  }
  func.func @transform_3(%arg0: i32, %arg1: i32, %arg2: i32) -> (i32, i32) {
    %c0_i32 = arith.constant 0 : i32
    return %arg0, %arg1 : i32, i32
  }
  func.func @transform_4(%arg0: i32, %arg1: i32, %arg2: i32) -> (i32, i32) {
    %c0_i32 = arith.constant 0 : i32
    return %arg0, %arg1 : i32, i32
  }
}

module attributes {stable_mosaic.version = 11 : i64} {
  func.func @_fused_mm_kernel(%arg0: i32, %arg1: i32, %arg2: i32, %arg3: memref<16x512xbf16, #tpu.memory_space<vmem>>, %arg4: memref<512x256xbf16, #tpu.memory_space<vmem>>, %arg5: memref<1x256xf32, #tpu.memory_space<vmem>>, %arg6: memref<16x256xbf16, #tpu.memory_space<vmem>>, %arg7: memref<16x256xf32, #tpu.memory_space<vmem>>) attributes {dimension_semantics = [#tpu.dimension_semantics<parallel>, #tpu.dimension_semantics<parallel>, #tpu.dimension_semantics<arbitrary>], iteration_bounds = array<i64: 1, 2, 9>, scalar_prefetch = 0 : i64, scratch_operands = 1 : i64, tpu.core_type = #tpu.core_type<tc>, window_params = [{transform_indices = @transform_0, window_bounds = array<i64: 16, 512>}, {transform_indices = @transform_1, window_bounds = array<i64: 512, 256>}, {transform_indices = @transform_2, window_bounds = array<i64: 1, 256>}, {transform_indices = @transform_3, window_bounds = array<i64: 16, 256>}]} {
    %c0_i32 = arith.constant 0 : i32
    %0 = arith.cmpi eq, %arg2, %c0_i32 : i32
    %1 = arith.extui %0 : i1 to i32
    %c0_i32_0 = arith.constant 0 : i32
    %2 = arith.cmpi ne, %1, %c0_i32_0 : i32
    scf.if %2 {
      %cst_9 = arith.constant 0.000000e+00 : f32
      %12 = vector.broadcast %cst_9 : f32 to vector<16x256xf32>
      %c0_10 = arith.constant 0 : index
      %c0_11 = arith.constant 0 : index
      %13 = vector.load %arg7[%c0_10, %c0_11] : memref<16x256xf32, #tpu.memory_space<vmem>>, vector<16x256xf32>
      tpu.vector_store %arg7[%c0_10, %c0_11], %12 {strides = array<i32>} : memref<16x256xf32, #tpu.memory_space<vmem>>, vector<16x256xf32>,
    } else {
    }
    %c0 = arith.constant 0 : index
    %c0_1 = arith.constant 0 : index
    %3 = vector.load %arg7[%c0, %c0_1] : memref<16x256xf32, #tpu.memory_space<vmem>>, vector<16x256xf32>
    %c0_2 = arith.constant 0 : index
    %c0_3 = arith.constant 0 : index
    %4 = vector.load %arg3[%c0_2, %c0_3] : memref<16x512xbf16, #tpu.memory_space<vmem>>, vector<16x512xbf16>
    %c0_4 = arith.constant 0 : index
    %c0_5 = arith.constant 0 : index
    %5 = vector.load %arg4[%c0_4, %c0_5] : memref<512x256xbf16, #tpu.memory_space<vmem>>, vector<512x256xbf16>
    %cst = arith.constant dense<0.000000e+00> : vector<16x256xf32>
    %6 = tpu.matmul %4, %5, %cst {dimension_numbers = #tpu.dot_dimension_numbers<[1], [0], [0], [1], [0, 0, 1, 1], [], []>} : vector<16x512xbf16>, vector<512x256xbf16>, vector<16x256xf32> -> vector<16x256xf32>
    %7 = arith.addf %3, %6 : vector<16x256xf32>
    %c0_6 = arith.constant 0 : index
    %c0_7 = arith.constant 0 : index
    %8 = vector.load %arg7[%c0_6, %c0_7] : memref<16x256xf32, #tpu.memory_space<vmem>>, vector<16x256xf32>
    tpu.vector_store %arg7[%c0_6, %c0_7], %7 {strides = array<i32>} : memref<16x256xf32, #tpu.memory_space<vmem>>, vector<16x256xf32>,
    %c8_i32 = arith.constant 8 : i32
    %9 = arith.cmpi eq, %arg2, %c8_i32 : i32
    %10 = arith.extui %9 : i1 to i32
    %c0_i32_8 = arith.constant 0 : i32
    %11 = arith.cmpi ne, %10, %c0_i32_8 : i32
    scf.if %11 {
      %c0_9 = arith.constant 0 : index
      %c0_10 = arith.constant 0 : index
      %12 = vector.load %arg7[%c0_9, %c0_10] : memref<16x256xf32, #tpu.memory_space<vmem>>, vector<16x256xf32>
      %c0_11 = arith.constant 0 : index
      %c0_12 = arith.constant 0 : index
      %13 = vector.load %arg5[%c0_11, %c0_12] : memref<1x256xf32, #tpu.memory_space<vmem>>, vector<1x256xf32>
      %14 = vector.broadcast %13 : vector<1x256xf32> to vector<16x256xf32>
      %15 = arith.addf %12, %14 : vector<16x256xf32>
      %cst_13 = arith.constant 0.000000e+00 : f32
      %16 = vector.broadcast %cst_13 : f32 to vector<16x256xf32>
      %17 = arith.maximumf %15, %16 : vector<16x256xf32>
      %18 = arith.truncf %17 : vector<16x256xf32> to vector<16x256xbf16>
      %c0_14 = arith.constant 0 : index
      %c0_15 = arith.constant 0 : index
      %19 = vector.load %arg6[%c0_14, %c0_15] : memref<16x256xbf16, #tpu.memory_space<vmem>>, vector<16x256xbf16>
      tpu.vector_store %arg6[%c0_14, %c0_15], %18 {strides = array<i32>} : memref<16x256xbf16, #tpu.memory_space<vmem>>, vector<16x256xbf16>,
    } else {
    }
    return
  }
  func.func @transform_0(%arg0: i32, %arg1: i32, %arg2: i32) -> (i32, i32) {
    %c0_i32 = arith.constant 0 : i32
    return %arg0, %arg2 : i32, i32
  }
  func.func @transform_1(%arg0: i32, %arg1: i32, %arg2: i32) -> (i32, i32) {
    %c0_i32 = arith.constant 0 : i32
    return %arg2, %arg1 : i32, i32
  }
  func.func @transform_2(%arg0: i32, %arg1: i32, %arg2: i32) -> (i32, i32) {
    %c0_i32 = arith.constant 0 : i32
    %c0_i32_0 = arith.constant 0 : i32
    return %c0_i32, %arg1 : i32, i32
  }
  func.func @transform_3(%arg0: i32, %arg1: i32, %arg2: i32) -> (i32, i32) {
    %c0_i32 = arith.constant 0 : i32
    return %arg0, %arg1 : i32, i32
  }
}

module attributes {stable_mosaic.version = 11 : i64} {
  func.func @_fused_mm_kernel(%arg0: i32, %arg1: i32, %arg2: i32, %arg3: memref<16x512xbf16, #tpu.memory_space<vmem>>, %arg4: memref<512x128xbf16, #tpu.memory_space<vmem>>, %arg5: memref<1x128xf32, #tpu.memory_space<vmem>>, %arg6: memref<16x128xf32, #tpu.memory_space<vmem>>, %arg7: memref<16x128xf32, #tpu.memory_space<vmem>>) attributes {dimension_semantics = [#tpu.dimension_semantics<parallel>, #tpu.dimension_semantics<parallel>, #tpu.dimension_semantics<arbitrary>], iteration_bounds = array<i64: 1, 1, 1>, scalar_prefetch = 0 : i64, scratch_operands = 1 : i64, tpu.core_type = #tpu.core_type<tc>, window_params = [{transform_indices = @transform_0, window_bounds = array<i64: 16, 512>}, {transform_indices = @transform_1, window_bounds = array<i64: 512, 128>}, {transform_indices = @transform_2, window_bounds = array<i64: 1, 128>}, {transform_indices = @transform_3, window_bounds = array<i64: 16, 128>}]} {
    %c0_i32 = arith.constant 0 : i32
    %0 = arith.cmpi eq, %arg2, %c0_i32 : i32
    %1 = arith.extui %0 : i1 to i32
    %c0_i32_0 = arith.constant 0 : i32
    %2 = arith.cmpi ne, %1, %c0_i32_0 : i32
    scf.if %2 {
      %cst_10 = arith.constant 0.000000e+00 : f32
      %12 = vector.broadcast %cst_10 : f32 to vector<16x128xf32>
      %c0_11 = arith.constant 0 : index
      %c0_12 = arith.constant 0 : index
      %13 = vector.load %arg7[%c0_11, %c0_12] : memref<16x128xf32, #tpu.memory_space<vmem>>, vector<16x128xf32>
      tpu.vector_store %arg7[%c0_11, %c0_12], %12 {strides = array<i32>} : memref<16x128xf32, #tpu.memory_space<vmem>>, vector<16x128xf32>,
    } else {
    }
    %c0 = arith.constant 0 : index
    %c0_1 = arith.constant 0 : index
    %3 = vector.load %arg7[%c0, %c0_1] : memref<16x128xf32, #tpu.memory_space<vmem>>, vector<16x128xf32>
    %c0_2 = arith.constant 0 : index
    %c0_3 = arith.constant 0 : index
    %4 = vector.load %arg3[%c0_2, %c0_3] : memref<16x512xbf16, #tpu.memory_space<vmem>>, vector<16x512xbf16>
    %c0_4 = arith.constant 0 : index
    %c0_5 = arith.constant 0 : index
    %5 = vector.load %arg4[%c0_4, %c0_5] : memref<512x128xbf16, #tpu.memory_space<vmem>>, vector<512x128xbf16>
    %cst = arith.constant dense<0.000000e+00> : vector<16x128xf32>
    %6 = tpu.matmul %4, %5, %cst {dimension_numbers = #tpu.dot_dimension_numbers<[1], [0], [0], [1], [0, 0, 1, 1], [], []>} : vector<16x512xbf16>, vector<512x128xbf16>, vector<16x128xf32> -> vector<16x128xf32>
    %7 = arith.addf %3, %6 : vector<16x128xf32>
    %c0_6 = arith.constant 0 : index
    %c0_7 = arith.constant 0 : index
    %8 = vector.load %arg7[%c0_6, %c0_7] : memref<16x128xf32, #tpu.memory_space<vmem>>, vector<16x128xf32>
    tpu.vector_store %arg7[%c0_6, %c0_7], %7 {strides = array<i32>} : memref<16x128xf32, #tpu.memory_space<vmem>>, vector<16x128xf32>,
    %c0_i32_8 = arith.constant 0 : i32
    %9 = arith.cmpi eq, %arg2, %c0_i32_8 : i32
    %10 = arith.extui %9 : i1 to i32
    %c0_i32_9 = arith.constant 0 : i32
    %11 = arith.cmpi ne, %10, %c0_i32_9 : i32
    scf.if %11 {
      %c0_10 = arith.constant 0 : index
      %c0_11 = arith.constant 0 : index
      %12 = vector.load %arg7[%c0_10, %c0_11] : memref<16x128xf32, #tpu.memory_space<vmem>>, vector<16x128xf32>
      %c0_12 = arith.constant 0 : index
      %c0_13 = arith.constant 0 : index
      %13 = vector.load %arg5[%c0_12, %c0_13] : memref<1x128xf32, #tpu.memory_space<vmem>>, vector<1x128xf32>
      %14 = vector.broadcast %13 : vector<1x128xf32> to vector<16x128xf32>
      %15 = arith.addf %12, %14 : vector<16x128xf32>
      %16 = arith.negf %15 : vector<16x128xf32>
      %17 = math.exp %16 : vector<16x128xf32>
      %cst_14 = arith.constant 1.000000e+00 : f32
      %18 = vector.broadcast %cst_14 : f32 to vector<16x128xf32>
      %19 = arith.addf %18, %17 : vector<16x128xf32>
      %20 = arith.divf %18, %19 : vector<16x128xf32>
      %c0_15 = arith.constant 0 : index
      %c0_16 = arith.constant 0 : index
      %21 = vector.load %arg6[%c0_15, %c0_16] : memref<16x128xf32, #tpu.memory_space<vmem>>, vector<16x128xf32>
      tpu.vector_store %arg6[%c0_15, %c0_16], %20 {strides = array<i32>} : memref<16x128xf32, #tpu.memory_space<vmem>>, vector<16x128xf32>,
    } else {
    }
    return
  }
  func.func @transform_0(%arg0: i32, %arg1: i32, %arg2: i32) -> (i32, i32) {
    %c0_i32 = arith.constant 0 : i32
    return %arg0, %arg2 : i32, i32
  }
  func.func @transform_1(%arg0: i32, %arg1: i32, %arg2: i32) -> (i32, i32) {
    %c0_i32 = arith.constant 0 : i32
    return %arg2, %arg1 : i32, i32
  }
  func.func @transform_2(%arg0: i32, %arg1: i32, %arg2: i32) -> (i32, i32) {
    %c0_i32 = arith.constant 0 : i32
    %c0_i32_0 = arith.constant 0 : i32
    return %c0_i32, %arg1 : i32, i32
  }
  func.func @transform_3(%arg0: i32, %arg1: i32, %arg2: i32) -> (i32, i32) {
    %c0_i32 = arith.constant 0 : i32
    return %arg0, %arg1 : i32, i32
  }
}

</mosaic_0001>

<bundles_post_ra>
// kernel: _lambda_.21
= control target key start
LH: loop header
LB: loop body
LE: loop exit
PB: predicated region body
PF: predicated region fallthrough
CT: control target
= control target key end

     0   :  { %s1224_s12 = smov 0   ;;  %s1226_s13 = smov 0   ;;  %s1358_s0 = inlined_call_operand.vmem [shape: bf16[512,256], index: 0, kind: input, shape index: {}]   ;;  %s1359_s1 = inlined_call_operand.vmem [shape: bf16[256,128], index: 1, kind: input, shape index: {}]   ;;  %s1360_s2 = inlined_call_operand.vmem [shape: f32[1,128], index: 2, kind: input, shape index: {}]   ;;  %s1361_s3 = inlined_call_operand.vmem [shape: bf16[512,128], index: 3, kind: output, shape index: {}]  }
   0x1   :  { %s1228_s14 = smov 0  }
   0x2 LB: > { %s32_s15 = sadd.s32 1, %s1198_s13  ;;  %p915_p0 = scmp.ge.s32.totalorder %s1202_s14, 1  ;;  %s1202_s14 = sphi %s1228_s14, %s13_s14   ;;  %s1198_s13 = sphi %s1226_s13, %s1363_s13   ;;  %s1194_s12 = sphi %s1224_s12, %s1362_s12  }
   0x3   : > { %p34_p1 = scmp.ge.s32.totalorder %s32_s15, 4  ;;  %p191_p2 = scmp.lt.s32.totalorder %s1202_s14, 5 }
   0x5   : > { %s1365_s15 = smov (%p34_p1, %s32_s15), 0  ;;  %p192_p3 = pnand %p915_p0, %p191_p2 }
   0x6   : > { %v1140_v0 = vld [vmem:[%s1359_s1 + $0x40] sm:$0xff] (!%p192_p3)   ;;  %s916_s18 = sshll.u32 (!%p192_p3), %s1194_s12, 4  ;;  %v1142_v2 = vld [vmem:[%s1359_s1 + $0x48] sm:$0xff] (!%p192_p3)   ;;  %v1144_v4 = vld [vmem:[%s1359_s1 + $0x50] sm:$0xff] (!%p192_p3)  }
   0x7   : > { %195 = sbr.rel (%p192_p3) target bundleno = 288 (0x120), region = 32  ;;  %v1141_v1 = vld [vmem:[%s1359_s1] sm:$0xff] (!%p192_p3)   ;;  %1036 = vmatprep.subr.bf16.mxu0 (!%p192_p3), %v1140_v0  ;;  %1100 = vmatprep.subr.bf16.mxu1 (!%p192_p3), %v1140_v0  ;;  %v1143_v3 = vld [vmem:[%s1359_s1 + $0x8] sm:$0xff] (!%p192_p3)   ;;  %p236_p4 = scmp.lt.s32.totalorder (!%p192_p3), %s916_s18, 63  ;;  %v1145_v5 = vld [vmem:[%s1359_s1 + $0x10] sm:$0xff] (!%p192_p3)  }
   0x8   : > { %1037 = vmatpush3.bf16.msra.mxu0 (!%p192_p3), %v1141_v1  ;;  %1108 = vmatpush3.bf16.msra.mxu1 (!%p192_p3), %v1141_v1  ;;  %v1146_v6 = vld [vmem:[%s1359_s1 + $0x58] sm:$0xff] (!%p192_p3)   ;;  %v1148_v8 = vld [vmem:[%s1359_s1 + $0x60] sm:$0xff] (!%p192_p3)   ;;  %v1150_v10 = vld [vmem:[%s1359_s1 + $0x68] sm:$0xff] (!%p192_p3)  }
   0x9   : > { %1038 = vmatprep.subr.bf16.mxu0 (!%p192_p3), %v1142_v2  ;;  %1101 = vmatprep.subr.bf16.mxu1 (!%p192_p3), %v1142_v2  ;;  %v1147_v7 = vld [vmem:[%s1359_s1 + $0x18] sm:$0xff] (!%p192_p3)   ;;  %v1149_v9 = vld [vmem:[%s1359_s1 + $0x20] sm:$0xff] (!%p192_p3)   ;;  %v1151_v13 = vld [vmem:[%s1359_s1 + $0x28] sm:$0xff] (!%p192_p3)  }
   0xa   : > { %v1152_v14 = vld [vmem:[%s1359_s1 + $0x70] sm:$0xff] (!%p192_p3)   ;;  %v1154_v16 = vld [vmem:[%s1359_s1 + $0x78] sm:$0xff] (!%p192_p3)   ;;  %v1317_v35 = vld [vmem:[%s1360_s2] ss:$0 sm:$0xff] (!%p192_p3) }
   0xb   : > { %v1153_v15 = vld [vmem:[%s1359_s1 + $0x30] sm:$0xff] (!%p192_p3)   ;;  %v1155_v17 = vld [vmem:[%s1359_s1 + $0x38] sm:$0xff] (!%p192_p3)  }
   0xc   : > { %1039 = vmatpush3.bf16.msra.mxu0 (!%p192_p3), %v1143_v3  ;;  %1109 = vmatpush3.bf16.msra.mxu1 (!%p192_p3), %v1143_v3 }
   0xd   : > { %1040 = vmatprep.subr.bf16.mxu0 (!%p192_p3), %v1144_v4  ;;  %1102 = vmatprep.subr.bf16.mxu1 (!%p192_p3), %v1144_v4 }
   0xe   : > { %s1367_s18 = smov (!%p236_p4, %s916_s18), 63 }
   0xf   : > { %s972_s6 = sshll.u32 %s1367_s18, 3  ;;  %s920_s5 = sshll.u32 %s1367_s18, 2 }
  0x10   : > { %1041 = vmatpush3.bf16.msra.mxu0 %v1145_v5  ;;  %1110 = vmatpush3.bf16.msra.mxu1 %v1145_v5  ;;  %s1275_s11 = scalar_lea.vmem %s1358_s0, %s972_s6  ;;  %s1327_s8 = scalar_lea.vmem %s1361_s3, %s920_s5 }
  0x11   : > { %1042 = vmatprep.subr.bf16.mxu0 %v1146_v6  ;;  %1103 = vmatprep.subr.bf16.mxu1 %v1146_v6  ;;  %v1158_v11 = vld [vmem:[%s1275_s11 + $0x4] ss:$8 sps:$4 sm:$0xff]   ;;  %v1156_v18 = vld [vmem:[%s1275_s11] ss:$8 sps:$4 sm:$0xff]   ;;  %v1162_v20 = vld [vmem:[%s1275_s11 + $0x14] ss:$8 sps:$4 sm:$0xff]  }
  0x12   : > { %v1161_v12 = vld [vmem:[%s1275_s11 + $0x44] ss:$8 sps:$4 sm:$0xff]   ;;  %560 = vmatprep.mubr.bf16.mxu0 %v1158_v11  ;;  %v1159_v19 = vld [vmem:[%s1275_s11 + $0x40] ss:$8 sps:$4 sm:$0xff]   ;;  %v1164_v21 = vld [vmem:[%s1275_s11 + $0x54] ss:$8 sps:$4 sm:$0xff]  }
  0x13   : > { %592 = vmatprep.mubr.bf16.mxu1 %v1161_v12  ;;  %v1166_v22 = vld [vmem:[%s1275_s11 + $0x10] ss:$8 sps:$4 sm:$0xff]   ;;  %v1168_v24 = vld [vmem:[%s1275_s11 + $0x24] ss:$8 sps:$4 sm:$0xff]   ;;  %v1172_v26 = vld [vmem:[%s1275_s11 + $0x20] ss:$8 sps:$4 sm:$0xff]  }
  0x14   : > { %1043 = vmatpush3.bf16.msra.mxu0 %v1147_v7  ;;  %1111 = vmatpush3.bf16.msra.mxu1 %v1147_v7  ;;  %v1167_v23 = vld [vmem:[%s1275_s11 + $0x50] ss:$8 sps:$4 sm:$0xff]   ;;  %v1170_v25 = vld [vmem:[%s1275_s11 + $0x64] ss:$8 sps:$4 sm:$0xff]   ;;  %v1173_v27 = vld [vmem:[%s1275_s11 + $0x60] ss:$8 sps:$4 sm:$0xff]  }
  0x15   : > { %1044 = vmatprep.subr.bf16.mxu0 %v1148_v8  ;;  %1104 = vmatprep.subr.bf16.mxu1 %v1148_v8  ;;  %v1174_v28 = vld [vmem:[%s1275_s11 + $0x34] ss:$8 sps:$4 sm:$0xff]   ;;  %v1178_v30 = vld [vmem:[%s1275_s11 + $0x30] ss:$8 sps:$4 sm:$0xff]  }
  0x16   : > { %v1176_v29 = vld [vmem:[%s1275_s11 + $0x74] ss:$8 sps:$4 sm:$0xff]   ;;  %v1179_v31 = vld [vmem:[%s1275_s11 + $0x70] ss:$8 sps:$4 sm:$0xff]  }
  0x18   : > { %1045 = vmatpush3.bf16.msra.mxu0 %v1149_v9  ;;  %1112 = vmatpush3.bf16.msra.mxu1 %v1149_v9 }
  0x19   : > { %1046 = vmatprep.subr.bf16.mxu0 %v1150_v10  ;;  %1105 = vmatprep.subr.bf16.mxu1 %v1150_v10 }
  0x1c   : > { %1047 = vmatpush3.bf16.msra.mxu0 %v1151_v13  ;;  %1113 = vmatpush3.bf16.msra.mxu1 %v1151_v13 }
  0x1d   : > { %1048 = vmatprep.subr.bf16.mxu0 %v1152_v14  ;;  %1106 = vmatprep.subr.bf16.mxu1 %v1152_v14 }
  0x20   : > { %1049 = vmatpush3.bf16.msra.mxu0 %v1153_v15  ;;  %1114 = vmatpush3.bf16.msra.mxu1 %v1153_v15 }
  0x21   : > { %1050 = vmatprep.subr.bf16.mxu0 %v1154_v16  ;;  %1107 = vmatprep.subr.bf16.mxu1 %v1154_v16 }
  0x24   : > { %1051 = vmatpush3.bf16.msra.mxu0 %v1155_v17  ;;  %1115 = vmatpush3.bf16.msra.mxu1 %v1155_v17 }
  0x27   : > { %561 = vmatmul.mubr.bf16.vlgmr.msra.gmra.mrb[0].mxu0 %v1156_v18  ;;  %593 = vmatmul.mubr.bf16.vlgmr.msra.gmra.mrb[0].mxu1 %v1159_v19 }
  0x28   : > { %568 = vmatprep.mubr.bf16.mxu0 %v1162_v20  ;;  %600 = vmatprep.mubr.bf16.mxu1 %v1164_v21 }
  0x2f   : > { %569 = vmatmul.mubr.bf16.gmra.mrb[4].mxu0 %v1166_v22  ;;  %601 = vmatmul.mubr.bf16.gmra.mrb[4].mxu1 %v1167_v23 }
  0x30   : > { %576 = vmatprep.mubr.bf16.mxu0 %v1168_v24  ;;  %608 = vmatprep.mubr.bf16.mxu1 %v1170_v25 }
  0x37   : > { %577 = vmatmul.mubr.bf16.gmra.mrb[8].mxu0 %v1172_v26  ;;  %609 = vmatmul.mubr.bf16.gmra.mrb[8].mxu1 %v1173_v27 }
  0x38   : > { %584 = vmatprep.mubr.bf16.mxu0 %v1174_v28  ;;  %616 = vmatprep.mubr.bf16.mxu1 %v1176_v29 }
  0x3f   : > { %585 = vmatmul.mubr.bf16.gmra.mrb[12].mxu0 %v1178_v30  ;;  %617 = vmatmul.mubr.bf16.gmra.mrb[12].mxu1 %v1179_v31 }
  0xfa   : > { %v1052_v32 = vpop.f32.mrb[0].mxu0  ;;  %v1076_v33 = vpop.f32.mrb[0].mxu1 }
  0xfb   : > { %v1053_v34 = vpop.f32.mrb[1].mxu0  ;;  %v1077_v36 = vpop.f32.mrb[1].mxu1 }
  0xfc   : > { %v1054_v37 = vadd.f32 %v1053_v34, %v1052_v32  ;;  %v1078_v38 = vadd.f32 %v1077_v36, %v1076_v33  ;;  %v1055_v39 = vpop.f32.mrb[2].mxu0  ;;  %v1079_v40 = vpop.f32.mrb[2].mxu1 }
  0xfd   : > { %v1056_v41 = vpop.f32.mrb[3].mxu0  ;;  %v1080_v42 = vpop.f32.mrb[3].mxu1 }
  0xfe   : > { %v683_v43 = vadd.f32 %v1054_v37, %v1317_v35  ;;  %v691_v44 = vadd.f32 %v1078_v38, %v1317_v35  ;;  %v1057_v45 = vadd.f32 %v1056_v41, %v1055_v39  ;;  %v1081_v46 = vadd.f32 %v1080_v42, %v1079_v40 }
 0x100   : > { %v684_v47 = vadd.f32 %v1057_v45, %v1317_v35  ;;  %v692_v48 = vadd.f32 %v1081_v46, %v1317_v35  ;;  %v699_v49 = vmax.f32 %v683_v43, 0.0  ;;  %v707_v50 = vmax.f32 %v691_v44, 0.0 }
 0x102   : > { %v700_v51 = vmax.f32 %v684_v47, 0.0  ;;  %v708_v52 = vmax.f32 %v692_v48, 0.0  ;;  %v1058_v53 = vpop.f32.mrb[4].mxu0  ;;  %v1082_v54 = vpop.f32.mrb[4].mxu1 }
 0x103   : > { %v1059_v55 = vpop.f32.mrb[5].mxu0  ;;  %v1083_v56 = vpop.f32.mrb[5].mxu1 }
 0x104   : > { %v992_v57 = vpack.c.bf16 %v700_v51, %v699_v49  ;;  %v1012_v58 = vpack.c.bf16 %v708_v52, %v707_v50  ;;  %v1060_v59 = vadd.f32 %v1059_v55, %v1058_v53  ;;  %v1084_v60 = vadd.f32 %v1083_v56, %v1082_v54  ;;  %v1061_v61 = vpop.f32.mrb[6].mxu0  ;;  %v1085_v62 = vpop.f32.mrb[6].mxu1 }
 0x105   : > { %v1062_v63 = vpop.f32.mrb[7].mxu0  ;;  %v1086_v0 = vpop.f32.mrb[7].mxu1 }
 0x106   : > { %993 = vst [vmem:[%s1327_s8] sm:$0xff] %v992_v57   ;;  %1032 = vst [vmem:[%s1327_s8 + $0x20] sm:$0xff] %v1012_v58   ;;  %v685_v1 = vadd.f32 %v1060_v59, %v1317_v35  ;;  %v693_v2 = vadd.f32 %v1084_v60, %v1317_v35  ;;  %v1063_v3 = vadd.f32 %v1062_v63, %v1061_v61 }
 0x107   : > { %v1087_v4 = vadd.f32 %v1086_v0, %v1085_v62 }
 0x108   : > { %v686_v5 = vadd.f32 %v1063_v3, %v1317_v35  ;;  %v701_v7 = vmax.f32 %v685_v1, 0.0  ;;  %v709_v8 = vmax.f32 %v693_v2, 0.0 }
 0x109   : > { %v694_v6 = vadd.f32 %v1087_v4, %v1317_v35 }
 0x10a   : > { %v702_v9 = vmax.f32 %v686_v5, 0.0  ;;  %v1064_v11 = vpop.f32.mrb[8].mxu0  ;;  %v1088_v12 = vpop.f32.mrb[8].mxu1 }
 0x10b   : > { %v710_v10 = vmax.f32 %v694_v6, 0.0  ;;  %v1065_v13 = vpop.f32.mrb[9].mxu0  ;;  %v1089_v14 = vpop.f32.mrb[9].mxu1 }
 0x10c   : > { %v997_v15 = vpack.c.bf16 %v702_v9, %v701_v7  ;;  %v1066_v17 = vadd.f32 %v1065_v13, %v1064_v11  ;;  %v1090_v18 = vadd.f32 %v1089_v14, %v1088_v12  ;;  %v1067_v19 = vpop.f32.mrb[10].mxu0  ;;  %v1091_v20 = vpop.f32.mrb[10].mxu1 }
 0x10d   : > { %v1017_v16 = vpack.c.bf16 %v710_v10, %v709_v8  ;;  %v1068_v21 = vpop.f32.mrb[11].mxu0  ;;  %v1092_v22 = vpop.f32.mrb[11].mxu1 }
 0x10e   : > { %1029 = vst [vmem:[%s1327_s8 + $0x8] sm:$0xff] %v997_v15   ;;  %v687_v23 = vadd.f32 %v1066_v17, %v1317_v35  ;;  %v695_v24 = vadd.f32 %v1090_v18, %v1317_v35  ;;  %v1069_v25 = vadd.f32 %v1068_v21, %v1067_v19  ;;  %v1093_v26 = vadd.f32 %v1092_v22, %v1091_v20 }
 0x10f   : > { %1033 = vst [vmem:[%s1327_s8 + $0x28] sm:$0xff] %v1017_v16  }
 0x110   : > { %v688_v27 = vadd.f32 %v1069_v25, %v1317_v35  ;;  %v696_v28 = vadd.f32 %v1093_v26, %v1317_v35  ;;  %v703_v29 = vmax.f32 %v687_v23, 0.0  ;;  %v711_v30 = vmax.f32 %v695_v24, 0.0 }
 0x112   : > { %v704_v31 = vmax.f32 %v688_v27, 0.0  ;;  %v712_v32 = vmax.f32 %v696_v28, 0.0  ;;  %v1070_v33 = vpop.f32.mrb[12].mxu0  ;;  %v1094_v34 = vpop.f32.mrb[12].mxu1 }
 0x113   : > { %v1071_v36 = vpop.f32.mrb[13].mxu0  ;;  %v1095_v37 = vpop.f32.mrb[13].mxu1 }
 0x114   : > { %v1002_v38 = vpack.c.bf16 %v704_v31, %v703_v29  ;;  %v1022_v39 = vpack.c.bf16 %v712_v32, %v711_v30  ;;  %v1072_v40 = vadd.f32 %v1071_v36, %v1070_v33  ;;  %v1096_v41 = vadd.f32 %v1095_v37, %v1094_v34  ;;  %v1073_v42 = vpop.f32.mrb[14].mxu0  ;;  %v1097_v43 = vpop.f32.mrb[14].mxu1 }
 0x115   : > { %v1074_v44 = vpop.f32.mrb[15].mxu0  ;;  %v1098_v45 = vpop.f32.mrb[15].mxu1 }
 0x116   : > { %1030 = vst [vmem:[%s1327_s8 + $0x10] sm:$0xff] %v1002_v38   ;;  %1034 = vst [vmem:[%s1327_s8 + $0x30] sm:$0xff] %v1022_v39   ;;  %v689_v46 = vadd.f32 %v1072_v40, %v1317_v35  ;;  %v697_v47 = vadd.f32 %v1096_v41, %v1317_v35  ;;  %v1075_v48 = vadd.f32 %v1074_v44, %v1073_v42 }
 0x117   : > { %v1099_v49 = vadd.f32 %v1098_v45, %v1097_v43 }
 0x118   : > { %v690_v50 = vadd.f32 %v1075_v48, %v1317_v35  ;;  %v705_v52 = vmax.f32 %v689_v46, 0.0  ;;  %v713_v53 = vmax.f32 %v697_v47, 0.0 }
 0x119   : > { %v698_v51 = vadd.f32 %v1099_v49, %v1317_v35 }
 0x11a   : > { %v706_v54 = vmax.f32 %v690_v50, 0.0 }
 0x11b   : > { %v714_v55 = vmax.f32 %v698_v51, 0.0 }
 0x11c   : > { %v1007_v56 = vpack.c.bf16 %v706_v54, %v705_v52 }
 0x11d   : > { %v1027_v57 = vpack.c.bf16 %v714_v55, %v713_v53 }
 0x11e   : > { %1031 = vst [vmem:[%s1327_s8 + $0x18] sm:$0xff] %v1007_v56  }
 0x11f   : > { %1035 = vst [vmem:[%s1327_s8 + $0x38] sm:$0xff] %v1027_v57  }
 0x120 PF: > { %s13_s14 = sadd.s32 1, %s1202_s14   ;;  %s1362_s12 = smov %s1198_s13 }
 0x121   : > { %p10_p5 = scmp.ge.s32.totalorder %s13_s14, 6   ;;  %s1363_s13 = smov %s1365_s15 }
 0x123   :  { %12 = sbr.rel (!%p10_p5) target bundleno = 2 (0x2), region = 76 }

// kernel: _lambda_.22
= control target key start
LH: loop header
LB: loop body
LE: loop exit
PB: predicated region body
PF: predicated region fallthrough
CT: control target
= control target key end

     0   :  { %s1190_s12 = smov 0   ;;  %s1192_s13 = smov 0   ;;  %s1322_s0 = inlined_call_operand.vmem [shape: bf16[128,640], index: 0, kind: input, shape index: {}]   ;;  %s1323_s1 = inlined_call_operand.vmem [shape: bf16[640,128], index: 1, kind: input, shape index: {}]   ;;  %s1324_s2 = inlined_call_operand.vmem [shape: f32[1,128], index: 2, kind: input, shape index: {}]   ;;  %s1325_s3 = inlined_call_operand.vmem [shape: bf16[128,128], index: 3, kind: output, shape index: {}]  }
   0x1   :  { %s1194_s14 = smov 0   ;;  %s1196_s15 = smov 0  }
   0x2   :  { %s1198_s16 = smov 0  }
   0x3 LB: > { %s25_s17 = sadd.s32 1, %s1163_s15  ;;  %p48_p1 = scmp.ne.s32.totalorder %s1155_s13, %s1151_s12  ;;  %s1167_s16 = sphi %s1198_s16, %s13_s16   ;;  %s1163_s15 = sphi %s1196_s15, %s1329_s15   ;;  %s1159_s14 = sphi %s1194_s14, %s1328_s14   ;;  %s1155_s13 = sphi %s1192_s13, %s1327_s13   ;;  %s1151_s12 = sphi %s1190_s12, %s1326_s12  }
   0x4   : > { %p26_p0 = scmp.ge.s32.totalorder %s25_s17, 5  ;;  %p49_p2 = scmp.eq.s32.totalorder %s1167_s16, 0 }
   0x5   : > { %s41_s19 = sadd.s32 1, %s1155_s13  ;;  %p899_p5 = scmp.ge.s32.totalorder %s1167_s16, 5 }
   0x6   : > { %s1331_s17 = smov (%p26_p0, %s25_s17), 0  ;;  %p50_p3 = por %p49_p2, %p48_p1 }
   0x7   : > { %s37_s18 = ssub.s32 %s1163_s15, %s1331_s17  ;;  %162 = sbr.rel (%p899_p5) target bundleno = 28 (0x1c), region = 20 }
   0x8   : > { %p39_p4 = scmp.eq.s32.totalorder %s37_s18, 0 }
   0xa   : > { %s1225_s20 = scalar_select %p39_p4, %s1155_s13, %s41_s19  }
   0xe   : > { %165 = sbr.rel (!%p50_p3) target bundleno = 28 (0x1c), region = 24  ;;  %s167_s21 = sand.u32 (%p50_p3), 1, %s1155_s13  }
   0xf   : > { %s901_s22 = sshll.u32 (%p50_p3), %s1163_s15, 2  ;;  %s900_s23 = sshll.u32 (%p50_p3), %s167_s21, 6 }
  0x10   : > { %s1233_s26 = scalar_lea.vmem (%p50_p3), %s1322_s0, %s901_s22  ;;  %s169_s27 = scalar_lea.vmem (%p50_p3), [#allocation3], %s900_s23 }
  0x11   : > { %v190_v0 = vld [vmem:[%s1233_s26] sm:$0xf] (%p50_p3)  ;;  %v192_v1 = vld [vmem:[%s1233_s26 + $0x14] sm:$0xf] (%p50_p3)  ;;  %v194_v2 = vld [vmem:[%s1233_s26 + $0x28] sm:$0xf] (%p50_p3) }
  0x12   : > { %191 = vst [vmem:[%s169_s27] sm:$0xf] (%p50_p3), %v190_v0  ;;  %193 = vst [vmem:[%s169_s27 + $0x4] sm:$0xf] (%p50_p3), %v192_v1  ;;  %v196_v3 = vld [vmem:[%s1233_s26 + $0x3c] sm:$0xf] (%p50_p3) }
  0x13   : > { %v198_v4 = vld [vmem:[%s1233_s26 + $0x50] sm:$0xf] (%p50_p3)  ;;  %195 = vst [vmem:[%s169_s27 + $0x8] sm:$0xf] (%p50_p3), %v194_v2  ;;  %197 = vst [vmem:[%s169_s27 + $0xc] sm:$0xf] (%p50_p3), %v196_v3 }
  0x14   : > { %199 = vst [vmem:[%s169_s27 + $0x10] sm:$0xf] (%p50_p3), %v198_v4  ;;  %v200_v5 = vld [vmem:[%s1233_s26 + $0x64] sm:$0xf] (%p50_p3)  ;;  %v202_v6 = vld [vmem:[%s1233_s26 + $0x78] sm:$0xf] (%p50_p3) }
  0x15   : > { %v204_v7 = vld [vmem:[%s1233_s26 + $0x8c] sm:$0xf]  ;;  %201 = vst [vmem:[%s169_s27 + $0x14] sm:$0xf] %v200_v5  ;;  %203 = vst [vmem:[%s169_s27 + $0x18] sm:$0xf] %v202_v6 }
  0x16   : > { %205 = vst [vmem:[%s169_s27 + $0x1c] sm:$0xf] %v204_v7  ;;  %v206_v8 = vld [vmem:[%s1233_s26 + $0xa0] sm:$0xf]  ;;  %v208_v9 = vld [vmem:[%s1233_s26 + $0xb4] sm:$0xf] }
  0x17   : > { %v210_v10 = vld [vmem:[%s1233_s26 + $0xc8] sm:$0xf]  ;;  %207 = vst [vmem:[%s169_s27 + $0x20] sm:$0xf] %v206_v8  ;;  %209 = vst [vmem:[%s169_s27 + $0x24] sm:$0xf] %v208_v9 }
  0x18   : > { %211 = vst [vmem:[%s169_s27 + $0x28] sm:$0xf] %v210_v10  ;;  %v212_v11 = vld [vmem:[%s1233_s26 + $0xdc] sm:$0xf]  ;;  %v214_v12 = vld [vmem:[%s1233_s26 + $0xf0] sm:$0xf] }
  0x19   : > { %v216_v13 = vld [vmem:[%s1233_s26 + $0x104] sm:$0xf]  ;;  %213 = vst [vmem:[%s169_s27 + $0x2c] sm:$0xf] %v212_v11  ;;  %215 = vst [vmem:[%s169_s27 + $0x30] sm:$0xf] %v214_v12 }
  0x1a   : > { %217 = vst [vmem:[%s169_s27 + $0x34] sm:$0xf] %v216_v13  ;;  %v218_v14 = vld [vmem:[%s1233_s26 + $0x118] sm:$0xf]  ;;  %v220_v15 = vld [vmem:[%s1233_s26 + $0x12c] sm:$0xf] }
  0x1b   : > { %219 = vst [vmem:[%s169_s27 + $0x38] sm:$0xf] %v218_v14  ;;  %221 = vst [vmem:[%s169_s27 + $0x3c] sm:$0xf] %v220_v15 }
  0x1c PF: > { %p902_p6 = scmp.ge.s32.totalorder %s1167_s16, 1  ;;  %p287_p7 = scmp.lt.s32.totalorder %s1167_s16, 6 }
  0x1e   : > { %p288_p8 = pnand %p902_p6, %p287_p7 }
  0x1f   : > { %s294_s28 = sand.u32 (!%p288_p8), 1, %s1151_s12   ;;  %s904_s29 = sshll.u32 (!%p288_p8), %s1159_s14, 4 }
  0x20   : > { %291 = sbr.rel (%p288_p8) target bundleno = 323 (0x143), region = 69  ;;  %s903_s30 = sshll.u32 (!%p288_p8), %s294_s28, 6 }
  0x21   : > { %p333_p9 = scmp.lt.s32.totalorder (!%p288_p8), %s904_s29, 79  ;;  %s1260_s8 = scalar_lea.vmem (!%p288_p8), [#allocation3], %s903_s30 }
  0x22   : > { %p906_p10 = scmp.ne.s32.totalorder (!%p288_p8), %s1159_s14, 0 }
  0x27   : > { %s1333_s29 = smov (!%p333_p9, %s904_s29), 79  ;;  %357 = sbr.rel (%p906_p10) target bundleno = 49 (0x31), region = 77 }
  0x28   : > { %s905_s4 = sshll.u32 %s1333_s29, 2  ;;  %v1169_v16 = vmov (!%p906_p10), 0.0  }
  0x29   : > { %s1258_s7 = scalar_lea.vmem %s1323_s1, %s905_s4  ;;  %358 = vst [vmem:[#allocation2] sm:$0xff] (!%p906_p10), %v1169_v16  ;;  %359 = vst [vmem:[#allocation2 + $0x8] sm:$0xff] (!%p906_p10), %v1169_v16 }
  0x2a   : > { %360 = vst [vmem:[#allocation2 + $0x10] sm:$0xff] (!%p906_p10), %v1169_v16  ;;  %361 = vst [vmem:[#allocation2 + $0x18] sm:$0xff] (!%p906_p10), %v1169_v16 }
  0x2b   : > { %362 = vst [vmem:[#allocation2 + $0x20] sm:$0xff] (!%p906_p10), %v1169_v16  ;;  %363 = vst [vmem:[#allocation2 + $0x28] sm:$0xff] (!%p906_p10), %v1169_v16 }
  0x2c   : > { %364 = vst [vmem:[#allocation2 + $0x30] sm:$0xff] (!%p906_p10), %v1169_v16  ;;  %365 = vst [vmem:[#allocation2 + $0x38] sm:$0xff] (!%p906_p10), %v1169_v16 }
  0x2d   : > { %366 = vst [vmem:[#allocation2 + $0x40] sm:$0xff] (!%p906_p10), %v1169_v16  ;;  %367 = vst [vmem:[#allocation2 + $0x48] sm:$0xff] (!%p906_p10), %v1169_v16 }
  0x2e   : > { %368 = vst [vmem:[#allocation2 + $0x50] sm:$0xff] %v1169_v16  ;;  %369 = vst [vmem:[#allocation2 + $0x58] sm:$0xff] %v1169_v16 }
  0x2f   : > { %370 = vst [vmem:[#allocation2 + $0x60] sm:$0xff] %v1169_v16  ;;  %371 = vst [vmem:[#allocation2 + $0x68] sm:$0xff] %v1169_v16 }
  0x30   : > { %372 = vst [vmem:[#allocation2 + $0x70] sm:$0xff] %v1169_v16  ;;  %373 = vst [vmem:[#allocation2 + $0x78] sm:$0xff] %v1169_v16 }
  0x31 PF: > { %v1113_v17 = vld [vmem:[%s1258_s7] sm:$0xff]   ;;  %v1114_v18 = vld [vmem:[%s1258_s7 + $0x8] sm:$0xff]   ;;  %v1115_v19 = vld [vmem:[%s1258_s7 + $0x10] sm:$0xff]   ;;  %p923_p11 = scmp.ne.s32.totalorder %s1159_s14, 4 }
  0x32   : > { %1024 = vmatprep.subr.bf16.mxu0 %v1113_v17  ;;  %1056 = vmatprep.subr.bf16.mxu1 %v1113_v17  ;;  %v1116_v20 = vld [vmem:[%s1258_s7 + $0x18] sm:$0xff]   ;;  %v1121_v21 = vld [vmem:[%s1260_s8] sm:$0xff]   ;;  %v1118_v24 = vld [vmem:[%s1258_s7 + $0x28] sm:$0xff]  }
  0x33   : > { %1025 = vmatpush3.bf16.msra.mxu0 %v1113_v17  ;;  %1064 = vmatpush3.bf16.msra.mxu1 %v1113_v17  ;;  %v1122_v22 = vld [vmem:[%s1260_s8 + $0x20] sm:$0xff]   ;;  %v1119_v25 = vld [vmem:[%s1258_s7 + $0x30] sm:$0xff]   ;;  %v1120_v26 = vld [vmem:[%s1258_s7 + $0x38] sm:$0xff]  }
  0x34   : > { %1026 = vmatprep.subr.bf16.mxu0 %v1114_v18  ;;  %1057 = vmatprep.subr.bf16.mxu1 %v1114_v18  ;;  %v1117_v23 = vld [vmem:[%s1258_s7 + $0x20] sm:$0xff]   ;;  %v1123_v27 = vld [vmem:[%s1260_s8 + $0x8] sm:$0xff]   ;;  %v1125_v29 = vld [vmem:[%s1260_s8 + $0x10] sm:$0xff]  }
  0x35   : > { %1040 = vmatprep.mubr.bf16.mxu0 %v1121_v21  ;;  %1048 = vmatprep.mubr.bf16.mxu1 %v1122_v22  ;;  %v1124_v28 = vld [vmem:[%s1260_s8 + $0x28] sm:$0xff]   ;;  %v1126_v30 = vld [vmem:[%s1260_s8 + $0x30] sm:$0xff]   ;;  %v1127_v31 = vld [vmem:[%s1260_s8 + $0x18] sm:$0xff]  }
  0x36   : > { %v1128_v32 = vld [vmem:[%s1260_s8 + $0x38] sm:$0xff]   ;;  %v376_v33 = vld [vmem:[#allocation2 + $0x10] sm:$0xff]  ;;  %v374_v35 = vld [vmem:[#allocation2] sm:$0xff] }
  0x37   : > { %1027 = vmatpush3.bf16.msra.mxu0 %v1114_v18  ;;  %1065 = vmatpush3.bf16.msra.mxu1 %v1114_v18  ;;  %v384_v34 = vld [vmem:[#allocation2 + $0x50] sm:$0xff]  ;;  %v382_v36 = vld [vmem:[#allocation2 + $0x40] sm:$0xff]  ;;  %v377_v39 = vld [vmem:[#allocation2 + $0x18] sm:$0xff] }
  0x38   : > { %1028 = vmatprep.subr.bf16.mxu0 %v1115_v19  ;;  %1058 = vmatprep.subr.bf16.mxu1 %v1115_v19  ;;  %v385_v40 = vld [vmem:[#allocation2 + $0x58] sm:$0xff]  ;;  %v375_v45 = vld [vmem:[#allocation2 + $0x8] sm:$0xff]  ;;  %v380_v57 = vld [vmem:[#allocation2 + $0x30] sm:$0xff] }
  0x39   : > { %v383_v46 = vld [vmem:[#allocation2 + $0x48] sm:$0xff]  ;;  %v388_v58 = vld [vmem:[#allocation2 + $0x70] sm:$0xff]  ;;  %v378_v59 = vld [vmem:[#allocation2 + $0x20] sm:$0xff] }
  0x3a   : > { %v386_v60 = vld [vmem:[#allocation2 + $0x60] sm:$0xff]  ;;  %v381_v63 = vld [vmem:[#allocation2 + $0x38] sm:$0xff]  ;;  %v379_v5 = vld [vmem:[#allocation2 + $0x28] sm:$0xff] }
  0x3b   : > { %1029 = vmatpush3.bf16.msra.mxu0 %v1115_v19  ;;  %1066 = vmatpush3.bf16.msra.mxu1 %v1115_v19  ;;  %v389_v0 = vld [vmem:[#allocation2 + $0x78] sm:$0xff]  ;;  %v387_v6 = vld [vmem:[#allocation2 + $0x68] sm:$0xff]  ;;  %v924_v19 = vld [vmem:[%s1324_s2] ss:$0 sm:$0xff] (!%p923_p11) }
  0x3c   : > { %1030 = vmatprep.subr.bf16.mxu0 %v1116_v20  ;;  %1059 = vmatprep.subr.bf16.mxu1 %v1116_v20 }
  0x3f   : > { %1031 = vmatpush3.bf16.msra.mxu0 %v1116_v20  ;;  %1067 = vmatpush3.bf16.msra.mxu1 %v1116_v20 }
  0x40   : > { %1032 = vmatprep.subr.bf16.mxu0 %v1117_v23  ;;  %1060 = vmatprep.subr.bf16.mxu1 %v1117_v23 }
  0x43   : > { %1033 = vmatpush3.bf16.msra.mxu0 %v1117_v23  ;;  %1068 = vmatpush3.bf16.msra.mxu1 %v1117_v23 }
  0x44   : > { %1034 = vmatprep.subr.bf16.mxu0 %v1118_v24  ;;  %1061 = vmatprep.subr.bf16.mxu1 %v1118_v24 }
  0x47   : > { %1035 = vmatpush3.bf16.msra.mxu0 %v1118_v24  ;;  %1069 = vmatpush3.bf16.msra.mxu1 %v1118_v24 }
  0x48   : > { %1036 = vmatprep.subr.bf16.mxu0 %v1119_v25  ;;  %1062 = vmatprep.subr.bf16.mxu1 %v1119_v25 }
  0x4b   : > { %1037 = vmatpush3.bf16.msra.mxu0 %v1119_v25  ;;  %1070 = vmatpush3.bf16.msra.mxu1 %v1119_v25 }
  0x4c   : > { %1038 = vmatprep.subr.bf16.mxu0 %v1120_v26  ;;  %1063 = vmatprep.subr.bf16.mxu1 %v1120_v26 }
  0x4f   : > { %1039 = vmatpush3.bf16.msra.mxu0 %v1120_v26  ;;  %1071 = vmatpush3.bf16.msra.mxu1 %v1120_v26 }
  0x52   : > { %1041 = vmatmul.mubr.bf16.vlgmr.msra.gmra.mrb[0].mxu0 %v1123_v27  ;;  %1049 = vmatmul.mubr.bf16.vlgmr.msra.gmra.mrb[0].mxu1 %v1124_v28 }
  0x53   : > { %1044 = vmatprep.mubr.bf16.mxu0 %v1125_v29  ;;  %1052 = vmatprep.mubr.bf16.mxu1 %v1126_v30 }
  0x5a   : > { %1045 = vmatmul.mubr.bf16.gmra.mrb[4].mxu0 %v1127_v31  ;;  %1053 = vmatmul.mubr.bf16.gmra.mrb[4].mxu1 %v1128_v32 }
 0x125   : > { %v1042_v37 = vpop.f32.mrb[0].mxu0  ;;  %v1050_v38 = vpop.f32.mrb[0].mxu1 }
 0x126   : > { %v617_v41 = vadd.f32 %v1042_v37, %v376_v33  ;;  %v625_v42 = vadd.f32 %v1050_v38, %v384_v34  ;;  %v552_v43 = vpop.f32.mrb[1].mxu0  ;;  %v584_v44 = vpop.f32.mrb[1].mxu1 }
 0x127   : > { %v615_v47 = vadd.f32 %v552_v43, %v374_v35  ;;  %v623_v48 = vadd.f32 %v584_v44, %v382_v36  ;;  %v1043_v49 = vpop.f32.mrb[2].mxu0  ;;  %v1051_v50 = vpop.f32.mrb[2].mxu1 }
 0x128   : > { %633 = vst [vmem:[#allocation2 + $0x10] sm:$0xff] %v617_v41  ;;  %641 = vst [vmem:[#allocation2 + $0x50] sm:$0xff] %v625_v42  ;;  %v618_v51 = vadd.f32 %v1043_v49, %v377_v39  ;;  %v626_v52 = vadd.f32 %v1051_v50, %v385_v40  ;;  %v555_v53 = vpop.f32.mrb[3].mxu0  ;;  %v587_v54 = vpop.f32.mrb[3].mxu1 }
 0x129   : > { %631 = vst [vmem:[#allocation2] sm:$0xff] %v615_v47  ;;  %639 = vst [vmem:[#allocation2 + $0x40] sm:$0xff] %v623_v48  ;;  %v616_v55 = vadd.f32 %v555_v53, %v375_v45  ;;  %v624_v56 = vadd.f32 %v587_v54, %v383_v46 }
 0x12a   : > { %634 = vst [vmem:[#allocation2 + $0x18] sm:$0xff] %v618_v51  ;;  %642 = vst [vmem:[#allocation2 + $0x58] sm:$0xff] %v626_v52 }
 0x12b   : > { %632 = vst [vmem:[#allocation2 + $0x8] sm:$0xff] %v616_v55  ;;  %640 = vst [vmem:[#allocation2 + $0x48] sm:$0xff] %v624_v56 }
 0x12d   : > { %v1046_v61 = vpop.f32.mrb[4].mxu0  ;;  %v1054_v62 = vpop.f32.mrb[4].mxu1  ;;  %650 = sbr.rel (%p923_p11) target bundleno = 323 (0x143), region = 81 }
 0x12e   : > { %v621_v1 = vadd.f32 %v1046_v61, %v380_v57  ;;  %v629_v2 = vadd.f32 %v1054_v62, %v388_v58  ;;  %v568_v3 = vpop.f32.mrb[5].mxu0  ;;  %v600_v4 = vpop.f32.mrb[5].mxu1 }
 0x12f   : > { %v619_v7 = vadd.f32 %v568_v3, %v378_v59  ;;  %v627_v8 = vadd.f32 %v600_v4, %v386_v60  ;;  %v1047_v9 = vpop.f32.mrb[6].mxu0  ;;  %v1055_v10 = vpop.f32.mrb[6].mxu1  ;;  %v653_v22 = vld [vmem:[#allocation2 + $0x10] sm:$0xff] (!%p923_p11) }
 0x130   : > { %637 = vst [vmem:[#allocation2 + $0x30] sm:$0xff] %v621_v1  ;;  %645 = vst [vmem:[#allocation2 + $0x70] sm:$0xff] %v629_v2  ;;  %v622_v11 = vadd.f32 %v1047_v9, %v381_v63  ;;  %v630_v12 = vadd.f32 %v1055_v10, %v389_v0  ;;  %v571_v13 = vpop.f32.mrb[7].mxu0  ;;  %v603_v14 = vpop.f32.mrb[7].mxu1  ;;  %v651_v17 = vld [vmem:[#allocation2] sm:$0xff] (!%p923_p11)  ;;  %v676_v25 = vadd.f32 (!%p923_p11), %v924_v19, %v653_v22  ;;  %v661_v37 = vld [vmem:[#allocation2 + $0x50] sm:$0xff] (!%p923_p11) }
 0x131   : > { %635 = vst [vmem:[#allocation2 + $0x20] sm:$0xff] %v619_v7  ;;  %643 = vst [vmem:[#allocation2 + $0x60] sm:$0xff] %v627_v8  ;;  %v620_v15 = vadd.f32 %v571_v13, %v379_v5  ;;  %v628_v16 = vadd.f32 %v603_v14, %v387_v6  ;;  %v674_v20 = vadd.f32 (!%p923_p11), %v924_v19, %v651_v17  ;;  %v654_v23 = vld [vmem:[#allocation2 + $0x18] sm:$0xff] (!%p923_p11)  ;;  %v659_v35 = vld [vmem:[#allocation2 + $0x40] sm:$0xff] (!%p923_p11) }
 0x132   : > { %638 = vst [vmem:[#allocation2 + $0x38] sm:$0xff] %v622_v11  ;;  %646 = vst [vmem:[#allocation2 + $0x78] sm:$0xff] %v630_v12  ;;  %v652_v18 = vld [vmem:[#allocation2 + $0x8] sm:$0xff] (!%p923_p11)  ;;  %v677_v26 = vadd.f32 (!%p923_p11), %v924_v19, %v654_v23  ;;  %v692_v38 = vmax.f32 (!%p923_p11), %v676_v25, 0.0  ;;  %v662_v42 = vld [vmem:[#allocation2 + $0x58] sm:$0xff] (!%p923_p11)  ;;  %v682_v47 = vadd.f32 (!%p923_p11), %v924_v19, %v659_v35  ;;  %v684_v52 = vadd.f32 (!%p923_p11), %v924_v19, %v661_v37 }
 0x133   : > { %636 = vst [vmem:[#allocation2 + $0x28] sm:$0xff] %v620_v15  ;;  %644 = vst [vmem:[#allocation2 + $0x68] sm:$0xff] %v628_v16  ;;  %v675_v21 = vadd.f32 (!%p923_p11), %v924_v19, %v652_v18  ;;  %v690_v31 = vmax.f32 (!%p923_p11), %v674_v20, 0.0  ;;  %v660_v36 = vld [vmem:[#allocation2 + $0x48] sm:$0xff] (!%p923_p11)  ;;  %v685_v57 = vadd.f32 (!%p923_p11), %v924_v19, %v662_v42 }
 0x134   : > { %v693_v39 = vmax.f32 %v677_v26, 0.0  ;;  %v683_v51 = vadd.f32 %v924_v19, %v660_v36  ;;  %v698_v56 = vmax.f32 %v682_v47, 0.0  ;;  %v700_v61 = vmax.f32 %v684_v52, 0.0 }
 0x135   : > { %v691_v32 = vmax.f32 %v675_v21, 0.0  ;;  %v701_v63 = vmax.f32 %v685_v57, 0.0 }
 0x136   : > { %v969_v49 = vpack.c.bf16 %v693_v39, %v692_v38  ;;  %v699_v60 = vmax.f32 %v683_v51, 0.0 }
 0x137   : > { %v657_v29 = vld [vmem:[#allocation2 + $0x30] sm:$0xff]  ;;  %v964_v44 = vpack.c.bf16 %v691_v32, %v690_v31  ;;  %v989_v5 = vpack.c.bf16 %v701_v63, %v700_v61 }
 0x138   : > { %v655_v24 = vld [vmem:[#allocation2 + $0x20] sm:$0xff]  ;;  %v680_v34 = vadd.f32 %v924_v19, %v657_v29  ;;  %v665_v53 = vld [vmem:[#allocation2 + $0x70] sm:$0xff]  ;;  %1001 = vst [vmem:[%s1325_s3 + $0x8] sm:$0xff] %v969_v49   ;;  %v984_v3 = vpack.c.bf16 %v699_v60, %v698_v56 }
 0x139   : > { %v678_v28 = vadd.f32 %v924_v19, %v655_v24  ;;  %v658_v30 = vld [vmem:[#allocation2 + $0x38] sm:$0xff]  ;;  %v663_v43 = vld [vmem:[#allocation2 + $0x60] sm:$0xff]  ;;  %965 = vst [vmem:[%s1325_s3] sm:$0xff] %v964_v44   ;;  %v688_v1 = vadd.f32 %v924_v19, %v665_v53  ;;  %1005 = vst [vmem:[%s1325_s3 + $0x28] sm:$0xff] %v989_v5  }
 0x13a   : > { %v656_v27 = vld [vmem:[#allocation2 + $0x28] sm:$0xff]  ;;  %v681_v41 = vadd.f32 %v924_v19, %v658_v30  ;;  %v696_v46 = vmax.f32 %v680_v34, 0.0  ;;  %v666_v54 = vld [vmem:[#allocation2 + $0x78] sm:$0xff]  ;;  %v686_v58 = vadd.f32 %v924_v19, %v663_v43  ;;  %1004 = vst [vmem:[%s1325_s3 + $0x20] sm:$0xff] %v984_v3  }
 0x13b   : > { %v679_v33 = vadd.f32 %v924_v19, %v656_v27  ;;  %v694_v40 = vmax.f32 %v678_v28, 0.0  ;;  %v664_v48 = vld [vmem:[#allocation2 + $0x68] sm:$0xff]  ;;  %v689_v2 = vadd.f32 %v924_v19, %v666_v54  ;;  %v704_v6 = vmax.f32 %v688_v1, 0.0 }
 0x13c   : > { %v697_v50 = vmax.f32 %v681_v41, 0.0  ;;  %v687_v62 = vadd.f32 %v924_v19, %v664_v48  ;;  %v702_v0 = vmax.f32 %v686_v58, 0.0 }
 0x13d   : > { %v695_v45 = vmax.f32 %v679_v33, 0.0  ;;  %v705_v7 = vmax.f32 %v689_v2, 0.0 }
 0x13e   : > { %v979_v59 = vpack.c.bf16 %v697_v50, %v696_v46  ;;  %v703_v4 = vmax.f32 %v687_v62, 0.0 }
 0x13f   : > { %v974_v55 = vpack.c.bf16 %v695_v45, %v694_v40  ;;  %v999_v9 = vpack.c.bf16 %v705_v7, %v704_v6 }
 0x140   : > { %1003 = vst [vmem:[%s1325_s3 + $0x18] sm:$0xff] %v979_v59   ;;  %v994_v8 = vpack.c.bf16 %v703_v4, %v702_v0 }
 0x141   : > { %1002 = vst [vmem:[%s1325_s3 + $0x10] sm:$0xff] %v974_v55   ;;  %1007 = vst [vmem:[%s1325_s3 + $0x38] sm:$0xff] %v999_v9  }
 0x142   : > { %1006 = vst [vmem:[%s1325_s3 + $0x30] sm:$0xff] %v994_v8  }
 0x143 PF: > { %s13_s16 = sadd.s32 1, %s1167_s16   ;;  %s1326_s12 = smov %s1155_s13 }
 0x144   : > { %p10_p12 = scmp.ge.s32.totalorder %s13_s16, 7   ;;  %s1327_s13 = smov %s1225_s20 }
 0x145   : > { %s1328_s14 = smov %s1163_s15  ;;  %s1329_s15 = smov %s1331_s17 }
 0x146   :  { %12 = sbr.rel (!%p10_p12) target bundleno = 3 (0x3), region = 122 }

// kernel: _lambda_.23
= control target key start
LH: loop header
LB: loop body
LE: loop exit
PB: predicated region body
PF: predicated region fallthrough
CT: control target
= control target key end

     0   :  { %s1361_s15 = smov 0   ;;  %s1363_s16 = smov 0   ;;  %s1535_s0 = inlined_call_operand.vmem [shape: bf16[128,640], index: 0, kind: input, shape index: {}]   ;;  %s1536_s1 = inlined_call_operand.vmem [shape: bf16[640,128], index: 1, kind: input, shape index: {}]   ;;  %s1537_s2 = inlined_call_operand.vmem [shape: f32[1,128], index: 2, kind: input, shape index: {}]   ;;  %s1538_s3 = inlined_call_operand.vmem [shape: bf16[128,128], index: 3, kind: input, shape index: {}]   ;;  %s1539_s4 = inlined_call_operand.vmem [shape: bf16[128,128], index: 4, kind: output, shape index: {}]  }
   0x1   :  { %s1365_s17 = smov 0   ;;  %s1367_s18 = smov 0  }
   0x2   :  { %s1369_s19 = smov 0  }
   0x3 LB: > { %s26_s20 = sadd.s32 1, %s1329_s18  ;;  %p49_p1 = scmp.ne.s32.totalorder %s1321_s16, %s1317_s15  ;;  %s1333_s19 = sphi %s1369_s19, %s14_s19   ;;  %s1329_s18 = sphi %s1367_s18, %s1543_s18   ;;  %s1325_s17 = sphi %s1365_s17, %s1542_s17   ;;  %s1321_s16 = sphi %s1363_s16, %s1541_s16   ;;  %s1317_s15 = sphi %s1361_s15, %s1540_s15  }
   0x4   : > { %p27_p0 = scmp.ge.s32.totalorder %s26_s20, 5  ;;  %p50_p2 = scmp.eq.s32.totalorder %s1333_s19, 0 }
   0x5   : > { %s42_s22 = sadd.s32 1, %s1321_s16  ;;  %p1026_p5 = scmp.ge.s32.totalorder %s1333_s19, 5 }
   0x6   : > { %s1545_s20 = smov (%p27_p0, %s26_s20), 0  ;;  %p51_p3 = por %p50_p2, %p49_p1 }
   0x7   : > { %s38_s21 = ssub.s32 %s1329_s18, %s1545_s20  ;;  %203 = sbr.rel (%p1026_p5) target bundleno = 28 (0x1c), region = 24 }
   0x8   : > { %p40_p4 = scmp.eq.s32.totalorder %s38_s21, 0 }
   0xa   : > { %s1396_s23 = scalar_select %p40_p4, %s1321_s16, %s42_s22  }
   0xe   : > { %206 = sbr.rel (!%p51_p3) target bundleno = 28 (0x1c), region = 28  ;;  %s208_s24 = sand.u32 (%p51_p3), 1, %s1321_s16  }
   0xf   : > { %s1028_s25 = sshll.u32 (%p51_p3), %s1329_s18, 2  ;;  %s1027_s26 = sshll.u32 (%p51_p3), %s208_s24, 6 }
  0x10   : > { %s1404_s29 = scalar_lea.vmem (%p51_p3), %s1535_s0, %s1028_s25  ;;  %s210_s30 = scalar_lea.vmem (%p51_p3), [#allocation3], %s1027_s26 }
  0x11   : > { %v231_v0 = vld [vmem:[%s1404_s29] sm:$0xf] (%p51_p3)  ;;  %v233_v1 = vld [vmem:[%s1404_s29 + $0x14] sm:$0xf] (%p51_p3)  ;;  %v235_v2 = vld [vmem:[%s1404_s29 + $0x28] sm:$0xf] (%p51_p3) }
  0x12   : > { %232 = vst [vmem:[%s210_s30] sm:$0xf] (%p51_p3), %v231_v0  ;;  %234 = vst [vmem:[%s210_s30 + $0x4] sm:$0xf] (%p51_p3), %v233_v1  ;;  %v237_v3 = vld [vmem:[%s1404_s29 + $0x3c] sm:$0xf] (%p51_p3) }
  0x13   : > { %v239_v4 = vld [vmem:[%s1404_s29 + $0x50] sm:$0xf] (%p51_p3)  ;;  %236 = vst [vmem:[%s210_s30 + $0x8] sm:$0xf] (%p51_p3), %v235_v2  ;;  %238 = vst [vmem:[%s210_s30 + $0xc] sm:$0xf] (%p51_p3), %v237_v3 }
  0x14   : > { %240 = vst [vmem:[%s210_s30 + $0x10] sm:$0xf] (%p51_p3), %v239_v4  ;;  %v241_v5 = vld [vmem:[%s1404_s29 + $0x64] sm:$0xf] (%p51_p3)  ;;  %v243_v6 = vld [vmem:[%s1404_s29 + $0x78] sm:$0xf] (%p51_p3) }
  0x15   : > { %v245_v7 = vld [vmem:[%s1404_s29 + $0x8c] sm:$0xf]  ;;  %242 = vst [vmem:[%s210_s30 + $0x14] sm:$0xf] %v241_v5  ;;  %244 = vst [vmem:[%s210_s30 + $0x18] sm:$0xf] %v243_v6 }
  0x16   : > { %246 = vst [vmem:[%s210_s30 + $0x1c] sm:$0xf] %v245_v7  ;;  %v247_v8 = vld [vmem:[%s1404_s29 + $0xa0] sm:$0xf]  ;;  %v249_v9 = vld [vmem:[%s1404_s29 + $0xb4] sm:$0xf] }
  0x17   : > { %v251_v10 = vld [vmem:[%s1404_s29 + $0xc8] sm:$0xf]  ;;  %248 = vst [vmem:[%s210_s30 + $0x20] sm:$0xf] %v247_v8  ;;  %250 = vst [vmem:[%s210_s30 + $0x24] sm:$0xf] %v249_v9 }
  0x18   : > { %252 = vst [vmem:[%s210_s30 + $0x28] sm:$0xf] %v251_v10  ;;  %v253_v11 = vld [vmem:[%s1404_s29 + $0xdc] sm:$0xf]  ;;  %v255_v12 = vld [vmem:[%s1404_s29 + $0xf0] sm:$0xf] }
  0x19   : > { %v257_v13 = vld [vmem:[%s1404_s29 + $0x104] sm:$0xf]  ;;  %254 = vst [vmem:[%s210_s30 + $0x2c] sm:$0xf] %v253_v11  ;;  %256 = vst [vmem:[%s210_s30 + $0x30] sm:$0xf] %v255_v12 }
  0x1a   : > { %258 = vst [vmem:[%s210_s30 + $0x34] sm:$0xf] %v257_v13  ;;  %v259_v14 = vld [vmem:[%s1404_s29 + $0x118] sm:$0xf]  ;;  %v261_v15 = vld [vmem:[%s1404_s29 + $0x12c] sm:$0xf] }
  0x1b   : > { %260 = vst [vmem:[%s210_s30 + $0x38] sm:$0xf] %v259_v14  ;;  %262 = vst [vmem:[%s210_s30 + $0x3c] sm:$0xf] %v261_v15 }
  0x1c PF: > { %p1029_p6 = scmp.ge.s32.totalorder %s1333_s19, 1  ;;  %p328_p7 = scmp.lt.s32.totalorder %s1333_s19, 6 }
  0x1e   : > { %p329_p8 = pnand %p1029_p6, %p328_p7 }
  0x1f   : > { %s335_s5 = sand.u32 (!%p329_p8), 1, %s1317_s15   ;;  %s1031_s6 = sshll.u32 (!%p329_p8), %s1325_s17, 4 }
  0x20   : > { %332 = sbr.rel (%p329_p8) target bundleno = 328 (0x148), region = 73  ;;  %s1030_s7 = sshll.u32 (!%p329_p8), %s335_s5, 6 }
  0x21   : > { %p384_p9 = scmp.lt.s32.totalorder (!%p329_p8), %s1031_s6, 79  ;;  %s1431_s12 = scalar_lea.vmem (!%p329_p8), [#allocation3], %s1030_s7 }
  0x22   : > { %p1033_p10 = scmp.ne.s32.totalorder (!%p329_p8), %s1325_s17, 0 }
  0x27   : > { %s1547_s6 = smov (!%p384_p9, %s1031_s6), 79  ;;  %417 = sbr.rel (%p1033_p10) target bundleno = 49 (0x31), region = 81 }
  0x28   : > { %s1032_s8 = sshll.u32 %s1547_s6, 2  ;;  %v1335_v16 = vmov (!%p1033_p10), 0.0  }
  0x29   : > { %s1429_s11 = scalar_lea.vmem %s1536_s1, %s1032_s8  ;;  %418 = vst [vmem:[#allocation2] sm:$0xff] (!%p1033_p10), %v1335_v16  ;;  %419 = vst [vmem:[#allocation2 + $0x8] sm:$0xff] (!%p1033_p10), %v1335_v16 }
  0x2a   : > { %420 = vst [vmem:[#allocation2 + $0x10] sm:$0xff] (!%p1033_p10), %v1335_v16  ;;  %421 = vst [vmem:[#allocation2 + $0x18] sm:$0xff] (!%p1033_p10), %v1335_v16 }
  0x2b   : > { %422 = vst [vmem:[#allocation2 + $0x20] sm:$0xff] (!%p1033_p10), %v1335_v16  ;;  %423 = vst [vmem:[#allocation2 + $0x28] sm:$0xff] (!%p1033_p10), %v1335_v16 }
  0x2c   : > { %424 = vst [vmem:[#allocation2 + $0x30] sm:$0xff] (!%p1033_p10), %v1335_v16  ;;  %425 = vst [vmem:[#allocation2 + $0x38] sm:$0xff] (!%p1033_p10), %v1335_v16 }
  0x2d   : > { %426 = vst [vmem:[#allocation2 + $0x40] sm:$0xff] (!%p1033_p10), %v1335_v16  ;;  %427 = vst [vmem:[#allocation2 + $0x48] sm:$0xff] (!%p1033_p10), %v1335_v16 }
  0x2e   : > { %428 = vst [vmem:[#allocation2 + $0x50] sm:$0xff] %v1335_v16  ;;  %429 = vst [vmem:[#allocation2 + $0x58] sm:$0xff] %v1335_v16 }
  0x2f   : > { %430 = vst [vmem:[#allocation2 + $0x60] sm:$0xff] %v1335_v16  ;;  %431 = vst [vmem:[#allocation2 + $0x68] sm:$0xff] %v1335_v16 }
  0x30   : > { %432 = vst [vmem:[#allocation2 + $0x70] sm:$0xff] %v1335_v16  ;;  %433 = vst [vmem:[#allocation2 + $0x78] sm:$0xff] %v1335_v16 }
  0x31 PF: > { %v1279_v17 = vld [vmem:[%s1429_s11] sm:$0xff]   ;;  %v1280_v18 = vld [vmem:[%s1429_s11 + $0x8] sm:$0xff]   ;;  %v1281_v19 = vld [vmem:[%s1429_s11 + $0x10] sm:$0xff]   ;;  %p1050_p11 = scmp.ne.s32.totalorder %s1325_s17, 4 }
  0x32   : > { %1190 = vmatprep.subr.bf16.mxu0 %v1279_v17  ;;  %1222 = vmatprep.subr.bf16.mxu1 %v1279_v17  ;;  %v1282_v20 = vld [vmem:[%s1429_s11 + $0x18] sm:$0xff]   ;;  %v1287_v21 = vld [vmem:[%s1431_s12] sm:$0xff]   ;;  %v1284_v24 = vld [vmem:[%s1429_s11 + $0x28] sm:$0xff]  }
  0x33   : > { %1191 = vmatpush3.bf16.msra.mxu0 %v1279_v17  ;;  %1230 = vmatpush3.bf16.msra.mxu1 %v1279_v17  ;;  %v1288_v22 = vld [vmem:[%s1431_s12 + $0x20] sm:$0xff]   ;;  %v1285_v25 = vld [vmem:[%s1429_s11 + $0x30] sm:$0xff]   ;;  %v1286_v26 = vld [vmem:[%s1429_s11 + $0x38] sm:$0xff]  }
  0x34   : > { %1192 = vmatprep.subr.bf16.mxu0 %v1280_v18  ;;  %1223 = vmatprep.subr.bf16.mxu1 %v1280_v18  ;;  %v1283_v23 = vld [vmem:[%s1429_s11 + $0x20] sm:$0xff]   ;;  %v1289_v27 = vld [vmem:[%s1431_s12 + $0x8] sm:$0xff]   ;;  %v1291_v29 = vld [vmem:[%s1431_s12 + $0x10] sm:$0xff]  }
  0x35   : > { %1206 = vmatprep.mubr.bf16.mxu0 %v1287_v21  ;;  %1214 = vmatprep.mubr.bf16.mxu1 %v1288_v22  ;;  %v1290_v28 = vld [vmem:[%s1431_s12 + $0x28] sm:$0xff]   ;;  %v1292_v30 = vld [vmem:[%s1431_s12 + $0x30] sm:$0xff]   ;;  %v1293_v31 = vld [vmem:[%s1431_s12 + $0x18] sm:$0xff]  }
  0x36   : > { %v1294_v32 = vld [vmem:[%s1431_s12 + $0x38] sm:$0xff]   ;;  %v436_v33 = vld [vmem:[#allocation2 + $0x10] sm:$0xff]  ;;  %v434_v35 = vld [vmem:[#allocation2] sm:$0xff] }
  0x37   : > { %1193 = vmatpush3.bf16.msra.mxu0 %v1280_v18  ;;  %1231 = vmatpush3.bf16.msra.mxu1 %v1280_v18  ;;  %v444_v34 = vld [vmem:[#allocation2 + $0x50] sm:$0xff]  ;;  %v442_v36 = vld [vmem:[#allocation2 + $0x40] sm:$0xff]  ;;  %v437_v39 = vld [vmem:[#allocation2 + $0x18] sm:$0xff] }
  0x38   : > { %1194 = vmatprep.subr.bf16.mxu0 %v1281_v19  ;;  %1224 = vmatprep.subr.bf16.mxu1 %v1281_v19  ;;  %v445_v40 = vld [vmem:[#allocation2 + $0x58] sm:$0xff]  ;;  %v435_v45 = vld [vmem:[#allocation2 + $0x8] sm:$0xff]  ;;  %v440_v57 = vld [vmem:[#allocation2 + $0x30] sm:$0xff] }
  0x39   : > { %v443_v46 = vld [vmem:[#allocation2 + $0x48] sm:$0xff]  ;;  %v448_v58 = vld [vmem:[#allocation2 + $0x70] sm:$0xff]  ;;  %v438_v59 = vld [vmem:[#allocation2 + $0x20] sm:$0xff] }
  0x3a   : > { %v446_v60 = vld [vmem:[#allocation2 + $0x60] sm:$0xff]  ;;  %v441_v63 = vld [vmem:[#allocation2 + $0x38] sm:$0xff]  ;;  %v439_v5 = vld [vmem:[#allocation2 + $0x28] sm:$0xff] }
  0x3b   : > { %1195 = vmatpush3.bf16.msra.mxu0 %v1281_v19  ;;  %1232 = vmatpush3.bf16.msra.mxu1 %v1281_v19  ;;  %v449_v0 = vld [vmem:[#allocation2 + $0x78] sm:$0xff]  ;;  %v447_v6 = vld [vmem:[#allocation2 + $0x68] sm:$0xff]  ;;  %v1454_v19 = vld [vmem:[%s1537_s2] ss:$0 sm:$0xff] (!%p1050_p11) }
  0x3c   : > { %1196 = vmatprep.subr.bf16.mxu0 %v1282_v20  ;;  %1225 = vmatprep.subr.bf16.mxu1 %v1282_v20  ;;  %v1089_v22 = vld [vmem:[%s1538_s3] sm:$0xff] (!%p1050_p11)  }
  0x3f   : > { %1197 = vmatpush3.bf16.msra.mxu0 %v1282_v20  ;;  %1233 = vmatpush3.bf16.msra.mxu1 %v1282_v20 }
  0x40   : > { %1198 = vmatprep.subr.bf16.mxu0 %v1283_v23  ;;  %1226 = vmatprep.subr.bf16.mxu1 %v1283_v23 }
  0x43   : > { %1199 = vmatpush3.bf16.msra.mxu0 %v1283_v23  ;;  %1234 = vmatpush3.bf16.msra.mxu1 %v1283_v23 }
  0x44   : > { %1200 = vmatprep.subr.bf16.mxu0 %v1284_v24  ;;  %1227 = vmatprep.subr.bf16.mxu1 %v1284_v24 }
  0x47   : > { %1201 = vmatpush3.bf16.msra.mxu0 %v1284_v24  ;;  %1235 = vmatpush3.bf16.msra.mxu1 %v1284_v24 }
  0x48   : > { %1202 = vmatprep.subr.bf16.mxu0 %v1285_v25  ;;  %1228 = vmatprep.subr.bf16.mxu1 %v1285_v25 }
  0x4b   : > { %1203 = vmatpush3.bf16.msra.mxu0 %v1285_v25  ;;  %1236 = vmatpush3.bf16.msra.mxu1 %v1285_v25  ;;  %v1090_v25 = vunpack.c.l.bf16 (!%p1050_p11), %v1089_v22 }
  0x4c   : > { %1204 = vmatprep.subr.bf16.mxu0 %v1286_v26  ;;  %1229 = vmatprep.subr.bf16.mxu1 %v1286_v26 }
  0x4f   : > { %1205 = vmatpush3.bf16.msra.mxu0 %v1286_v26  ;;  %1237 = vmatpush3.bf16.msra.mxu1 %v1286_v26  ;;  %v1091_v26 = vunpack.c.h.bf16 (!%p1050_p11), %v1089_v22 }
  0x52   : > { %1207 = vmatmul.mubr.bf16.vlgmr.msra.gmra.mrb[0].mxu0 %v1289_v27  ;;  %1215 = vmatmul.mubr.bf16.vlgmr.msra.gmra.mrb[0].mxu1 %v1290_v28 }
  0x53   : > { %1210 = vmatprep.mubr.bf16.mxu0 %v1291_v29  ;;  %1218 = vmatprep.mubr.bf16.mxu1 %v1292_v30  ;;  %v1160_v29 = vld [vmem:[%s1538_s3 + $0x8] sm:$0xff] (!%p1050_p11)  }
  0x5a   : > { %1211 = vmatmul.mubr.bf16.gmra.mrb[4].mxu0 %v1293_v31  ;;  %1219 = vmatmul.mubr.bf16.gmra.mrb[4].mxu1 %v1294_v32  ;;  %v1094_v32 = vunpack.c.l.bf16 (!%p1050_p11), %v1160_v29 }
 0x125   : > { %v1208_v37 = vpop.f32.mrb[0].mxu0  ;;  %v1216_v38 = vpop.f32.mrb[0].mxu1 }
 0x126   : > { %v677_v41 = vadd.f32 %v1208_v37, %v436_v33  ;;  %v685_v42 = vadd.f32 %v1216_v38, %v444_v34  ;;  %v612_v43 = vpop.f32.mrb[1].mxu0  ;;  %v644_v44 = vpop.f32.mrb[1].mxu1  ;;  %v1095_v33 = vunpack.c.h.bf16 (!%p1050_p11), %v1160_v29 }
 0x127   : > { %v675_v47 = vadd.f32 %v612_v43, %v434_v35  ;;  %v683_v48 = vadd.f32 %v644_v44, %v442_v36  ;;  %v1209_v49 = vpop.f32.mrb[2].mxu0  ;;  %v1217_v50 = vpop.f32.mrb[2].mxu1  ;;  %v1161_v36 = vld [vmem:[%s1538_s3 + $0x10] sm:$0xff] (!%p1050_p11)   ;;  %v1162_v43 = vld [vmem:[%s1538_s3 + $0x18] sm:$0xff] (!%p1050_p11)  }
 0x128   : > { %693 = vst [vmem:[#allocation2 + $0x10] sm:$0xff] %v677_v41  ;;  %701 = vst [vmem:[#allocation2 + $0x50] sm:$0xff] %v685_v42  ;;  %v678_v51 = vadd.f32 %v1209_v49, %v437_v39  ;;  %v686_v52 = vadd.f32 %v1217_v50, %v445_v40  ;;  %v615_v53 = vpop.f32.mrb[3].mxu0  ;;  %v647_v54 = vpop.f32.mrb[3].mxu1  ;;  %v1098_v41 = vunpack.c.l.bf16 (!%p1050_p11), %v1161_v36  ;;  %v1099_v42 = vunpack.c.h.bf16 (!%p1050_p11), %v1161_v36 }
 0x129   : > { %691 = vst [vmem:[#allocation2] sm:$0xff] %v675_v47  ;;  %699 = vst [vmem:[#allocation2 + $0x40] sm:$0xff] %v683_v48  ;;  %v676_v55 = vadd.f32 %v615_v53, %v435_v45  ;;  %v684_v56 = vadd.f32 %v647_v54, %v443_v46 }
 0x12a   : > { %694 = vst [vmem:[#allocation2 + $0x18] sm:$0xff] %v678_v51  ;;  %702 = vst [vmem:[#allocation2 + $0x58] sm:$0xff] %v686_v52 }
 0x12b   : > { %692 = vst [vmem:[#allocation2 + $0x8] sm:$0xff] %v676_v55  ;;  %700 = vst [vmem:[#allocation2 + $0x48] sm:$0xff] %v684_v56  ;;  %v1102_v56 = vunpack.c.l.bf16 (!%p1050_p11), %v1162_v43 }
 0x12d   : > { %v1212_v61 = vpop.f32.mrb[4].mxu0  ;;  %v1220_v62 = vpop.f32.mrb[4].mxu1  ;;  %710 = sbr.rel (%p1050_p11) target bundleno = 328 (0x148), region = 85 }
 0x12e   : > { %v681_v1 = vadd.f32 %v1212_v61, %v440_v57  ;;  %v689_v2 = vadd.f32 %v1220_v62, %v448_v58  ;;  %v628_v3 = vpop.f32.mrb[5].mxu0  ;;  %v660_v4 = vpop.f32.mrb[5].mxu1  ;;  %v1103_v57 = vunpack.c.h.bf16 (!%p1050_p11), %v1162_v43  ;;  %v1163_v58 = vld [vmem:[%s1538_s3 + $0x20] sm:$0xff] (!%p1050_p11)  }
 0x12f   : > { %v679_v7 = vadd.f32 %v628_v3, %v438_v59  ;;  %v687_v8 = vadd.f32 %v660_v4, %v446_v60  ;;  %v1213_v9 = vpop.f32.mrb[6].mxu0  ;;  %v1221_v10 = vpop.f32.mrb[6].mxu1  ;;  %v713_v23 = vld [vmem:[#allocation2 + $0x10] sm:$0xff] (!%p1050_p11) }
 0x130   : > { %697 = vst [vmem:[#allocation2 + $0x30] sm:$0xff] %v681_v1  ;;  %705 = vst [vmem:[#allocation2 + $0x70] sm:$0xff] %v689_v2  ;;  %v682_v11 = vadd.f32 %v1213_v9, %v441_v63  ;;  %v690_v12 = vadd.f32 %v1221_v10, %v449_v0  ;;  %v631_v13 = vpop.f32.mrb[7].mxu0  ;;  %v663_v14 = vpop.f32.mrb[7].mxu1  ;;  %v711_v17 = vld [vmem:[#allocation2] sm:$0xff] (!%p1050_p11)  ;;  %v736_v27 = vadd.f32 (!%p1050_p11), %v1454_v19, %v713_v23  ;;  %v721_v59 = vld [vmem:[#allocation2 + $0x50] sm:$0xff] (!%p1050_p11)  ;;  %v1107_v9 = vunpack.c.h.bf16 (!%p1050_p11), %v1163_v58 }
 0x131   : > { %695 = vst [vmem:[#allocation2 + $0x20] sm:$0xff] %v679_v7  ;;  %703 = vst [vmem:[#allocation2 + $0x60] sm:$0xff] %v687_v8  ;;  %v680_v15 = vadd.f32 %v631_v13, %v439_v5  ;;  %v688_v16 = vadd.f32 %v663_v14, %v447_v6  ;;  %v734_v20 = vadd.f32 (!%p1050_p11), %v1454_v19, %v711_v17  ;;  %v714_v24 = vld [vmem:[#allocation2 + $0x18] sm:$0xff] (!%p1050_p11)  ;;  %v719_v48 = vld [vmem:[#allocation2 + $0x40] sm:$0xff] (!%p1050_p11)  ;;  %v1106_v8 = vunpack.c.l.bf16 (!%p1050_p11), %v1163_v58 }
 0x132   : > { %698 = vst [vmem:[#allocation2 + $0x38] sm:$0xff] %v682_v11  ;;  %706 = vst [vmem:[#allocation2 + $0x78] sm:$0xff] %v690_v12  ;;  %v712_v18 = vld [vmem:[#allocation2 + $0x8] sm:$0xff] (!%p1050_p11)  ;;  %v737_v28 = vadd.f32 (!%p1050_p11), %v1454_v19, %v714_v24  ;;  %v784_v44 = vadd.f32 (!%p1050_p11), %v1094_v32, %v736_v27  ;;  %v742_v63 = vadd.f32 (!%p1050_p11), %v1454_v19, %v719_v48  ;;  %v722_v0 = vld [vmem:[#allocation2 + $0x58] sm:$0xff] (!%p1050_p11) }
 0x133   : > { %696 = vst [vmem:[#allocation2 + $0x28] sm:$0xff] %v680_v15  ;;  %704 = vst [vmem:[#allocation2 + $0x68] sm:$0xff] %v688_v16  ;;  %v735_v21 = vadd.f32 (!%p1050_p11), %v1454_v19, %v712_v18  ;;  %v782_v39 = vadd.f32 (!%p1050_p11), %v1090_v25, %v734_v20  ;;  %v720_v53 = vld [vmem:[#allocation2 + $0x48] sm:$0xff] (!%p1050_p11)  ;;  %v744_v10 = vadd.f32 (!%p1050_p11), %v1454_v19, %v721_v59  ;;  %v1165_v12 = vld [vmem:[%s1538_s3 + $0x30] sm:$0xff] (!%p1050_p11)  }
 0x134   : > { %v785_v45 = vadd.f32 %v1095_v33, %v737_v28  ;;  %v800_v54 = vmax.f32 %v784_v44, 0.0  ;;  %v1164_v1 = vld [vmem:[%s1538_s3 + $0x28] sm:$0xff]   ;;  %v743_v5 = vadd.f32 %v1454_v19, %v720_v53  ;;  %v745_v15 = vadd.f32 %v1454_v19, %v722_v0  ;;  %v1166_v28 = vld [vmem:[%s1538_s3 + $0x38] sm:$0xff]  }
 0x135   : > { %v783_v40 = vadd.f32 %v1091_v26, %v735_v21  ;;  %v798_v49 = vmax.f32 %v782_v39, 0.0  ;;  %v1110_v16 = vunpack.c.l.bf16 %v1164_v1  ;;  %v790_v17 = vadd.f32 %v1106_v8, %v742_v63 }
 0x136   : > { %v801_v55 = vmax.f32 %v785_v45, 0.0  ;;  %v791_v18 = vadd.f32 %v1107_v9, %v743_v5  ;;  %v1111_v20 = vunpack.c.h.bf16 %v1164_v1  ;;  %v1114_v27 = vunpack.c.l.bf16 %v1165_v12 }
 0x137   : > { %v717_v37 = vld [vmem:[#allocation2 + $0x30] sm:$0xff]  ;;  %v799_v50 = vmax.f32 %v783_v40, 0.0  ;;  %v792_v25 = vadd.f32 %v1110_v16, %v744_v10  ;;  %v806_v29 = vmax.f32 %v790_v17, 0.0  ;;  %v1115_v32 = vunpack.c.h.bf16 %v1165_v12 }
 0x138   : > { %v715_v30 = vld [vmem:[#allocation2 + $0x20] sm:$0xff]  ;;  %v740_v46 = vadd.f32 %v1454_v19, %v717_v37  ;;  %v1128_v2 = vpack.c.bf16 %v801_v55, %v800_v54  ;;  %v725_v22 = vld [vmem:[#allocation2 + $0x70] sm:$0xff]  ;;  %v1118_v40 = vunpack.c.l.bf16 %v1166_v28 }
 0x139   : > { %v738_v34 = vadd.f32 %v1454_v19, %v715_v30  ;;  %v718_v38 = vld [vmem:[#allocation2 + $0x38] sm:$0xff]  ;;  %v1123_v60 = vpack.c.bf16 %v799_v50, %v798_v49  ;;  %v723_v6 = vld [vmem:[#allocation2 + $0x60] sm:$0xff]  ;;  %v807_v30 = vmax.f32 %v791_v18, 0.0  ;;  %v808_v33 = vmax.f32 %v792_v25, 0.0 }
 0x13a   : > { %v716_v31 = vld [vmem:[#allocation2 + $0x28] sm:$0xff]  ;;  %v741_v47 = vadd.f32 %v1454_v19, %v718_v38  ;;  %v788_v3 = vadd.f32 %v1102_v56, %v740_v46  ;;  %1167 = vst [vmem:[%s1539_s4 + $0x8] sm:$0xff] %v1128_v2   ;;  %v746_v21 = vadd.f32 %v1454_v19, %v723_v6  ;;  %v726_v23 = vld [vmem:[#allocation2 + $0x78] sm:$0xff] }
 0x13b   : > { %v739_v35 = vadd.f32 %v1454_v19, %v716_v31  ;;  %v786_v51 = vadd.f32 %v1098_v41, %v738_v34  ;;  %1124 = vst [vmem:[%s1539_s4] sm:$0xff] %v1123_v60   ;;  %v724_v11 = vld [vmem:[#allocation2 + $0x68] sm:$0xff]  ;;  %v793_v31 = vadd.f32 %v1111_v20, %v745_v15  ;;  %v749_v36 = vadd.f32 %v1454_v19, %v726_v23 }
 0x13c   : > { %v789_v4 = vadd.f32 %v1103_v57, %v741_v47  ;;  %v804_v13 = vmax.f32 %v788_v3, 0.0  ;;  %v747_v26 = vadd.f32 %v1454_v19, %v724_v11  ;;  %v794_v34 = vadd.f32 %v1114_v27, %v746_v21 }
 0x13d   : > { %v787_v52 = vadd.f32 %v1099_v42, %v739_v35  ;;  %v802_v61 = vmax.f32 %v786_v51, 0.0  ;;  %v748_v35 = vadd.f32 %v1454_v19, %v725_v22  ;;  %v1143_v37 = vpack.c.bf16 %v807_v30, %v806_v29 }
 0x13e   : > { %v805_v14 = vmax.f32 %v789_v4, 0.0  ;;  %v809_v38 = vmax.f32 %v793_v31, 0.0  ;;  %v795_v39 = vadd.f32 %v1115_v32, %v747_v26  ;;  %v810_v41 = vmax.f32 %v794_v34, 0.0 }
 0x13f   : > { %v803_v62 = vmax.f32 %v787_v52, 0.0  ;;  %v1119_v42 = vunpack.c.h.bf16 %v1166_v28  ;;  %1170 = vst [vmem:[%s1539_s4 + $0x20] sm:$0xff] %v1143_v37   ;;  %v796_v45 = vadd.f32 %v1118_v40, %v748_v35 }
 0x140   : > { %v1138_v24 = vpack.c.bf16 %v805_v14, %v804_v13  ;;  %v1148_v43 = vpack.c.bf16 %v809_v38, %v808_v33  ;;  %v811_v44 = vmax.f32 %v795_v39, 0.0 }
 0x141   : > { %v1133_v7 = vpack.c.bf16 %v803_v62, %v802_v61  ;;  %v797_v46 = vadd.f32 %v1119_v42, %v749_v36  ;;  %v812_v19 = vmax.f32 %v796_v45, 0.0 }
 0x142   : > { %1169 = vst [vmem:[%s1539_s4 + $0x18] sm:$0xff] %v1138_v24   ;;  %1171 = vst [vmem:[%s1539_s4 + $0x28] sm:$0xff] %v1148_v43   ;;  %v1153_v47 = vpack.c.bf16 %v811_v44, %v810_v41 }
 0x143   : > { %1168 = vst [vmem:[%s1539_s4 + $0x10] sm:$0xff] %v1133_v7   ;;  %v813_v48 = vmax.f32 %v797_v46, 0.0 }
 0x144   : > { %1172 = vst [vmem:[%s1539_s4 + $0x30] sm:$0xff] %v1153_v47  }
 0x145   : > { %v1158_v49 = vpack.c.bf16 %v813_v48, %v812_v19 }
 0x147   : > { %1173 = vst [vmem:[%s1539_s4 + $0x38] sm:$0xff] %v1158_v49  }
 0x148 PF: > { %s14_s19 = sadd.s32 1, %s1333_s19   ;;  %s1540_s15 = smov %s1321_s16 }
 0x149   : > { %p11_p12 = scmp.ge.s32.totalorder %s14_s19, 7   ;;  %s1541_s16 = smov %s1396_s23 }
 0x14a   : > { %s1542_s17 = smov %s1329_s18  ;;  %s1543_s18 = smov %s1545_s20 }
 0x14b   :  { %13 = sbr.rel (!%p11_p12) target bundleno = 3 (0x3), region = 129 }

// kernel: _lambda_.26
= control target key start
LH: loop header
LB: loop body
LE: loop exit
PB: predicated region body
PF: predicated region fallthrough
CT: control target
= control target key end

     0   :  { %s796_s12 = smov 0   ;;  %s798_s13 = smov 0   ;;  %s889_s0 = inlined_call_operand.vmem [shape: bf16[32,640], index: 0, kind: input, shape index: {}]   ;;  %s890_s1 = inlined_call_operand.vmem [shape: bf16[640,128], index: 1, kind: input, shape index: {}]   ;;  %s891_s2 = inlined_call_operand.vmem [shape: f32[1,128], index: 2, kind: input, shape index: {}]   ;;  %s892_s3 = inlined_call_operand.vmem [shape: bf16[32,128], index: 3, kind: output, shape index: {}]  }
   0x1   :  { %s800_s14 = smov 0   ;;  %s802_s15 = smov 0  }
   0x2   :  { %s804_s16 = smov 0  }
   0x3 LB: > { %s25_s17 = sadd.s32 1, %s769_s15  ;;  %p48_p1 = scmp.ne.s32.totalorder %s761_s13, %s757_s12  ;;  %s773_s16 = sphi %s804_s16, %s13_s16   ;;  %s769_s15 = sphi %s802_s15, %s896_s15   ;;  %s765_s14 = sphi %s800_s14, %s895_s14   ;;  %s761_s13 = sphi %s798_s13, %s894_s13   ;;  %s757_s12 = sphi %s796_s12, %s893_s12  }
   0x4   : > { %p26_p0 = scmp.ge.s32.totalorder %s25_s17, 5  ;;  %p49_p2 = scmp.eq.s32.totalorder %s773_s16, 0 }
   0x5   : > { %s41_s19 = sadd.s32 1, %s761_s13  ;;  %p611_p5 = scmp.ge.s32.totalorder %s773_s16, 5 }
   0x6   : > { %s898_s17 = smov (%p26_p0, %s25_s17), 0  ;;  %p50_p3 = por %p49_p2, %p48_p1 }
   0x7   : > { %s37_s18 = ssub.s32 %s769_s15, %s898_s17  ;;  %162 = sbr.rel (%p611_p5) target bundleno = 21 (0x15), region = 20 }
   0x8   : > { %p39_p4 = scmp.eq.s32.totalorder %s37_s18, 0 }
   0xa   : > { %s831_s20 = scalar_select %p39_p4, %s761_s13, %s41_s19  }
   0xe   : > { %165 = sbr.rel (!%p50_p3) target bundleno = 21 (0x15), region = 24  ;;  %s167_s21 = sand.u32 (%p50_p3), 1, %s761_s13  }
   0xf   : > { %s613_s22 = sshll.u32 (%p50_p3), %s769_s15, 2  ;;  %s612_s23 = sshll.u32 (%p50_p3), %s167_s21, 4 }
  0x10   : > { %s174_s26 = scalar_lea.vmem (%p50_p3), %s889_s0, %s613_s22  ;;  %s169_s27 = scalar_lea.vmem (%p50_p3), [#allocation3], %s612_s23 }
  0x11   : > { %v190_v0 = vld [vmem:[%s174_s26] sm:$0xf] (%p50_p3)  ;;  %v192_v1 = vld [vmem:[%s174_s26 + $0x14] sm:$0xf] (%p50_p3)  ;;  %v194_v2 = vld [vmem:[%s174_s26 + $0x28] sm:$0xf] (%p50_p3) }
  0x12   : > { %191 = vst [vmem:[%s169_s27] sm:$0xf] (%p50_p3), %v190_v0  ;;  %193 = vst [vmem:[%s169_s27 + $0x4] sm:$0xf] (%p50_p3), %v192_v1  ;;  %v196_v3 = vld [vmem:[%s174_s26 + $0x3c] sm:$0xf] (%p50_p3) }
  0x13   : > { %195 = vst [vmem:[%s169_s27 + $0x8] sm:$0xf] (%p50_p3), %v194_v2  ;;  %197 = vst [vmem:[%s169_s27 + $0xc] sm:$0xf] (%p50_p3), %v196_v3 }
  0x15 PF: > { %p614_p6 = scmp.ge.s32.totalorder %s773_s16, 1  ;;  %p239_p7 = scmp.lt.s32.totalorder %s773_s16, 6 }
  0x17   : > { %p240_p8 = pnand %p614_p6, %p239_p7 }
  0x18   : > { %s246_s28 = sand.u32 (!%p240_p8), 1, %s757_s12   ;;  %s616_s29 = sshll.u32 (!%p240_p8), %s765_s14, 4 }
  0x19   : > { %243 = sbr.rel (%p240_p8) target bundleno = 304 (0x130), region = 69  ;;  %s843_s30 = sshll.u32 (!%p240_p8), %s246_s28, 4 }
  0x1a   : > { %p285_p9 = scmp.lt.s32.totalorder (!%p240_p8), %s616_s29, 79  ;;  %s248_s8 = scalar_lea.vmem (!%p240_p8), [#allocation3], %s843_s30 }
  0x1b   : > { %p618_p10 = scmp.ne.s32.totalorder (!%p240_p8), %s765_s14, 0 }
  0x20   : > { %s900_s29 = smov (!%p285_p9, %s616_s29), 79  ;;  %309 = sbr.rel (%p618_p10) target bundleno = 39 (0x27), region = 77 }
  0x21   : > { %s617_s4 = sshll.u32 %s900_s29, 2  ;;  %v775_v4 = vmov (!%p618_p10), 0.0  }
  0x22   : > { %s848_s7 = scalar_lea.vmem %s890_s1, %s617_s4  ;;  %310 = vst [vmem:[#allocation2] sm:$0xff] (!%p618_p10), %v775_v4  ;;  %311 = vst [vmem:[#allocation2 + $0x8] sm:$0xff] (!%p618_p10), %v775_v4 }
  0x23   : > { %312 = vst [vmem:[#allocation2 + $0x10] sm:$0xff] (!%p618_p10), %v775_v4  ;;  %313 = vst [vmem:[#allocation2 + $0x18] sm:$0xff] (!%p618_p10), %v775_v4 }
  0x27 PF: > { %v725_v5 = vld [vmem:[%s848_s7] sm:$0xff]   ;;  %v726_v6 = vld [vmem:[%s848_s7 + $0x8] sm:$0xff]   ;;  %v727_v7 = vld [vmem:[%s848_s7 + $0x10] sm:$0xff]   ;;  %p629_p11 = scmp.ne.s32.totalorder %s765_s14, 4 }
  0x28   : > { %664 = vmatprep.subr.bf16.mxu0 %v725_v5  ;;  %v728_v8 = vld [vmem:[%s848_s7 + $0x18] sm:$0xff]   ;;  %v733_v9 = vld [vmem:[%s248_s8] sm:$0xff]   ;;  %v730_v11 = vld [vmem:[%s848_s7 + $0x28] sm:$0xff]  }
  0x29   : > { %665 = vmatpush3.bf16.msra.mxu0 %v725_v5  ;;  %680 = vmatprep.mubr.bf16.mxu0 %v733_v9  ;;  %v729_v10 = vld [vmem:[%s848_s7 + $0x20] sm:$0xff]   ;;  %v731_v12 = vld [vmem:[%s848_s7 + $0x30] sm:$0xff]   ;;  %v732_v13 = vld [vmem:[%s848_s7 + $0x38] sm:$0xff]  }
  0x2a   : > { %666 = vmatprep.subr.bf16.mxu0 %v726_v6  ;;  %v734_v14 = vld [vmem:[%s248_s8 + $0x8] sm:$0xff]   ;;  %v316_v15 = vld [vmem:[#allocation2 + $0x10] sm:$0xff]  ;;  %v314_v16 = vld [vmem:[#allocation2] sm:$0xff] }
  0x2b   : > { %v317_v18 = vld [vmem:[#allocation2 + $0x18] sm:$0xff]  ;;  %v315_v21 = vld [vmem:[#allocation2 + $0x8] sm:$0xff]  ;;  %v630_v29 = vld [vmem:[%s891_s2] ss:$0 sm:$0xff] (!%p629_p11) }
  0x2d   : > { %667 = vmatpush3.bf16.msra.mxu0 %v726_v6 }
  0x2e   : > { %668 = vmatprep.subr.bf16.mxu0 %v727_v7 }
  0x31   : > { %669 = vmatpush3.bf16.msra.mxu0 %v727_v7 }
  0x32   : > { %670 = vmatprep.subr.bf16.mxu0 %v728_v8 }
  0x35   : > { %671 = vmatpush3.bf16.msra.mxu0 %v728_v8 }
  0x36   : > { %672 = vmatprep.subr.bf16.mxu0 %v729_v10 }
  0x39   : > { %673 = vmatpush3.bf16.msra.mxu0 %v729_v10 }
  0x3a   : > { %674 = vmatprep.subr.bf16.mxu0 %v730_v11 }
  0x3d   : > { %675 = vmatpush3.bf16.msra.mxu0 %v730_v11 }
  0x3e   : > { %676 = vmatprep.subr.bf16.mxu0 %v731_v12 }
  0x41   : > { %677 = vmatpush3.bf16.msra.mxu0 %v731_v12 }
  0x42   : > { %678 = vmatprep.subr.bf16.mxu0 %v732_v13 }
  0x45   : > { %679 = vmatpush3.bf16.msra.mxu0 %v732_v13 }
  0x48   : > { %681 = vmatmul.mubr.bf16.vlgmr.msra.gmra.mrb[0].mxu0 %v734_v14 }
 0x11b   : > { %v682_v17 = vpop.f32.mrb[0].mxu0  ;;  %458 = sbr.rel (%p629_p11) target bundleno = 304 (0x130), region = 81 }
 0x11c   : > { %v449_v19 = vadd.f32 %v682_v17, %v316_v15  ;;  %v432_v20 = vpop.f32.mrb[1].mxu0 }
 0x11d   : > { %v447_v22 = vadd.f32 %v432_v20, %v314_v16  ;;  %v683_v23 = vpop.f32.mrb[2].mxu0 }
 0x11e   : > { %453 = vst [vmem:[#allocation2 + $0x10] sm:$0xff] %v449_v19  ;;  %v450_v24 = vadd.f32 %v683_v23, %v317_v18  ;;  %v435_v25 = vpop.f32.mrb[3].mxu0 }
 0x11f   : > { %451 = vst [vmem:[#allocation2] sm:$0xff] %v447_v22  ;;  %v448_v26 = vadd.f32 %v435_v25, %v315_v21 }
 0x120   : > { %454 = vst [vmem:[#allocation2 + $0x18] sm:$0xff] %v450_v24 }
 0x121   : > { %452 = vst [vmem:[#allocation2 + $0x8] sm:$0xff] %v448_v26 }
 0x125   : > { %v461_v32 = vld [vmem:[#allocation2 + $0x10] sm:$0xff] }
 0x126   : > { %v459_v27 = vld [vmem:[#allocation2] sm:$0xff]  ;;  %v472_v34 = vadd.f32 %v630_v29, %v461_v32 }
 0x127   : > { %v470_v30 = vadd.f32 %v630_v29, %v459_v27  ;;  %v462_v33 = vld [vmem:[#allocation2 + $0x18] sm:$0xff] }
 0x128   : > { %v460_v28 = vld [vmem:[#allocation2 + $0x8] sm:$0xff]  ;;  %v473_v35 = vadd.f32 %v630_v29, %v462_v33  ;;  %v476_v38 = vmax.f32 %v472_v34, 0.0 }
 0x129   : > { %v471_v31 = vadd.f32 %v630_v29, %v460_v28  ;;  %v474_v36 = vmax.f32 %v470_v30, 0.0 }
 0x12a   : > { %v477_v39 = vmax.f32 %v473_v35, 0.0 }
 0x12b   : > { %v475_v37 = vmax.f32 %v471_v31, 0.0 }
 0x12c   : > { %v651_v41 = vpack.c.bf16 %v477_v39, %v476_v38 }
 0x12d   : > { %v646_v40 = vpack.c.bf16 %v475_v37, %v474_v36 }
 0x12e   : > { %653 = vst [vmem:[%s892_s3 + $0x8] sm:$0xff] %v651_v41  }
 0x12f   : > { %647 = vst [vmem:[%s892_s3] sm:$0xff] %v646_v40  }
 0x130 PF: > { %s13_s16 = sadd.s32 1, %s773_s16   ;;  %s893_s12 = smov %s761_s13 }
 0x131   : > { %p10_p12 = scmp.ge.s32.totalorder %s13_s16, 7   ;;  %s894_s13 = smov %s831_s20 }
 0x132   : > { %s895_s14 = smov %s769_s15  ;;  %s896_s15 = smov %s898_s17 }
 0x133   :  { %12 = sbr.rel (!%p10_p12) target bundleno = 3 (0x3), region = 122 }

// kernel: _lambda_.28
= control target key start
LH: loop header
LB: loop body
LE: loop exit
PB: predicated region body
PF: predicated region fallthrough
CT: control target
= control target key end

     0   :  { %s1176_s15 = smov 0   ;;  %s1178_s16 = smov 0   ;;  %s1292_s0 = inlined_call_operand.vmem [shape: bf16[32,1152], index: 0, kind: input, shape index: {}]   ;;  %s1293_s1 = inlined_call_operand.vmem [shape: bf16[1152,128], index: 1, kind: input, shape index: {}]   ;;  %s1294_s2 = inlined_call_operand.vmem [shape: f32[1,128], index: 2, kind: input, shape index: {}]   ;;  %s1295_s3 = inlined_call_operand.vmem [shape: bf16[32,128], index: 3, kind: input, shape index: {}]   ;;  %s1296_s4 = inlined_call_operand.vmem [shape: bf16[32,128], index: 4, kind: output, shape index: {}]  }
   0x1   :  { %s1180_s17 = smov 0   ;;  %s1182_s18 = smov 0  }
   0x2   :  { %s1184_s19 = smov 0  }
   0x3 LB: > { %s26_s20 = sadd.s32 1, %s1144_s18  ;;  %p49_p1 = scmp.ne.s32.totalorder %s1136_s16, %s1132_s15  ;;  %s1148_s19 = sphi %s1184_s19, %s14_s19   ;;  %s1144_s18 = sphi %s1182_s18, %s1300_s18   ;;  %s1140_s17 = sphi %s1180_s17, %s1299_s17   ;;  %s1136_s16 = sphi %s1178_s16, %s1298_s16   ;;  %s1132_s15 = sphi %s1176_s15, %s1297_s15  }
   0x4   : > { %p27_p0 = scmp.ge.s32.totalorder %s26_s20, 3  ;;  %p50_p2 = scmp.eq.s32.totalorder %s1148_s19, 0 }
   0x5   : > { %s42_s22 = sadd.s32 1, %s1136_s16  ;;  %p899_p5 = scmp.ge.s32.totalorder %s1148_s19, 3 }
   0x6   : > { %s1302_s20 = smov (%p27_p0, %s26_s20), 0  ;;  %p51_p3 = por %p50_p2, %p49_p1 }
   0x7   : > { %s38_s21 = ssub.s32 %s1144_s18, %s1302_s20  ;;  %203 = sbr.rel (%p899_p5) target bundleno = 23 (0x17), region = 24 }
   0x8   : > { %p40_p4 = scmp.eq.s32.totalorder %s38_s21, 0 }
   0xa   : > { %s1211_s23 = scalar_select %p40_p4, %s1136_s16, %s42_s22  }
   0xe   : > { %206 = sbr.rel (!%p51_p3) target bundleno = 23 (0x17), region = 28  ;;  %s208_s24 = sand.u32 (%p51_p3), 1, %s1136_s16  }
   0xf   : > { %s952_s25 = smul.u32 (%p51_p3), 12, %s1144_s18 }
  0x10   : > { %s1035_s26 = smul.u32 (%p51_p3), 48, %s208_s24 }
  0x11   : > { %s216_s29 = scalar_lea.vmem (%p51_p3), %s1292_s0, %s952_s25 }
  0x12   : > { %v231_v0 = vld [vmem:[%s216_s29] sm:$0xff] (%p51_p3)  ;;  %v235_v2 = vld [vmem:[%s216_s29 + $0x48] sm:$0xff] (%p51_p3)  ;;  %s210_s30 = scalar_lea.vmem (%p51_p3), [#allocation3], %s1035_s26  ;;  %v905_v6 = vld [vmem:[%s216_s29 + $0x50] sm:$0xf] (%p51_p3) }
  0x13   : > { %v233_v1 = vld [vmem:[%s216_s29 + $0x24] sm:$0xff] (%p51_p3)  ;;  %232 = vst [vmem:[%s210_s30] sm:$0xff] (%p51_p3), %v231_v0  ;;  %236 = vst [vmem:[%s210_s30 + $0x18] sm:$0xff] (%p51_p3), %v235_v2  ;;  %v237_v3 = vld [vmem:[%s216_s29 + $0x6c] sm:$0xff] (%p51_p3) }
  0x14   : > { %234 = vst [vmem:[%s210_s30 + $0xc] sm:$0xff] (%p51_p3), %v233_v1  ;;  %v901_v4 = vld [vmem:[%s216_s29 + $0x8] sm:$0xf] (%p51_p3)  ;;  %v903_v5 = vld [vmem:[%s216_s29 + $0x2c] sm:$0xf] (%p51_p3)  ;;  %238 = vst [vmem:[%s210_s30 + $0x24] sm:$0xff] (%p51_p3), %v237_v3 }
  0x15   : > { %902 = vst [vmem:[%s210_s30 + $0x8] sm:$0xf] %v901_v4  ;;  %904 = vst [vmem:[%s210_s30 + $0x14] sm:$0xf] %v903_v5  ;;  %v907_v7 = vld [vmem:[%s216_s29 + $0x74] sm:$0xf] }
  0x16   : > { %906 = vst [vmem:[%s210_s30 + $0x20] sm:$0xf] %v905_v6  ;;  %908 = vst [vmem:[%s210_s30 + $0x2c] sm:$0xf] %v907_v7 }
  0x17 PF: > { %p909_p6 = scmp.ge.s32.totalorder %s1148_s19, 1  ;;  %p270_p7 = scmp.lt.s32.totalorder %s1148_s19, 4 }
  0x19   : > { %p271_p8 = pnand %p909_p6, %p270_p7 }
  0x1a   : > { %s277_s5 = sand.u32 (!%p271_p8), 1, %s1132_s15   ;;  %s326_s6 = smul.u32 (!%p271_p8), 48, %s1140_s17 }
  0x1b   : > { %274 = sbr.rel (%p271_p8) target bundleno = 320 (0x140), region = 58  ;;  %p911_p10 = scmp.ne.s32.totalorder (!%p271_p8), %s1140_s17, 0 }
  0x1c   : > { %s1036_s7 = smul.u32 (!%p271_p8), 48, %s277_s5  ;;  %p327_p9 = scmp.lt.s32.totalorder (!%p271_p8), %s326_s6, 143 }
  0x1e   : > { %s1228_s12 = scalar_lea.vmem (!%p271_p8), [#allocation3], %s1036_s7 }
  0x22   : > { %s1304_s6 = smov (!%p327_p9, %s326_s6), 143  ;;  %360 = sbr.rel (%p911_p10) target bundleno = 41 (0x29), region = 66 }
  0x23   : > { %s910_s8 = sshll.u32 %s1304_s6, 2  ;;  %v1150_v8 = vmov (!%p911_p10), 0.0  }
  0x24   : > { %s1226_s11 = scalar_lea.vmem %s1293_s1, %s910_s8  ;;  %361 = vst [vmem:[#allocation2] sm:$0xff] (!%p911_p10), %v1150_v8  ;;  %362 = vst [vmem:[#allocation2 + $0x8] sm:$0xff] (!%p911_p10), %v1150_v8 }
  0x25   : > { %363 = vst [vmem:[#allocation2 + $0x10] sm:$0xff] (!%p911_p10), %v1150_v8  ;;  %364 = vst [vmem:[#allocation2 + $0x18] sm:$0xff] (!%p911_p10), %v1150_v8 }
  0x29 PF: > { %v1078_v9 = vld [vmem:[%s1226_s11 + $0x40] sm:$0xff]   ;;  %v1081_v12 = vld [vmem:[%s1226_s11 + $0x48] sm:$0xff]   ;;  %v1084_v15 = vld [vmem:[%s1226_s11 + $0x50] sm:$0xff]   ;;  %p942_p11 = scmp.ne.s32.totalorder %s1140_s17, 2 }
  0x2a   : > { %v1079_v10 = vld [vmem:[%s1226_s11] sm:$0xff]   ;;  %977 = vmatprep.subr.bf16.mxu0 %v1078_v9  ;;  %v1082_v13 = vld [vmem:[%s1226_s11 + $0x8] sm:$0xff]   ;;  %v1085_v16 = vld [vmem:[%s1226_s11 + $0x10] sm:$0xff]  }
  0x2b   : > { %v1080_v11 = vld [vmem:[%s1226_s11 + $0x80] sm:$0xff]   ;;  %978 = vmatpush3.bf16.msra.mxu0 %v1079_v10  ;;  %v1083_v14 = vld [vmem:[%s1226_s11 + $0x88] sm:$0xff]   ;;  %v1086_v17 = vld [vmem:[%s1226_s11 + $0x90] sm:$0xff]  }
  0x2c   : > { %1015 = vmatprep.subr.bf16.mxu1 %v1080_v11  ;;  %979 = vmatprep.subr.bf16.mxu0 %v1081_v12  ;;  %v1087_v18 = vld [vmem:[%s1226_s11 + $0x58] sm:$0xff]   ;;  %v1090_v21 = vld [vmem:[%s1226_s11 + $0x60] sm:$0xff]   ;;  %v1093_v24 = vld [vmem:[%s1226_s11 + $0x68] sm:$0xff]  }
  0x2d   : > { %1016 = vmatpush3.bf16.msra.mxu1 %v1080_v11  ;;  %v1088_v19 = vld [vmem:[%s1226_s11 + $0x18] sm:$0xff]   ;;  %v1092_v22 = vld [vmem:[%s1226_s11 + $0xa0] sm:$0xff]   ;;  %v1095_v25 = vld [vmem:[%s1226_s11 + $0xa8] sm:$0xff]  }
  0x2e   : > { %1017 = vmatprep.subr.bf16.mxu1 %v1083_v14  ;;  %v1089_v20 = vld [vmem:[%s1226_s11 + $0x98] sm:$0xff]   ;;  %v1091_v23 = vld [vmem:[%s1226_s11 + $0x20] sm:$0xff]   ;;  %v1094_v26 = vld [vmem:[%s1226_s11 + $0x28] sm:$0xff]  }
  0x2f   : > { %980 = vmatpush3.bf16.msra.mxu0 %v1082_v13  ;;  %v1096_v27 = vld [vmem:[%s1226_s11 + $0x70] sm:$0xff]   ;;  %v1099_v30 = vld [vmem:[%s1226_s11 + $0x78] sm:$0xff]   ;;  %v365_v45 = vld [vmem:[#allocation2] sm:$0xff] }
  0x30   : > { %981 = vmatprep.subr.bf16.mxu0 %v1084_v15  ;;  %v1097_v28 = vld [vmem:[%s1226_s11 + $0x30] sm:$0xff]   ;;  %v1101_v31 = vld [vmem:[%s1226_s11 + $0xb8] sm:$0xff]   ;;  %v366_v50 = vld [vmem:[#allocation2 + $0x8] sm:$0xff] }
  0x31   : > { %1018 = vmatpush3.bf16.msra.mxu1 %v1083_v14  ;;  %v1098_v29 = vld [vmem:[%s1226_s11 + $0xb0] sm:$0xff]   ;;  %v1100_v34 = vld [vmem:[%s1226_s11 + $0x38] sm:$0xff]   ;;  %v943_v5 = vld [vmem:[%s1294_s2] ss:$0 sm:$0xff] (!%p942_p11) }
  0x32   : > { %1019 = vmatprep.subr.bf16.mxu1 %v1086_v17  ;;  %v1104_v32 = vld [vmem:[%s1228_s12 + $0x4] ss:$12 sps:$4 sm:$0xff]   ;;  %v1105_v33 = vld [vmem:[%s1228_s12 + $0x8] ss:$12 sps:$4 sm:$0xff]   ;;  %v1102_v35 = vld [vmem:[%s1228_s12] ss:$12 sps:$4 sm:$0xff]  }
  0x33   : > { %982 = vmatpush3.bf16.msra.mxu0 %v1085_v16  ;;  %633 = vmatprep.mubr.bf16.mxu0 %v1104_v32  ;;  %v1107_v36 = vld [vmem:[%s1228_s12 + $0x1c] ss:$12 sps:$4 sm:$0xff]   ;;  %v1106_v37 = vld [vmem:[%s1228_s12 + $0x20] ss:$12 sps:$4 sm:$0xff]   ;;  %v1109_v38 = vld [vmem:[%s1228_s12 + $0x18] ss:$12 sps:$4 sm:$0xff]  }
  0x34   : > { %983 = vmatprep.subr.bf16.mxu0 %v1087_v18  ;;  %1031 = vmatprep.mubr.bf16.mxu1 %v1105_v33  ;;  %v367_v59 = vld [vmem:[#allocation2 + $0x10] sm:$0xff]  ;;  %v368_v63 = vld [vmem:[#allocation2 + $0x18] sm:$0xff]  ;;  %v958_v8 = vld [vmem:[%s1295_s3] sm:$0xff] (!%p942_p11)  }
  0x35   : > { %1020 = vmatpush3.bf16.msra.mxu1 %v1086_v17  ;;  %v959_v11 = vunpack.c.l.bf16 (!%p942_p11), %v958_v8  ;;  %v960_v12 = vunpack.c.h.bf16 (!%p942_p11), %v958_v8  ;;  %v975_v15 = vld [vmem:[%s1295_s3 + $0x8] sm:$0xff] (!%p942_p11)  }
  0x36   : > { %1021 = vmatprep.subr.bf16.mxu1 %v1089_v20  ;;  %v963_v16 = vunpack.c.l.bf16 (!%p942_p11), %v975_v15  ;;  %v964_v17 = vunpack.c.h.bf16 (!%p942_p11), %v975_v15 }
  0x37   : > { %984 = vmatpush3.bf16.msra.mxu0 %v1088_v19 }
  0x38   : > { %985 = vmatprep.subr.bf16.mxu0 %v1090_v21 }
  0x39   : > { %1022 = vmatpush3.bf16.msra.mxu1 %v1089_v20 }
  0x3a   : > { %1023 = vmatprep.subr.bf16.mxu1 %v1092_v22 }
  0x3b   : > { %986 = vmatpush3.bf16.msra.mxu0 %v1091_v23 }
  0x3c   : > { %987 = vmatprep.subr.bf16.mxu0 %v1093_v24 }
  0x3d   : > { %1024 = vmatpush3.bf16.msra.mxu1 %v1092_v22 }
  0x3e   : > { %1025 = vmatprep.subr.bf16.mxu1 %v1095_v25 }
  0x3f   : > { %988 = vmatpush3.bf16.msra.mxu0 %v1094_v26 }
  0x40   : > { %989 = vmatprep.subr.bf16.mxu0 %v1096_v27 }
  0x41   : > { %1026 = vmatpush3.bf16.msra.mxu1 %v1095_v25 }
  0x42   : > { %1027 = vmatprep.subr.bf16.mxu1 %v1098_v29 }
  0x43   : > { %990 = vmatpush3.bf16.msra.mxu0 %v1097_v28 }
  0x44   : > { %991 = vmatprep.subr.bf16.mxu0 %v1099_v30 }
  0x45   : > { %1028 = vmatpush3.bf16.msra.mxu1 %v1098_v29 }
  0x46   : > { %1029 = vmatprep.subr.bf16.mxu1 %v1101_v31 }
  0x47   : > { %992 = vmatpush3.bf16.msra.mxu0 %v1100_v34 }
  0x49   : > { %1030 = vmatpush3.bf16.msra.mxu1 %v1101_v31 }
  0x4a   : > { %634 = vmatmul.mubr.bf16.vlgmr.msra.gmra.mrb[0].mxu0 %v1102_v35 }
  0x4b   : > { %641 = vmatprep.mubr.bf16.mxu0 %v1107_v36 }
  0x4c   : > { %1032 = vmatmul.mubr.bf16.vlgmr.msra.gmra.mrb[0].mxu1 %v1106_v37 }
  0x52   : > { %642 = vmatmul.mubr.bf16.gmra.mrb[4].mxu0 %v1109_v38 }
 0x11d   : > { %v993_v39 = vpop.f32.mrb[0].mxu0 }
 0x11e   : > { %v994_v40 = vpop.f32.mrb[1].mxu0 }
 0x11f   : > { %v995_v41 = vadd.f32 %v994_v40, %v993_v39  ;;  %v996_v42 = vpop.f32.mrb[2].mxu0  ;;  %v1033_v43 = vpop.f32.mrb[0].mxu1 }
 0x120   : > { %v997_v44 = vpop.f32.mrb[3].mxu0  ;;  %v684_v46 = vpop.f32.mrb[1].mxu1 }
 0x121   : > { %v998_v47 = vadd.f32 %v997_v44, %v996_v42  ;;  %v685_v48 = vadd.f32 %v995_v41, %v684_v46  ;;  %v1034_v49 = vpop.f32.mrb[2].mxu1 }
 0x122   : > { %v687_v51 = vpop.f32.mrb[3].mxu1 }
 0x123   : > { %v699_v52 = vadd.f32 %v685_v48, %v365_v45  ;;  %v688_v53 = vadd.f32 %v998_v47, %v687_v51 }
 0x125   : > { %703 = vst [vmem:[#allocation2] sm:$0xff] %v699_v52  ;;  %v700_v54 = vadd.f32 %v688_v53, %v366_v50  ;;  %v999_v55 = vpop.f32.mrb[4].mxu0 }
 0x126   : > { %v1000_v56 = vpop.f32.mrb[5].mxu0 }
 0x127   : > { %704 = vst [vmem:[#allocation2 + $0x8] sm:$0xff] %v700_v54  ;;  %v1001_v57 = vadd.f32 %v1000_v56, %v999_v55  ;;  %v1002_v58 = vpop.f32.mrb[6].mxu0 }
 0x128   : > { %v1003_v60 = vpop.f32.mrb[7].mxu0 }
 0x129   : > { %v693_v61 = vadd.f32 %v1033_v43, %v1001_v57  ;;  %v1004_v62 = vadd.f32 %v1003_v60, %v1002_v58  ;;  %710 = sbr.rel (%p942_p11) target bundleno = 320 (0x140), region = 70 }
 0x12b   : > { %v701_v0 = vadd.f32 %v693_v61, %v367_v59  ;;  %v696_v1 = vadd.f32 %v1034_v49, %v1004_v62 }
 0x12c   : > { %v711_v3 = vld [vmem:[#allocation2] sm:$0xff] (!%p942_p11) }
 0x12d   : > { %705 = vst [vmem:[#allocation2 + $0x10] sm:$0xff] %v701_v0  ;;  %v702_v2 = vadd.f32 %v696_v1, %v368_v63  ;;  %v722_v6 = vadd.f32 (!%p942_p11), %v943_v5, %v711_v3 }
 0x12e   : > { %v712_v4 = vld [vmem:[#allocation2 + $0x8] sm:$0xff] (!%p942_p11) }
 0x12f   : > { %706 = vst [vmem:[#allocation2 + $0x18] sm:$0xff] %v702_v2  ;;  %v723_v7 = vadd.f32 (!%p942_p11), %v943_v5, %v712_v4  ;;  %v734_v18 = vadd.f32 (!%p942_p11), %v959_v11, %v722_v6 }
 0x131   : > { %v735_v19 = vadd.f32 %v960_v12, %v723_v7  ;;  %v738_v22 = vmax.f32 %v734_v18, 0.0 }
 0x133   : > { %v739_v23 = vmax.f32 %v735_v19, 0.0 }
 0x134   : > { %v713_v9 = vld [vmem:[#allocation2 + $0x10] sm:$0xff] }
 0x135   : > { %v724_v13 = vadd.f32 %v943_v5, %v713_v9  ;;  %v968_v26 = vpack.c.bf16 %v739_v23, %v738_v22 }
 0x136   : > { %v714_v10 = vld [vmem:[#allocation2 + $0x18] sm:$0xff] }
 0x137   : > { %v725_v14 = vadd.f32 %v943_v5, %v714_v10  ;;  %v736_v20 = vadd.f32 %v963_v16, %v724_v13  ;;  %969 = vst [vmem:[%s1296_s4] sm:$0xff] %v968_v26  }
 0x139   : > { %v737_v21 = vadd.f32 %v964_v17, %v725_v14  ;;  %v740_v24 = vmax.f32 %v736_v20, 0.0 }
 0x13b   : > { %v741_v25 = vmax.f32 %v737_v21, 0.0 }
 0x13d   : > { %v973_v27 = vpack.c.bf16 %v741_v25, %v740_v24 }
 0x13f   : > { %976 = vst [vmem:[%s1296_s4 + $0x8] sm:$0xff] %v973_v27  }
 0x140 PF: > { %s14_s19 = sadd.s32 1, %s1148_s19   ;;  %s1297_s15 = smov %s1136_s16 }
 0x141   : > { %p11_p12 = scmp.ge.s32.totalorder %s14_s19, 5   ;;  %s1298_s16 = smov %s1211_s23 }
 0x142   : > { %s1299_s17 = smov %s1144_s18  ;;  %s1300_s18 = smov %s1302_s20 }
 0x143   :  { %13 = sbr.rel (!%p11_p12) target bundleno = 3 (0x3), region = 120 }

// kernel: _lambda_.27
= control target key start
LH: loop header
LB: loop body
LE: loop exit
PB: predicated region body
PF: predicated region fallthrough
CT: control target
= control target key end

     0   :  { %s335_s1 = inlined_call_operand.vmem [shape: bf16[128,128], index: 1, kind: input, shape index: {}]   ;;  %s336_s0 = inlined_call_operand.vmem [shape: bf16[32,128], index: 0, kind: input, shape index: {}]   ;;  %s337_s2 = inlined_call_operand.vmem [shape: f32[1,128], index: 2, kind: input, shape index: {}]   ;;  %s338_s3 = inlined_call_operand.vmem [shape: bf16[32,128], index: 3, kind: output, shape index: {}]  }
   0x1   :  { %v266_v0 = vld [vmem:[%s335_s1] sm:$0xff]   ;;  %v267_v1 = vld [vmem:[%s335_s1 + $0x8] sm:$0xff]   ;;  %v268_v2 = vld [vmem:[%s335_s1 + $0x10] sm:$0xff]  }
   0x2   :  { %246 = vmatprep.subr.bf16.mxu0 %v266_v0  ;;  %v269_v3 = vld [vmem:[%s335_s1 + $0x18] sm:$0xff]   ;;  %v274_v4 = vld [vmem:[%s336_s0] sm:$0xff]   ;;  %v271_v6 = vld [vmem:[%s335_s1 + $0x28] sm:$0xff]  }
   0x3   :  { %247 = vmatpush3.bf16.msra.mxu0 %v266_v0  ;;  %262 = vmatprep.mubr.bf16.mxu0 %v274_v4  ;;  %v270_v5 = vld [vmem:[%s335_s1 + $0x20] sm:$0xff]   ;;  %v272_v7 = vld [vmem:[%s335_s1 + $0x30] sm:$0xff]   ;;  %v273_v8 = vld [vmem:[%s335_s1 + $0x38] sm:$0xff]  }
   0x4   :  { %248 = vmatprep.subr.bf16.mxu0 %v267_v1  ;;  %v275_v9 = vld [vmem:[%s336_s0 + $0x8] sm:$0xff]   ;;  %v216_v11 = vld [vmem:[%s337_s2] ss:$0 sm:$0xff] }
   0x7   :  { %249 = vmatpush3.bf16.msra.mxu0 %v267_v1 }
   0x8   :  { %250 = vmatprep.subr.bf16.mxu0 %v268_v2 }
   0xb   :  { %251 = vmatpush3.bf16.msra.mxu0 %v268_v2 }
   0xc   :  { %252 = vmatprep.subr.bf16.mxu0 %v269_v3 }
   0xf   :  { %253 = vmatpush3.bf16.msra.mxu0 %v269_v3 }
  0x10   :  { %254 = vmatprep.subr.bf16.mxu0 %v270_v5 }
  0x13   :  { %255 = vmatpush3.bf16.msra.mxu0 %v270_v5 }
  0x14   :  { %256 = vmatprep.subr.bf16.mxu0 %v271_v6 }
  0x17   :  { %257 = vmatpush3.bf16.msra.mxu0 %v271_v6 }
  0x18   :  { %258 = vmatprep.subr.bf16.mxu0 %v272_v7 }
  0x1b   :  { %259 = vmatpush3.bf16.msra.mxu0 %v272_v7 }
  0x1c   :  { %260 = vmatprep.subr.bf16.mxu0 %v273_v8 }
  0x1f   :  { %261 = vmatpush3.bf16.msra.mxu0 %v273_v8 }
  0x22   :  { %263 = vmatmul.mubr.bf16.vlgmr.msra.gmra.mrb[0].mxu0 %v275_v9 }
  0xf5   :  { %v264_v10 = vpop.f32.mrb[0].mxu0 }
  0xf6   :  { %v141_v12 = vpop.f32.mrb[1].mxu0  ;;  %v180_v14 = vadd.f32 %v264_v10, %v216_v11 }
  0xf7   :  { %v265_v13 = vpop.f32.mrb[2].mxu0  ;;  %v178_v17 = vadd.f32 %v216_v11, %v141_v12 }
  0xf8   :  { %v181_v15 = vadd.f32 %v265_v13, %v216_v11  ;;  %v144_v16 = vpop.f32.mrb[3].mxu0 }
  0xf9   :  { %v179_v18 = vadd.f32 %v216_v11, %v144_v16 }
  0xfa   :  { %v233_v19 = vpack.c.bf16 %v181_v15, %v180_v14 }
  0xfb   :  { %v228_v20 = vpack.c.bf16 %v179_v18, %v178_v17 }
  0xfc   :  { %235 = vst [vmem:[%s338_s3 + $0x8] sm:$0xff] %v233_v19  }
  0xfd   :  { %229 = vst [vmem:[%s338_s3] sm:$0xff] %v228_v20  }

// kernel: _lambda_.29
= control target key start
LH: loop header
LB: loop body
LE: loop exit
PB: predicated region body
PF: predicated region fallthrough
CT: control target
= control target key end

     0   :  { %s1071_s12 = smov 0   ;;  %s1073_s13 = smov 0   ;;  %s1181_s0 = inlined_call_operand.vmem [shape: bf16[32,1152], index: 0, kind: input, shape index: {}]   ;;  %s1182_s1 = inlined_call_operand.vmem [shape: bf16[1152,128], index: 1, kind: input, shape index: {}]   ;;  %s1183_s2 = inlined_call_operand.vmem [shape: f32[1,128], index: 2, kind: input, shape index: {}]   ;;  %s1184_s3 = inlined_call_operand.vmem [shape: bf16[32,128], index: 3, kind: output, shape index: {}]  }
   0x1   :  { %s1075_s14 = smov 0   ;;  %s1077_s15 = smov 0  }
   0x2   :  { %s1079_s16 = smov 0  }
   0x3 LB: > { %s25_s17 = sadd.s32 1, %s1044_s15  ;;  %p48_p1 = scmp.ne.s32.totalorder %s1036_s13, %s1032_s12  ;;  %s1048_s16 = sphi %s1079_s16, %s13_s16   ;;  %s1044_s15 = sphi %s1077_s15, %s1188_s15   ;;  %s1040_s14 = sphi %s1075_s14, %s1187_s14   ;;  %s1036_s13 = sphi %s1073_s13, %s1186_s13   ;;  %s1032_s12 = sphi %s1071_s12, %s1185_s12  }
   0x4   : > { %p26_p0 = scmp.ge.s32.totalorder %s25_s17, 3  ;;  %p49_p2 = scmp.eq.s32.totalorder %s1048_s16, 0 }
   0x5   : > { %s41_s19 = sadd.s32 1, %s1036_s13  ;;  %p808_p5 = scmp.ge.s32.totalorder %s1048_s16, 3 }
   0x6   : > { %s1190_s17 = smov (%p26_p0, %s25_s17), 0  ;;  %p50_p3 = por %p49_p2, %p48_p1 }
   0x7   : > { %s37_s18 = ssub.s32 %s1044_s15, %s1190_s17  ;;  %162 = sbr.rel (%p808_p5) target bundleno = 23 (0x17), region = 20 }
   0x8   : > { %p39_p4 = scmp.eq.s32.totalorder %s37_s18, 0 }
   0xa   : > { %s1106_s20 = scalar_select %p39_p4, %s1036_s13, %s41_s19  }
   0xe   : > { %165 = sbr.rel (!%p50_p3) target bundleno = 23 (0x17), region = 24  ;;  %s167_s21 = sand.u32 (%p50_p3), 1, %s1036_s13  }
   0xf   : > { %s861_s22 = smul.u32 (%p50_p3), 12, %s1044_s15 }
  0x10   : > { %s935_s23 = smul.u32 (%p50_p3), 48, %s167_s21 }
  0x11   : > { %s175_s26 = scalar_lea.vmem (%p50_p3), %s1181_s0, %s861_s22 }
  0x12   : > { %v190_v0 = vld [vmem:[%s175_s26] sm:$0xff] (%p50_p3)  ;;  %v194_v2 = vld [vmem:[%s175_s26 + $0x48] sm:$0xff] (%p50_p3)  ;;  %s169_s27 = scalar_lea.vmem (%p50_p3), [#allocation3], %s935_s23  ;;  %v814_v6 = vld [vmem:[%s175_s26 + $0x50] sm:$0xf] (%p50_p3) }
  0x13   : > { %v192_v1 = vld [vmem:[%s175_s26 + $0x24] sm:$0xff] (%p50_p3)  ;;  %191 = vst [vmem:[%s169_s27] sm:$0xff] (%p50_p3), %v190_v0  ;;  %195 = vst [vmem:[%s169_s27 + $0x18] sm:$0xff] (%p50_p3), %v194_v2  ;;  %v196_v3 = vld [vmem:[%s175_s26 + $0x6c] sm:$0xff] (%p50_p3) }
  0x14   : > { %193 = vst [vmem:[%s169_s27 + $0xc] sm:$0xff] (%p50_p3), %v192_v1  ;;  %v810_v4 = vld [vmem:[%s175_s26 + $0x8] sm:$0xf] (%p50_p3)  ;;  %v812_v5 = vld [vmem:[%s175_s26 + $0x2c] sm:$0xf] (%p50_p3)  ;;  %197 = vst [vmem:[%s169_s27 + $0x24] sm:$0xff] (%p50_p3), %v196_v3 }
  0x15   : > { %811 = vst [vmem:[%s169_s27 + $0x8] sm:$0xf] %v810_v4  ;;  %813 = vst [vmem:[%s169_s27 + $0x14] sm:$0xf] %v812_v5  ;;  %v816_v7 = vld [vmem:[%s175_s26 + $0x74] sm:$0xf] }
  0x16   : > { %815 = vst [vmem:[%s169_s27 + $0x20] sm:$0xf] %v814_v6  ;;  %817 = vst [vmem:[%s169_s27 + $0x2c] sm:$0xf] %v816_v7 }
  0x17 PF: > { %p818_p6 = scmp.ge.s32.totalorder %s1048_s16, 1  ;;  %p229_p7 = scmp.lt.s32.totalorder %s1048_s16, 4 }
  0x19   : > { %p230_p8 = pnand %p818_p6, %p229_p7 }
  0x1a   : > { %s236_s28 = sand.u32 (!%p230_p8), 1, %s1032_s12   ;;  %s275_s29 = smul.u32 (!%p230_p8), 48, %s1040_s14 }
  0x1b   : > { %233 = sbr.rel (%p230_p8) target bundleno = 318 (0x13e), region = 54  ;;  %p820_p10 = scmp.ne.s32.totalorder (!%p230_p8), %s1040_s14, 0 }
  0x1c   : > { %s936_s30 = smul.u32 (!%p230_p8), 48, %s236_s28  ;;  %p276_p9 = scmp.lt.s32.totalorder (!%p230_p8), %s275_s29, 143 }
  0x1e   : > { %s1123_s8 = scalar_lea.vmem (!%p230_p8), [#allocation3], %s936_s30 }
  0x22   : > { %s1192_s29 = smov (!%p276_p9, %s275_s29), 143  ;;  %300 = sbr.rel (%p820_p10) target bundleno = 41 (0x29), region = 62 }
  0x23   : > { %s819_s4 = sshll.u32 %s1192_s29, 2  ;;  %v1050_v8 = vmov (!%p820_p10), 0.0  }
  0x24   : > { %s1121_s7 = scalar_lea.vmem %s1182_s1, %s819_s4  ;;  %301 = vst [vmem:[#allocation2] sm:$0xff] (!%p820_p10), %v1050_v8  ;;  %302 = vst [vmem:[#allocation2 + $0x8] sm:$0xff] (!%p820_p10), %v1050_v8 }
  0x25   : > { %303 = vst [vmem:[#allocation2 + $0x10] sm:$0xff] (!%p820_p10), %v1050_v8  ;;  %304 = vst [vmem:[#allocation2 + $0x18] sm:$0xff] (!%p820_p10), %v1050_v8 }
  0x29 PF: > { %v978_v9 = vld [vmem:[%s1121_s7 + $0x40] sm:$0xff]   ;;  %v981_v12 = vld [vmem:[%s1121_s7 + $0x48] sm:$0xff]   ;;  %v984_v15 = vld [vmem:[%s1121_s7 + $0x50] sm:$0xff]   ;;  %p851_p11 = scmp.ne.s32.totalorder %s1040_s14, 2 }
  0x2a   : > { %v979_v10 = vld [vmem:[%s1121_s7] sm:$0xff]   ;;  %877 = vmatprep.subr.bf16.mxu0 %v978_v9  ;;  %v982_v13 = vld [vmem:[%s1121_s7 + $0x8] sm:$0xff]   ;;  %v985_v16 = vld [vmem:[%s1121_s7 + $0x10] sm:$0xff]  }
  0x2b   : > { %v980_v11 = vld [vmem:[%s1121_s7 + $0x80] sm:$0xff]   ;;  %878 = vmatpush3.bf16.msra.mxu0 %v979_v10  ;;  %v983_v14 = vld [vmem:[%s1121_s7 + $0x88] sm:$0xff]   ;;  %v986_v17 = vld [vmem:[%s1121_s7 + $0x90] sm:$0xff]  }
  0x2c   : > { %915 = vmatprep.subr.bf16.mxu1 %v980_v11  ;;  %879 = vmatprep.subr.bf16.mxu0 %v981_v12  ;;  %v987_v18 = vld [vmem:[%s1121_s7 + $0x58] sm:$0xff]   ;;  %v990_v21 = vld [vmem:[%s1121_s7 + $0x60] sm:$0xff]   ;;  %v993_v24 = vld [vmem:[%s1121_s7 + $0x68] sm:$0xff]  }
  0x2d   : > { %916 = vmatpush3.bf16.msra.mxu1 %v980_v11  ;;  %v988_v19 = vld [vmem:[%s1121_s7 + $0x18] sm:$0xff]   ;;  %v992_v22 = vld [vmem:[%s1121_s7 + $0xa0] sm:$0xff]   ;;  %v995_v25 = vld [vmem:[%s1121_s7 + $0xa8] sm:$0xff]  }
  0x2e   : > { %917 = vmatprep.subr.bf16.mxu1 %v983_v14  ;;  %v989_v20 = vld [vmem:[%s1121_s7 + $0x98] sm:$0xff]   ;;  %v991_v23 = vld [vmem:[%s1121_s7 + $0x20] sm:$0xff]   ;;  %v994_v26 = vld [vmem:[%s1121_s7 + $0x28] sm:$0xff]  }
  0x2f   : > { %880 = vmatpush3.bf16.msra.mxu0 %v982_v13  ;;  %v996_v27 = vld [vmem:[%s1121_s7 + $0x70] sm:$0xff]   ;;  %v999_v30 = vld [vmem:[%s1121_s7 + $0x78] sm:$0xff]   ;;  %v305_v45 = vld [vmem:[#allocation2] sm:$0xff] }
  0x30   : > { %881 = vmatprep.subr.bf16.mxu0 %v984_v15  ;;  %v997_v28 = vld [vmem:[%s1121_s7 + $0x30] sm:$0xff]   ;;  %v1001_v31 = vld [vmem:[%s1121_s7 + $0xb8] sm:$0xff]   ;;  %v306_v50 = vld [vmem:[#allocation2 + $0x8] sm:$0xff] }
  0x31   : > { %918 = vmatpush3.bf16.msra.mxu1 %v983_v14  ;;  %v998_v29 = vld [vmem:[%s1121_s7 + $0xb0] sm:$0xff]   ;;  %v1000_v34 = vld [vmem:[%s1121_s7 + $0x38] sm:$0xff]   ;;  %v852_v5 = vld [vmem:[%s1183_s2] ss:$0 sm:$0xff] (!%p851_p11) }
  0x32   : > { %919 = vmatprep.subr.bf16.mxu1 %v986_v17  ;;  %v1004_v32 = vld [vmem:[%s1123_s8 + $0x4] ss:$12 sps:$4 sm:$0xff]   ;;  %v1005_v33 = vld [vmem:[%s1123_s8 + $0x8] ss:$12 sps:$4 sm:$0xff]   ;;  %v1002_v35 = vld [vmem:[%s1123_s8] ss:$12 sps:$4 sm:$0xff]  }
  0x33   : > { %882 = vmatpush3.bf16.msra.mxu0 %v985_v16  ;;  %573 = vmatprep.mubr.bf16.mxu0 %v1004_v32  ;;  %v1007_v36 = vld [vmem:[%s1123_s8 + $0x1c] ss:$12 sps:$4 sm:$0xff]   ;;  %v1006_v37 = vld [vmem:[%s1123_s8 + $0x20] ss:$12 sps:$4 sm:$0xff]   ;;  %v1009_v38 = vld [vmem:[%s1123_s8 + $0x18] ss:$12 sps:$4 sm:$0xff]  }
  0x34   : > { %883 = vmatprep.subr.bf16.mxu0 %v987_v18  ;;  %931 = vmatprep.mubr.bf16.mxu1 %v1005_v33  ;;  %v307_v59 = vld [vmem:[#allocation2 + $0x10] sm:$0xff]  ;;  %v308_v63 = vld [vmem:[#allocation2 + $0x18] sm:$0xff] }
  0x35   : > { %920 = vmatpush3.bf16.msra.mxu1 %v986_v17 }
  0x36   : > { %921 = vmatprep.subr.bf16.mxu1 %v989_v20 }
  0x37   : > { %884 = vmatpush3.bf16.msra.mxu0 %v988_v19 }
  0x38   : > { %885 = vmatprep.subr.bf16.mxu0 %v990_v21 }
  0x39   : > { %922 = vmatpush3.bf16.msra.mxu1 %v989_v20 }
  0x3a   : > { %923 = vmatprep.subr.bf16.mxu1 %v992_v22 }
  0x3b   : > { %886 = vmatpush3.bf16.msra.mxu0 %v991_v23 }
  0x3c   : > { %887 = vmatprep.subr.bf16.mxu0 %v993_v24 }
  0x3d   : > { %924 = vmatpush3.bf16.msra.mxu1 %v992_v22 }
  0x3e   : > { %925 = vmatprep.subr.bf16.mxu1 %v995_v25 }
  0x3f   : > { %888 = vmatpush3.bf16.msra.mxu0 %v994_v26 }
  0x40   : > { %889 = vmatprep.subr.bf16.mxu0 %v996_v27 }
  0x41   : > { %926 = vmatpush3.bf16.msra.mxu1 %v995_v25 }
  0x42   : > { %927 = vmatprep.subr.bf16.mxu1 %v998_v29 }
  0x43   : > { %890 = vmatpush3.bf16.msra.mxu0 %v997_v28 }
  0x44   : > { %891 = vmatprep.subr.bf16.mxu0 %v999_v30 }
  0x45   : > { %928 = vmatpush3.bf16.msra.mxu1 %v998_v29 }
  0x46   : > { %929 = vmatprep.subr.bf16.mxu1 %v1001_v31 }
  0x47   : > { %892 = vmatpush3.bf16.msra.mxu0 %v1000_v34 }
  0x49   : > { %930 = vmatpush3.bf16.msra.mxu1 %v1001_v31 }
  0x4a   : > { %574 = vmatmul.mubr.bf16.vlgmr.msra.gmra.mrb[0].mxu0 %v1002_v35 }
  0x4b   : > { %581 = vmatprep.mubr.bf16.mxu0 %v1007_v36 }
  0x4c   : > { %932 = vmatmul.mubr.bf16.vlgmr.msra.gmra.mrb[0].mxu1 %v1006_v37 }
  0x52   : > { %582 = vmatmul.mubr.bf16.gmra.mrb[4].mxu0 %v1009_v38 }
 0x11d   : > { %v893_v39 = vpop.f32.mrb[0].mxu0 }
 0x11e   : > { %v894_v40 = vpop.f32.mrb[1].mxu0 }
 0x11f   : > { %v895_v41 = vadd.f32 %v894_v40, %v893_v39  ;;  %v896_v42 = vpop.f32.mrb[2].mxu0  ;;  %v933_v43 = vpop.f32.mrb[0].mxu1 }
 0x120   : > { %v897_v44 = vpop.f32.mrb[3].mxu0  ;;  %v624_v46 = vpop.f32.mrb[1].mxu1 }
 0x121   : > { %v898_v47 = vadd.f32 %v897_v44, %v896_v42  ;;  %v625_v48 = vadd.f32 %v895_v41, %v624_v46  ;;  %v934_v49 = vpop.f32.mrb[2].mxu1 }
 0x122   : > { %v627_v51 = vpop.f32.mrb[3].mxu1 }
 0x123   : > { %v639_v52 = vadd.f32 %v625_v48, %v305_v45  ;;  %v628_v53 = vadd.f32 %v898_v47, %v627_v51 }
 0x125   : > { %643 = vst [vmem:[#allocation2] sm:$0xff] %v639_v52  ;;  %v640_v54 = vadd.f32 %v628_v53, %v306_v50  ;;  %v899_v55 = vpop.f32.mrb[4].mxu0 }
 0x126   : > { %v900_v56 = vpop.f32.mrb[5].mxu0 }
 0x127   : > { %644 = vst [vmem:[#allocation2 + $0x8] sm:$0xff] %v640_v54  ;;  %v901_v57 = vadd.f32 %v900_v56, %v899_v55  ;;  %v902_v58 = vpop.f32.mrb[6].mxu0 }
 0x128   : > { %v903_v60 = vpop.f32.mrb[7].mxu0 }
 0x129   : > { %v633_v61 = vadd.f32 %v933_v43, %v901_v57  ;;  %v904_v62 = vadd.f32 %v903_v60, %v902_v58  ;;  %650 = sbr.rel (%p851_p11) target bundleno = 318 (0x13e), region = 66 }
 0x12b   : > { %v641_v0 = vadd.f32 %v633_v61, %v307_v59  ;;  %v636_v1 = vadd.f32 %v934_v49, %v904_v62 }
 0x12c   : > { %v651_v3 = vld [vmem:[#allocation2] sm:$0xff] (!%p851_p11) }
 0x12d   : > { %645 = vst [vmem:[#allocation2 + $0x10] sm:$0xff] %v641_v0  ;;  %v642_v2 = vadd.f32 %v636_v1, %v308_v63  ;;  %v662_v6 = vadd.f32 (!%p851_p11), %v852_v5, %v651_v3 }
 0x12e   : > { %v652_v4 = vld [vmem:[#allocation2 + $0x8] sm:$0xff] (!%p851_p11) }
 0x12f   : > { %646 = vst [vmem:[#allocation2 + $0x18] sm:$0xff] %v642_v2  ;;  %v663_v7 = vadd.f32 (!%p851_p11), %v852_v5, %v652_v4  ;;  %v666_v12 = vmax.f32 (!%p851_p11), %v662_v6, 0.0 }
 0x131   : > { %v667_v13 = vmax.f32 %v663_v7, 0.0 }
 0x133   : > { %v869_v16 = vpack.c.bf16 %v667_v13, %v666_v12 }
 0x134   : > { %v653_v8 = vld [vmem:[#allocation2 + $0x10] sm:$0xff] }
 0x135   : > { %v664_v10 = vadd.f32 %v852_v5, %v653_v8  ;;  %870 = vst [vmem:[%s1184_s3] sm:$0xff] %v869_v16  }
 0x136   : > { %v654_v9 = vld [vmem:[#allocation2 + $0x18] sm:$0xff] }
 0x137   : > { %v665_v11 = vadd.f32 %v852_v5, %v654_v9  ;;  %v668_v14 = vmax.f32 %v664_v10, 0.0 }
 0x139   : > { %v669_v15 = vmax.f32 %v665_v11, 0.0 }
 0x13b   : > { %v874_v17 = vpack.c.bf16 %v669_v15, %v668_v14 }
 0x13d   : > { %876 = vst [vmem:[%s1184_s3 + $0x8] sm:$0xff] %v874_v17  }
 0x13e PF: > { %s13_s16 = sadd.s32 1, %s1048_s16   ;;  %s1185_s12 = smov %s1036_s13 }
 0x13f   : > { %p10_p12 = scmp.ge.s32.totalorder %s13_s16, 5   ;;  %s1186_s13 = smov %s1106_s20 }
 0x140   : > { %s1187_s14 = smov %s1044_s15  ;;  %s1188_s15 = smov %s1190_s17 }
 0x141   :  { %12 = sbr.rel (!%p10_p12) target bundleno = 3 (0x3), region = 113 }

// kernel: _lambda_.31
= control target key start
LH: loop header
LB: loop body
LE: loop exit
PB: predicated region body
PF: predicated region fallthrough
CT: control target
= control target key end

     0   :  { %s1151_s12 = smov 0   ;;  %s1153_s13 = smov 0   ;;  %s1282_s0 = inlined_call_operand.vmem [shape: bf16[16,1152], index: 0, kind: input, shape index: {}]   ;;  %s1283_s1 = inlined_call_operand.vmem [shape: bf16[1152,256], index: 1, kind: input, shape index: {}]   ;;  %s1284_s2 = inlined_call_operand.vmem [shape: f32[1,256], index: 2, kind: input, shape index: {}]   ;;  %s1285_s3 = inlined_call_operand.vmem [shape: bf16[16,256], index: 3, kind: output, shape index: {}]  }
   0x1   :  { %s1155_s14 = smov 0   ;;  %s1157_s15 = smov 0  }
   0x2   :  { %s1159_s16 = smov 0  }
   0x3 LB: > { %s25_s17 = sadd.s32 1, %s1123_s15  ;;  %p48_p1 = scmp.ne.s32.totalorder %s1115_s13, %s1111_s12  ;;  %s1127_s16 = sphi %s1159_s16, %s13_s16   ;;  %s1123_s15 = sphi %s1157_s15, %s1289_s15   ;;  %s1119_s14 = sphi %s1155_s14, %s1288_s14   ;;  %s1115_s13 = sphi %s1153_s13, %s1287_s13   ;;  %s1111_s12 = sphi %s1151_s12, %s1286_s12  }
   0x4   : > { %p26_p0 = scmp.ge.s32.totalorder %s25_s17, 3  ;;  %p49_p2 = scmp.eq.s32.totalorder %s1127_s16, 0 }
   0x5   : > { %s41_s19 = sadd.s32 1, %s1115_s13  ;;  %p893_p5 = scmp.ge.s32.totalorder %s1127_s16, 3 }
   0x6   : > { %s1291_s17 = smov (%p26_p0, %s25_s17), 0  ;;  %p50_p3 = por %p49_p2, %p48_p1 }
   0x7   : > { %s37_s18 = ssub.s32 %s1123_s15, %s1291_s17  ;;  %164 = sbr.rel (%p893_p5) target bundleno = 21 (0x15), region = 20 }
   0x8   : > { %p39_p4 = scmp.eq.s32.totalorder %s37_s18, 0 }
   0xa   : > { %s1186_s20 = scalar_select %p39_p4, %s1115_s13, %s41_s19  }
   0xe   : > { %167 = sbr.rel (!%p50_p3) target bundleno = 21 (0x15), region = 24  ;;  %s169_s21 = sand.u32 (%p50_p3), 1, %s1115_s13  }
   0xf   : > { %s961_s22 = smul.u32 (%p50_p3), 12, %s1123_s15 }
  0x10   : > { %s969_s23 = smul.u32 (%p50_p3), 24, %s169_s21 }
  0x11   : > { %s177_s26 = scalar_lea.vmem (%p50_p3), %s1282_s0, %s961_s22 }
  0x12   : > { %v192_v0 = vld [vmem:[%s177_s26] sm:$0xff] (%p50_p3)  ;;  %v895_v2 = vld [vmem:[%s177_s26 + $0x8] sm:$0xf] (%p50_p3)  ;;  %s171_s27 = scalar_lea.vmem (%p50_p3), [#allocation3], %s969_s23  ;;  %v897_v3 = vld [vmem:[%s177_s26 + $0x2c] sm:$0xf] (%p50_p3) }
  0x13   : > { %v194_v1 = vld [vmem:[%s177_s26 + $0x24] sm:$0xff] (%p50_p3)  ;;  %193 = vst [vmem:[%s171_s27] sm:$0xff] (%p50_p3), %v192_v0  ;;  %896 = vst [vmem:[%s171_s27 + $0x8] sm:$0xf] (%p50_p3), %v895_v2 }
  0x14   : > { %195 = vst [vmem:[%s171_s27 + $0xc] sm:$0xff] (%p50_p3), %v194_v1  ;;  %898 = vst [vmem:[%s171_s27 + $0x14] sm:$0xf] (%p50_p3), %v897_v3 }
  0x15 PF: > { %p899_p6 = scmp.ge.s32.totalorder %s1127_s16, 1  ;;  %p226_p7 = scmp.lt.s32.totalorder %s1127_s16, 4 }
  0x17   : > { %p227_p8 = pnand %p899_p6, %p226_p7 }
  0x18   : > { %s233_s28 = sand.u32 (!%p227_p8), 1, %s1111_s12   ;;  %s277_s29 = smul.u32 (!%p227_p8), 48, %s1119_s14 }
  0x19   : > { %230 = sbr.rel (%p227_p8) target bundleno = 338 (0x152), region = 54  ;;  %p902_p10 = scmp.ne.s32.totalorder (!%p227_p8), %s1119_s14, 0 }
  0x1a   : > { %s970_s30 = smul.u32 (!%p227_p8), 24, %s233_s28  ;;  %p279_p9 = scmp.lt.s32.totalorder (!%p227_p8), %s277_s29, 143 }
  0x1c   : > { %s1203_s8 = scalar_lea.vmem (!%p227_p8), [#allocation3], %s970_s30 }
  0x20   : > { %s1293_s29 = smov (!%p279_p9, %s277_s29), 143  ;;  %310 = sbr.rel (%p902_p10) target bundleno = 39 (0x27), region = 62 }
  0x21   : > { %s962_s4 = sshll.u32 %s1293_s29, 3  ;;  %v1129_v4 = vmov (!%p902_p10), 0.0  }
  0x22   : > { %s1201_s7 = scalar_lea.vmem %s1283_s1, %s962_s4  ;;  %311 = vst [vmem:[#allocation2] sm:$0xff] (!%p902_p10), %v1129_v4  ;;  %312 = vst [vmem:[#allocation2 + $0x8] sm:$0xff] (!%p902_p10), %v1129_v4 }
  0x23   : > { %313 = vst [vmem:[#allocation2 + $0x10] sm:$0xff] (!%p902_p10), %v1129_v4  ;;  %314 = vst [vmem:[#allocation2 + $0x18] sm:$0xff] (!%p902_p10), %v1129_v4 }
  0x27 PF: > { %v1013_v5 = vld [vmem:[%s1201_s7 + $0x4] ss:$8 sps:$4 sm:$0xff]   ;;  %v1015_v6 = vld [vmem:[%s1201_s7] ss:$8 sps:$4 sm:$0xff]   ;;  %v1130_v7 = vmov 0   ;;  %p954_p11 = scmp.ne.s32.totalorder %s1119_s14, 2 }
  0x28   : > { %702 = vmatprep.mubr.bf16.mxu0 %v1130_v7  ;;  %627 = vmatprep.subr.bf16.mxu1 %v1013_v5  ;;  %v1016_v8 = vld [vmem:[%s1201_s7 + $0x14] ss:$8 sps:$4 sm:$0xff]   ;;  %v1018_v9 = vld [vmem:[%s1201_s7 + $0x10] ss:$8 sps:$4 sm:$0xff]   ;;  %v1019_v10 = vld [vmem:[%s1201_s7 + $0x24] ss:$8 sps:$4 sm:$0xff]  }
  0x29   : > { %628 = vmatpush1.bf16.msra.mxu1 %v1015_v6  ;;  %v1021_v11 = vld [vmem:[%s1201_s7 + $0x20] ss:$8 sps:$4 sm:$0xff]   ;;  %v1022_v12 = vld [vmem:[%s1201_s7 + $0x34] ss:$8 sps:$4 sm:$0xff]   ;;  %v1024_v13 = vld [vmem:[%s1201_s7 + $0x30] ss:$8 sps:$4 sm:$0xff]  }
  0x2a   : > { %629 = vmatprep.subr.bf16.mxu1 %v1016_v8  ;;  %v1037_v14 = vld [vmem:[%s1201_s7 + $0x104] ss:$8 sps:$4 sm:$0xff]   ;;  %v1039_v15 = vld [vmem:[%s1201_s7 + $0x100] ss:$8 sps:$4 sm:$0xff]   ;;  %v1043_v17 = vld [vmem:[%s1201_s7 + $0x114] ss:$8 sps:$4 sm:$0xff]  }
  0x2b   : > { %v1025_v16 = vld [vmem:[%s1201_s7 + $0x44] ss:$8 sps:$4 sm:$0xff]   ;;  %670 = vmatprep.subr.bf16.mxu0 %v1037_v14  ;;  %v1045_v18 = vld [vmem:[%s1201_s7 + $0x110] ss:$8 sps:$4 sm:$0xff]   ;;  %v1027_v19 = vld [vmem:[%s1201_s7 + $0x40] ss:$8 sps:$4 sm:$0xff]  }
  0x2c   : > { %671 = vmatpush1.bf16.msra.mxu0 %v1039_v15  ;;  %v1028_v20 = vld [vmem:[%s1201_s7 + $0x54] ss:$8 sps:$4 sm:$0xff]   ;;  %v1049_v21 = vld [vmem:[%s1201_s7 + $0x124] ss:$8 sps:$4 sm:$0xff]   ;;  %v1051_v22 = vld [vmem:[%s1201_s7 + $0x120] ss:$8 sps:$4 sm:$0xff]  }
  0x2d   : > { %630 = vmatpush1.bf16.msra.mxu1 %v1018_v9  ;;  %672 = vmatprep.subr.bf16.mxu0 %v1043_v17  ;;  %v1030_v23 = vld [vmem:[%s1201_s7 + $0x50] ss:$8 sps:$4 sm:$0xff]   ;;  %v1055_v24 = vld [vmem:[%s1201_s7 + $0x134] ss:$8 sps:$4 sm:$0xff]   ;;  %v1031_v25 = vld [vmem:[%s1201_s7 + $0x64] ss:$8 sps:$4 sm:$0xff]  }
  0x2e   : > { %631 = vmatprep.subr.bf16.mxu1 %v1019_v10  ;;  %v1057_v26 = vld [vmem:[%s1201_s7 + $0x130] ss:$8 sps:$4 sm:$0xff]   ;;  %v1033_v27 = vld [vmem:[%s1201_s7 + $0x60] ss:$8 sps:$4 sm:$0xff]   ;;  %v1061_v28 = vld [vmem:[%s1201_s7 + $0x144] ss:$8 sps:$4 sm:$0xff]  }
  0x2f   : > { %v1034_v29 = vld [vmem:[%s1201_s7 + $0x74] ss:$8 sps:$4 sm:$0xff]   ;;  %v1063_v30 = vld [vmem:[%s1201_s7 + $0x140] ss:$8 sps:$4 sm:$0xff]   ;;  %v1036_v31 = vld [vmem:[%s1201_s7 + $0x70] ss:$8 sps:$4 sm:$0xff]  }
  0x30   : > { %673 = vmatpush1.bf16.msra.mxu0 %v1045_v18  ;;  %v1067_v32 = vld [vmem:[%s1201_s7 + $0x154] ss:$8 sps:$4 sm:$0xff]   ;;  %v1040_v33 = vld [vmem:[%s1201_s7 + $0x84] ss:$8 sps:$4 sm:$0xff]   ;;  %v1069_v34 = vld [vmem:[%s1201_s7 + $0x150] ss:$8 sps:$4 sm:$0xff]  }
  0x31   : > { %632 = vmatpush1.bf16.msra.mxu1 %v1021_v11  ;;  %674 = vmatprep.subr.bf16.mxu0 %v1049_v21  ;;  %v1042_v35 = vld [vmem:[%s1201_s7 + $0x80] ss:$8 sps:$4 sm:$0xff]   ;;  %v1073_v36 = vld [vmem:[%s1201_s7 + $0x164] ss:$8 sps:$4 sm:$0xff]   ;;  %v1046_v37 = vld [vmem:[%s1201_s7 + $0x94] ss:$8 sps:$4 sm:$0xff]  }
  0x32   : > { %633 = vmatprep.subr.bf16.mxu1 %v1022_v12  ;;  %v1075_v38 = vld [vmem:[%s1201_s7 + $0x160] ss:$8 sps:$4 sm:$0xff]   ;;  %v1048_v40 = vld [vmem:[%s1201_s7 + $0x90] ss:$8 sps:$4 sm:$0xff]   ;;  %v1079_v41 = vld [vmem:[%s1201_s7 + $0x174] ss:$8 sps:$4 sm:$0xff]  }
  0x33   : > { %v1088_v39 = vld [vmem:[%s1203_s8 + $0x4] ss:$12 sps:$4 sm:$0xff]   ;;  %v1085_v46 = vld [vmem:[%s1203_s8 + $0x8] ss:$12 sps:$4 sm:$0xff]   ;;  %v1086_v56 = vld [vmem:[%s1203_s8] ss:$12 sps:$4 sm:$0xff]  }
  0x34   : > { %675 = vmatpush1.bf16.msra.mxu0 %v1051_v22  ;;  %v1052_v42 = vld [vmem:[%s1201_s7 + $0xa4] ss:$8 sps:$4 sm:$0xff]   ;;  %659 = vmatprep.mubr.bf16.mxu1 %v1088_v39  ;;  %v1081_v43 = vld [vmem:[%s1201_s7 + $0x170] ss:$8 sps:$4 sm:$0xff]   ;;  %v1054_v44 = vld [vmem:[%s1201_s7 + $0xa0] ss:$8 sps:$4 sm:$0xff]  }
  0x35   : > { %634 = vmatpush1.bf16.msra.mxu1 %v1024_v13  ;;  %676 = vmatprep.subr.bf16.mxu0 %v1055_v24  ;;  %v1058_v45 = vld [vmem:[%s1201_s7 + $0xb4] ss:$8 sps:$4 sm:$0xff]   ;;  %v1060_v47 = vld [vmem:[%s1201_s7 + $0xb0] ss:$8 sps:$4 sm:$0xff]   ;;  %v1064_v48 = vld [vmem:[%s1201_s7 + $0xc4] ss:$8 sps:$4 sm:$0xff]   ;;  %v731_v13 = vlaneseq (!%p954_p11) }
  0x36   : > { %635 = vmatprep.subr.bf16.mxu1 %v1025_v16  ;;  %v1066_v49 = vld [vmem:[%s1201_s7 + $0xc0] ss:$8 sps:$4 sm:$0xff]   ;;  %v1070_v50 = vld [vmem:[%s1201_s7 + $0xd4] ss:$8 sps:$4 sm:$0xff]   ;;  %v1072_v51 = vld [vmem:[%s1201_s7 + $0xd0] ss:$8 sps:$4 sm:$0xff]  }
  0x37   : > { %v1076_v52 = vld [vmem:[%s1201_s7 + $0xe4] ss:$8 sps:$4 sm:$0xff]   ;;  %v1078_v53 = vld [vmem:[%s1201_s7 + $0xe0] ss:$8 sps:$4 sm:$0xff]   ;;  %v1082_v54 = vld [vmem:[%s1201_s7 + $0xf4] ss:$8 sps:$4 sm:$0xff]  }
  0x38   : > { %677 = vmatpush1.bf16.msra.mxu0 %v1057_v26  ;;  %v1084_v55 = vld [vmem:[%s1201_s7 + $0xf0] ss:$8 sps:$4 sm:$0xff]   ;;  %v315_v61 = vld [vmem:[#allocation2] sm:$0xff]  ;;  %v316_v0 = vld [vmem:[#allocation2 + $0x8] sm:$0xff]  ;;  %v732_v14 = vshrl.u32 (!%p954_p11), %v731_v13, 7 }
  0x39   : > { %636 = vmatpush1.bf16.msra.mxu1 %v1027_v19  ;;  %678 = vmatprep.subr.bf16.mxu0 %v1061_v28  ;;  %v317_v3 = vld [vmem:[#allocation2 + $0x10] sm:$0xff]  ;;  %v318_v7 = vld [vmem:[#allocation2 + $0x18] sm:$0xff]  ;;  %v729_v15 = vld [vmem:[%s1284_s2] sm:$0x3] (!%p954_p11) }
  0x3a   : > { %637 = vmatprep.subr.bf16.mxu1 %v1028_v20  ;;  %v733_v17 = vsub.s32 (!%p954_p11), 0, %v732_v14  ;;  %v737_v18 = vsub.s32 (!%p954_p11), 1, %v732_v14 }
  0x3c   : > { %679 = vmatpush1.bf16.msra.mxu0 %v1063_v30  ;;  %v734_v22 = vrot.slane (!%p954_p11), %v729_v15, %v733_v17 }
  0x3d   : > { %638 = vmatpush1.bf16.msra.mxu1 %v1030_v23  ;;  %680 = vmatprep.subr.bf16.mxu0 %v1067_v32  ;;  %v738_v23 = vrot.slane (!%p954_p11), %v729_v15, %v737_v18 }
  0x3e   : > { %639 = vmatprep.subr.bf16.mxu1 %v1031_v25 }
  0x40   : > { %681 = vmatpush1.bf16.msra.mxu0 %v1069_v34 }
  0x41   : > { %640 = vmatpush1.bf16.msra.mxu1 %v1033_v27  ;;  %682 = vmatprep.subr.bf16.mxu0 %v1073_v36 }
  0x42   : > { %641 = vmatprep.subr.bf16.mxu1 %v1034_v29 }
  0x44   : > { %683 = vmatpush1.bf16.msra.mxu0 %v1075_v38 }
  0x45   : > { %642 = vmatpush1.bf16.msra.mxu1 %v1036_v31  ;;  %684 = vmatprep.subr.bf16.mxu0 %v1079_v41 }
  0x46   : > { %643 = vmatprep.subr.bf16.mxu1 %v1040_v33 }
  0x48   : > { %685 = vmatpush1.bf16.msra.mxu0 %v1081_v43 }
  0x49   : > { %644 = vmatpush1.bf16.msra.mxu1 %v1042_v35 }
  0x4a   : > { %645 = vmatprep.subr.bf16.mxu1 %v1046_v37 }
  0x4b   : > { %703 = vmatmul.mubr.bf16.vlgmr.msra.gmra.mrb[0].mxu0 %v1085_v46 }
  0x4d   : > { %646 = vmatpush1.bf16.msra.mxu1 %v1048_v40 }
  0x4e   : > { %647 = vmatprep.subr.bf16.mxu1 %v1052_v42 }
  0x51   : > { %648 = vmatpush1.bf16.msra.mxu1 %v1054_v44 }
  0x52   : > { %649 = vmatprep.subr.bf16.mxu1 %v1058_v45 }
  0x55   : > { %650 = vmatpush1.bf16.msra.mxu1 %v1060_v47 }
  0x56   : > { %651 = vmatprep.subr.bf16.mxu1 %v1064_v48 }
  0x59   : > { %652 = vmatpush1.bf16.msra.mxu1 %v1066_v49 }
  0x5a   : > { %653 = vmatprep.subr.bf16.mxu1 %v1070_v50 }
  0x5d   : > { %654 = vmatpush1.bf16.msra.mxu1 %v1072_v51 }
  0x5e   : > { %655 = vmatprep.subr.bf16.mxu1 %v1076_v52 }
  0x61   : > { %656 = vmatpush1.bf16.msra.mxu1 %v1078_v53 }
  0x62   : > { %657 = vmatprep.subr.bf16.mxu1 %v1082_v54 }
  0x65   : > { %658 = vmatpush1.bf16.msra.mxu1 %v1084_v55 }
  0x68   : > { %660 = vmatmul.mubr.bf16.vlgmr.msra.gmra.mrb[0].mxu1 %v1086_v56 }
 0x11e   : > { %v704_v57 = vpop.f32.mrb[0].mxu0 }
 0x11f   : > { %v706_v58 = vpop.f32.mrb[1].mxu0 }
 0x120   : > { %v708_v59 = vpop.f32.mrb[2].mxu0 }
 0x121   : > { %v710_v60 = vpop.f32.mrb[3].mxu0 }
 0x13b   : > { %v661_v62 = vpop.f32.mrb[0].mxu1 }
 0x13c   : > { %v705_v63 = vadd.f32 %v704_v57, %v661_v62  ;;  %v663_v1 = vpop.f32.mrb[1].mxu1 }
 0x13d   : > { %v707_v2 = vadd.f32 %v706_v58, %v663_v1  ;;  %v665_v4 = vpop.f32.mrb[2].mxu1  ;;  %724 = sbr.rel (%p954_p11) target bundleno = 338 (0x152), region = 66 }
 0x13e   : > { %v713_v5 = vadd.f32 %v705_v63, %v315_v61  ;;  %v709_v6 = vadd.f32 %v708_v59, %v665_v4  ;;  %v667_v8 = vpop.f32.mrb[3].mxu1 }
 0x13f   : > { %v714_v9 = vadd.f32 %v707_v2, %v316_v0  ;;  %v711_v10 = vadd.f32 %v710_v60, %v667_v8 }
 0x140   : > { %717 = vst [vmem:[#allocation2] sm:$0xff] %v713_v5  ;;  %v715_v11 = vadd.f32 %v709_v6, %v317_v3 }
 0x141   : > { %718 = vst [vmem:[#allocation2 + $0x8] sm:$0xff] %v714_v9  ;;  %v716_v12 = vadd.f32 %v711_v10, %v318_v7 }
 0x142   : > { %719 = vst [vmem:[#allocation2 + $0x10] sm:$0xff] %v715_v11 }
 0x143   : > { %720 = vst [vmem:[#allocation2 + $0x18] sm:$0xff] %v716_v12 }
 0x147   : > { %v725_v16 = vld [vmem:[#allocation2] sm:$0xff] }
 0x148   : > { %v726_v19 = vld [vmem:[#allocation2 + $0x8] sm:$0xff]  ;;  %v741_v24 = vadd.f32 %v734_v22, %v725_v16 }
 0x149   : > { %v727_v20 = vld [vmem:[#allocation2 + $0x10] sm:$0xff]  ;;  %v742_v25 = vadd.f32 %v738_v23, %v726_v19 }
 0x14a   : > { %v728_v21 = vld [vmem:[#allocation2 + $0x18] sm:$0xff]  ;;  %v743_v26 = vadd.f32 %v734_v22, %v727_v20  ;;  %v745_v28 = vmax.f32 %v741_v24, 0.0 }
 0x14b   : > { %v744_v27 = vadd.f32 %v738_v23, %v728_v21  ;;  %v746_v29 = vmax.f32 %v742_v25, 0.0 }
 0x14c   : > { %v747_v30 = vmax.f32 %v743_v26, 0.0 }
 0x14d   : > { %v748_v31 = vmax.f32 %v744_v27, 0.0  ;;  %v963_v32 = vpack.c.bf16 %v746_v29, %v745_v28 }
 0x14f   : > { %v964_v33 = vpack.c.bf16 %v748_v31, %v747_v30  ;;  %761 = vst [vmem:[%s1285_s3] sm:$0xff] %v963_v32 }
 0x151   : > { %762 = vst [vmem:[%s1285_s3 + $0x8] sm:$0xff] %v964_v33 }
 0x152 PF: > { %s13_s16 = sadd.s32 1, %s1127_s16   ;;  %s1286_s12 = smov %s1115_s13 }
 0x153   : > { %p10_p12 = scmp.ge.s32.totalorder %s13_s16, 5   ;;  %s1287_s13 = smov %s1186_s20 }
 0x154   : > { %s1288_s14 = smov %s1123_s15  ;;  %s1289_s15 = smov %s1291_s17 }
 0x155   :  { %12 = sbr.rel (!%p10_p12) target bundleno = 3 (0x3), region = 113 }

// kernel: _lambda_.32
= control target key start
LH: loop header
LB: loop body
LE: loop exit
PB: predicated region body
PF: predicated region fallthrough
CT: control target
= control target key end

     0   :  { %v270_v1 = vmov 0   ;;  %v191_v18 = vlaneseq  ;;  %s351_s1 = inlined_call_operand.vmem [shape: bf16[128,256], index: 1, kind: input, shape index: {}]   ;;  %s352_s0 = inlined_call_operand.vmem [shape: bf16[16,128], index: 0, kind: input, shape index: {}]   ;;  %s353_s2 = inlined_call_operand.vmem [shape: f32[1,256], index: 2, kind: input, shape index: {}]   ;;  %s354_s3 = inlined_call_operand.vmem [shape: bf16[16,256], index: 3, kind: output, shape index: {}]  }
   0x1   :  { %v245_v0 = vld [vmem:[%s351_s1 + $0x4] ss:$8 sps:$4 sm:$0xff]   ;;  %163 = vmatprep.mubr.bf16.mxu0 %v270_v1  ;;  %v247_v2 = vld [vmem:[%s351_s1] ss:$8 sps:$4 sm:$0xff]   ;;  %v248_v3 = vld [vmem:[%s351_s1 + $0x14] ss:$8 sps:$4 sm:$0xff]  }
   0x2   :  { %131 = vmatprep.subr.bf16.mxu0 %v245_v0  ;;  %v250_v4 = vld [vmem:[%s351_s1 + $0x10] ss:$8 sps:$4 sm:$0xff]   ;;  %v251_v5 = vld [vmem:[%s351_s1 + $0x24] ss:$8 sps:$4 sm:$0xff]   ;;  %v253_v6 = vld [vmem:[%s351_s1 + $0x20] ss:$8 sps:$4 sm:$0xff]  }
   0x3   :  { %132 = vmatpush1.bf16.msra.mxu0 %v247_v2  ;;  %v254_v7 = vld [vmem:[%s351_s1 + $0x34] ss:$8 sps:$4 sm:$0xff]   ;;  %v256_v8 = vld [vmem:[%s351_s1 + $0x30] ss:$8 sps:$4 sm:$0xff]   ;;  %v257_v9 = vld [vmem:[%s351_s1 + $0x44] ss:$8 sps:$4 sm:$0xff]  }
   0x4   :  { %133 = vmatprep.subr.bf16.mxu0 %v248_v3  ;;  %v259_v10 = vld [vmem:[%s351_s1 + $0x40] ss:$8 sps:$4 sm:$0xff]   ;;  %v260_v11 = vld [vmem:[%s351_s1 + $0x54] ss:$8 sps:$4 sm:$0xff]   ;;  %v262_v12 = vld [vmem:[%s351_s1 + $0x50] ss:$8 sps:$4 sm:$0xff]  }
   0x5   :  { %v263_v13 = vld [vmem:[%s351_s1 + $0x64] ss:$8 sps:$4 sm:$0xff]   ;;  %v265_v14 = vld [vmem:[%s351_s1 + $0x60] ss:$8 sps:$4 sm:$0xff]   ;;  %v266_v15 = vld [vmem:[%s351_s1 + $0x74] ss:$8 sps:$4 sm:$0xff]  }
   0x6   :  { %v268_v16 = vld [vmem:[%s351_s1 + $0x70] ss:$8 sps:$4 sm:$0xff]   ;;  %v269_v17 = vld [vmem:[%s352_s0] sm:$0xff]   ;;  %v192_v19 = vshrl.u32 %v191_v18, 7 }
   0x7   :  { %134 = vmatpush1.bf16.msra.mxu0 %v250_v4  ;;  %v189_v21 = vld [vmem:[%s353_s2] sm:$0x3] }
   0x8   :  { %135 = vmatprep.subr.bf16.mxu0 %v251_v5  ;;  %v193_v20 = vsub.s32 0, %v192_v19  ;;  %v197_v22 = vsub.s32 1, %v192_v19 }
   0xa   :  { %v194_v23 = vrot.slane %v189_v21, %v193_v20  ;;  %v198_v24 = vrot.slane %v189_v21, %v197_v22 }
   0xb   :  { %136 = vmatpush1.bf16.msra.mxu0 %v253_v6 }
   0xc   :  { %137 = vmatprep.subr.bf16.mxu0 %v254_v7 }
   0xf   :  { %138 = vmatpush1.bf16.msra.mxu0 %v256_v8 }
  0x10   :  { %139 = vmatprep.subr.bf16.mxu0 %v257_v9 }
  0x13   :  { %140 = vmatpush1.bf16.msra.mxu0 %v259_v10 }
  0x14   :  { %141 = vmatprep.subr.bf16.mxu0 %v260_v11 }
  0x17   :  { %142 = vmatpush1.bf16.msra.mxu0 %v262_v12 }
  0x18   :  { %143 = vmatprep.subr.bf16.mxu0 %v263_v13 }
  0x1b   :  { %144 = vmatpush1.bf16.msra.mxu0 %v265_v14 }
  0x1c   :  { %145 = vmatprep.subr.bf16.mxu0 %v266_v15 }
  0x1f   :  { %146 = vmatpush1.bf16.msra.mxu0 %v268_v16 }
  0x22   :  { %164 = vmatmul.mubr.bf16.vlgmr.msra.gmra.mrb[0].mxu0 %v269_v17 }
  0xf5   :  { %v165_v25 = vpop.f32.mrb[0].mxu0 }
  0xf6   :  { %v201_v26 = vadd.f32 %v194_v23, %v165_v25  ;;  %v167_v27 = vpop.f32.mrb[1].mxu0 }
  0xf7   :  { %v202_v28 = vadd.f32 %v198_v24, %v167_v27  ;;  %v169_v29 = vpop.f32.mrb[2].mxu0 }
  0xf8   :  { %v203_v30 = vadd.f32 %v194_v23, %v169_v29  ;;  %v171_v31 = vpop.f32.mrb[3].mxu0 }
  0xf9   :  { %v242_v32 = vpack.c.bf16 %v202_v28, %v201_v26  ;;  %v204_v33 = vadd.f32 %v198_v24, %v171_v31 }
  0xfb   :  { %217 = vst [vmem:[%s354_s3] sm:$0xff] %v242_v32  ;;  %v243_v34 = vpack.c.bf16 %v204_v33, %v203_v30 }
  0xfd   :  { %218 = vst [vmem:[%s354_s3 + $0x8] sm:$0xff] %v243_v34 }

// kernel: _lambda_.33
= control target key start
LH: loop header
LB: loop body
LE: loop exit
PB: predicated region body
PF: predicated region fallthrough
CT: control target
= control target key end

     0   :  { %s1256_s15 = smov 0   ;;  %s1258_s16 = smov 0   ;;  %s1393_s0 = inlined_call_operand.vmem [shape: bf16[16,2304], index: 0, kind: input, shape index: {}]   ;;  %s1394_s1 = inlined_call_operand.vmem [shape: bf16[2304,256], index: 1, kind: input, shape index: {}]   ;;  %s1395_s2 = inlined_call_operand.vmem [shape: f32[1,256], index: 2, kind: input, shape index: {}]   ;;  %s1396_s3 = inlined_call_operand.vmem [shape: bf16[16,256], index: 3, kind: input, shape index: {}]   ;;  %s1397_s4 = inlined_call_operand.vmem [shape: bf16[16,256], index: 4, kind: output, shape index: {}]  }
   0x1   :  { %s1260_s17 = smov 0   ;;  %s1262_s18 = smov 0  }
   0x2   :  { %s1264_s19 = smov 0  }
   0x3 LB: > { %s26_s20 = sadd.s32 1, %s1223_s18  ;;  %p49_p1 = scmp.ne.s32.totalorder %s1215_s16, %s1211_s15  ;;  %s1227_s19 = sphi %s1264_s19, %s14_s19   ;;  %s1223_s18 = sphi %s1262_s18, %s1401_s18   ;;  %s1219_s17 = sphi %s1260_s17, %s1400_s17   ;;  %s1215_s16 = sphi %s1258_s16, %s1399_s16   ;;  %s1211_s15 = sphi %s1256_s15, %s1398_s15  }
   0x4   : > { %p27_p0 = scmp.ge.s32.totalorder %s26_s20, 6  ;;  %p50_p2 = scmp.eq.s32.totalorder %s1227_s19, 0 }
   0x5   : > { %s42_s22 = sadd.s32 1, %s1215_s16  ;;  %p993_p5 = scmp.ge.s32.totalorder %s1227_s19, 6 }
   0x6   : > { %s1403_s20 = smov (%p27_p0, %s26_s20), 0  ;;  %p51_p3 = por %p50_p2, %p49_p1 }
   0x7   : > { %s38_s21 = ssub.s32 %s1223_s18, %s1403_s20  ;;  %208 = sbr.rel (%p993_p5) target bundleno = 21 (0x15), region = 24 }
   0x8   : > { %p40_p4 = scmp.eq.s32.totalorder %s38_s21, 0 }
   0xa   : > { %s1291_s23 = scalar_select %p40_p4, %s1215_s16, %s42_s22  }
   0xe   : > { %211 = sbr.rel (!%p51_p3) target bundleno = 21 (0x15), region = 28  ;;  %s213_s24 = sand.u32 (%p51_p3), 1, %s1215_s16  }
   0xf   : > { %s1061_s25 = smul.u32 (%p51_p3), 12, %s1223_s18 }
  0x10   : > { %s1069_s26 = smul.u32 (%p51_p3), 24, %s213_s24 }
  0x11   : > { %s221_s29 = scalar_lea.vmem (%p51_p3), %s1393_s0, %s1061_s25 }
  0x12   : > { %v236_v0 = vld [vmem:[%s221_s29] sm:$0xff] (%p51_p3)  ;;  %v238_v1 = vld [vmem:[%s221_s29 + $0x48] sm:$0xff] (%p51_p3)  ;;  %s215_s30 = scalar_lea.vmem (%p51_p3), [#allocation3], %s1069_s26  ;;  %v997_v3 = vld [vmem:[%s221_s29 + $0x50] sm:$0xf] (%p51_p3) }
  0x13   : > { %v995_v2 = vld [vmem:[%s221_s29 + $0x8] sm:$0xf] (%p51_p3)  ;;  %237 = vst [vmem:[%s215_s30] sm:$0xff] (%p51_p3), %v236_v0  ;;  %239 = vst [vmem:[%s215_s30 + $0xc] sm:$0xff] (%p51_p3), %v238_v1 }
  0x14   : > { %996 = vst [vmem:[%s215_s30 + $0x8] sm:$0xf] (%p51_p3), %v995_v2  ;;  %998 = vst [vmem:[%s215_s30 + $0x14] sm:$0xf] (%p51_p3), %v997_v3 }
  0x15 PF: > { %p999_p6 = scmp.ge.s32.totalorder %s1227_s19, 1  ;;  %p270_p7 = scmp.lt.s32.totalorder %s1227_s19, 7 }
  0x17   : > { %p271_p8 = pnand %p999_p6, %p270_p7 }
  0x18   : > { %s277_s5 = sand.u32 (!%p271_p8), 1, %s1211_s15   ;;  %s333_s6 = smul.u32 (!%p271_p8), 48, %s1219_s17 }
  0x19   : > { %274 = sbr.rel (%p271_p8) target bundleno = 340 (0x154), region = 58  ;;  %p1002_p10 = scmp.ne.s32.totalorder (!%p271_p8), %s1219_s17, 0 }
  0x1a   : > { %s1070_s7 = smul.u32 (!%p271_p8), 24, %s277_s5  ;;  %p335_p9 = scmp.lt.s32.totalorder (!%p271_p8), %s333_s6, 287 }
  0x1c   : > { %s1308_s12 = scalar_lea.vmem (!%p271_p8), [#allocation3], %s1070_s7 }
  0x20   : > { %s1405_s6 = smov (!%p335_p9, %s333_s6), 287  ;;  %378 = sbr.rel (%p1002_p10) target bundleno = 39 (0x27), region = 66 }
  0x21   : > { %s1062_s8 = sshll.u32 %s1405_s6, 3  ;;  %v1229_v4 = vmov (!%p1002_p10), 0.0  }
  0x22   : > { %s1306_s11 = scalar_lea.vmem %s1394_s1, %s1062_s8  ;;  %379 = vst [vmem:[#allocation2] sm:$0xff] (!%p1002_p10), %v1229_v4  ;;  %380 = vst [vmem:[#allocation2 + $0x8] sm:$0xff] (!%p1002_p10), %v1229_v4 }
  0x23   : > { %381 = vst [vmem:[#allocation2 + $0x10] sm:$0xff] (!%p1002_p10), %v1229_v4  ;;  %382 = vst [vmem:[#allocation2 + $0x18] sm:$0xff] (!%p1002_p10), %v1229_v4 }
  0x27 PF: > { %v1113_v5 = vld [vmem:[%s1306_s11 + $0x4] ss:$8 sps:$4 sm:$0xff]   ;;  %v1115_v6 = vld [vmem:[%s1306_s11] ss:$8 sps:$4 sm:$0xff]   ;;  %v1230_v7 = vmov 0   ;;  %p1054_p11 = scmp.ne.s32.totalorder %s1219_s17, 5 }
  0x28   : > { %770 = vmatprep.mubr.bf16.mxu0 %v1230_v7  ;;  %695 = vmatprep.subr.bf16.mxu1 %v1113_v5  ;;  %v1116_v8 = vld [vmem:[%s1306_s11 + $0x14] ss:$8 sps:$4 sm:$0xff]   ;;  %v1118_v9 = vld [vmem:[%s1306_s11 + $0x10] ss:$8 sps:$4 sm:$0xff]   ;;  %v1119_v10 = vld [vmem:[%s1306_s11 + $0x24] ss:$8 sps:$4 sm:$0xff]  }
  0x29   : > { %696 = vmatpush1.bf16.msra.mxu1 %v1115_v6  ;;  %v1121_v11 = vld [vmem:[%s1306_s11 + $0x20] ss:$8 sps:$4 sm:$0xff]   ;;  %v1122_v12 = vld [vmem:[%s1306_s11 + $0x34] ss:$8 sps:$4 sm:$0xff]   ;;  %v1124_v13 = vld [vmem:[%s1306_s11 + $0x30] ss:$8 sps:$4 sm:$0xff]  }
  0x2a   : > { %697 = vmatprep.subr.bf16.mxu1 %v1116_v8  ;;  %v1137_v14 = vld [vmem:[%s1306_s11 + $0x104] ss:$8 sps:$4 sm:$0xff]   ;;  %v1139_v15 = vld [vmem:[%s1306_s11 + $0x100] ss:$8 sps:$4 sm:$0xff]   ;;  %v1143_v17 = vld [vmem:[%s1306_s11 + $0x114] ss:$8 sps:$4 sm:$0xff]  }
  0x2b   : > { %v1125_v16 = vld [vmem:[%s1306_s11 + $0x44] ss:$8 sps:$4 sm:$0xff]   ;;  %738 = vmatprep.subr.bf16.mxu0 %v1137_v14  ;;  %v1145_v18 = vld [vmem:[%s1306_s11 + $0x110] ss:$8 sps:$4 sm:$0xff]   ;;  %v1127_v19 = vld [vmem:[%s1306_s11 + $0x40] ss:$8 sps:$4 sm:$0xff]  }
  0x2c   : > { %739 = vmatpush1.bf16.msra.mxu0 %v1139_v15  ;;  %v1128_v20 = vld [vmem:[%s1306_s11 + $0x54] ss:$8 sps:$4 sm:$0xff]   ;;  %v1149_v21 = vld [vmem:[%s1306_s11 + $0x124] ss:$8 sps:$4 sm:$0xff]   ;;  %v1151_v22 = vld [vmem:[%s1306_s11 + $0x120] ss:$8 sps:$4 sm:$0xff]  }
  0x2d   : > { %698 = vmatpush1.bf16.msra.mxu1 %v1118_v9  ;;  %740 = vmatprep.subr.bf16.mxu0 %v1143_v17  ;;  %v1130_v23 = vld [vmem:[%s1306_s11 + $0x50] ss:$8 sps:$4 sm:$0xff]   ;;  %v1155_v24 = vld [vmem:[%s1306_s11 + $0x134] ss:$8 sps:$4 sm:$0xff]   ;;  %v1131_v25 = vld [vmem:[%s1306_s11 + $0x64] ss:$8 sps:$4 sm:$0xff]  }
  0x2e   : > { %699 = vmatprep.subr.bf16.mxu1 %v1119_v10  ;;  %v1157_v26 = vld [vmem:[%s1306_s11 + $0x130] ss:$8 sps:$4 sm:$0xff]   ;;  %v1133_v27 = vld [vmem:[%s1306_s11 + $0x60] ss:$8 sps:$4 sm:$0xff]   ;;  %v1161_v28 = vld [vmem:[%s1306_s11 + $0x144] ss:$8 sps:$4 sm:$0xff]  }
  0x2f   : > { %v1134_v29 = vld [vmem:[%s1306_s11 + $0x74] ss:$8 sps:$4 sm:$0xff]   ;;  %v1163_v30 = vld [vmem:[%s1306_s11 + $0x140] ss:$8 sps:$4 sm:$0xff]   ;;  %v1136_v31 = vld [vmem:[%s1306_s11 + $0x70] ss:$8 sps:$4 sm:$0xff]  }
  0x30   : > { %741 = vmatpush1.bf16.msra.mxu0 %v1145_v18  ;;  %v1167_v32 = vld [vmem:[%s1306_s11 + $0x154] ss:$8 sps:$4 sm:$0xff]   ;;  %v1140_v33 = vld [vmem:[%s1306_s11 + $0x84] ss:$8 sps:$4 sm:$0xff]   ;;  %v1169_v34 = vld [vmem:[%s1306_s11 + $0x150] ss:$8 sps:$4 sm:$0xff]  }
  0x31   : > { %700 = vmatpush1.bf16.msra.mxu1 %v1121_v11  ;;  %742 = vmatprep.subr.bf16.mxu0 %v1149_v21  ;;  %v1142_v35 = vld [vmem:[%s1306_s11 + $0x80] ss:$8 sps:$4 sm:$0xff]   ;;  %v1173_v36 = vld [vmem:[%s1306_s11 + $0x164] ss:$8 sps:$4 sm:$0xff]   ;;  %v1146_v37 = vld [vmem:[%s1306_s11 + $0x94] ss:$8 sps:$4 sm:$0xff]  }
  0x32   : > { %701 = vmatprep.subr.bf16.mxu1 %v1122_v12  ;;  %v1175_v38 = vld [vmem:[%s1306_s11 + $0x160] ss:$8 sps:$4 sm:$0xff]   ;;  %v1148_v40 = vld [vmem:[%s1306_s11 + $0x90] ss:$8 sps:$4 sm:$0xff]   ;;  %v1179_v41 = vld [vmem:[%s1306_s11 + $0x174] ss:$8 sps:$4 sm:$0xff]  }
  0x33   : > { %v1188_v39 = vld [vmem:[%s1308_s12 + $0x4] ss:$12 sps:$4 sm:$0xff]   ;;  %v1185_v46 = vld [vmem:[%s1308_s12 + $0x8] ss:$12 sps:$4 sm:$0xff]   ;;  %v1186_v56 = vld [vmem:[%s1308_s12] ss:$12 sps:$4 sm:$0xff]  }
  0x34   : > { %743 = vmatpush1.bf16.msra.mxu0 %v1151_v22  ;;  %v1152_v42 = vld [vmem:[%s1306_s11 + $0xa4] ss:$8 sps:$4 sm:$0xff]   ;;  %727 = vmatprep.mubr.bf16.mxu1 %v1188_v39  ;;  %v1181_v43 = vld [vmem:[%s1306_s11 + $0x170] ss:$8 sps:$4 sm:$0xff]   ;;  %v1154_v44 = vld [vmem:[%s1306_s11 + $0xa0] ss:$8 sps:$4 sm:$0xff]  }
  0x35   : > { %702 = vmatpush1.bf16.msra.mxu1 %v1124_v13  ;;  %744 = vmatprep.subr.bf16.mxu0 %v1155_v24  ;;  %v1158_v45 = vld [vmem:[%s1306_s11 + $0xb4] ss:$8 sps:$4 sm:$0xff]   ;;  %v1160_v47 = vld [vmem:[%s1306_s11 + $0xb0] ss:$8 sps:$4 sm:$0xff]   ;;  %v1164_v48 = vld [vmem:[%s1306_s11 + $0xc4] ss:$8 sps:$4 sm:$0xff]   ;;  %v799_v13 = vlaneseq (!%p1054_p11) }
  0x36   : > { %703 = vmatprep.subr.bf16.mxu1 %v1125_v16  ;;  %v1166_v49 = vld [vmem:[%s1306_s11 + $0xc0] ss:$8 sps:$4 sm:$0xff]   ;;  %v1170_v50 = vld [vmem:[%s1306_s11 + $0xd4] ss:$8 sps:$4 sm:$0xff]   ;;  %v1172_v51 = vld [vmem:[%s1306_s11 + $0xd0] ss:$8 sps:$4 sm:$0xff]  }
  0x37   : > { %v1176_v52 = vld [vmem:[%s1306_s11 + $0xe4] ss:$8 sps:$4 sm:$0xff]   ;;  %v1178_v53 = vld [vmem:[%s1306_s11 + $0xe0] ss:$8 sps:$4 sm:$0xff]   ;;  %v1182_v54 = vld [vmem:[%s1306_s11 + $0xf4] ss:$8 sps:$4 sm:$0xff]  }
  0x38   : > { %745 = vmatpush1.bf16.msra.mxu0 %v1157_v26  ;;  %v1184_v55 = vld [vmem:[%s1306_s11 + $0xf0] ss:$8 sps:$4 sm:$0xff]   ;;  %v383_v61 = vld [vmem:[#allocation2] sm:$0xff]  ;;  %v384_v0 = vld [vmem:[#allocation2 + $0x8] sm:$0xff]  ;;  %v800_v14 = vshrl.u32 (!%p1054_p11), %v799_v13, 7 }
  0x39   : > { %704 = vmatpush1.bf16.msra.mxu1 %v1127_v19  ;;  %746 = vmatprep.subr.bf16.mxu0 %v1161_v28  ;;  %v385_v3 = vld [vmem:[#allocation2 + $0x10] sm:$0xff]  ;;  %v386_v7 = vld [vmem:[#allocation2 + $0x18] sm:$0xff]  ;;  %v813_v15 = vld [vmem:[%s1396_s3] sm:$0xff] (!%p1054_p11) }
  0x3a   : > { %705 = vmatprep.subr.bf16.mxu1 %v1128_v20  ;;  %v797_v16 = vld [vmem:[%s1395_s2] sm:$0x3] (!%p1054_p11)  ;;  %v814_v17 = vld [vmem:[%s1396_s3 + $0x8] sm:$0xff] (!%p1054_p11)  ;;  %v801_v19 = vsub.s32 (!%p1054_p11), 0, %v800_v14  ;;  %v805_v20 = vsub.s32 (!%p1054_p11), 1, %v800_v14  ;;  %v815_v22 = vunpack.c.l.bf16 (!%p1054_p11), %v813_v15 }
  0x3b   : > { %v817_v28 = vunpack.c.l.bf16 (!%p1054_p11), %v814_v17 }
  0x3c   : > { %747 = vmatpush1.bf16.msra.mxu0 %v1163_v30  ;;  %v802_v26 = vrot.slane (!%p1054_p11), %v797_v16, %v801_v19 }
  0x3d   : > { %706 = vmatpush1.bf16.msra.mxu1 %v1130_v23  ;;  %748 = vmatprep.subr.bf16.mxu0 %v1167_v32  ;;  %v816_v23 = vunpack.c.h.bf16 (!%p1054_p11), %v813_v15 }
  0x3e   : > { %707 = vmatprep.subr.bf16.mxu1 %v1131_v25 }
  0x40   : > { %749 = vmatpush1.bf16.msra.mxu0 %v1169_v34 }
  0x41   : > { %708 = vmatpush1.bf16.msra.mxu1 %v1133_v27  ;;  %750 = vmatprep.subr.bf16.mxu0 %v1173_v36  ;;  %v806_v27 = vrot.slane (!%p1054_p11), %v797_v16, %v805_v20 }
  0x42   : > { %709 = vmatprep.subr.bf16.mxu1 %v1134_v29  ;;  %v818_v29 = vunpack.c.h.bf16 (!%p1054_p11), %v814_v17 }
  0x44   : > { %751 = vmatpush1.bf16.msra.mxu0 %v1175_v38 }
  0x45   : > { %710 = vmatpush1.bf16.msra.mxu1 %v1136_v31  ;;  %752 = vmatprep.subr.bf16.mxu0 %v1179_v41 }
  0x46   : > { %711 = vmatprep.subr.bf16.mxu1 %v1140_v33 }
  0x48   : > { %753 = vmatpush1.bf16.msra.mxu0 %v1181_v43 }
  0x49   : > { %712 = vmatpush1.bf16.msra.mxu1 %v1142_v35 }
  0x4a   : > { %713 = vmatprep.subr.bf16.mxu1 %v1146_v37 }
  0x4b   : > { %771 = vmatmul.mubr.bf16.vlgmr.msra.gmra.mrb[0].mxu0 %v1185_v46 }
  0x4d   : > { %714 = vmatpush1.bf16.msra.mxu1 %v1148_v40 }
  0x4e   : > { %715 = vmatprep.subr.bf16.mxu1 %v1152_v42 }
  0x51   : > { %716 = vmatpush1.bf16.msra.mxu1 %v1154_v44 }
  0x52   : > { %717 = vmatprep.subr.bf16.mxu1 %v1158_v45 }
  0x55   : > { %718 = vmatpush1.bf16.msra.mxu1 %v1160_v47 }
  0x56   : > { %719 = vmatprep.subr.bf16.mxu1 %v1164_v48 }
  0x59   : > { %720 = vmatpush1.bf16.msra.mxu1 %v1166_v49 }
  0x5a   : > { %721 = vmatprep.subr.bf16.mxu1 %v1170_v50 }
  0x5d   : > { %722 = vmatpush1.bf16.msra.mxu1 %v1172_v51 }
  0x5e   : > { %723 = vmatprep.subr.bf16.mxu1 %v1176_v52 }
  0x61   : > { %724 = vmatpush1.bf16.msra.mxu1 %v1178_v53 }
  0x62   : > { %725 = vmatprep.subr.bf16.mxu1 %v1182_v54 }
  0x65   : > { %726 = vmatpush1.bf16.msra.mxu1 %v1184_v55 }
  0x68   : > { %728 = vmatmul.mubr.bf16.vlgmr.msra.gmra.mrb[0].mxu1 %v1186_v56 }
 0x11e   : > { %v772_v57 = vpop.f32.mrb[0].mxu0 }
 0x11f   : > { %v774_v58 = vpop.f32.mrb[1].mxu0 }
 0x120   : > { %v776_v59 = vpop.f32.mrb[2].mxu0 }
 0x121   : > { %v778_v60 = vpop.f32.mrb[3].mxu0 }
 0x13b   : > { %v729_v62 = vpop.f32.mrb[0].mxu1 }
 0x13c   : > { %v773_v63 = vadd.f32 %v772_v57, %v729_v62  ;;  %v731_v1 = vpop.f32.mrb[1].mxu1 }
 0x13d   : > { %v775_v2 = vadd.f32 %v774_v58, %v731_v1  ;;  %v733_v4 = vpop.f32.mrb[2].mxu1  ;;  %792 = sbr.rel (%p1054_p11) target bundleno = 340 (0x154), region = 70 }
 0x13e   : > { %v781_v5 = vadd.f32 %v773_v63, %v383_v61  ;;  %v777_v6 = vadd.f32 %v776_v59, %v733_v4  ;;  %v735_v8 = vpop.f32.mrb[3].mxu1 }
 0x13f   : > { %v782_v9 = vadd.f32 %v775_v2, %v384_v0  ;;  %v779_v10 = vadd.f32 %v778_v60, %v735_v8 }
 0x140   : > { %785 = vst [vmem:[#allocation2] sm:$0xff] %v781_v5  ;;  %v783_v11 = vadd.f32 %v777_v6, %v385_v3 }
 0x141   : > { %786 = vst [vmem:[#allocation2 + $0x8] sm:$0xff] %v782_v9  ;;  %v784_v12 = vadd.f32 %v779_v10, %v386_v7 }
 0x142   : > { %787 = vst [vmem:[#allocation2 + $0x10] sm:$0xff] %v783_v11 }
 0x143   : > { %788 = vst [vmem:[#allocation2 + $0x18] sm:$0xff] %v784_v12 }
 0x147   : > { %v793_v18 = vld [vmem:[#allocation2] sm:$0xff] }
 0x148   : > { %v794_v21 = vld [vmem:[#allocation2 + $0x8] sm:$0xff]  ;;  %v809_v30 = vadd.f32 %v802_v26, %v793_v18 }
 0x149   : > { %v795_v24 = vld [vmem:[#allocation2 + $0x10] sm:$0xff]  ;;  %v810_v31 = vadd.f32 %v806_v27, %v794_v21 }
 0x14a   : > { %v796_v25 = vld [vmem:[#allocation2 + $0x18] sm:$0xff]  ;;  %v811_v32 = vadd.f32 %v802_v26, %v795_v24  ;;  %v819_v34 = vadd.f32 %v815_v22, %v809_v30 }
 0x14b   : > { %v812_v33 = vadd.f32 %v806_v27, %v796_v25  ;;  %v820_v35 = vadd.f32 %v816_v23, %v810_v31 }
 0x14c   : > { %v821_v36 = vadd.f32 %v817_v28, %v811_v32  ;;  %v823_v38 = vmax.f32 %v819_v34, 0.0 }
 0x14d   : > { %v822_v37 = vadd.f32 %v818_v29, %v812_v33  ;;  %v824_v39 = vmax.f32 %v820_v35, 0.0 }
 0x14e   : > { %v825_v40 = vmax.f32 %v821_v36, 0.0 }
 0x14f   : > { %v826_v41 = vmax.f32 %v822_v37, 0.0  ;;  %v1063_v42 = vpack.c.bf16 %v824_v39, %v823_v38 }
 0x151   : > { %v1064_v43 = vpack.c.bf16 %v826_v41, %v825_v40  ;;  %839 = vst [vmem:[%s1397_s4] sm:$0xff] %v1063_v42 }
 0x153   : > { %840 = vst [vmem:[%s1397_s4 + $0x8] sm:$0xff] %v1064_v43 }
 0x154 PF: > { %s14_s19 = sadd.s32 1, %s1227_s19   ;;  %s1398_s15 = smov %s1215_s16 }
 0x155   : > { %p11_p12 = scmp.ge.s32.totalorder %s14_s19, 8   ;;  %s1399_s16 = smov %s1291_s23 }
 0x156   : > { %s1400_s17 = smov %s1223_s18  ;;  %s1401_s18 = smov %s1403_s20 }
 0x157   :  { %13 = sbr.rel (!%p11_p12) target bundleno = 3 (0x3), region = 120 }

// kernel: _lambda_.34
= control target key start
LH: loop header
LB: loop body
LE: loop exit
PB: predicated region body
PF: predicated region fallthrough
CT: control target
= control target key end

     0   :  { %s1151_s12 = smov 0   ;;  %s1153_s13 = smov 0   ;;  %s1282_s0 = inlined_call_operand.vmem [shape: bf16[16,2304], index: 0, kind: input, shape index: {}]   ;;  %s1283_s1 = inlined_call_operand.vmem [shape: bf16[2304,256], index: 1, kind: input, shape index: {}]   ;;  %s1284_s2 = inlined_call_operand.vmem [shape: f32[1,256], index: 2, kind: input, shape index: {}]   ;;  %s1285_s3 = inlined_call_operand.vmem [shape: bf16[16,256], index: 3, kind: output, shape index: {}]  }
   0x1   :  { %s1155_s14 = smov 0   ;;  %s1157_s15 = smov 0  }
   0x2   :  { %s1159_s16 = smov 0  }
   0x3 LB: > { %s25_s17 = sadd.s32 1, %s1123_s15  ;;  %p48_p1 = scmp.ne.s32.totalorder %s1115_s13, %s1111_s12  ;;  %s1127_s16 = sphi %s1159_s16, %s13_s16   ;;  %s1123_s15 = sphi %s1157_s15, %s1289_s15   ;;  %s1119_s14 = sphi %s1155_s14, %s1288_s14   ;;  %s1115_s13 = sphi %s1153_s13, %s1287_s13   ;;  %s1111_s12 = sphi %s1151_s12, %s1286_s12  }
   0x4   : > { %p26_p0 = scmp.ge.s32.totalorder %s25_s17, 6  ;;  %p49_p2 = scmp.eq.s32.totalorder %s1127_s16, 0 }
   0x5   : > { %s41_s19 = sadd.s32 1, %s1115_s13  ;;  %p893_p5 = scmp.ge.s32.totalorder %s1127_s16, 6 }
   0x6   : > { %s1291_s17 = smov (%p26_p0, %s25_s17), 0  ;;  %p50_p3 = por %p49_p2, %p48_p1 }
   0x7   : > { %s37_s18 = ssub.s32 %s1123_s15, %s1291_s17  ;;  %164 = sbr.rel (%p893_p5) target bundleno = 21 (0x15), region = 20 }
   0x8   : > { %p39_p4 = scmp.eq.s32.totalorder %s37_s18, 0 }
   0xa   : > { %s1186_s20 = scalar_select %p39_p4, %s1115_s13, %s41_s19  }
   0xe   : > { %167 = sbr.rel (!%p50_p3) target bundleno = 21 (0x15), region = 24  ;;  %s169_s21 = sand.u32 (%p50_p3), 1, %s1115_s13  }
   0xf   : > { %s961_s22 = smul.u32 (%p50_p3), 12, %s1123_s15 }
  0x10   : > { %s969_s23 = smul.u32 (%p50_p3), 24, %s169_s21 }
  0x11   : > { %s177_s26 = scalar_lea.vmem (%p50_p3), %s1282_s0, %s961_s22 }
  0x12   : > { %v192_v0 = vld [vmem:[%s177_s26] sm:$0xff] (%p50_p3)  ;;  %v194_v1 = vld [vmem:[%s177_s26 + $0x48] sm:$0xff] (%p50_p3)  ;;  %s171_s27 = scalar_lea.vmem (%p50_p3), [#allocation3], %s969_s23  ;;  %v897_v3 = vld [vmem:[%s177_s26 + $0x50] sm:$0xf] (%p50_p3) }
  0x13   : > { %v895_v2 = vld [vmem:[%s177_s26 + $0x8] sm:$0xf] (%p50_p3)  ;;  %193 = vst [vmem:[%s171_s27] sm:$0xff] (%p50_p3), %v192_v0  ;;  %195 = vst [vmem:[%s171_s27 + $0xc] sm:$0xff] (%p50_p3), %v194_v1 }
  0x14   : > { %896 = vst [vmem:[%s171_s27 + $0x8] sm:$0xf] (%p50_p3), %v895_v2  ;;  %898 = vst [vmem:[%s171_s27 + $0x14] sm:$0xf] (%p50_p3), %v897_v3 }
  0x15 PF: > { %p899_p6 = scmp.ge.s32.totalorder %s1127_s16, 1  ;;  %p226_p7 = scmp.lt.s32.totalorder %s1127_s16, 7 }
  0x17   : > { %p227_p8 = pnand %p899_p6, %p226_p7 }
  0x18   : > { %s233_s28 = sand.u32 (!%p227_p8), 1, %s1111_s12   ;;  %s277_s29 = smul.u32 (!%p227_p8), 48, %s1119_s14 }
  0x19   : > { %230 = sbr.rel (%p227_p8) target bundleno = 338 (0x152), region = 54  ;;  %p902_p10 = scmp.ne.s32.totalorder (!%p227_p8), %s1119_s14, 0 }
  0x1a   : > { %s970_s30 = smul.u32 (!%p227_p8), 24, %s233_s28  ;;  %p279_p9 = scmp.lt.s32.totalorder (!%p227_p8), %s277_s29, 287 }
  0x1c   : > { %s1203_s8 = scalar_lea.vmem (!%p227_p8), [#allocation3], %s970_s30 }
  0x20   : > { %s1293_s29 = smov (!%p279_p9, %s277_s29), 287  ;;  %310 = sbr.rel (%p902_p10) target bundleno = 39 (0x27), region = 62 }
  0x21   : > { %s962_s4 = sshll.u32 %s1293_s29, 3  ;;  %v1129_v4 = vmov (!%p902_p10), 0.0  }
  0x22   : > { %s1201_s7 = scalar_lea.vmem %s1283_s1, %s962_s4  ;;  %311 = vst [vmem:[#allocation2] sm:$0xff] (!%p902_p10), %v1129_v4  ;;  %312 = vst [vmem:[#allocation2 + $0x8] sm:$0xff] (!%p902_p10), %v1129_v4 }
  0x23   : > { %313 = vst [vmem:[#allocation2 + $0x10] sm:$0xff] (!%p902_p10), %v1129_v4  ;;  %314 = vst [vmem:[#allocation2 + $0x18] sm:$0xff] (!%p902_p10), %v1129_v4 }
  0x27 PF: > { %v1013_v5 = vld [vmem:[%s1201_s7 + $0x4] ss:$8 sps:$4 sm:$0xff]   ;;  %v1015_v6 = vld [vmem:[%s1201_s7] ss:$8 sps:$4 sm:$0xff]   ;;  %v1130_v7 = vmov 0   ;;  %p954_p11 = scmp.ne.s32.totalorder %s1119_s14, 5 }
  0x28   : > { %702 = vmatprep.mubr.bf16.mxu0 %v1130_v7  ;;  %627 = vmatprep.subr.bf16.mxu1 %v1013_v5  ;;  %v1016_v8 = vld [vmem:[%s1201_s7 + $0x14] ss:$8 sps:$4 sm:$0xff]   ;;  %v1018_v9 = vld [vmem:[%s1201_s7 + $0x10] ss:$8 sps:$4 sm:$0xff]   ;;  %v1019_v10 = vld [vmem:[%s1201_s7 + $0x24] ss:$8 sps:$4 sm:$0xff]  }
  0x29   : > { %628 = vmatpush1.bf16.msra.mxu1 %v1015_v6  ;;  %v1021_v11 = vld [vmem:[%s1201_s7 + $0x20] ss:$8 sps:$4 sm:$0xff]   ;;  %v1022_v12 = vld [vmem:[%s1201_s7 + $0x34] ss:$8 sps:$4 sm:$0xff]   ;;  %v1024_v13 = vld [vmem:[%s1201_s7 + $0x30] ss:$8 sps:$4 sm:$0xff]  }
  0x2a   : > { %629 = vmatprep.subr.bf16.mxu1 %v1016_v8  ;;  %v1037_v14 = vld [vmem:[%s1201_s7 + $0x104] ss:$8 sps:$4 sm:$0xff]   ;;  %v1039_v15 = vld [vmem:[%s1201_s7 + $0x100] ss:$8 sps:$4 sm:$0xff]   ;;  %v1043_v17 = vld [vmem:[%s1201_s7 + $0x114] ss:$8 sps:$4 sm:$0xff]  }
  0x2b   : > { %v1025_v16 = vld [vmem:[%s1201_s7 + $0x44] ss:$8 sps:$4 sm:$0xff]   ;;  %670 = vmatprep.subr.bf16.mxu0 %v1037_v14  ;;  %v1045_v18 = vld [vmem:[%s1201_s7 + $0x110] ss:$8 sps:$4 sm:$0xff]   ;;  %v1027_v19 = vld [vmem:[%s1201_s7 + $0x40] ss:$8 sps:$4 sm:$0xff]  }
  0x2c   : > { %671 = vmatpush1.bf16.msra.mxu0 %v1039_v15  ;;  %v1028_v20 = vld [vmem:[%s1201_s7 + $0x54] ss:$8 sps:$4 sm:$0xff]   ;;  %v1049_v21 = vld [vmem:[%s1201_s7 + $0x124] ss:$8 sps:$4 sm:$0xff]   ;;  %v1051_v22 = vld [vmem:[%s1201_s7 + $0x120] ss:$8 sps:$4 sm:$0xff]  }
  0x2d   : > { %630 = vmatpush1.bf16.msra.mxu1 %v1018_v9  ;;  %672 = vmatprep.subr.bf16.mxu0 %v1043_v17  ;;  %v1030_v23 = vld [vmem:[%s1201_s7 + $0x50] ss:$8 sps:$4 sm:$0xff]   ;;  %v1055_v24 = vld [vmem:[%s1201_s7 + $0x134] ss:$8 sps:$4 sm:$0xff]   ;;  %v1031_v25 = vld [vmem:[%s1201_s7 + $0x64] ss:$8 sps:$4 sm:$0xff]  }
  0x2e   : > { %631 = vmatprep.subr.bf16.mxu1 %v1019_v10  ;;  %v1057_v26 = vld [vmem:[%s1201_s7 + $0x130] ss:$8 sps:$4 sm:$0xff]   ;;  %v1033_v27 = vld [vmem:[%s1201_s7 + $0x60] ss:$8 sps:$4 sm:$0xff]   ;;  %v1061_v28 = vld [vmem:[%s1201_s7 + $0x144] ss:$8 sps:$4 sm:$0xff]  }
  0x2f   : > { %v1034_v29 = vld [vmem:[%s1201_s7 + $0x74] ss:$8 sps:$4 sm:$0xff]   ;;  %v1063_v30 = vld [vmem:[%s1201_s7 + $0x140] ss:$8 sps:$4 sm:$0xff]   ;;  %v1036_v31 = vld [vmem:[%s1201_s7 + $0x70] ss:$8 sps:$4 sm:$0xff]  }
  0x30   : > { %673 = vmatpush1.bf16.msra.mxu0 %v1045_v18  ;;  %v1067_v32 = vld [vmem:[%s1201_s7 + $0x154] ss:$8 sps:$4 sm:$0xff]   ;;  %v1040_v33 = vld [vmem:[%s1201_s7 + $0x84] ss:$8 sps:$4 sm:$0xff]   ;;  %v1069_v34 = vld [vmem:[%s1201_s7 + $0x150] ss:$8 sps:$4 sm:$0xff]  }
  0x31   : > { %632 = vmatpush1.bf16.msra.mxu1 %v1021_v11  ;;  %674 = vmatprep.subr.bf16.mxu0 %v1049_v21  ;;  %v1042_v35 = vld [vmem:[%s1201_s7 + $0x80] ss:$8 sps:$4 sm:$0xff]   ;;  %v1073_v36 = vld [vmem:[%s1201_s7 + $0x164] ss:$8 sps:$4 sm:$0xff]   ;;  %v1046_v37 = vld [vmem:[%s1201_s7 + $0x94] ss:$8 sps:$4 sm:$0xff]  }
  0x32   : > { %633 = vmatprep.subr.bf16.mxu1 %v1022_v12  ;;  %v1075_v38 = vld [vmem:[%s1201_s7 + $0x160] ss:$8 sps:$4 sm:$0xff]   ;;  %v1048_v40 = vld [vmem:[%s1201_s7 + $0x90] ss:$8 sps:$4 sm:$0xff]   ;;  %v1079_v41 = vld [vmem:[%s1201_s7 + $0x174] ss:$8 sps:$4 sm:$0xff]  }
  0x33   : > { %v1088_v39 = vld [vmem:[%s1203_s8 + $0x4] ss:$12 sps:$4 sm:$0xff]   ;;  %v1085_v46 = vld [vmem:[%s1203_s8 + $0x8] ss:$12 sps:$4 sm:$0xff]   ;;  %v1086_v56 = vld [vmem:[%s1203_s8] ss:$12 sps:$4 sm:$0xff]  }
  0x34   : > { %675 = vmatpush1.bf16.msra.mxu0 %v1051_v22  ;;  %v1052_v42 = vld [vmem:[%s1201_s7 + $0xa4] ss:$8 sps:$4 sm:$0xff]   ;;  %659 = vmatprep.mubr.bf16.mxu1 %v1088_v39  ;;  %v1081_v43 = vld [vmem:[%s1201_s7 + $0x170] ss:$8 sps:$4 sm:$0xff]   ;;  %v1054_v44 = vld [vmem:[%s1201_s7 + $0xa0] ss:$8 sps:$4 sm:$0xff]  }
  0x35   : > { %634 = vmatpush1.bf16.msra.mxu1 %v1024_v13  ;;  %676 = vmatprep.subr.bf16.mxu0 %v1055_v24  ;;  %v1058_v45 = vld [vmem:[%s1201_s7 + $0xb4] ss:$8 sps:$4 sm:$0xff]   ;;  %v1060_v47 = vld [vmem:[%s1201_s7 + $0xb0] ss:$8 sps:$4 sm:$0xff]   ;;  %v1064_v48 = vld [vmem:[%s1201_s7 + $0xc4] ss:$8 sps:$4 sm:$0xff]   ;;  %v731_v13 = vlaneseq (!%p954_p11) }
  0x36   : > { %635 = vmatprep.subr.bf16.mxu1 %v1025_v16  ;;  %v1066_v49 = vld [vmem:[%s1201_s7 + $0xc0] ss:$8 sps:$4 sm:$0xff]   ;;  %v1070_v50 = vld [vmem:[%s1201_s7 + $0xd4] ss:$8 sps:$4 sm:$0xff]   ;;  %v1072_v51 = vld [vmem:[%s1201_s7 + $0xd0] ss:$8 sps:$4 sm:$0xff]  }
  0x37   : > { %v1076_v52 = vld [vmem:[%s1201_s7 + $0xe4] ss:$8 sps:$4 sm:$0xff]   ;;  %v1078_v53 = vld [vmem:[%s1201_s7 + $0xe0] ss:$8 sps:$4 sm:$0xff]   ;;  %v1082_v54 = vld [vmem:[%s1201_s7 + $0xf4] ss:$8 sps:$4 sm:$0xff]  }
  0x38   : > { %677 = vmatpush1.bf16.msra.mxu0 %v1057_v26  ;;  %v1084_v55 = vld [vmem:[%s1201_s7 + $0xf0] ss:$8 sps:$4 sm:$0xff]   ;;  %v315_v61 = vld [vmem:[#allocation2] sm:$0xff]  ;;  %v316_v0 = vld [vmem:[#allocation2 + $0x8] sm:$0xff]  ;;  %v732_v14 = vshrl.u32 (!%p954_p11), %v731_v13, 7 }
  0x39   : > { %636 = vmatpush1.bf16.msra.mxu1 %v1027_v19  ;;  %678 = vmatprep.subr.bf16.mxu0 %v1061_v28  ;;  %v317_v3 = vld [vmem:[#allocation2 + $0x10] sm:$0xff]  ;;  %v318_v7 = vld [vmem:[#allocation2 + $0x18] sm:$0xff]  ;;  %v729_v15 = vld [vmem:[%s1284_s2] sm:$0x3] (!%p954_p11) }
  0x3a   : > { %637 = vmatprep.subr.bf16.mxu1 %v1028_v20  ;;  %v733_v17 = vsub.s32 (!%p954_p11), 0, %v732_v14  ;;  %v737_v18 = vsub.s32 (!%p954_p11), 1, %v732_v14 }
  0x3c   : > { %679 = vmatpush1.bf16.msra.mxu0 %v1063_v30  ;;  %v734_v22 = vrot.slane (!%p954_p11), %v729_v15, %v733_v17 }
  0x3d   : > { %638 = vmatpush1.bf16.msra.mxu1 %v1030_v23  ;;  %680 = vmatprep.subr.bf16.mxu0 %v1067_v32  ;;  %v738_v23 = vrot.slane (!%p954_p11), %v729_v15, %v737_v18 }
  0x3e   : > { %639 = vmatprep.subr.bf16.mxu1 %v1031_v25 }
  0x40   : > { %681 = vmatpush1.bf16.msra.mxu0 %v1069_v34 }
  0x41   : > { %640 = vmatpush1.bf16.msra.mxu1 %v1033_v27  ;;  %682 = vmatprep.subr.bf16.mxu0 %v1073_v36 }
  0x42   : > { %641 = vmatprep.subr.bf16.mxu1 %v1034_v29 }
  0x44   : > { %683 = vmatpush1.bf16.msra.mxu0 %v1075_v38 }
  0x45   : > { %642 = vmatpush1.bf16.msra.mxu1 %v1036_v31  ;;  %684 = vmatprep.subr.bf16.mxu0 %v1079_v41 }
  0x46   : > { %643 = vmatprep.subr.bf16.mxu1 %v1040_v33 }
  0x48   : > { %685 = vmatpush1.bf16.msra.mxu0 %v1081_v43 }
  0x49   : > { %644 = vmatpush1.bf16.msra.mxu1 %v1042_v35 }
  0x4a   : > { %645 = vmatprep.subr.bf16.mxu1 %v1046_v37 }
  0x4b   : > { %703 = vmatmul.mubr.bf16.vlgmr.msra.gmra.mrb[0].mxu0 %v1085_v46 }
  0x4d   : > { %646 = vmatpush1.bf16.msra.mxu1 %v1048_v40 }
  0x4e   : > { %647 = vmatprep.subr.bf16.mxu1 %v1052_v42 }
  0x51   : > { %648 = vmatpush1.bf16.msra.mxu1 %v1054_v44 }
  0x52   : > { %649 = vmatprep.subr.bf16.mxu1 %v1058_v45 }
  0x55   : > { %650 = vmatpush1.bf16.msra.mxu1 %v1060_v47 }
  0x56   : > { %651 = vmatprep.subr.bf16.mxu1 %v1064_v48 }
  0x59   : > { %652 = vmatpush1.bf16.msra.mxu1 %v1066_v49 }
  0x5a   : > { %653 = vmatprep.subr.bf16.mxu1 %v1070_v50 }
  0x5d   : > { %654 = vmatpush1.bf16.msra.mxu1 %v1072_v51 }
  0x5e   : > { %655 = vmatprep.subr.bf16.mxu1 %v1076_v52 }
  0x61   : > { %656 = vmatpush1.bf16.msra.mxu1 %v1078_v53 }
  0x62   : > { %657 = vmatprep.subr.bf16.mxu1 %v1082_v54 }
  0x65   : > { %658 = vmatpush1.bf16.msra.mxu1 %v1084_v55 }
  0x68   : > { %660 = vmatmul.mubr.bf16.vlgmr.msra.gmra.mrb[0].mxu1 %v1086_v56 }
 0x11e   : > { %v704_v57 = vpop.f32.mrb[0].mxu0 }
 0x11f   : > { %v706_v58 = vpop.f32.mrb[1].mxu0 }
 0x120   : > { %v708_v59 = vpop.f32.mrb[2].mxu0 }
 0x121   : > { %v710_v60 = vpop.f32.mrb[3].mxu0 }
 0x13b   : > { %v661_v62 = vpop.f32.mrb[0].mxu1 }
 0x13c   : > { %v705_v63 = vadd.f32 %v704_v57, %v661_v62  ;;  %v663_v1 = vpop.f32.mrb[1].mxu1 }
 0x13d   : > { %v707_v2 = vadd.f32 %v706_v58, %v663_v1  ;;  %v665_v4 = vpop.f32.mrb[2].mxu1  ;;  %724 = sbr.rel (%p954_p11) target bundleno = 338 (0x152), region = 66 }
 0x13e   : > { %v713_v5 = vadd.f32 %v705_v63, %v315_v61  ;;  %v709_v6 = vadd.f32 %v708_v59, %v665_v4  ;;  %v667_v8 = vpop.f32.mrb[3].mxu1 }
 0x13f   : > { %v714_v9 = vadd.f32 %v707_v2, %v316_v0  ;;  %v711_v10 = vadd.f32 %v710_v60, %v667_v8 }
 0x140   : > { %717 = vst [vmem:[#allocation2] sm:$0xff] %v713_v5  ;;  %v715_v11 = vadd.f32 %v709_v6, %v317_v3 }
 0x141   : > { %718 = vst [vmem:[#allocation2 + $0x8] sm:$0xff] %v714_v9  ;;  %v716_v12 = vadd.f32 %v711_v10, %v318_v7 }
 0x142   : > { %719 = vst [vmem:[#allocation2 + $0x10] sm:$0xff] %v715_v11 }
 0x143   : > { %720 = vst [vmem:[#allocation2 + $0x18] sm:$0xff] %v716_v12 }
 0x147   : > { %v725_v16 = vld [vmem:[#allocation2] sm:$0xff] }
 0x148   : > { %v726_v19 = vld [vmem:[#allocation2 + $0x8] sm:$0xff]  ;;  %v741_v24 = vadd.f32 %v734_v22, %v725_v16 }
 0x149   : > { %v727_v20 = vld [vmem:[#allocation2 + $0x10] sm:$0xff]  ;;  %v742_v25 = vadd.f32 %v738_v23, %v726_v19 }
 0x14a   : > { %v728_v21 = vld [vmem:[#allocation2 + $0x18] sm:$0xff]  ;;  %v743_v26 = vadd.f32 %v734_v22, %v727_v20  ;;  %v745_v28 = vmax.f32 %v741_v24, 0.0 }
 0x14b   : > { %v744_v27 = vadd.f32 %v738_v23, %v728_v21  ;;  %v746_v29 = vmax.f32 %v742_v25, 0.0 }
 0x14c   : > { %v747_v30 = vmax.f32 %v743_v26, 0.0 }
 0x14d   : > { %v748_v31 = vmax.f32 %v744_v27, 0.0  ;;  %v963_v32 = vpack.c.bf16 %v746_v29, %v745_v28 }
 0x14f   : > { %v964_v33 = vpack.c.bf16 %v748_v31, %v747_v30  ;;  %761 = vst [vmem:[%s1285_s3] sm:$0xff] %v963_v32 }
 0x151   : > { %762 = vst [vmem:[%s1285_s3 + $0x8] sm:$0xff] %v964_v33 }
 0x152 PF: > { %s13_s16 = sadd.s32 1, %s1127_s16   ;;  %s1286_s12 = smov %s1115_s13 }
 0x153   : > { %p10_p12 = scmp.ge.s32.totalorder %s13_s16, 8   ;;  %s1287_s13 = smov %s1186_s20 }
 0x154   : > { %s1288_s14 = smov %s1123_s15  ;;  %s1289_s15 = smov %s1291_s17 }
 0x155   :  { %12 = sbr.rel (!%p10_p12) target bundleno = 3 (0x3), region = 113 }

// kernel: _lambda_.36
= control target key start
LH: loop header
LB: loop body
LE: loop exit
PB: predicated region body
PF: predicated region fallthrough
CT: control target
= control target key end

     0   :  { %s1813_s0 = inlined_call_operand.vmem [shape: bf16[16,2304], index: 0, kind: input, shape index: {}]   ;;  %s1814_s1 = inlined_call_operand.vmem [shape: bf16[2304,512], index: 1, kind: input, shape index: {}]   ;;  %s1815_s2 = inlined_call_operand.vmem [shape: f32[1,512], index: 2, kind: input, shape index: {}]   ;;  %s1816_s3 = inlined_call_operand.vmem [shape: bf16[16,512], index: 3, kind: output, shape index: {}]  }
   0x1   :  { %1818 = sst [smem:[#allocation7_spill]] %s1813_s0 }
   0x2   :  { %1819 = sst [smem:[#allocation8_spill]] %s1814_s1 }
   0x3   :  { %s1480_s12 = smov 0   ;;  %s1482_s13 = smov 0  }
   0x4   :  { %s1484_s14 = smov 0   ;;  %s1486_s15 = smov 0  }
   0x5   :  { %s1488_s16 = smov 0   ;;  %s1490_s17 = smov 0  }
   0x6   :  { %s1492_s18 = smov 0   ;;  %s1494_s19 = smov 0  }
   0x7   :  { %s1496_s20 = smov 0   ;;  %s1498_s21 = smov 0  }
   0x8   :  { %s1500_s22 = smov 0  }
   0x9 LB: > { %s1116_s23 = sadd.s32 4294967295, %s1456_s22   ;;  %s25_s24 = sadd.s32 1, %s1448_s20  ;;  %s1456_s22 = sphi %s1500_s22, %s13_s22   ;;  %s1452_s21 = sphi %s1498_s21, %s1836_s21   ;;  %s1448_s20 = sphi %s1496_s20, %s1835_s20   ;;  %s1444_s19 = sphi %s1494_s19, %s1834_s19   ;;  %s1440_s18 = sphi %s1492_s18, %s1833_s18   ;;  %s1436_s17 = sphi %s1490_s17, %s1832_s17   ;;  %s1432_s16 = sphi %s1488_s16, %s1831_s16   ;;  %s1428_s15 = sphi %s1486_s15, %s1830_s15   ;;  %s1424_s14 = sphi %s1484_s14, %s1829_s14   ;;  %s1420_s13 = sphi %s1482_s13, %s1828_s13   ;;  %s1416_s12 = sphi %s1480_s12, %s1827_s12  }
   0xa   : > { %p26_p0 = scmp.ge.s32.totalorder %s25_s24, 6  ;;  %s28_s25 = sadd.s32 1, %s1452_s21 }
   0xb   : > { %s41_s26 = sadd.s32 1, %s1436_s17  ;;  %p48_p1 = scmp.ne.s32.totalorder %s1436_s17, %s1432_s16 }
   0xc   : > { %s1838_s24 = smov (%p26_p0, %s25_s24), 0  ;;  %s1840_s25 = smov (!%p26_p0, %s28_s25), %s1452_s21 }
   0xd   : > { %s37_s27 = ssub.s32 %s1448_s20, %s1838_s24  ;;  %p49_p2 = scmp.eq.s32.totalorder %s1456_s22, 0 }
   0xe   : > { %p30_p3 = scmp.ge.s32.totalorder %s1840_s25, 2  ;;  %p39_p4 = scmp.eq.s32.totalorder %s37_s27, 0 }
   0xf   : > { %p1547_p5 = por %p49_p2, %p48_p1  ;;  %s69_s29 = sadd.s32 1, %s1428_s15 }
  0x10   : > { %s1842_s25 = smov (%p30_p3, %s1840_s25), 0  ;;  %p76_p6 = scmp.ne.s32.totalorder %s1428_s15, %s1424_s14 }
  0x11   : > { %1821 = sst [smem:[#allocation6_spill]] %s1842_s25  ;;  %s65_s4 = ssub.s32 %s1452_s21, %s1842_s25 }
  0x12   : > { %s1555_s30 = scalar_select %p39_p4, %s1436_s17, %s41_s26  }
  0x13   : > { %s66_s5 = sor.u32 %s65_s4, %s37_s27  ;;  %p121_p7 = scmp.eq.s32.totalorder %s65_s4, 0 }
  0x14   : > { %p67_p8 = scmp.eq.s32.totalorder %s66_s5, 0  ;;  %p1561_p9 = por %p76_p6, %p49_p2 }
  0x15   : > { %s123_s7 = sadd.s32 1, %s1420_s13  ;;  %p133_p10 = scmp.ne.s32.totalorder %s1420_s13, %s1416_s12 }
  0x16   : > { %s1569_s8 = scalar_select %p67_p8, %s1428_s15, %s69_s29  }
  0x17   : > { %s1572_s9 = scalar_select %p121_p7, %s1420_s13, %s123_s7  }
  0x18   : > { %p134_p11 = scmp.eq.s32.totalorder %s1116_s23, 11  ;;  %p1119_p13 = scmp.ge.s32.totalorder %s1456_s22, 12 }
  0x1a   : > { %p1574_p12 = por %p134_p11, %p133_p10  ;;  %156 = sbr.rel (%p1119_p13) target bundleno = 78 (0x4e), region = 16 }
  0x21   : > { %159 = sbr.rel (!%p1547_p5) target bundleno = 44 (0x2c), region = 20  ;;  %s161_s11 = sand.u32 (%p1547_p5), 1, %s1436_s17  }
  0x22   : > { %s1191_s26 = smul.u32 (%p1547_p5), 12, %s1448_s20  ;;  %s1824_s0 = sld [smem:[#allocation7_spill]] (%p1547_p5) }
  0x23   : > { %s1200_s27 = smul.u32 (%p1547_p5), 24, %s161_s11 }
  0x25   : > { %s163_s23 = scalar_lea.vmem (%p1547_p5), [#allocation3], %s1200_s27 }
  0x28   : > { %s169_s5 = scalar_lea.vmem %s1824_s0, %s1191_s26 }
  0x29   : > { %v184_v0 = vld [vmem:[%s169_s5] sm:$0xff]  ;;  %v186_v1 = vld [vmem:[%s169_s5 + $0x48] sm:$0xff]  ;;  %v1123_v3 = vld [vmem:[%s169_s5 + $0x50] sm:$0xf] }
  0x2a   : > { %v1121_v2 = vld [vmem:[%s169_s5 + $0x8] sm:$0xf]  ;;  %185 = vst [vmem:[%s163_s23] sm:$0xff] %v184_v0  ;;  %187 = vst [vmem:[%s163_s23 + $0xc] sm:$0xff] %v186_v1 }
  0x2b   : > { %1122 = vst [vmem:[%s163_s23 + $0x8] sm:$0xf] %v1121_v2  ;;  %1124 = vst [vmem:[%s163_s23 + $0x14] sm:$0xf] %v1123_v3 }
  0x2c PF: > { %204 = sbr.rel (!%p1561_p9) target bundleno = 78 (0x4e), region = 46  ;;  %s206_s28 = sand.u32 (%p1561_p9), 1, %s1428_s15  }
  0x2d   : > { %s1201_s7 = smul.u32 (%p1561_p9), 384, %s206_s28  ;;  %s1125_s11 = sshll.u32 (%p1561_p9), %s1452_s21, 1 }
  0x2e   : > { %s1192_s26 = smul.u32 (%p1561_p9), 192, %s1448_s20  ;;  %s1825_s1 = sld [smem:[#allocation8_spill]] (%p1561_p9) }
  0x2f   : > { %s1599_s6 = scalar_lea.vmem (%p1561_p9), [#allocation4], %s1201_s7 }
  0x30   : > { %s212_s29 = sadd.s32 (%p1561_p9), %s1192_s26, %s1125_s11 }
  0x31   : > { %s1127_s4 = sshll.u32 (%p1561_p9), %s212_s29, 2 }
  0x34   : > { %s1594_s25 = scalar_lea.vmem %s1825_s1, %s1127_s4 }
  0x35   : > { %v336_v4 = vld [vmem:[%s1594_s25] sm:$0xff]  ;;  %v338_v5 = vld [vmem:[%s1594_s25 + $0x10] sm:$0xff] }
  0x36   : > { %v340_v6 = vld [vmem:[%s1594_s25 + $0x20] sm:$0xff]  ;;  %337 = vst [vmem:[%s1599_s6] sm:$0xff] %v336_v4  ;;  %339 = vst [vmem:[%s1599_s6 + $0x8] sm:$0xff] %v338_v5  ;;  %v342_v7 = vld [vmem:[%s1594_s25 + $0x30] sm:$0xff] }
  0x37   : > { %341 = vst [vmem:[%s1599_s6 + $0x10] sm:$0xff] %v340_v6  ;;  %v344_v8 = vld [vmem:[%s1594_s25 + $0x40] sm:$0xff]  ;;  %v346_v9 = vld [vmem:[%s1594_s25 + $0x50] sm:$0xff]  ;;  %343 = vst [vmem:[%s1599_s6 + $0x18] sm:$0xff] %v342_v7 }
  0x38   : > { %345 = vst [vmem:[%s1599_s6 + $0x20] sm:$0xff] %v344_v8  ;;  %347 = vst [vmem:[%s1599_s6 + $0x28] sm:$0xff] %v346_v9  ;;  %v348_v10 = vld [vmem:[%s1594_s25 + $0x60] sm:$0xff]  ;;  %v350_v11 = vld [vmem:[%s1594_s25 + $0x70] sm:$0xff] }
  0x39   : > { %v352_v12 = vld [vmem:[%s1594_s25 + $0x80] sm:$0xff]  ;;  %349 = vst [vmem:[%s1599_s6 + $0x30] sm:$0xff] %v348_v10  ;;  %351 = vst [vmem:[%s1599_s6 + $0x38] sm:$0xff] %v350_v11  ;;  %v354_v13 = vld [vmem:[%s1594_s25 + $0x90] sm:$0xff] }
  0x3a   : > { %353 = vst [vmem:[%s1599_s6 + $0x40] sm:$0xff] %v352_v12  ;;  %v356_v14 = vld [vmem:[%s1594_s25 + $0xa0] sm:$0xff]  ;;  %v358_v15 = vld [vmem:[%s1594_s25 + $0xb0] sm:$0xff]  ;;  %355 = vst [vmem:[%s1599_s6 + $0x48] sm:$0xff] %v354_v13 }
  0x3b   : > { %357 = vst [vmem:[%s1599_s6 + $0x50] sm:$0xff] %v356_v14  ;;  %359 = vst [vmem:[%s1599_s6 + $0x58] sm:$0xff] %v358_v15  ;;  %v360_v16 = vld [vmem:[%s1594_s25 + $0xc0] sm:$0xff]  ;;  %v362_v17 = vld [vmem:[%s1594_s25 + $0xd0] sm:$0xff] }
  0x3c   : > { %v364_v18 = vld [vmem:[%s1594_s25 + $0xe0] sm:$0xff]  ;;  %361 = vst [vmem:[%s1599_s6 + $0x60] sm:$0xff] %v360_v16  ;;  %363 = vst [vmem:[%s1599_s6 + $0x68] sm:$0xff] %v362_v17  ;;  %v366_v19 = vld [vmem:[%s1594_s25 + $0xf0] sm:$0xff] }
  0x3d   : > { %365 = vst [vmem:[%s1599_s6 + $0x70] sm:$0xff] %v364_v18  ;;  %v368_v20 = vld [vmem:[%s1594_s25 + $0x100] sm:$0xff]  ;;  %v370_v21 = vld [vmem:[%s1594_s25 + $0x110] sm:$0xff]  ;;  %367 = vst [vmem:[%s1599_s6 + $0x78] sm:$0xff] %v366_v19 }
  0x3e   : > { %369 = vst [vmem:[%s1599_s6 + $0x80] sm:$0xff] %v368_v20  ;;  %371 = vst [vmem:[%s1599_s6 + $0x88] sm:$0xff] %v370_v21  ;;  %v372_v22 = vld [vmem:[%s1594_s25 + $0x120] sm:$0xff]  ;;  %v374_v23 = vld [vmem:[%s1594_s25 + $0x130] sm:$0xff] }
  0x3f   : > { %v376_v24 = vld [vmem:[%s1594_s25 + $0x140] sm:$0xff]  ;;  %373 = vst [vmem:[%s1599_s6 + $0x90] sm:$0xff] %v372_v22  ;;  %375 = vst [vmem:[%s1599_s6 + $0x98] sm:$0xff] %v374_v23  ;;  %v378_v25 = vld [vmem:[%s1594_s25 + $0x150] sm:$0xff] }
  0x40   : > { %377 = vst [vmem:[%s1599_s6 + $0xa0] sm:$0xff] %v376_v24  ;;  %v380_v26 = vld [vmem:[%s1594_s25 + $0x160] sm:$0xff]  ;;  %v382_v27 = vld [vmem:[%s1594_s25 + $0x170] sm:$0xff]  ;;  %379 = vst [vmem:[%s1599_s6 + $0xa8] sm:$0xff] %v378_v25 }
  0x41   : > { %381 = vst [vmem:[%s1599_s6 + $0xb0] sm:$0xff] %v380_v26  ;;  %383 = vst [vmem:[%s1599_s6 + $0xb8] sm:$0xff] %v382_v27  ;;  %v384_v28 = vld [vmem:[%s1594_s25 + $0x180] sm:$0xff]  ;;  %v386_v29 = vld [vmem:[%s1594_s25 + $0x190] sm:$0xff] }
  0x42   : > { %v388_v30 = vld [vmem:[%s1594_s25 + $0x1a0] sm:$0xff]  ;;  %385 = vst [vmem:[%s1599_s6 + $0xc0] sm:$0xff] %v384_v28  ;;  %387 = vst [vmem:[%s1599_s6 + $0xc8] sm:$0xff] %v386_v29  ;;  %v390_v31 = vld [vmem:[%s1594_s25 + $0x1b0] sm:$0xff] }
  0x43   : > { %389 = vst [vmem:[%s1599_s6 + $0xd0] sm:$0xff] %v388_v30  ;;  %v392_v32 = vld [vmem:[%s1594_s25 + $0x1c0] sm:$0xff]  ;;  %v394_v33 = vld [vmem:[%s1594_s25 + $0x1d0] sm:$0xff]  ;;  %391 = vst [vmem:[%s1599_s6 + $0xd8] sm:$0xff] %v390_v31 }
  0x44   : > { %393 = vst [vmem:[%s1599_s6 + $0xe0] sm:$0xff] %v392_v32  ;;  %395 = vst [vmem:[%s1599_s6 + $0xe8] sm:$0xff] %v394_v33  ;;  %v396_v34 = vld [vmem:[%s1594_s25 + $0x1e0] sm:$0xff]  ;;  %v398_v35 = vld [vmem:[%s1594_s25 + $0x1f0] sm:$0xff] }
  0x45   : > { %v400_v36 = vld [vmem:[%s1594_s25 + $0x200] sm:$0xff]  ;;  %397 = vst [vmem:[%s1599_s6 + $0xf0] sm:$0xff] %v396_v34  ;;  %399 = vst [vmem:[%s1599_s6 + $0xf8] sm:$0xff] %v398_v35  ;;  %v402_v37 = vld [vmem:[%s1594_s25 + $0x210] sm:$0xff] }
  0x46   : > { %401 = vst [vmem:[%s1599_s6 + $0x100] sm:$0xff] %v400_v36  ;;  %v404_v38 = vld [vmem:[%s1594_s25 + $0x220] sm:$0xff]  ;;  %v406_v39 = vld [vmem:[%s1594_s25 + $0x230] sm:$0xff]  ;;  %403 = vst [vmem:[%s1599_s6 + $0x108] sm:$0xff] %v402_v37 }
  0x47   : > { %405 = vst [vmem:[%s1599_s6 + $0x110] sm:$0xff] %v404_v38  ;;  %407 = vst [vmem:[%s1599_s6 + $0x118] sm:$0xff] %v406_v39  ;;  %v408_v40 = vld [vmem:[%s1594_s25 + $0x240] sm:$0xff]  ;;  %v410_v41 = vld [vmem:[%s1594_s25 + $0x250] sm:$0xff] }
  0x48   : > { %v412_v42 = vld [vmem:[%s1594_s25 + $0x260] sm:$0xff]  ;;  %409 = vst [vmem:[%s1599_s6 + $0x120] sm:$0xff] %v408_v40  ;;  %411 = vst [vmem:[%s1599_s6 + $0x128] sm:$0xff] %v410_v41  ;;  %v414_v43 = vld [vmem:[%s1594_s25 + $0x270] sm:$0xff] }
  0x49   : > { %413 = vst [vmem:[%s1599_s6 + $0x130] sm:$0xff] %v412_v42  ;;  %v416_v44 = vld [vmem:[%s1594_s25 + $0x280] sm:$0xff]  ;;  %v418_v45 = vld [vmem:[%s1594_s25 + $0x290] sm:$0xff]  ;;  %415 = vst [vmem:[%s1599_s6 + $0x138] sm:$0xff] %v414_v43 }
  0x4a   : > { %417 = vst [vmem:[%s1599_s6 + $0x140] sm:$0xff] %v416_v44  ;;  %419 = vst [vmem:[%s1599_s6 + $0x148] sm:$0xff] %v418_v45  ;;  %v420_v46 = vld [vmem:[%s1594_s25 + $0x2a0] sm:$0xff]  ;;  %v422_v47 = vld [vmem:[%s1594_s25 + $0x2b0] sm:$0xff] }
  0x4b   : > { %v424_v48 = vld [vmem:[%s1594_s25 + $0x2c0] sm:$0xff]  ;;  %421 = vst [vmem:[%s1599_s6 + $0x150] sm:$0xff] %v420_v46  ;;  %423 = vst [vmem:[%s1599_s6 + $0x158] sm:$0xff] %v422_v47  ;;  %v426_v49 = vld [vmem:[%s1594_s25 + $0x2d0] sm:$0xff] }
  0x4c   : > { %425 = vst [vmem:[%s1599_s6 + $0x160] sm:$0xff] %v424_v48  ;;  %v428_v50 = vld [vmem:[%s1594_s25 + $0x2e0] sm:$0xff]  ;;  %v430_v51 = vld [vmem:[%s1594_s25 + $0x2f0] sm:$0xff]  ;;  %427 = vst [vmem:[%s1599_s6 + $0x168] sm:$0xff] %v426_v49 }
  0x4d   : > { %429 = vst [vmem:[%s1599_s6 + $0x170] sm:$0xff] %v428_v50  ;;  %431 = vst [vmem:[%s1599_s6 + $0x178] sm:$0xff] %v430_v51 }
  0x4e PF: > { %p1128_p0 = scmp.ge.s32.totalorder %s1456_s22, 1  ;;  %p444_p1 = scmp.lt.s32.totalorder %s1456_s22, 13 }
  0x50   : > { %p445_p2 = pnand %p1128_p0, %p444_p1 }
  0x51   : > { %s451_s0 = sand.u32 (!%p445_p2), 1, %s1432_s16   ;;  %s458_s5 = sand.u32 (!%p445_p2), 1, %s1424_s14  }
  0x52   : > { %448 = sbr.rel (%p445_p2) target bundleno = 403 (0x193), region = 88  ;;  %s485_s28 = sand.u32 (!%p445_p2), 1, %s1416_s12  }
  0x53   : > { %s1202_s23 = smul.u32 (!%p445_p2), 24, %s451_s0  ;;  %s1129_s7 = sshll.u32 (!%p445_p2), %s485_s28, 4 }
  0x54   : > { %s1203_s25 = smul.u32 (!%p445_p2), 384, %s458_s5  ;;  %s1130_s11 = sshll.u32 (!%p445_p2), %s1444_s19, 1 }
  0x55   : > { %p493_p3 = scmp.lt.s32.totalorder (!%p445_p2), %s1130_s11, 3  ;;  %s1706_s27 = scalar_lea.vmem (!%p445_p2), [#allocation3], %s1202_s23 }
  0x56   : > { %s1708_s6 = scalar_lea.vmem (!%p445_p2), [#allocation4], %s1203_s25  ;;  %s1710_s1 = scalar_lea.vmem (!%p445_p2), [#allocation5], %s1129_s7 }
  0x57   : > { %p1131_p4 = scmp.ne.s32.totalorder (!%p445_p2), %s1440_s18, 0 }
  0x59   : > { %s1844_s11 = smov (!%p493_p3, %s1130_s11), 3  ;;  %503 = sbr.rel (%p1131_p4) target bundleno = 96 (0x60), region = 100 }
  0x5a   : > { %s495_s4 = scalar_lea.vmem %s1815_s2, %s1844_s11  ;;  %v1458_v52 = vmov (!%p1131_p4), 0.0  }
  0x5b   : > { %504 = vst [vmem:[#allocation2] sm:$0xff] (!%p1131_p4), %v1458_v52  ;;  %505 = vst [vmem:[#allocation2 + $0x8] sm:$0xff] (!%p1131_p4), %v1458_v52 }
  0x5c   : > { %506 = vst [vmem:[#allocation2 + $0x10] sm:$0xff] (!%p1131_p4), %v1458_v52  ;;  %507 = vst [vmem:[#allocation2 + $0x18] sm:$0xff] (!%p1131_p4), %v1458_v52 }
  0x60 PF: > { %v1294_v53 = vld [vmem:[%s1708_s6 + $0x4] ss:$8 sps:$4 sm:$0xff]   ;;  %v1296_v54 = vld [vmem:[%s1708_s6] ss:$8 sps:$4 sm:$0xff]   ;;  %v1459_v55 = vmov 0   ;;  %p1183_p5 = scmp.ne.s32.totalorder %s1440_s18, 5 }
  0x61   : > { %895 = vmatprep.mubr.bf16.mxu0 %v1459_v55  ;;  %820 = vmatprep.subr.bf16.mxu1 %v1294_v53  ;;  %v1297_v56 = vld [vmem:[%s1708_s6 + $0x14] ss:$8 sps:$4 sm:$0xff]   ;;  %v1299_v57 = vld [vmem:[%s1708_s6 + $0x10] ss:$8 sps:$4 sm:$0xff]   ;;  %v1300_v58 = vld [vmem:[%s1708_s6 + $0x24] ss:$8 sps:$4 sm:$0xff]  }
  0x62   : > { %821 = vmatpush1.bf16.msra.mxu1 %v1296_v54  ;;  %v1302_v59 = vld [vmem:[%s1708_s6 + $0x20] ss:$8 sps:$4 sm:$0xff]   ;;  %v1303_v60 = vld [vmem:[%s1708_s6 + $0x34] ss:$8 sps:$4 sm:$0xff]   ;;  %v1305_v61 = vld [vmem:[%s1708_s6 + $0x30] ss:$8 sps:$4 sm:$0xff]  }
  0x63   : > { %822 = vmatprep.subr.bf16.mxu1 %v1297_v56  ;;  %v1318_v62 = vld [vmem:[%s1708_s6 + $0x104] ss:$8 sps:$4 sm:$0xff]   ;;  %v1320_v63 = vld [vmem:[%s1708_s6 + $0x100] ss:$8 sps:$4 sm:$0xff]   ;;  %v1324_v1 = vld [vmem:[%s1708_s6 + $0x114] ss:$8 sps:$4 sm:$0xff]  }
  0x64   : > { %v1306_v0 = vld [vmem:[%s1708_s6 + $0x44] ss:$8 sps:$4 sm:$0xff]   ;;  %863 = vmatprep.subr.bf16.mxu0 %v1318_v62  ;;  %v1326_v2 = vld [vmem:[%s1708_s6 + $0x110] ss:$8 sps:$4 sm:$0xff]   ;;  %v1308_v3 = vld [vmem:[%s1708_s6 + $0x40] ss:$8 sps:$4 sm:$0xff]  }
  0x65   : > { %864 = vmatpush1.bf16.msra.mxu0 %v1320_v63  ;;  %v1309_v4 = vld [vmem:[%s1708_s6 + $0x54] ss:$8 sps:$4 sm:$0xff]   ;;  %v1330_v5 = vld [vmem:[%s1708_s6 + $0x124] ss:$8 sps:$4 sm:$0xff]   ;;  %v1332_v6 = vld [vmem:[%s1708_s6 + $0x120] ss:$8 sps:$4 sm:$0xff]  }
  0x66   : > { %823 = vmatpush1.bf16.msra.mxu1 %v1299_v57  ;;  %865 = vmatprep.subr.bf16.mxu0 %v1324_v1  ;;  %v1311_v7 = vld [vmem:[%s1708_s6 + $0x50] ss:$8 sps:$4 sm:$0xff]   ;;  %v1336_v8 = vld [vmem:[%s1708_s6 + $0x134] ss:$8 sps:$4 sm:$0xff]   ;;  %v1312_v9 = vld [vmem:[%s1708_s6 + $0x64] ss:$8 sps:$4 sm:$0xff]  }
  0x67   : > { %824 = vmatprep.subr.bf16.mxu1 %v1300_v58  ;;  %v1338_v10 = vld [vmem:[%s1708_s6 + $0x130] ss:$8 sps:$4 sm:$0xff]   ;;  %v1314_v11 = vld [vmem:[%s1708_s6 + $0x60] ss:$8 sps:$4 sm:$0xff]   ;;  %v1342_v12 = vld [vmem:[%s1708_s6 + $0x144] ss:$8 sps:$4 sm:$0xff]  }
  0x68   : > { %v1315_v13 = vld [vmem:[%s1708_s6 + $0x74] ss:$8 sps:$4 sm:$0xff]   ;;  %v1344_v14 = vld [vmem:[%s1708_s6 + $0x140] ss:$8 sps:$4 sm:$0xff]   ;;  %v1317_v15 = vld [vmem:[%s1708_s6 + $0x70] ss:$8 sps:$4 sm:$0xff]  }
  0x69   : > { %866 = vmatpush1.bf16.msra.mxu0 %v1326_v2  ;;  %v1348_v16 = vld [vmem:[%s1708_s6 + $0x154] ss:$8 sps:$4 sm:$0xff]   ;;  %v1321_v17 = vld [vmem:[%s1708_s6 + $0x84] ss:$8 sps:$4 sm:$0xff]   ;;  %v1350_v18 = vld [vmem:[%s1708_s6 + $0x150] ss:$8 sps:$4 sm:$0xff]  }
  0x6a   : > { %825 = vmatpush1.bf16.msra.mxu1 %v1302_v59  ;;  %867 = vmatprep.subr.bf16.mxu0 %v1330_v5  ;;  %v1323_v19 = vld [vmem:[%s1708_s6 + $0x80] ss:$8 sps:$4 sm:$0xff]   ;;  %v1354_v20 = vld [vmem:[%s1708_s6 + $0x164] ss:$8 sps:$4 sm:$0xff]   ;;  %v1327_v21 = vld [vmem:[%s1708_s6 + $0x94] ss:$8 sps:$4 sm:$0xff]  }
  0x6b   : > { %826 = vmatprep.subr.bf16.mxu1 %v1303_v60  ;;  %v1356_v22 = vld [vmem:[%s1708_s6 + $0x160] ss:$8 sps:$4 sm:$0xff]   ;;  %v1329_v24 = vld [vmem:[%s1708_s6 + $0x90] ss:$8 sps:$4 sm:$0xff]   ;;  %v1360_v25 = vld [vmem:[%s1708_s6 + $0x174] ss:$8 sps:$4 sm:$0xff]  }
  0x6c   : > { %v1369_v23 = vld [vmem:[%s1706_s27 + $0x4] ss:$12 sps:$4 sm:$0xff]   ;;  %v1366_v30 = vld [vmem:[%s1706_s27 + $0x8] ss:$12 sps:$4 sm:$0xff]   ;;  %v1367_v40 = vld [vmem:[%s1706_s27] ss:$12 sps:$4 sm:$0xff]  }
  0x6d   : > { %868 = vmatpush1.bf16.msra.mxu0 %v1332_v6  ;;  %v1333_v26 = vld [vmem:[%s1708_s6 + $0xa4] ss:$8 sps:$4 sm:$0xff]   ;;  %852 = vmatprep.mubr.bf16.mxu1 %v1369_v23  ;;  %v1362_v27 = vld [vmem:[%s1708_s6 + $0x170] ss:$8 sps:$4 sm:$0xff]   ;;  %v1335_v28 = vld [vmem:[%s1708_s6 + $0xa0] ss:$8 sps:$4 sm:$0xff]  }
  0x6e   : > { %827 = vmatpush1.bf16.msra.mxu1 %v1305_v61  ;;  %869 = vmatprep.subr.bf16.mxu0 %v1336_v8  ;;  %v1339_v29 = vld [vmem:[%s1708_s6 + $0xb4] ss:$8 sps:$4 sm:$0xff]   ;;  %v1341_v31 = vld [vmem:[%s1708_s6 + $0xb0] ss:$8 sps:$4 sm:$0xff]   ;;  %v1345_v32 = vld [vmem:[%s1708_s6 + $0xc4] ss:$8 sps:$4 sm:$0xff]   ;;  %v924_v61 = vlaneseq (!%p1183_p5) }
  0x6f   : > { %828 = vmatprep.subr.bf16.mxu1 %v1306_v0  ;;  %v1347_v33 = vld [vmem:[%s1708_s6 + $0xc0] ss:$8 sps:$4 sm:$0xff]   ;;  %v1351_v34 = vld [vmem:[%s1708_s6 + $0xd4] ss:$8 sps:$4 sm:$0xff]   ;;  %v1353_v35 = vld [vmem:[%s1708_s6 + $0xd0] ss:$8 sps:$4 sm:$0xff]  }
  0x70   : > { %v1357_v36 = vld [vmem:[%s1708_s6 + $0xe4] ss:$8 sps:$4 sm:$0xff]   ;;  %v1359_v37 = vld [vmem:[%s1708_s6 + $0xe0] ss:$8 sps:$4 sm:$0xff]   ;;  %v1363_v38 = vld [vmem:[%s1708_s6 + $0xf4] ss:$8 sps:$4 sm:$0xff]  }
  0x71   : > { %870 = vmatpush1.bf16.msra.mxu0 %v1338_v10  ;;  %v1365_v39 = vld [vmem:[%s1708_s6 + $0xf0] ss:$8 sps:$4 sm:$0xff]   ;;  %v510_v51 = vld [vmem:[#allocation2 + $0x10] sm:$0xff]  ;;  %v511_v55 = vld [vmem:[#allocation2 + $0x18] sm:$0xff]  ;;  %v925_v62 = vshrl.u32 (!%p1183_p5), %v924_v61, 7 }
  0x72   : > { %829 = vmatpush1.bf16.msra.mxu1 %v1308_v3  ;;  %871 = vmatprep.subr.bf16.mxu0 %v1342_v12  ;;  %v508_v45 = vld [vmem:[#allocation2] sm:$0xff]  ;;  %v509_v48 = vld [vmem:[#allocation2 + $0x8] sm:$0xff] }
  0x73   : > { %830 = vmatprep.subr.bf16.mxu1 %v1309_v4  ;;  %v922_v63 = vld [vmem:[%s495_s4] sm:$0x3] (!%p1183_p5)  ;;  %v926_v1 = vsub.s32 (!%p1183_p5), 0, %v925_v62  ;;  %v930_v2 = vsub.s32 (!%p1183_p5), 1, %v925_v62 }
  0x75   : > { %872 = vmatpush1.bf16.msra.mxu0 %v1344_v14  ;;  %v927_v6 = vrot.slane (!%p1183_p5), %v922_v63, %v926_v1 }
  0x76   : > { %831 = vmatpush1.bf16.msra.mxu1 %v1311_v7  ;;  %873 = vmatprep.subr.bf16.mxu0 %v1348_v16  ;;  %v931_v7 = vrot.slane (!%p1183_p5), %v922_v63, %v930_v2 }
  0x77   : > { %832 = vmatprep.subr.bf16.mxu1 %v1312_v9 }
  0x79   : > { %874 = vmatpush1.bf16.msra.mxu0 %v1350_v18 }
  0x7a   : > { %833 = vmatpush1.bf16.msra.mxu1 %v1314_v11  ;;  %875 = vmatprep.subr.bf16.mxu0 %v1354_v20 }
  0x7b   : > { %834 = vmatprep.subr.bf16.mxu1 %v1315_v13 }
  0x7d   : > { %876 = vmatpush1.bf16.msra.mxu0 %v1356_v22 }
  0x7e   : > { %835 = vmatpush1.bf16.msra.mxu1 %v1317_v15  ;;  %877 = vmatprep.subr.bf16.mxu0 %v1360_v25 }
  0x7f   : > { %836 = vmatprep.subr.bf16.mxu1 %v1321_v17 }
  0x81   : > { %878 = vmatpush1.bf16.msra.mxu0 %v1362_v27 }
  0x82   : > { %837 = vmatpush1.bf16.msra.mxu1 %v1323_v19 }
  0x83   : > { %838 = vmatprep.subr.bf16.mxu1 %v1327_v21 }
  0x84   : > { %896 = vmatmul.mubr.bf16.vlgmr.msra.gmra.mrb[0].mxu0 %v1366_v30 }
  0x86   : > { %839 = vmatpush1.bf16.msra.mxu1 %v1329_v24 }
  0x87   : > { %840 = vmatprep.subr.bf16.mxu1 %v1333_v26 }
  0x8a   : > { %841 = vmatpush1.bf16.msra.mxu1 %v1335_v28 }
  0x8b   : > { %842 = vmatprep.subr.bf16.mxu1 %v1339_v29 }
  0x8e   : > { %843 = vmatpush1.bf16.msra.mxu1 %v1341_v31 }
  0x8f   : > { %844 = vmatprep.subr.bf16.mxu1 %v1345_v32 }
  0x92   : > { %845 = vmatpush1.bf16.msra.mxu1 %v1347_v33 }
  0x93   : > { %846 = vmatprep.subr.bf16.mxu1 %v1351_v34 }
  0x96   : > { %847 = vmatpush1.bf16.msra.mxu1 %v1353_v35 }
  0x97   : > { %848 = vmatprep.subr.bf16.mxu1 %v1357_v36 }
  0x9a   : > { %849 = vmatpush1.bf16.msra.mxu1 %v1359_v37 }
  0x9b   : > { %850 = vmatprep.subr.bf16.mxu1 %v1363_v38 }
  0x9e   : > { %851 = vmatpush1.bf16.msra.mxu1 %v1365_v39 }
  0xa1   : > { %853 = vmatmul.mubr.bf16.vlgmr.msra.gmra.mrb[0].mxu1 %v1367_v40 }
 0x157   : > { %v897_v41 = vpop.f32.mrb[0].mxu0 }
 0x158   : > { %v899_v42 = vpop.f32.mrb[1].mxu0 }
 0x159   : > { %v901_v43 = vpop.f32.mrb[2].mxu0 }
 0x15a   : > { %v903_v44 = vpop.f32.mrb[3].mxu0 }
 0x174   : > { %v854_v46 = vpop.f32.mrb[0].mxu1 }
 0x175   : > { %v898_v47 = vadd.f32 %v897_v41, %v854_v46  ;;  %v856_v49 = vpop.f32.mrb[1].mxu1 }
 0x176   : > { %v900_v50 = vadd.f32 %v899_v42, %v856_v49  ;;  %v858_v52 = vpop.f32.mrb[2].mxu1  ;;  %917 = sbr.rel (%p1183_p5) target bundleno = 395 (0x18b), region = 104 }
 0x177   : > { %v906_v53 = vadd.f32 %v898_v47, %v508_v45  ;;  %v902_v54 = vadd.f32 %v901_v43, %v858_v52  ;;  %v860_v56 = vpop.f32.mrb[3].mxu1 }
 0x178   : > { %v907_v57 = vadd.f32 %v900_v50, %v509_v48  ;;  %v904_v58 = vadd.f32 %v903_v44, %v860_v56 }
 0x179   : > { %910 = vst [vmem:[#allocation2] sm:$0xff] %v906_v53  ;;  %v908_v59 = vadd.f32 %v902_v54, %v510_v51 }
 0x17a   : > { %911 = vst [vmem:[#allocation2 + $0x8] sm:$0xff] %v907_v57  ;;  %v909_v60 = vadd.f32 %v904_v58, %v511_v55 }
 0x17b   : > { %912 = vst [vmem:[#allocation2 + $0x10] sm:$0xff] %v908_v59 }
 0x17c   : > { %913 = vst [vmem:[#allocation2 + $0x18] sm:$0xff] %v909_v60 }
 0x180   : > { %v918_v0 = vld [vmem:[#allocation2] sm:$0xff] }
 0x181   : > { %v919_v3 = vld [vmem:[#allocation2 + $0x8] sm:$0xff]  ;;  %v934_v8 = vadd.f32 %v927_v6, %v918_v0 }
 0x182   : > { %v920_v4 = vld [vmem:[#allocation2 + $0x10] sm:$0xff]  ;;  %v935_v9 = vadd.f32 %v931_v7, %v919_v3 }
 0x183   : > { %v921_v5 = vld [vmem:[#allocation2 + $0x18] sm:$0xff]  ;;  %v936_v10 = vadd.f32 %v927_v6, %v920_v4  ;;  %v938_v12 = vmax.f32 %v934_v8, 0.0 }
 0x184   : > { %v937_v11 = vadd.f32 %v931_v7, %v921_v5  ;;  %v939_v13 = vmax.f32 %v935_v9, 0.0 }
 0x185   : > { %v940_v14 = vmax.f32 %v936_v10, 0.0 }
 0x186   : > { %v941_v15 = vmax.f32 %v937_v11, 0.0  ;;  %v1193_v16 = vpack.c.bf16 %v939_v13, %v938_v12 }
 0x188   : > { %v1194_v17 = vpack.c.bf16 %v941_v15, %v940_v14  ;;  %954 = vst [vmem:[%s1710_s1] sm:$0xff] %v1193_v16 }
 0x18a   : > { %955 = vst [vmem:[%s1710_s1 + $0x8] sm:$0xff] %v1194_v17 }
 0x18b PF: > { %962 = sbr.rel (!%p1574_p12) target bundleno = 403 (0x193), region = 108  ;;  %s1195_s16 = sshll.u32 (%p1574_p12), %s1444_s19, 3 }
 0x18c   : > { %s968_s5 = scalar_lea.vmem (%p1574_p12), %s1816_s3, %s1195_s16 }
 0x18f   : > { %v998_v18 = vld [vmem:[%s1710_s1] sm:$0xff] (%p1574_p12) }
 0x190   : > { %999 = vst [vmem:[%s968_s5] sm:$0xff] (%p1574_p12), %v998_v18 }
 0x191   : > { %v1000_v19 = vld [vmem:[%s1710_s1 + $0x8] sm:$0xff] (%p1574_p12) }
 0x192   : > { %1001 = vst [vmem:[%s968_s5 + $0x10] sm:$0xff] %v1000_v19 }
 0x193 PF: > { %s13_s22 = sadd.s32 1, %s1456_s22   ;;  %s1826_s1 = sld [smem:[#allocation6_spill]] }
 0x194   : > { %p10_p6 = scmp.ge.s32.totalorder %s13_s22, 14   ;;  %s1827_s12 = smov %s1420_s13 }
 0x195   : > { %s1828_s13 = smov %s1572_s9  ;;  %s1829_s14 = smov %s1428_s15 }
 0x196   : > { %s1830_s15 = smov %s1569_s8  ;;  %s1831_s16 = smov %s1436_s17 }
 0x197   : > { %s1832_s17 = smov %s1555_s30  ;;  %s1833_s18 = smov %s1448_s20 }
 0x198   : > { %s1834_s19 = smov %s1452_s21  ;;  %s1835_s20 = smov %s1838_s24 }
 0x199   : > { %s1836_s21 = smov %s1826_s1  ;;  %12 = sbr.rel (!%p10_p6) target bundleno = 9 (0x9), region = 194 }

// kernel: _lambda_.37
= control target key start
LH: loop header
LB: loop body
LE: loop exit
PB: predicated region body
PF: predicated region fallthrough
CT: control target
= control target key end

     0   :  { %s1079_s12 = smov 0   ;;  %s1081_s13 = smov 0   ;;  %s1267_s0 = inlined_call_operand.vmem [shape: bf16[16,256], index: 0, kind: input, shape index: {}]   ;;  %s1268_s1 = inlined_call_operand.vmem [shape: bf16[256,512], index: 1, kind: input, shape index: {}]   ;;  %s1269_s2 = inlined_call_operand.vmem [shape: f32[1,512], index: 2, kind: input, shape index: {}]   ;;  %s1270_s3 = inlined_call_operand.vmem [shape: bf16[16,512], index: 3, kind: output, shape index: {}]  }
   0x1   :  { %s1083_s14 = smov 0   ;;  %s1085_s15 = smov 0  }
   0x2   :  { %s1087_s16 = smov 0  }
   0x3 LB: > { %s28_s17 = sadd.s32 1, %s1053_s15  ;;  %s871_s18 = sadd.s32 4294967295, %s1057_s16   ;;  %s1057_s16 = sphi %s1087_s16, %s13_s16   ;;  %s1053_s15 = sphi %s1085_s15, %s1275_s15   ;;  %s1049_s14 = sphi %s1083_s14, %s1274_s14   ;;  %s1045_s13 = sphi %s1081_s13, %s1273_s13   ;;  %s1041_s12 = sphi %s1079_s12, %s1272_s12  }
   0x4   : > { %p30_p0 = scmp.ge.s32.totalorder %s28_s17, 2  ;;  %p76_p1 = scmp.ne.s32.totalorder %s1045_s13, %s1041_s12 }
   0x5   : > { %p77_p2 = scmp.eq.s32.totalorder %s1057_s16, 0  ;;  %p134_p4 = scmp.eq.s32.totalorder %s871_s18, 1 }
   0x6   : > { %s1277_s17 = smov (%p30_p0, %s28_s17), 0  ;;  %s69_s20 = sadd.s32 1, %s1045_s13 }
   0x7   : > { %p78_p3 = por %p77_p2, %p76_p1  ;;  %s65_s19 = ssub.s32 %s1053_s15, %s1277_s17 }
   0x8   : > { %p67_p5 = scmp.eq.s32.totalorder %s65_s19, 0  ;;  %p1114_p6 = por %p134_p4, %p76_p1 }
   0x9   : > { %p875_p7 = scmp.ge.s32.totalorder %s1057_s16, 2 }
   0xa   : > { %s1119_s22 = scalar_select %p67_p5, %s1045_s13, %s69_s20  }
   0xb   : > { %171 = sbr.rel (%p875_p7) target bundleno = 38 (0x26), region = 20 }
  0x12   : > { %174 = sbr.rel (!%p78_p3) target bundleno = 38 (0x26), region = 24  ;;  %s176_s23 = sand.u32 (%p78_p3), 1, %s1045_s13  }
  0x13   : > { %s924_s24 = sshll.u32 (%p78_p3), %s1053_s15, 3  ;;  %s876_s25 = sshll.u32 (%p78_p3), %s176_s23, 8 }
  0x14   : > { %s1127_s28 = scalar_lea.vmem (%p78_p3), %s1268_s1, %s924_s24  ;;  %s1132_s29 = scalar_lea.vmem (%p78_p3), [#allocation3], %s876_s25 }
  0x15   : > { %v274_v0 = vld [vmem:[%s1127_s28] sm:$0xff] (%p78_p3)  ;;  %v276_v1 = vld [vmem:[%s1127_s28 + $0x10] sm:$0xff] (%p78_p3) }
  0x16   : > { %v278_v2 = vld [vmem:[%s1127_s28 + $0x20] sm:$0xff] (%p78_p3)  ;;  %275 = vst [vmem:[%s1132_s29] sm:$0xff] (%p78_p3), %v274_v0  ;;  %277 = vst [vmem:[%s1132_s29 + $0x8] sm:$0xff] (%p78_p3), %v276_v1  ;;  %v280_v3 = vld [vmem:[%s1127_s28 + $0x30] sm:$0xff] (%p78_p3) }
  0x17   : > { %279 = vst [vmem:[%s1132_s29 + $0x10] sm:$0xff] (%p78_p3), %v278_v2  ;;  %v282_v4 = vld [vmem:[%s1127_s28 + $0x40] sm:$0xff] (%p78_p3)  ;;  %v284_v5 = vld [vmem:[%s1127_s28 + $0x50] sm:$0xff] (%p78_p3)  ;;  %281 = vst [vmem:[%s1132_s29 + $0x18] sm:$0xff] (%p78_p3), %v280_v3 }
  0x18   : > { %283 = vst [vmem:[%s1132_s29 + $0x20] sm:$0xff] (%p78_p3), %v282_v4  ;;  %285 = vst [vmem:[%s1132_s29 + $0x28] sm:$0xff] (%p78_p3), %v284_v5  ;;  %v286_v6 = vld [vmem:[%s1127_s28 + $0x60] sm:$0xff] (%p78_p3)  ;;  %v288_v7 = vld [vmem:[%s1127_s28 + $0x70] sm:$0xff] (%p78_p3) }
  0x19   : > { %v290_v8 = vld [vmem:[%s1127_s28 + $0x80] sm:$0xff]  ;;  %287 = vst [vmem:[%s1132_s29 + $0x30] sm:$0xff] %v286_v6  ;;  %289 = vst [vmem:[%s1132_s29 + $0x38] sm:$0xff] %v288_v7  ;;  %v292_v9 = vld [vmem:[%s1127_s28 + $0x90] sm:$0xff] }
  0x1a   : > { %291 = vst [vmem:[%s1132_s29 + $0x40] sm:$0xff] %v290_v8  ;;  %v294_v10 = vld [vmem:[%s1127_s28 + $0xa0] sm:$0xff]  ;;  %v296_v11 = vld [vmem:[%s1127_s28 + $0xb0] sm:$0xff]  ;;  %293 = vst [vmem:[%s1132_s29 + $0x48] sm:$0xff] %v292_v9 }
  0x1b   : > { %295 = vst [vmem:[%s1132_s29 + $0x50] sm:$0xff] %v294_v10  ;;  %297 = vst [vmem:[%s1132_s29 + $0x58] sm:$0xff] %v296_v11  ;;  %v298_v12 = vld [vmem:[%s1127_s28 + $0xc0] sm:$0xff]  ;;  %v300_v13 = vld [vmem:[%s1127_s28 + $0xd0] sm:$0xff] }
  0x1c   : > { %v302_v14 = vld [vmem:[%s1127_s28 + $0xe0] sm:$0xff]  ;;  %299 = vst [vmem:[%s1132_s29 + $0x60] sm:$0xff] %v298_v12  ;;  %301 = vst [vmem:[%s1132_s29 + $0x68] sm:$0xff] %v300_v13  ;;  %v304_v15 = vld [vmem:[%s1127_s28 + $0xf0] sm:$0xff] }
  0x1d   : > { %303 = vst [vmem:[%s1132_s29 + $0x70] sm:$0xff] %v302_v14  ;;  %v306_v16 = vld [vmem:[%s1127_s28 + $0x100] sm:$0xff]  ;;  %v308_v17 = vld [vmem:[%s1127_s28 + $0x110] sm:$0xff]  ;;  %305 = vst [vmem:[%s1132_s29 + $0x78] sm:$0xff] %v304_v15 }
  0x1e   : > { %307 = vst [vmem:[%s1132_s29 + $0x80] sm:$0xff] %v306_v16  ;;  %309 = vst [vmem:[%s1132_s29 + $0x88] sm:$0xff] %v308_v17  ;;  %v310_v18 = vld [vmem:[%s1127_s28 + $0x120] sm:$0xff]  ;;  %v312_v19 = vld [vmem:[%s1127_s28 + $0x130] sm:$0xff] }
  0x1f   : > { %v314_v20 = vld [vmem:[%s1127_s28 + $0x140] sm:$0xff]  ;;  %311 = vst [vmem:[%s1132_s29 + $0x90] sm:$0xff] %v310_v18  ;;  %313 = vst [vmem:[%s1132_s29 + $0x98] sm:$0xff] %v312_v19  ;;  %v316_v21 = vld [vmem:[%s1127_s28 + $0x150] sm:$0xff] }
  0x20   : > { %315 = vst [vmem:[%s1132_s29 + $0xa0] sm:$0xff] %v314_v20  ;;  %v318_v22 = vld [vmem:[%s1127_s28 + $0x160] sm:$0xff]  ;;  %v320_v23 = vld [vmem:[%s1127_s28 + $0x170] sm:$0xff]  ;;  %317 = vst [vmem:[%s1132_s29 + $0xa8] sm:$0xff] %v316_v21 }
  0x21   : > { %319 = vst [vmem:[%s1132_s29 + $0xb0] sm:$0xff] %v318_v22  ;;  %321 = vst [vmem:[%s1132_s29 + $0xb8] sm:$0xff] %v320_v23  ;;  %v322_v24 = vld [vmem:[%s1127_s28 + $0x180] sm:$0xff]  ;;  %v324_v25 = vld [vmem:[%s1127_s28 + $0x190] sm:$0xff] }
  0x22   : > { %v326_v26 = vld [vmem:[%s1127_s28 + $0x1a0] sm:$0xff]  ;;  %323 = vst [vmem:[%s1132_s29 + $0xc0] sm:$0xff] %v322_v24  ;;  %325 = vst [vmem:[%s1132_s29 + $0xc8] sm:$0xff] %v324_v25  ;;  %v328_v27 = vld [vmem:[%s1127_s28 + $0x1b0] sm:$0xff] }
  0x23   : > { %327 = vst [vmem:[%s1132_s29 + $0xd0] sm:$0xff] %v326_v26  ;;  %v330_v28 = vld [vmem:[%s1127_s28 + $0x1c0] sm:$0xff]  ;;  %v332_v29 = vld [vmem:[%s1127_s28 + $0x1d0] sm:$0xff]  ;;  %329 = vst [vmem:[%s1132_s29 + $0xd8] sm:$0xff] %v328_v27 }
  0x24   : > { %331 = vst [vmem:[%s1132_s29 + $0xe0] sm:$0xff] %v330_v28  ;;  %333 = vst [vmem:[%s1132_s29 + $0xe8] sm:$0xff] %v332_v29  ;;  %v334_v30 = vld [vmem:[%s1127_s28 + $0x1e0] sm:$0xff]  ;;  %v336_v31 = vld [vmem:[%s1127_s28 + $0x1f0] sm:$0xff] }
  0x25   : > { %335 = vst [vmem:[%s1132_s29 + $0xf0] sm:$0xff] %v334_v30  ;;  %337 = vst [vmem:[%s1132_s29 + $0xf8] sm:$0xff] %v336_v31 }
  0x26 PF: > { %p879_p8 = scmp.ge.s32.totalorder %s1057_s16, 1  ;;  %p350_p9 = scmp.lt.s32.totalorder %s1057_s16, 3 }
  0x28   : > { %p351_p10 = pnand %p879_p8, %p350_p9 }
  0x29   : > { %s357_s30 = sand.u32 (!%p351_p10), 1, %s1041_s12   ;;  %v1018_v32 = vld [vmem:[%s1267_s0 + $0x4] ss:$8 sps:$4 sm:$0xff] (!%p351_p10)   ;;  %v1016_v1 = vld [vmem:[%s1267_s0] ss:$8 sps:$4 sm:$0xff] (!%p351_p10)   ;;  %s882_s10 = sshll.u32 (!%p351_p10), %s1049_s14, 1  ;;  %v690_v2 = vlaneseq (!%p351_p10) }
  0x2a   : > { %354 = sbr.rel (%p351_p10) target bundleno = 337 (0x151), region = 66  ;;  %s880_s4 = sshll.u32 (!%p351_p10), %s357_s30, 8  ;;  %662 = vmatprep.mubr.bf16.mxu0 (!%p351_p10), %v1018_v32 }
  0x2b   : > { %s1203_s7 = scalar_lea.vmem (!%p351_p10), [#allocation3], %s880_s4  ;;  %p408_p11 = scmp.lt.s32.totalorder (!%p351_p10), %s882_s10, 3  ;;  %v691_v3 = vshrl.u32 (!%p351_p10), %v690_v2, 7 }
  0x2c   : > { %v968_v33 = vld [vmem:[%s1203_s7 + $0x4] ss:$8 sps:$4 sm:$0xff] (!%p351_p10)   ;;  %v970_v34 = vld [vmem:[%s1203_s7] ss:$8 sps:$4 sm:$0xff] (!%p351_p10)   ;;  %v971_v35 = vld [vmem:[%s1203_s7 + $0x14] ss:$8 sps:$4 sm:$0xff] (!%p351_p10)  }
  0x2d   : > { %630 = vmatprep.subr.bf16.mxu0 (!%p351_p10), %v968_v33  ;;  %v973_v36 = vld [vmem:[%s1203_s7 + $0x10] ss:$8 sps:$4 sm:$0xff] (!%p351_p10)   ;;  %v974_v37 = vld [vmem:[%s1203_s7 + $0x24] ss:$8 sps:$4 sm:$0xff] (!%p351_p10)   ;;  %v976_v38 = vld [vmem:[%s1203_s7 + $0x20] ss:$8 sps:$4 sm:$0xff] (!%p351_p10)  }
  0x2e   : > { %631 = vmatpush1.bf16.msra.mxu0 (!%p351_p10), %v970_v34  ;;  %v977_v39 = vld [vmem:[%s1203_s7 + $0x34] ss:$8 sps:$4 sm:$0xff] (!%p351_p10)   ;;  %v979_v40 = vld [vmem:[%s1203_s7 + $0x30] ss:$8 sps:$4 sm:$0xff] (!%p351_p10)   ;;  %v980_v41 = vld [vmem:[%s1203_s7 + $0x44] ss:$8 sps:$4 sm:$0xff] (!%p351_p10)  }
  0x2f   : > { %632 = vmatprep.subr.bf16.mxu0 (!%p351_p10), %v971_v35  ;;  %v982_v42 = vld [vmem:[%s1203_s7 + $0x40] ss:$8 sps:$4 sm:$0xff] (!%p351_p10)   ;;  %v983_v43 = vld [vmem:[%s1203_s7 + $0x54] ss:$8 sps:$4 sm:$0xff] (!%p351_p10)   ;;  %v985_v44 = vld [vmem:[%s1203_s7 + $0x50] ss:$8 sps:$4 sm:$0xff] (!%p351_p10)  }
  0x30   : > { %v986_v45 = vld [vmem:[%s1203_s7 + $0x64] ss:$8 sps:$4 sm:$0xff] (!%p351_p10)   ;;  %v988_v46 = vld [vmem:[%s1203_s7 + $0x60] ss:$8 sps:$4 sm:$0xff] (!%p351_p10)   ;;  %v989_v47 = vld [vmem:[%s1203_s7 + $0x74] ss:$8 sps:$4 sm:$0xff] (!%p351_p10)  }
  0x31   : > { %v991_v48 = vld [vmem:[%s1203_s7 + $0x70] ss:$8 sps:$4 sm:$0xff]   ;;  %v992_v49 = vld [vmem:[%s1203_s7 + $0x84] ss:$8 sps:$4 sm:$0xff]   ;;  %v994_v50 = vld [vmem:[%s1203_s7 + $0x80] ss:$8 sps:$4 sm:$0xff]  }
  0x32   : > { %633 = vmatpush1.bf16.msra.mxu0 %v973_v36  ;;  %v995_v51 = vld [vmem:[%s1203_s7 + $0x94] ss:$8 sps:$4 sm:$0xff]   ;;  %v997_v52 = vld [vmem:[%s1203_s7 + $0x90] ss:$8 sps:$4 sm:$0xff]   ;;  %v998_v53 = vld [vmem:[%s1203_s7 + $0xa4] ss:$8 sps:$4 sm:$0xff]  }
  0x33   : > { %634 = vmatprep.subr.bf16.mxu0 %v974_v37  ;;  %v1000_v54 = vld [vmem:[%s1203_s7 + $0xa0] ss:$8 sps:$4 sm:$0xff]   ;;  %v1001_v55 = vld [vmem:[%s1203_s7 + $0xb4] ss:$8 sps:$4 sm:$0xff]   ;;  %v1003_v56 = vld [vmem:[%s1203_s7 + $0xb0] ss:$8 sps:$4 sm:$0xff]  }
  0x34   : > { %v1004_v57 = vld [vmem:[%s1203_s7 + $0xc4] ss:$8 sps:$4 sm:$0xff]   ;;  %v1006_v58 = vld [vmem:[%s1203_s7 + $0xc0] ss:$8 sps:$4 sm:$0xff]   ;;  %v1007_v59 = vld [vmem:[%s1203_s7 + $0xd4] ss:$8 sps:$4 sm:$0xff]  }
  0x35   : > { %v1009_v60 = vld [vmem:[%s1203_s7 + $0xd0] ss:$8 sps:$4 sm:$0xff]   ;;  %v1010_v61 = vld [vmem:[%s1203_s7 + $0xe4] ss:$8 sps:$4 sm:$0xff]   ;;  %v1012_v62 = vld [vmem:[%s1203_s7 + $0xe0] ss:$8 sps:$4 sm:$0xff]  }
  0x36   : > { %635 = vmatpush1.bf16.msra.mxu0 %v976_v38  ;;  %v1013_v63 = vld [vmem:[%s1203_s7 + $0xf4] ss:$8 sps:$4 sm:$0xff]   ;;  %v1015_v0 = vld [vmem:[%s1203_s7 + $0xf0] ss:$8 sps:$4 sm:$0xff]   ;;  %s1279_s10 = smov (!%p408_p11, %s882_s10), 3  ;;  %v692_v4 = vsub.s32 0, %v691_v3 }
  0x37   : > { %636 = vmatprep.subr.bf16.mxu0 %v977_v39  ;;  %s410_s19 = scalar_lea.vmem %s1269_s2, %s1279_s10  ;;  %v696_v6 = vsub.s32 1, %v691_v3  ;;  %s881_s20 = sshll.u32 %s357_s30, 4 }
  0x38   : > { %v688_v5 = vld [vmem:[%s410_s19] sm:$0x3]  ;;  %s392_s23 = scalar_lea.vmem [#allocation4], %s881_s20  ;;  %s927_s24 = sshll.u32 (%p1114_p6), %s1049_s14, 3 }
  0x39   : > { %v693_v7 = vrot.slane %v688_v5, %v692_v4  ;;  %v697_v8 = vrot.slane %v688_v5, %v696_v6  ;;  %s730_s26 = scalar_lea.vmem (%p1114_p6), %s1270_s3, %s927_s24 }
  0x3a   : > { %637 = vmatpush1.bf16.msra.mxu0 %v979_v40 }
  0x3b   : > { %638 = vmatprep.subr.bf16.mxu0 %v980_v41 }
  0x3e   : > { %639 = vmatpush1.bf16.msra.mxu0 %v982_v42 }
  0x3f   : > { %640 = vmatprep.subr.bf16.mxu0 %v983_v43 }
  0x42   : > { %641 = vmatpush1.bf16.msra.mxu0 %v985_v44 }
  0x43   : > { %642 = vmatprep.subr.bf16.mxu0 %v986_v45 }
  0x46   : > { %643 = vmatpush1.bf16.msra.mxu0 %v988_v46 }
  0x47   : > { %644 = vmatprep.subr.bf16.mxu0 %v989_v47 }
  0x4a   : > { %645 = vmatpush1.bf16.msra.mxu0 %v991_v48 }
  0x4b   : > { %646 = vmatprep.subr.bf16.mxu0 %v992_v49 }
  0x4e   : > { %647 = vmatpush1.bf16.msra.mxu0 %v994_v50 }
  0x4f   : > { %648 = vmatprep.subr.bf16.mxu0 %v995_v51 }
  0x52   : > { %649 = vmatpush1.bf16.msra.mxu0 %v997_v52 }
  0x53   : > { %650 = vmatprep.subr.bf16.mxu0 %v998_v53 }
  0x56   : > { %651 = vmatpush1.bf16.msra.mxu0 %v1000_v54 }
  0x57   : > { %652 = vmatprep.subr.bf16.mxu0 %v1001_v55 }
  0x5a   : > { %653 = vmatpush1.bf16.msra.mxu0 %v1003_v56 }
  0x5b   : > { %654 = vmatprep.subr.bf16.mxu0 %v1004_v57 }
  0x5e   : > { %655 = vmatpush1.bf16.msra.mxu0 %v1006_v58 }
  0x5f   : > { %656 = vmatprep.subr.bf16.mxu0 %v1007_v59 }
  0x62   : > { %657 = vmatpush1.bf16.msra.mxu0 %v1009_v60 }
  0x63   : > { %658 = vmatprep.subr.bf16.mxu0 %v1010_v61 }
  0x66   : > { %659 = vmatpush1.bf16.msra.mxu0 %v1012_v62 }
  0x67   : > { %660 = vmatprep.subr.bf16.mxu0 %v1013_v63 }
  0x6a   : > { %661 = vmatpush1.bf16.msra.mxu0 %v1015_v0 }
  0x6d   : > { %663 = vmatmul.mubr.bf16.vlgmr.msra.gmra.mrb[0].mxu0 %v1016_v1 }
 0x140   : > { %v664_v9 = vpop.f32.mrb[0].mxu0 }
 0x141   : > { %v700_v10 = vadd.f32 %v693_v7, %v664_v9  ;;  %v666_v11 = vpop.f32.mrb[1].mxu0 }
 0x142   : > { %v701_v12 = vadd.f32 %v697_v8, %v666_v11  ;;  %v668_v13 = vpop.f32.mrb[2].mxu0  ;;  %724 = sbr.rel (!%p1114_p6) target bundleno = 337 (0x151), region = 82 }
 0x143   : > { %v702_v14 = vadd.f32 %v693_v7, %v668_v13  ;;  %v670_v15 = vpop.f32.mrb[3].mxu0 }
 0x144   : > { %v925_v16 = vpack.c.bf16 %v701_v12, %v700_v10  ;;  %v703_v17 = vadd.f32 %v697_v8, %v670_v15 }
 0x146   : > { %716 = vst [vmem:[%s392_s23] sm:$0xff] %v925_v16  ;;  %v926_v18 = vpack.c.bf16 %v703_v17, %v702_v14 }
 0x148   : > { %717 = vst [vmem:[%s392_s23 + $0x8] sm:$0xff] %v926_v18 }
 0x14d   : > { %v760_v19 = vld [vmem:[%s392_s23] sm:$0xff] }
 0x14e   : > { %761 = vst [vmem:[%s730_s26] sm:$0xff] %v760_v19 }
 0x14f   : > { %v762_v20 = vld [vmem:[%s392_s23 + $0x8] sm:$0xff] }
 0x150   : > { %763 = vst [vmem:[%s730_s26 + $0x10] sm:$0xff] %v762_v20 }
 0x151 PF: > { %s13_s16 = sadd.s32 1, %s1057_s16   ;;  %s1272_s12 = smov %s1045_s13 }
 0x152   : > { %p10_p12 = scmp.ge.s32.totalorder %s13_s16, 4   ;;  %s1273_s13 = smov %s1119_s22 }
 0x153   : > { %s1274_s14 = smov %s1053_s15  ;;  %s1275_s15 = smov %s1277_s17 }
 0x154   :  { %12 = sbr.rel (!%p10_p12) target bundleno = 3 (0x3), region = 157 }

// kernel: _lambda_.38
= control target key start
LH: loop header
LB: loop body
LE: loop exit
PB: predicated region body
PF: predicated region fallthrough
CT: control target
= control target key end

     0   :  { %s2210_s0 = inlined_call_operand.vmem [shape: bf16[16,4608], index: 0, kind: input, shape index: {}]   ;;  %s2211_s1 = inlined_call_operand.vmem [shape: bf16[4608,512], index: 1, kind: input, shape index: {}]   ;;  %s2212_s2 = inlined_call_operand.vmem [shape: f32[1,512], index: 2, kind: input, shape index: {}]   ;;  %s2213_s3 = inlined_call_operand.vmem [shape: bf16[16,512], index: 3, kind: input, shape index: {}]   ;;  %s2214_s4 = inlined_call_operand.vmem [shape: bf16[16,512], index: 4, kind: output, shape index: {}]  }
   0x1   :  { %2217 = sst [smem:[#allocation10_spill]] %s2210_s0 }
   0x2   :  { %s1803_s15 = smov 0   ;;  %s1805_s16 = smov 0  }
   0x3   :  { %s1807_s17 = smov 0   ;;  %s1809_s18 = smov 0  }
   0x4   :  { %s1811_s19 = smov 0   ;;  %s1813_s20 = smov 0  }
   0x5   :  { %s1815_s21 = smov 0   ;;  %s1817_s22 = smov 0  }
   0x6   :  { %s1819_s23 = smov 0   ;;  %s1821_s24 = smov 0  }
   0x7   :  { %s1823_s25 = smov 0  }
   0x8 LB: > { %s1390_s26 = sadd.s32 4294967295, %s1775_s25   ;;  %s26_s27 = sadd.s32 1, %s1767_s23  ;;  %s1775_s25 = sphi %s1823_s25, %s14_s25   ;;  %s1771_s24 = sphi %s1821_s24, %s2238_s24   ;;  %s1767_s23 = sphi %s1819_s23, %s2237_s23   ;;  %s1763_s22 = sphi %s1817_s22, %s2236_s22   ;;  %s1759_s21 = sphi %s1815_s21, %s2235_s21   ;;  %s1755_s20 = sphi %s1813_s20, %s2234_s20   ;;  %s1751_s19 = sphi %s1811_s19, %s2233_s19   ;;  %s1747_s18 = sphi %s1809_s18, %s2232_s18   ;;  %s1743_s17 = sphi %s1807_s17, %s2231_s17   ;;  %s1739_s16 = sphi %s1805_s16, %s2230_s16   ;;  %s1735_s15 = sphi %s1803_s15, %s2229_s15  }
   0x9   : > { %p27_p0 = scmp.ge.s32.totalorder %s26_s27, 9  ;;  %s29_s28 = sadd.s32 1, %s1771_s24 }
   0xa   : > { %s42_s29 = sadd.s32 1, %s1755_s20  ;;  %p49_p1 = scmp.ne.s32.totalorder %s1755_s20, %s1751_s19 }
   0xb   : > { %s2240_s27 = smov (%p27_p0, %s26_s27), 0  ;;  %s2242_s28 = smov (!%p27_p0, %s29_s28), %s1771_s24 }
   0xc   : > { %2218 = sst [smem:[#allocation7_spill]] %s2240_s27  ;;  %s38_s30 = ssub.s32 %s1767_s23, %s2240_s27 }
   0xd   : > { %p50_p2 = scmp.eq.s32.totalorder %s1775_s25, 0  ;;  %p31_p3 = scmp.ge.s32.totalorder %s2242_s28, 2 }
   0xe   : > { %p40_p4 = scmp.eq.s32.totalorder %s38_s30, 0  ;;  %s70_s6 = sadd.s32 1, %s1747_s18 }
   0xf   : > { %p1872_p5 = por %p50_p2, %p49_p1  ;;  %s2244_s28 = smov (%p31_p3, %s2242_s28), 0 }
  0x10   : > { %2220 = sst [smem:[#allocation8_spill]] %s2244_s28  ;;  %s66_s8 = ssub.s32 %s1771_s24, %s2244_s28 }
  0x11   : > { %s1880_s7 = scalar_select %p40_p4, %s1755_s20, %s42_s29  }
  0x12   : > { %p77_p6 = scmp.ne.s32.totalorder %s1747_s18, %s1743_s17  ;;  %s67_s9 = sor.u32 %s66_s8, %s38_s30 }
  0x13   : > { %2221 = sst [smem:[#allocation9_spill]] %s1880_s7  ;;  %p122_p7 = scmp.eq.s32.totalorder %s66_s8, 0 }
  0x14   : > { %p68_p8 = scmp.eq.s32.totalorder %s67_s9, 0  ;;  %p1888_p9 = por %p77_p6, %p50_p2 }
  0x15   : > { %s124_s11 = sadd.s32 1, %s1739_s16  ;;  %p131_p10 = scmp.ne.s32.totalorder %s1739_s16, %s1735_s15 }
  0x16   : > { %s1896_s12 = scalar_select %p68_p8, %s1747_s18, %s70_s6  }
  0x17   : > { %s1899_s13 = scalar_select %p122_p7, %s1739_s16, %s124_s11  }
  0x18   : > { %p1903_p11 = por %p131_p10, %p50_p2  ;;  %p163_p12 = scmp.eq.s32.totalorder %s1390_s26, 17 }
  0x19   : > { %p1393_p0 = scmp.ge.s32.totalorder %s1775_s25, 18 }
  0x1a   : > { %p1907_p13 = por %p163_p12, %p131_p10 }
  0x1b   : > { %185 = sbr.rel (%p1393_p0) target bundleno = 92 (0x5c), region = 16 }
  0x22   : > { %188 = sbr.rel (!%p1872_p5) target bundleno = 46 (0x2e), region = 20  ;;  %s190_s30 = sand.u32 (%p1872_p5), 1, %s1755_s20  }
  0x23   : > { %s1488_s6 = sshll.u32 (%p1872_p5), %s1767_s23, 4  ;;  %s1394_s8 = sshll.u32 (%p1872_p5), %s190_s30, 5 }
  0x24   : > { %s2225_s0 = sld [smem:[#allocation10_spill]] (%p1872_p5)  ;;  %s192_s26 = scalar_lea.vmem (%p1872_p5), [#allocation3], %s1394_s8 }
  0x2a   : > { %s198_s28 = scalar_lea.vmem %s2225_s0, %s1488_s6 }
  0x2b   : > { %v211_v0 = vld [vmem:[%s198_s28] sm:$0xff]  ;;  %v213_v1 = vld [vmem:[%s198_s28 + $0x8] sm:$0xff]  ;;  %v215_v2 = vld [vmem:[%s198_s28 + $0x90] sm:$0xff] }
  0x2c   : > { %212 = vst [vmem:[%s192_s26] sm:$0xff] %v211_v0  ;;  %214 = vst [vmem:[%s192_s26 + $0x8] sm:$0xff] %v213_v1  ;;  %v217_v3 = vld [vmem:[%s198_s28 + $0x98] sm:$0xff] }
  0x2d   : > { %216 = vst [vmem:[%s192_s26 + $0x10] sm:$0xff] %v215_v2  ;;  %218 = vst [vmem:[%s192_s26 + $0x18] sm:$0xff] %v217_v3 }
  0x2e PF: > { %224 = sbr.rel (!%p1888_p9) target bundleno = 85 (0x55), region = 43  ;;  %s226_s5 = sand.u32 (%p1888_p9), 1, %s1747_s18  }
  0x2f   : > { %s1399_s30 = sshll.u32 (%p1888_p9), %s1771_s24, 1  ;;  %s1397_s9 = sshll.u32 (%p1888_p9), %s226_s5, 9 }
  0x30   : > { %s1489_s6 = sshll.u32 (%p1888_p9), %s1767_s23, 8  ;;  %s1932_s28 = scalar_lea.vmem (%p1888_p9), [#allocation4], %s1397_s9 }
  0x31   : > { %s232_s11 = sadd.s32 (%p1888_p9), %s1489_s6, %s1399_s30 }
  0x32   : > { %s1401_s0 = sshll.u32 (%p1888_p9), %s232_s11, 2 }
  0x33   : > { %s1927_s7 = scalar_lea.vmem (%p1888_p9), %s2211_s1, %s1401_s0 }
  0x34   : > { %v388_v4 = vld [vmem:[%s1927_s7] sm:$0xff] (%p1888_p9)  ;;  %v390_v5 = vld [vmem:[%s1927_s7 + $0x10] sm:$0xff] (%p1888_p9) }
  0x35   : > { %v392_v6 = vld [vmem:[%s1927_s7 + $0x20] sm:$0xff]  ;;  %389 = vst [vmem:[%s1932_s28] sm:$0xff] %v388_v4  ;;  %391 = vst [vmem:[%s1932_s28 + $0x8] sm:$0xff] %v390_v5  ;;  %v394_v7 = vld [vmem:[%s1927_s7 + $0x30] sm:$0xff] }
  0x36   : > { %393 = vst [vmem:[%s1932_s28 + $0x10] sm:$0xff] %v392_v6  ;;  %v396_v8 = vld [vmem:[%s1927_s7 + $0x40] sm:$0xff]  ;;  %v398_v9 = vld [vmem:[%s1927_s7 + $0x50] sm:$0xff]  ;;  %395 = vst [vmem:[%s1932_s28 + $0x18] sm:$0xff] %v394_v7 }
  0x37   : > { %397 = vst [vmem:[%s1932_s28 + $0x20] sm:$0xff] %v396_v8  ;;  %399 = vst [vmem:[%s1932_s28 + $0x28] sm:$0xff] %v398_v9  ;;  %v400_v10 = vld [vmem:[%s1927_s7 + $0x60] sm:$0xff]  ;;  %v402_v11 = vld [vmem:[%s1927_s7 + $0x70] sm:$0xff] }
  0x38   : > { %v404_v12 = vld [vmem:[%s1927_s7 + $0x80] sm:$0xff]  ;;  %401 = vst [vmem:[%s1932_s28 + $0x30] sm:$0xff] %v400_v10  ;;  %403 = vst [vmem:[%s1932_s28 + $0x38] sm:$0xff] %v402_v11  ;;  %v406_v13 = vld [vmem:[%s1927_s7 + $0x90] sm:$0xff] }
  0x39   : > { %405 = vst [vmem:[%s1932_s28 + $0x40] sm:$0xff] %v404_v12  ;;  %v408_v14 = vld [vmem:[%s1927_s7 + $0xa0] sm:$0xff]  ;;  %v410_v15 = vld [vmem:[%s1927_s7 + $0xb0] sm:$0xff]  ;;  %407 = vst [vmem:[%s1932_s28 + $0x48] sm:$0xff] %v406_v13 }
  0x3a   : > { %409 = vst [vmem:[%s1932_s28 + $0x50] sm:$0xff] %v408_v14  ;;  %411 = vst [vmem:[%s1932_s28 + $0x58] sm:$0xff] %v410_v15  ;;  %v412_v16 = vld [vmem:[%s1927_s7 + $0xc0] sm:$0xff]  ;;  %v414_v17 = vld [vmem:[%s1927_s7 + $0xd0] sm:$0xff] }
  0x3b   : > { %v416_v18 = vld [vmem:[%s1927_s7 + $0xe0] sm:$0xff]  ;;  %413 = vst [vmem:[%s1932_s28 + $0x60] sm:$0xff] %v412_v16  ;;  %415 = vst [vmem:[%s1932_s28 + $0x68] sm:$0xff] %v414_v17  ;;  %v418_v19 = vld [vmem:[%s1927_s7 + $0xf0] sm:$0xff] }
  0x3c   : > { %417 = vst [vmem:[%s1932_s28 + $0x70] sm:$0xff] %v416_v18  ;;  %v420_v20 = vld [vmem:[%s1927_s7 + $0x100] sm:$0xff]  ;;  %v422_v21 = vld [vmem:[%s1927_s7 + $0x110] sm:$0xff]  ;;  %419 = vst [vmem:[%s1932_s28 + $0x78] sm:$0xff] %v418_v19 }
  0x3d   : > { %421 = vst [vmem:[%s1932_s28 + $0x80] sm:$0xff] %v420_v20  ;;  %423 = vst [vmem:[%s1932_s28 + $0x88] sm:$0xff] %v422_v21  ;;  %v424_v22 = vld [vmem:[%s1927_s7 + $0x120] sm:$0xff]  ;;  %v426_v23 = vld [vmem:[%s1927_s7 + $0x130] sm:$0xff] }
  0x3e   : > { %v428_v24 = vld [vmem:[%s1927_s7 + $0x140] sm:$0xff]  ;;  %425 = vst [vmem:[%s1932_s28 + $0x90] sm:$0xff] %v424_v22  ;;  %427 = vst [vmem:[%s1932_s28 + $0x98] sm:$0xff] %v426_v23  ;;  %v430_v25 = vld [vmem:[%s1927_s7 + $0x150] sm:$0xff] }
  0x3f   : > { %429 = vst [vmem:[%s1932_s28 + $0xa0] sm:$0xff] %v428_v24  ;;  %v432_v26 = vld [vmem:[%s1927_s7 + $0x160] sm:$0xff]  ;;  %v434_v27 = vld [vmem:[%s1927_s7 + $0x170] sm:$0xff]  ;;  %431 = vst [vmem:[%s1932_s28 + $0xa8] sm:$0xff] %v430_v25 }
  0x40   : > { %433 = vst [vmem:[%s1932_s28 + $0xb0] sm:$0xff] %v432_v26  ;;  %435 = vst [vmem:[%s1932_s28 + $0xb8] sm:$0xff] %v434_v27  ;;  %v436_v28 = vld [vmem:[%s1927_s7 + $0x180] sm:$0xff]  ;;  %v438_v29 = vld [vmem:[%s1927_s7 + $0x190] sm:$0xff] }
  0x41   : > { %v440_v30 = vld [vmem:[%s1927_s7 + $0x1a0] sm:$0xff]  ;;  %437 = vst [vmem:[%s1932_s28 + $0xc0] sm:$0xff] %v436_v28  ;;  %439 = vst [vmem:[%s1932_s28 + $0xc8] sm:$0xff] %v438_v29  ;;  %v442_v31 = vld [vmem:[%s1927_s7 + $0x1b0] sm:$0xff] }
  0x42   : > { %441 = vst [vmem:[%s1932_s28 + $0xd0] sm:$0xff] %v440_v30  ;;  %v444_v32 = vld [vmem:[%s1927_s7 + $0x1c0] sm:$0xff]  ;;  %v446_v33 = vld [vmem:[%s1927_s7 + $0x1d0] sm:$0xff]  ;;  %443 = vst [vmem:[%s1932_s28 + $0xd8] sm:$0xff] %v442_v31 }
  0x43   : > { %445 = vst [vmem:[%s1932_s28 + $0xe0] sm:$0xff] %v444_v32  ;;  %447 = vst [vmem:[%s1932_s28 + $0xe8] sm:$0xff] %v446_v33  ;;  %v448_v34 = vld [vmem:[%s1927_s7 + $0x1e0] sm:$0xff]  ;;  %v450_v35 = vld [vmem:[%s1927_s7 + $0x1f0] sm:$0xff] }
  0x44   : > { %v452_v36 = vld [vmem:[%s1927_s7 + $0x200] sm:$0xff]  ;;  %449 = vst [vmem:[%s1932_s28 + $0xf0] sm:$0xff] %v448_v34  ;;  %451 = vst [vmem:[%s1932_s28 + $0xf8] sm:$0xff] %v450_v35  ;;  %v454_v37 = vld [vmem:[%s1927_s7 + $0x210] sm:$0xff] }
  0x45   : > { %453 = vst [vmem:[%s1932_s28 + $0x100] sm:$0xff] %v452_v36  ;;  %v456_v38 = vld [vmem:[%s1927_s7 + $0x220] sm:$0xff]  ;;  %v458_v39 = vld [vmem:[%s1927_s7 + $0x230] sm:$0xff]  ;;  %455 = vst [vmem:[%s1932_s28 + $0x108] sm:$0xff] %v454_v37 }
  0x46   : > { %457 = vst [vmem:[%s1932_s28 + $0x110] sm:$0xff] %v456_v38  ;;  %459 = vst [vmem:[%s1932_s28 + $0x118] sm:$0xff] %v458_v39  ;;  %v460_v40 = vld [vmem:[%s1927_s7 + $0x240] sm:$0xff]  ;;  %v462_v41 = vld [vmem:[%s1927_s7 + $0x250] sm:$0xff] }
  0x47   : > { %v464_v42 = vld [vmem:[%s1927_s7 + $0x260] sm:$0xff]  ;;  %461 = vst [vmem:[%s1932_s28 + $0x120] sm:$0xff] %v460_v40  ;;  %463 = vst [vmem:[%s1932_s28 + $0x128] sm:$0xff] %v462_v41  ;;  %v466_v43 = vld [vmem:[%s1927_s7 + $0x270] sm:$0xff] }
  0x48   : > { %465 = vst [vmem:[%s1932_s28 + $0x130] sm:$0xff] %v464_v42  ;;  %v468_v44 = vld [vmem:[%s1927_s7 + $0x280] sm:$0xff]  ;;  %v470_v45 = vld [vmem:[%s1927_s7 + $0x290] sm:$0xff]  ;;  %467 = vst [vmem:[%s1932_s28 + $0x138] sm:$0xff] %v466_v43 }
  0x49   : > { %469 = vst [vmem:[%s1932_s28 + $0x140] sm:$0xff] %v468_v44  ;;  %471 = vst [vmem:[%s1932_s28 + $0x148] sm:$0xff] %v470_v45  ;;  %v472_v46 = vld [vmem:[%s1927_s7 + $0x2a0] sm:$0xff]  ;;  %v474_v47 = vld [vmem:[%s1927_s7 + $0x2b0] sm:$0xff] }
  0x4a   : > { %v476_v48 = vld [vmem:[%s1927_s7 + $0x2c0] sm:$0xff]  ;;  %473 = vst [vmem:[%s1932_s28 + $0x150] sm:$0xff] %v472_v46  ;;  %475 = vst [vmem:[%s1932_s28 + $0x158] sm:$0xff] %v474_v47  ;;  %v478_v49 = vld [vmem:[%s1927_s7 + $0x2d0] sm:$0xff] }
  0x4b   : > { %477 = vst [vmem:[%s1932_s28 + $0x160] sm:$0xff] %v476_v48  ;;  %v480_v50 = vld [vmem:[%s1927_s7 + $0x2e0] sm:$0xff]  ;;  %v482_v51 = vld [vmem:[%s1927_s7 + $0x2f0] sm:$0xff]  ;;  %479 = vst [vmem:[%s1932_s28 + $0x168] sm:$0xff] %v478_v49 }
  0x4c   : > { %481 = vst [vmem:[%s1932_s28 + $0x170] sm:$0xff] %v480_v50  ;;  %483 = vst [vmem:[%s1932_s28 + $0x178] sm:$0xff] %v482_v51  ;;  %v484_v52 = vld [vmem:[%s1927_s7 + $0x300] sm:$0xff]  ;;  %v486_v53 = vld [vmem:[%s1927_s7 + $0x310] sm:$0xff] }
  0x4d   : > { %v488_v54 = vld [vmem:[%s1927_s7 + $0x320] sm:$0xff]  ;;  %485 = vst [vmem:[%s1932_s28 + $0x180] sm:$0xff] %v484_v52  ;;  %487 = vst [vmem:[%s1932_s28 + $0x188] sm:$0xff] %v486_v53  ;;  %v490_v55 = vld [vmem:[%s1927_s7 + $0x330] sm:$0xff] }
  0x4e   : > { %489 = vst [vmem:[%s1932_s28 + $0x190] sm:$0xff] %v488_v54  ;;  %v492_v56 = vld [vmem:[%s1927_s7 + $0x340] sm:$0xff]  ;;  %v494_v57 = vld [vmem:[%s1927_s7 + $0x350] sm:$0xff]  ;;  %491 = vst [vmem:[%s1932_s28 + $0x198] sm:$0xff] %v490_v55 }
  0x4f   : > { %493 = vst [vmem:[%s1932_s28 + $0x1a0] sm:$0xff] %v492_v56  ;;  %495 = vst [vmem:[%s1932_s28 + $0x1a8] sm:$0xff] %v494_v57  ;;  %v496_v58 = vld [vmem:[%s1927_s7 + $0x360] sm:$0xff]  ;;  %v498_v59 = vld [vmem:[%s1927_s7 + $0x370] sm:$0xff] }
  0x50   : > { %v500_v60 = vld [vmem:[%s1927_s7 + $0x380] sm:$0xff]  ;;  %497 = vst [vmem:[%s1932_s28 + $0x1b0] sm:$0xff] %v496_v58  ;;  %499 = vst [vmem:[%s1932_s28 + $0x1b8] sm:$0xff] %v498_v59  ;;  %v502_v61 = vld [vmem:[%s1927_s7 + $0x390] sm:$0xff] }
  0x51   : > { %501 = vst [vmem:[%s1932_s28 + $0x1c0] sm:$0xff] %v500_v60  ;;  %v504_v62 = vld [vmem:[%s1927_s7 + $0x3a0] sm:$0xff]  ;;  %v506_v63 = vld [vmem:[%s1927_s7 + $0x3b0] sm:$0xff]  ;;  %503 = vst [vmem:[%s1932_s28 + $0x1c8] sm:$0xff] %v502_v61 }
  0x52   : > { %505 = vst [vmem:[%s1932_s28 + $0x1d0] sm:$0xff] %v504_v62  ;;  %507 = vst [vmem:[%s1932_s28 + $0x1d8] sm:$0xff] %v506_v63  ;;  %v508_v0 = vld [vmem:[%s1927_s7 + $0x3c0] sm:$0xff]  ;;  %v510_v1 = vld [vmem:[%s1927_s7 + $0x3d0] sm:$0xff] }
  0x53   : > { %v512_v2 = vld [vmem:[%s1927_s7 + $0x3e0] sm:$0xff]  ;;  %509 = vst [vmem:[%s1932_s28 + $0x1e0] sm:$0xff] %v508_v0  ;;  %511 = vst [vmem:[%s1932_s28 + $0x1e8] sm:$0xff] %v510_v1  ;;  %v514_v3 = vld [vmem:[%s1927_s7 + $0x3f0] sm:$0xff] }
  0x54   : > { %513 = vst [vmem:[%s1932_s28 + $0x1f0] sm:$0xff] %v512_v2  ;;  %515 = vst [vmem:[%s1932_s28 + $0x1f8] sm:$0xff] %v514_v3 }
  0x55 PF: > { %529 = sbr.rel (!%p1903_p11) target bundleno = 92 (0x5c), region = 85  ;;  %s531_s0 = sand.u32 (%p1903_p11), 1, %s1739_s16  }
  0x56   : > { %s1490_s27 = sshll.u32 (%p1903_p11), %s1771_s24, 3  ;;  %s1402_s10 = sshll.u32 (%p1903_p11), %s531_s0, 4 }
  0x57   : > { %s539_s30 = scalar_lea.vmem (%p1903_p11), %s2213_s3, %s1490_s27  ;;  %s533_s9 = scalar_lea.vmem (%p1903_p11), [#allocation5], %s1402_s10 }
  0x58   : > { %v569_v4 = vld [vmem:[%s539_s30] sm:$0xff] (%p1903_p11)  ;;  %v571_v5 = vld [vmem:[%s539_s30 + $0x10] sm:$0xff] (%p1903_p11) }
  0x59   : > { %570 = vst [vmem:[%s533_s9] sm:$0xff] (%p1903_p11), %v569_v4  ;;  %572 = vst [vmem:[%s533_s9 + $0x8] sm:$0xff] (%p1903_p11), %v571_v5 }
  0x5c PF: > { %p1405_p1 = scmp.ge.s32.totalorder %s1775_s25, 1  ;;  %p577_p2 = scmp.lt.s32.totalorder %s1775_s25, 19 }
  0x5e   : > { %p578_p3 = pnand %p1405_p1, %p577_p2 }
  0x5f   : > { %s584_s7 = sand.u32 (!%p578_p3), 1, %s1751_s19   ;;  %s591_s14 = sand.u32 (!%p578_p3), 1, %s1743_s17  }
  0x60   : > { %581 = sbr.rel (%p578_p3) target bundleno = 420 (0x1a4), region = 123  ;;  %s1406_s6 = sshll.u32 (!%p578_p3), %s584_s7, 5 }
  0x61   : > { %s1407_s11 = sshll.u32 (!%p578_p3), %s591_s14, 9  ;;  %s598_s8 = sand.u32 (!%p578_p3), 1, %s1735_s15  }
  0x62   : > { %s1410_s28 = sshll.u32 (!%p578_p3), %s1763_s22, 1  ;;  %s2072_s0 = sshll.u32 (!%p578_p3), %s598_s8, 4 }
  0x63   : > { %p639_p4 = scmp.lt.s32.totalorder (!%p578_p3), %s1410_s28, 3  ;;  %s2080_s5 = scalar_lea.vmem (!%p578_p3), [#allocation3], %s1406_s6 }
  0x64   : > { %s2082_s19 = scalar_lea.vmem (!%p578_p3), [#allocation4], %s1407_s11  ;;  %s600_s17 = scalar_lea.vmem (!%p578_p3), [#allocation5], %s2072_s0 }
  0x65   : > { %s2086_s30 = scalar_lea.vmem (!%p578_p3), [#allocation6], %s2072_s0  ;;  %p1411_p5 = scmp.ne.s32.totalorder (!%p578_p3), %s1759_s21, 0 }
  0x67   : > { %s2246_s28 = smov (!%p639_p4, %s1410_s28), 3  ;;  %650 = sbr.rel (%p1411_p5) target bundleno = 110 (0x6e), region = 139 }
  0x68   : > { %s641_s26 = scalar_lea.vmem %s2212_s2, %s2246_s28  ;;  %v1777_v6 = vmov (!%p1411_p5), 0.0  }
  0x69   : > { %651 = vst [vmem:[#allocation2] sm:$0xff] (!%p1411_p5), %v1777_v6  ;;  %652 = vst [vmem:[#allocation2 + $0x8] sm:$0xff] (!%p1411_p5), %v1777_v6 }
  0x6a   : > { %653 = vst [vmem:[#allocation2 + $0x10] sm:$0xff] (!%p1411_p5), %v1777_v6  ;;  %654 = vst [vmem:[#allocation2 + $0x18] sm:$0xff] (!%p1411_p5), %v1777_v6 }
  0x6e PF: > { %v1587_v7 = vld [vmem:[%s2082_s19 + $0x4] ss:$8 sps:$4 sm:$0xff]   ;;  %v1591_v9 = vld [vmem:[%s2082_s19] ss:$8 sps:$4 sm:$0xff]   ;;  %v1593_v11 = vld [vmem:[%s2082_s19 + $0x14] ss:$8 sps:$4 sm:$0xff]  }
  0x6f   : > { %v1589_v8 = vld [vmem:[%s2082_s19 + $0x104] ss:$8 sps:$4 sm:$0xff]   ;;  %1067 = vmatprep.subr.bf16.mxu1 %v1587_v7  ;;  %v1592_v10 = vld [vmem:[%s2082_s19 + $0x100] ss:$8 sps:$4 sm:$0xff]   ;;  %v1595_v12 = vld [vmem:[%s2082_s19 + $0x114] ss:$8 sps:$4 sm:$0xff]  }
  0x70   : > { %1110 = vmatprep.subr.bf16.mxu0 %v1589_v8  ;;  %1068 = vmatpush1.bf16.msra.mxu1 %v1591_v9  ;;  %v1597_v13 = vld [vmem:[%s2082_s19 + $0x10] ss:$8 sps:$4 sm:$0xff]   ;;  %v1599_v15 = vld [vmem:[%s2082_s19 + $0x24] ss:$8 sps:$4 sm:$0xff]   ;;  %v1603_v17 = vld [vmem:[%s2082_s19 + $0x20] ss:$8 sps:$4 sm:$0xff]  }
  0x71   : > { %1111 = vmatpush1.bf16.msra.mxu0 %v1592_v10  ;;  %1069 = vmatprep.subr.bf16.mxu1 %v1593_v11  ;;  %v1598_v14 = vld [vmem:[%s2082_s19 + $0x110] ss:$8 sps:$4 sm:$0xff]   ;;  %v1601_v16 = vld [vmem:[%s2082_s19 + $0x124] ss:$8 sps:$4 sm:$0xff]   ;;  %v1604_v18 = vld [vmem:[%s2082_s19 + $0x120] ss:$8 sps:$4 sm:$0xff]  }
  0x72   : > { %1112 = vmatprep.subr.bf16.mxu0 %v1595_v12  ;;  %v1605_v19 = vld [vmem:[%s2082_s19 + $0x34] ss:$8 sps:$4 sm:$0xff]   ;;  %v1609_v21 = vld [vmem:[%s2082_s19 + $0x30] ss:$8 sps:$4 sm:$0xff]   ;;  %v1611_v23 = vld [vmem:[%s2082_s19 + $0x44] ss:$8 sps:$4 sm:$0xff]  }
  0x73   : > { %v1607_v20 = vld [vmem:[%s2082_s19 + $0x134] ss:$8 sps:$4 sm:$0xff]   ;;  %v1610_v22 = vld [vmem:[%s2082_s19 + $0x130] ss:$8 sps:$4 sm:$0xff]   ;;  %v1613_v24 = vld [vmem:[%s2082_s19 + $0x144] ss:$8 sps:$4 sm:$0xff]  }
  0x74   : > { %1070 = vmatpush1.bf16.msra.mxu1 %v1597_v13  ;;  %v1615_v25 = vld [vmem:[%s2082_s19 + $0x40] ss:$8 sps:$4 sm:$0xff]   ;;  %v1617_v27 = vld [vmem:[%s2082_s19 + $0x54] ss:$8 sps:$4 sm:$0xff]   ;;  %v1621_v29 = vld [vmem:[%s2082_s19 + $0x50] ss:$8 sps:$4 sm:$0xff]  }
  0x75   : > { %1113 = vmatpush1.bf16.msra.mxu0 %v1598_v14  ;;  %1071 = vmatprep.subr.bf16.mxu1 %v1599_v15  ;;  %v1616_v26 = vld [vmem:[%s2082_s19 + $0x140] ss:$8 sps:$4 sm:$0xff]   ;;  %v1619_v28 = vld [vmem:[%s2082_s19 + $0x154] ss:$8 sps:$4 sm:$0xff]   ;;  %v1622_v30 = vld [vmem:[%s2082_s19 + $0x150] ss:$8 sps:$4 sm:$0xff]  }
  0x76   : > { %1114 = vmatprep.subr.bf16.mxu0 %v1601_v16  ;;  %v1623_v31 = vld [vmem:[%s2082_s19 + $0x64] ss:$8 sps:$4 sm:$0xff]   ;;  %v1627_v33 = vld [vmem:[%s2082_s19 + $0x60] ss:$8 sps:$4 sm:$0xff]   ;;  %v1629_v35 = vld [vmem:[%s2082_s19 + $0x74] ss:$8 sps:$4 sm:$0xff]  }
  0x77   : > { %v1625_v32 = vld [vmem:[%s2082_s19 + $0x164] ss:$8 sps:$4 sm:$0xff]   ;;  %v1628_v34 = vld [vmem:[%s2082_s19 + $0x160] ss:$8 sps:$4 sm:$0xff]   ;;  %v1631_v36 = vld [vmem:[%s2082_s19 + $0x174] ss:$8 sps:$4 sm:$0xff]  }
  0x78   : > { %1072 = vmatpush1.bf16.msra.mxu1 %v1603_v17  ;;  %v1633_v37 = vld [vmem:[%s2082_s19 + $0x70] ss:$8 sps:$4 sm:$0xff]   ;;  %v1635_v39 = vld [vmem:[%s2082_s19 + $0x84] ss:$8 sps:$4 sm:$0xff]   ;;  %v1639_v41 = vld [vmem:[%s2082_s19 + $0x80] ss:$8 sps:$4 sm:$0xff]  }
  0x79   : > { %1115 = vmatpush1.bf16.msra.mxu0 %v1604_v18  ;;  %1073 = vmatprep.subr.bf16.mxu1 %v1605_v19  ;;  %v1634_v38 = vld [vmem:[%s2082_s19 + $0x170] ss:$8 sps:$4 sm:$0xff]   ;;  %v1637_v40 = vld [vmem:[%s2082_s19 + $0x184] ss:$8 sps:$4 sm:$0xff]   ;;  %v1640_v42 = vld [vmem:[%s2082_s19 + $0x180] ss:$8 sps:$4 sm:$0xff]  }
  0x7a   : > { %1116 = vmatprep.subr.bf16.mxu0 %v1607_v20  ;;  %v1641_v43 = vld [vmem:[%s2082_s19 + $0x94] ss:$8 sps:$4 sm:$0xff]   ;;  %v1645_v45 = vld [vmem:[%s2082_s19 + $0x90] ss:$8 sps:$4 sm:$0xff]   ;;  %v1647_v47 = vld [vmem:[%s2082_s19 + $0xa4] ss:$8 sps:$4 sm:$0xff]  }
  0x7b   : > { %v1643_v44 = vld [vmem:[%s2082_s19 + $0x194] ss:$8 sps:$4 sm:$0xff]   ;;  %v1646_v46 = vld [vmem:[%s2082_s19 + $0x190] ss:$8 sps:$4 sm:$0xff]   ;;  %v1649_v48 = vld [vmem:[%s2082_s19 + $0x1a4] ss:$8 sps:$4 sm:$0xff]  }
  0x7c   : > { %1074 = vmatpush1.bf16.msra.mxu1 %v1609_v21  ;;  %v1651_v49 = vld [vmem:[%s2082_s19 + $0xa0] ss:$8 sps:$4 sm:$0xff]   ;;  %v1653_v51 = vld [vmem:[%s2082_s19 + $0xb4] ss:$8 sps:$4 sm:$0xff]   ;;  %v1657_v53 = vld [vmem:[%s2082_s19 + $0xb0] ss:$8 sps:$4 sm:$0xff]  }
  0x7d   : > { %1117 = vmatpush1.bf16.msra.mxu0 %v1610_v22  ;;  %1075 = vmatprep.subr.bf16.mxu1 %v1611_v23  ;;  %v1652_v50 = vld [vmem:[%s2082_s19 + $0x1a0] ss:$8 sps:$4 sm:$0xff]   ;;  %v1655_v52 = vld [vmem:[%s2082_s19 + $0x1b4] ss:$8 sps:$4 sm:$0xff]   ;;  %v1658_v55 = vld [vmem:[%s2082_s19 + $0x1b0] ss:$8 sps:$4 sm:$0xff]  }
  0x7e   : > { %1118 = vmatprep.subr.bf16.mxu0 %v1613_v24  ;;  %v1685_v54 = vld [vmem:[%s2080_s5 + $0x4] ss:$16 sps:$4 sm:$0xff]   ;;  %v1688_v58 = vld [vmem:[%s2080_s5 + $0xc] ss:$16 sps:$4 sm:$0xff]   ;;  %v1663_v59 = vld [vmem:[%s2082_s19 + $0xc0] ss:$8 sps:$4 sm:$0xff]  }
  0x7f   : > { %v1659_v56 = vld [vmem:[%s2082_s19 + $0xc4] ss:$8 sps:$4 sm:$0xff]   ;;  %1099 = vmatprep.mubr.bf16.mxu1 %v1685_v54  ;;  %1142 = vmatprep.mubr.bf16.mxu0 %v1688_v58  ;;  %v1664_v60 = vld [vmem:[%s2082_s19 + $0x1c0] ss:$8 sps:$4 sm:$0xff]   ;;  %v1665_v61 = vld [vmem:[%s2082_s19 + $0xd4] ss:$8 sps:$4 sm:$0xff]  }
  0x80   : > { %1076 = vmatpush1.bf16.msra.mxu1 %v1615_v25  ;;  %v1661_v57 = vld [vmem:[%s2082_s19 + $0x1c4] ss:$8 sps:$4 sm:$0xff]   ;;  %v1667_v62 = vld [vmem:[%s2082_s19 + $0x1d4] ss:$8 sps:$4 sm:$0xff]   ;;  %v1669_v63 = vld [vmem:[%s2082_s19 + $0xd0] ss:$8 sps:$4 sm:$0xff]  }
  0x81   : > { %1119 = vmatpush1.bf16.msra.mxu0 %v1616_v26  ;;  %1077 = vmatprep.subr.bf16.mxu1 %v1617_v27  ;;  %v1670_v0 = vld [vmem:[%s2082_s19 + $0x1d0] ss:$8 sps:$4 sm:$0xff]   ;;  %v1671_v1 = vld [vmem:[%s2082_s19 + $0xe4] ss:$8 sps:$4 sm:$0xff]   ;;  %v1675_v3 = vld [vmem:[%s2082_s19 + $0xe0] ss:$8 sps:$4 sm:$0xff]  }
  0x82   : > { %1120 = vmatprep.subr.bf16.mxu0 %v1619_v28  ;;  %v1673_v2 = vld [vmem:[%s2082_s19 + $0x1e4] ss:$8 sps:$4 sm:$0xff]   ;;  %v1676_v4 = vld [vmem:[%s2082_s19 + $0x1e0] ss:$8 sps:$4 sm:$0xff]   ;;  %v1677_v5 = vld [vmem:[%s2082_s19 + $0xf4] ss:$8 sps:$4 sm:$0xff]  }
  0x83   : > { %v1679_v6 = vld [vmem:[%s2082_s19 + $0x1f4] ss:$8 sps:$4 sm:$0xff]   ;;  %v1681_v7 = vld [vmem:[%s2082_s19 + $0xf0] ss:$8 sps:$4 sm:$0xff]   ;;  %v655_v12 = vld [vmem:[#allocation2] sm:$0xff]  ;;  %p1480_p6 = scmp.ne.s32.totalorder %s1759_s21, 8 }
  0x84   : > { %1078 = vmatpush1.bf16.msra.mxu1 %v1621_v29  ;;  %v1682_v8 = vld [vmem:[%s2082_s19 + $0x1f0] ss:$8 sps:$4 sm:$0xff]   ;;  %v656_v16 = vld [vmem:[#allocation2 + $0x8] sm:$0xff] }
  0x85   : > { %1121 = vmatpush1.bf16.msra.mxu0 %v1622_v30  ;;  %1079 = vmatprep.subr.bf16.mxu1 %v1623_v31  ;;  %v1683_v9 = vld [vmem:[%s2080_s5] ss:$16 sps:$4 sm:$0xff]   ;;  %v1686_v10 = vld [vmem:[%s2080_s5 + $0x8] ss:$16 sps:$4 sm:$0xff]   ;;  %v1171_v31 = vlaneseq (!%p1480_p6) }
  0x86   : > { %1122 = vmatprep.subr.bf16.mxu0 %v1625_v32  ;;  %v657_v20 = vld [vmem:[#allocation2 + $0x10] sm:$0xff]  ;;  %v658_v25 = vld [vmem:[#allocation2 + $0x18] sm:$0xff] }
  0x87   : > { %v1172_v32 = vshrl.u32 (!%p1480_p6), %v1171_v31, 7 }
  0x88   : > { %1080 = vmatpush1.bf16.msra.mxu1 %v1627_v33  ;;  %v1185_v33 = vld [vmem:[%s600_s17] sm:$0xff] (!%p1480_p6) }
  0x89   : > { %1123 = vmatpush1.bf16.msra.mxu0 %v1628_v34  ;;  %1081 = vmatprep.subr.bf16.mxu1 %v1629_v35  ;;  %v1169_v34 = vld [vmem:[%s641_s26] sm:$0x3] (!%p1480_p6)  ;;  %v1186_v35 = vld [vmem:[%s600_s17 + $0x8] sm:$0xff] (!%p1480_p6) }
  0x8a   : > { %1124 = vmatprep.subr.bf16.mxu0 %v1631_v36 }
  0x8c   : > { %1082 = vmatpush1.bf16.msra.mxu1 %v1633_v37  ;;  %v1173_v37 = vsub.s32 (!%p1480_p6), 0, %v1172_v32 }
  0x8d   : > { %1125 = vmatpush1.bf16.msra.mxu0 %v1634_v38  ;;  %1083 = vmatprep.subr.bf16.mxu1 %v1635_v39  ;;  %v1177_v38 = vsub.s32 (!%p1480_p6), 1, %v1172_v32 }
  0x8e   : > { %1126 = vmatprep.subr.bf16.mxu0 %v1637_v40  ;;  %v1187_v40 = vunpack.c.l.bf16 (!%p1480_p6), %v1185_v33 }
  0x90   : > { %1084 = vmatpush1.bf16.msra.mxu1 %v1639_v41  ;;  %v1188_v41 = vunpack.c.h.bf16 (!%p1480_p6), %v1185_v33 }
  0x91   : > { %1127 = vmatpush1.bf16.msra.mxu0 %v1640_v42  ;;  %1085 = vmatprep.subr.bf16.mxu1 %v1641_v43 }
  0x92   : > { %1128 = vmatprep.subr.bf16.mxu0 %v1643_v44  ;;  %v1174_v44 = vrot.slane (!%p1480_p6), %v1169_v34, %v1173_v37 }
  0x94   : > { %1086 = vmatpush1.bf16.msra.mxu1 %v1645_v45  ;;  %v1178_v45 = vrot.slane (!%p1480_p6), %v1169_v34, %v1177_v38 }
  0x95   : > { %1129 = vmatpush1.bf16.msra.mxu0 %v1646_v46  ;;  %1087 = vmatprep.subr.bf16.mxu1 %v1647_v47  ;;  %v1189_v46 = vunpack.c.l.bf16 (!%p1480_p6), %v1186_v35  ;;  %v1190_v47 = vunpack.c.h.bf16 (!%p1480_p6), %v1186_v35 }
  0x96   : > { %1130 = vmatprep.subr.bf16.mxu0 %v1649_v48 }
  0x98   : > { %1088 = vmatpush1.bf16.msra.mxu1 %v1651_v49 }
  0x99   : > { %1131 = vmatpush1.bf16.msra.mxu0 %v1652_v50  ;;  %1089 = vmatprep.subr.bf16.mxu1 %v1653_v51 }
  0x9a   : > { %1132 = vmatprep.subr.bf16.mxu0 %v1655_v52 }
  0x9c   : > { %1090 = vmatpush1.bf16.msra.mxu1 %v1657_v53 }
  0x9d   : > { %1133 = vmatpush1.bf16.msra.mxu0 %v1658_v55  ;;  %1091 = vmatprep.subr.bf16.mxu1 %v1659_v56 }
  0x9e   : > { %1134 = vmatprep.subr.bf16.mxu0 %v1661_v57 }
  0xa0   : > { %1092 = vmatpush1.bf16.msra.mxu1 %v1663_v59 }
  0xa1   : > { %1135 = vmatpush1.bf16.msra.mxu0 %v1664_v60  ;;  %1093 = vmatprep.subr.bf16.mxu1 %v1665_v61 }
  0xa2   : > { %1136 = vmatprep.subr.bf16.mxu0 %v1667_v62 }
  0xa4   : > { %1094 = vmatpush1.bf16.msra.mxu1 %v1669_v63 }
  0xa5   : > { %1137 = vmatpush1.bf16.msra.mxu0 %v1670_v0  ;;  %1095 = vmatprep.subr.bf16.mxu1 %v1671_v1 }
  0xa6   : > { %1138 = vmatprep.subr.bf16.mxu0 %v1673_v2 }
  0xa8   : > { %1096 = vmatpush1.bf16.msra.mxu1 %v1675_v3 }
  0xa9   : > { %1139 = vmatpush1.bf16.msra.mxu0 %v1676_v4  ;;  %1097 = vmatprep.subr.bf16.mxu1 %v1677_v5 }
  0xaa   : > { %1140 = vmatprep.subr.bf16.mxu0 %v1679_v6 }
  0xac   : > { %1098 = vmatpush1.bf16.msra.mxu1 %v1681_v7 }
  0xad   : > { %1141 = vmatpush1.bf16.msra.mxu0 %v1682_v8 }
  0xaf   : > { %1100 = vmatmul.mubr.bf16.vlgmr.msra.gmra.mrb[0].mxu1 %v1683_v9 }
  0xb0   : > { %1143 = vmatmul.mubr.bf16.vlgmr.msra.gmra.mrb[0].mxu0 %v1686_v10 }
 0x182   : > { %v1101_v11 = vpop.f32.mrb[0].mxu1 }
 0x183   : > { %v1144_v13 = vpop.f32.mrb[0].mxu0  ;;  %v1103_v15 = vpop.f32.mrb[1].mxu1 }
 0x184   : > { %v1145_v14 = vadd.f32 %v1144_v13, %v1101_v11  ;;  %v1146_v17 = vpop.f32.mrb[1].mxu0  ;;  %v1105_v19 = vpop.f32.mrb[2].mxu1 }
 0x185   : > { %v1147_v18 = vadd.f32 %v1146_v17, %v1103_v15  ;;  %v1148_v21 = vpop.f32.mrb[2].mxu0  ;;  %v1107_v24 = vpop.f32.mrb[3].mxu1  ;;  %1164 = sbr.rel (%p1480_p6) target bundleno = 412 (0x19c), region = 143 }
 0x186   : > { %v1153_v22 = vadd.f32 %v1145_v14, %v655_v12  ;;  %v1149_v23 = vadd.f32 %v1148_v21, %v1105_v19  ;;  %v1150_v26 = vpop.f32.mrb[3].mxu0 }
 0x187   : > { %v1154_v27 = vadd.f32 %v1147_v18, %v656_v16  ;;  %v1151_v28 = vadd.f32 %v1150_v26, %v1107_v24 }
 0x188   : > { %1157 = vst [vmem:[#allocation2] sm:$0xff] %v1153_v22  ;;  %v1155_v29 = vadd.f32 %v1149_v23, %v657_v20 }
 0x189   : > { %1158 = vst [vmem:[#allocation2 + $0x8] sm:$0xff] %v1154_v27  ;;  %v1156_v30 = vadd.f32 %v1151_v28, %v658_v25 }
 0x18a   : > { %1159 = vst [vmem:[#allocation2 + $0x10] sm:$0xff] %v1155_v29 }
 0x18b   : > { %1160 = vst [vmem:[#allocation2 + $0x18] sm:$0xff] %v1156_v30 }
 0x18f   : > { %v1165_v36 = vld [vmem:[#allocation2] sm:$0xff] }
 0x190   : > { %v1166_v39 = vld [vmem:[#allocation2 + $0x8] sm:$0xff]  ;;  %v1181_v48 = vadd.f32 %v1174_v44, %v1165_v36 }
 0x191   : > { %v1167_v42 = vld [vmem:[#allocation2 + $0x10] sm:$0xff]  ;;  %v1182_v49 = vadd.f32 %v1178_v45, %v1166_v39 }
 0x192   : > { %v1168_v43 = vld [vmem:[#allocation2 + $0x18] sm:$0xff]  ;;  %v1183_v50 = vadd.f32 %v1174_v44, %v1167_v42  ;;  %v1191_v52 = vadd.f32 %v1187_v40, %v1181_v48 }
 0x193   : > { %v1184_v51 = vadd.f32 %v1178_v45, %v1168_v43  ;;  %v1192_v53 = vadd.f32 %v1188_v41, %v1182_v49 }
 0x194   : > { %v1193_v54 = vadd.f32 %v1189_v46, %v1183_v50  ;;  %v1195_v56 = vmax.f32 %v1191_v52, 0.0 }
 0x195   : > { %v1194_v55 = vadd.f32 %v1190_v47, %v1184_v51  ;;  %v1196_v57 = vmax.f32 %v1192_v53, 0.0 }
 0x196   : > { %v1197_v58 = vmax.f32 %v1193_v54, 0.0 }
 0x197   : > { %v1198_v59 = vmax.f32 %v1194_v55, 0.0  ;;  %v1491_v60 = vpack.c.bf16 %v1196_v57, %v1195_v56 }
 0x199   : > { %v1492_v61 = vpack.c.bf16 %v1198_v59, %v1197_v58  ;;  %1211 = vst [vmem:[%s2086_s30] sm:$0xff] %v1491_v60 }
 0x19b   : > { %1212 = vst [vmem:[%s2086_s30 + $0x8] sm:$0xff] %v1492_v61 }
 0x19c PF: > { %1219 = sbr.rel (!%p1907_p13) target bundleno = 420 (0x1a4), region = 147  ;;  %s1493_s21 = sshll.u32 (%p1907_p13), %s1763_s22, 3 }
 0x19d   : > { %s1225_s6 = scalar_lea.vmem (%p1907_p13), %s2214_s4, %s1493_s21 }
 0x1a0   : > { %v1255_v62 = vld [vmem:[%s2086_s30] sm:$0xff] (%p1907_p13) }
 0x1a1   : > { %1256 = vst [vmem:[%s1225_s6] sm:$0xff] (%p1907_p13), %v1255_v62 }
 0x1a2   : > { %v1257_v63 = vld [vmem:[%s2086_s30 + $0x8] sm:$0xff] (%p1907_p13) }
 0x1a3   : > { %1258 = vst [vmem:[%s1225_s6 + $0x10] sm:$0xff] %v1257_v63 }
 0x1a4 PF: > { %s14_s25 = sadd.s32 1, %s1775_s25   ;;  %s2226_s29 = sld [smem:[#allocation9_spill]] }
 0x1a5   : > { %p11_p7 = scmp.ge.s32.totalorder %s14_s25, 20   ;;  %s2227_s11 = sld [smem:[#allocation7_spill]] }
 0x1a6   : > { %s2228_s8 = sld [smem:[#allocation8_spill]]  ;;  %s2229_s15 = smov %s1739_s16 }
 0x1a7   : > { %s2230_s16 = smov %s1899_s13  ;;  %s2231_s17 = smov %s1747_s18 }
 0x1a8   : > { %s2232_s18 = smov %s1896_s12  ;;  %s2233_s19 = smov %s1755_s20 }
 0x1a9   : > { %s2235_s21 = smov %s1767_s23  ;;  %s2236_s22 = smov %s1771_s24 }
 0x1aa   : > { %s2234_s20 = smov %s2226_s29  ;;  %13 = sbr.rel (!%p11_p7) target bundleno = 8 (0x8), region = 235 }
 0x1ab   : > { %s2237_s23 = smov %s2227_s11 }
 0x1ac   : > { %s2238_s24 = smov %s2228_s8 }

// kernel: _lambda_.39
= control target key start
LH: loop header
LB: loop body
LE: loop exit
PB: predicated region body
PF: predicated region fallthrough
CT: control target
= control target key end

     0   :  { %s2051_s0 = inlined_call_operand.vmem [shape: bf16[16,4608], index: 0, kind: input, shape index: {}]   ;;  %s2052_s1 = inlined_call_operand.vmem [shape: bf16[4608,512], index: 1, kind: input, shape index: {}]   ;;  %s2053_s2 = inlined_call_operand.vmem [shape: f32[1,512], index: 2, kind: input, shape index: {}]   ;;  %s2054_s3 = inlined_call_operand.vmem [shape: bf16[16,512], index: 3, kind: output, shape index: {}]  }
   0x1   :  { %2056 = sst [smem:[#allocation7_spill]] %s2051_s0 }
   0x2   :  { %2057 = sst [smem:[#allocation8_spill]] %s2052_s1 }
   0x3   :  { %s1669_s12 = smov 0   ;;  %s1671_s13 = smov 0  }
   0x4   :  { %s1673_s14 = smov 0   ;;  %s1675_s15 = smov 0  }
   0x5   :  { %s1677_s16 = smov 0   ;;  %s1679_s17 = smov 0  }
   0x6   :  { %s1681_s18 = smov 0   ;;  %s1683_s19 = smov 0  }
   0x7   :  { %s1685_s20 = smov 0   ;;  %s1687_s21 = smov 0  }
   0x8   :  { %s1689_s22 = smov 0  }
   0x9 LB: > { %s1266_s23 = sadd.s32 4294967295, %s1646_s22   ;;  %s25_s24 = sadd.s32 1, %s1638_s20  ;;  %s1646_s22 = sphi %s1689_s22, %s13_s22   ;;  %s1642_s21 = sphi %s1687_s21, %s2074_s21   ;;  %s1638_s20 = sphi %s1685_s20, %s2073_s20   ;;  %s1634_s19 = sphi %s1683_s19, %s2072_s19   ;;  %s1630_s18 = sphi %s1681_s18, %s2071_s18   ;;  %s1626_s17 = sphi %s1679_s17, %s2070_s17   ;;  %s1622_s16 = sphi %s1677_s16, %s2069_s16   ;;  %s1618_s15 = sphi %s1675_s15, %s2068_s15   ;;  %s1614_s14 = sphi %s1673_s14, %s2067_s14   ;;  %s1610_s13 = sphi %s1671_s13, %s2066_s13   ;;  %s1606_s12 = sphi %s1669_s12, %s2065_s12  }
   0xa   : > { %p26_p0 = scmp.ge.s32.totalorder %s25_s24, 9  ;;  %s28_s25 = sadd.s32 1, %s1642_s21 }
   0xb   : > { %s41_s26 = sadd.s32 1, %s1626_s17  ;;  %p48_p1 = scmp.ne.s32.totalorder %s1626_s17, %s1622_s16 }
   0xc   : > { %s2076_s24 = smov (%p26_p0, %s25_s24), 0  ;;  %s2078_s25 = smov (!%p26_p0, %s28_s25), %s1642_s21 }
   0xd   : > { %s37_s27 = ssub.s32 %s1638_s20, %s2076_s24  ;;  %p49_p2 = scmp.eq.s32.totalorder %s1646_s22, 0 }
   0xe   : > { %p30_p3 = scmp.ge.s32.totalorder %s2078_s25, 2  ;;  %p39_p4 = scmp.eq.s32.totalorder %s37_s27, 0 }
   0xf   : > { %p1736_p5 = por %p49_p2, %p48_p1  ;;  %s69_s29 = sadd.s32 1, %s1618_s15 }
  0x10   : > { %s2080_s25 = smov (%p30_p3, %s2078_s25), 0  ;;  %p76_p6 = scmp.ne.s32.totalorder %s1618_s15, %s1614_s14 }
  0x11   : > { %2059 = sst [smem:[#allocation6_spill]] %s2080_s25  ;;  %s65_s4 = ssub.s32 %s1642_s21, %s2080_s25 }
  0x12   : > { %s1744_s30 = scalar_select %p39_p4, %s1626_s17, %s41_s26  }
  0x13   : > { %s66_s5 = sor.u32 %s65_s4, %s37_s27  ;;  %p121_p7 = scmp.eq.s32.totalorder %s65_s4, 0 }
  0x14   : > { %p67_p8 = scmp.eq.s32.totalorder %s66_s5, 0  ;;  %p1750_p9 = por %p76_p6, %p49_p2 }
  0x15   : > { %s123_s7 = sadd.s32 1, %s1610_s13  ;;  %p133_p10 = scmp.ne.s32.totalorder %s1610_s13, %s1606_s12 }
  0x16   : > { %s1758_s8 = scalar_select %p67_p8, %s1618_s15, %s69_s29  }
  0x17   : > { %s1761_s9 = scalar_select %p121_p7, %s1610_s13, %s123_s7  }
  0x18   : > { %p134_p11 = scmp.eq.s32.totalorder %s1266_s23, 17  ;;  %p1269_p13 = scmp.ge.s32.totalorder %s1646_s22, 18 }
  0x1a   : > { %p1763_p12 = por %p134_p11, %p133_p10  ;;  %156 = sbr.rel (%p1269_p13) target bundleno = 87 (0x57), region = 16 }
  0x21   : > { %159 = sbr.rel (!%p1736_p5) target bundleno = 45 (0x2d), region = 20  ;;  %s161_s11 = sand.u32 (%p1736_p5), 1, %s1626_s17  }
  0x22   : > { %s1360_s26 = sshll.u32 (%p1736_p5), %s1638_s20, 4  ;;  %s1270_s27 = sshll.u32 (%p1736_p5), %s161_s11, 5 }
  0x23   : > { %s2062_s0 = sld [smem:[#allocation7_spill]] (%p1736_p5)  ;;  %s163_s23 = scalar_lea.vmem (%p1736_p5), [#allocation3], %s1270_s27 }
  0x29   : > { %s169_s5 = scalar_lea.vmem %s2062_s0, %s1360_s26 }
  0x2a   : > { %v182_v0 = vld [vmem:[%s169_s5] sm:$0xff]  ;;  %v184_v1 = vld [vmem:[%s169_s5 + $0x8] sm:$0xff]  ;;  %v186_v2 = vld [vmem:[%s169_s5 + $0x90] sm:$0xff] }
  0x2b   : > { %183 = vst [vmem:[%s163_s23] sm:$0xff] %v182_v0  ;;  %185 = vst [vmem:[%s163_s23 + $0x8] sm:$0xff] %v184_v1  ;;  %v188_v3 = vld [vmem:[%s169_s5 + $0x98] sm:$0xff] }
  0x2c   : > { %187 = vst [vmem:[%s163_s23 + $0x10] sm:$0xff] %v186_v2  ;;  %189 = vst [vmem:[%s163_s23 + $0x18] sm:$0xff] %v188_v3 }
  0x2d PF: > { %195 = sbr.rel (!%p1750_p9) target bundleno = 87 (0x57), region = 43  ;;  %s197_s28 = sand.u32 (%p1750_p9), 1, %s1618_s15  }
  0x2e   : > { %s1275_s7 = sshll.u32 (%p1750_p9), %s1642_s21, 1  ;;  %s1273_s11 = sshll.u32 (%p1750_p9), %s197_s28, 9 }
  0x2f   : > { %s1361_s26 = sshll.u32 (%p1750_p9), %s1638_s20, 8  ;;  %s2063_s1 = sld [smem:[#allocation8_spill]] (%p1750_p9) }
  0x30   : > { %s203_s29 = sadd.s32 (%p1750_p9), %s1361_s26, %s1275_s7  ;;  %s1788_s6 = scalar_lea.vmem (%p1750_p9), [#allocation4], %s1273_s11 }
  0x31   : > { %s1277_s4 = sshll.u32 (%p1750_p9), %s203_s29, 2 }
  0x35   : > { %s1783_s25 = scalar_lea.vmem %s2063_s1, %s1277_s4 }
  0x36   : > { %v359_v4 = vld [vmem:[%s1783_s25] sm:$0xff]  ;;  %v361_v5 = vld [vmem:[%s1783_s25 + $0x10] sm:$0xff] }
  0x37   : > { %v363_v6 = vld [vmem:[%s1783_s25 + $0x20] sm:$0xff]  ;;  %360 = vst [vmem:[%s1788_s6] sm:$0xff] %v359_v4  ;;  %362 = vst [vmem:[%s1788_s6 + $0x8] sm:$0xff] %v361_v5  ;;  %v365_v7 = vld [vmem:[%s1783_s25 + $0x30] sm:$0xff] }
  0x38   : > { %364 = vst [vmem:[%s1788_s6 + $0x10] sm:$0xff] %v363_v6  ;;  %v367_v8 = vld [vmem:[%s1783_s25 + $0x40] sm:$0xff]  ;;  %v369_v9 = vld [vmem:[%s1783_s25 + $0x50] sm:$0xff]  ;;  %366 = vst [vmem:[%s1788_s6 + $0x18] sm:$0xff] %v365_v7 }
  0x39   : > { %368 = vst [vmem:[%s1788_s6 + $0x20] sm:$0xff] %v367_v8  ;;  %370 = vst [vmem:[%s1788_s6 + $0x28] sm:$0xff] %v369_v9  ;;  %v371_v10 = vld [vmem:[%s1783_s25 + $0x60] sm:$0xff]  ;;  %v373_v11 = vld [vmem:[%s1783_s25 + $0x70] sm:$0xff] }
  0x3a   : > { %v375_v12 = vld [vmem:[%s1783_s25 + $0x80] sm:$0xff]  ;;  %372 = vst [vmem:[%s1788_s6 + $0x30] sm:$0xff] %v371_v10  ;;  %374 = vst [vmem:[%s1788_s6 + $0x38] sm:$0xff] %v373_v11  ;;  %v377_v13 = vld [vmem:[%s1783_s25 + $0x90] sm:$0xff] }
  0x3b   : > { %376 = vst [vmem:[%s1788_s6 + $0x40] sm:$0xff] %v375_v12  ;;  %v379_v14 = vld [vmem:[%s1783_s25 + $0xa0] sm:$0xff]  ;;  %v381_v15 = vld [vmem:[%s1783_s25 + $0xb0] sm:$0xff]  ;;  %378 = vst [vmem:[%s1788_s6 + $0x48] sm:$0xff] %v377_v13 }
  0x3c   : > { %380 = vst [vmem:[%s1788_s6 + $0x50] sm:$0xff] %v379_v14  ;;  %382 = vst [vmem:[%s1788_s6 + $0x58] sm:$0xff] %v381_v15  ;;  %v383_v16 = vld [vmem:[%s1783_s25 + $0xc0] sm:$0xff]  ;;  %v385_v17 = vld [vmem:[%s1783_s25 + $0xd0] sm:$0xff] }
  0x3d   : > { %v387_v18 = vld [vmem:[%s1783_s25 + $0xe0] sm:$0xff]  ;;  %384 = vst [vmem:[%s1788_s6 + $0x60] sm:$0xff] %v383_v16  ;;  %386 = vst [vmem:[%s1788_s6 + $0x68] sm:$0xff] %v385_v17  ;;  %v389_v19 = vld [vmem:[%s1783_s25 + $0xf0] sm:$0xff] }
  0x3e   : > { %388 = vst [vmem:[%s1788_s6 + $0x70] sm:$0xff] %v387_v18  ;;  %v391_v20 = vld [vmem:[%s1783_s25 + $0x100] sm:$0xff]  ;;  %v393_v21 = vld [vmem:[%s1783_s25 + $0x110] sm:$0xff]  ;;  %390 = vst [vmem:[%s1788_s6 + $0x78] sm:$0xff] %v389_v19 }
  0x3f   : > { %392 = vst [vmem:[%s1788_s6 + $0x80] sm:$0xff] %v391_v20  ;;  %394 = vst [vmem:[%s1788_s6 + $0x88] sm:$0xff] %v393_v21  ;;  %v395_v22 = vld [vmem:[%s1783_s25 + $0x120] sm:$0xff]  ;;  %v397_v23 = vld [vmem:[%s1783_s25 + $0x130] sm:$0xff] }
  0x40   : > { %v399_v24 = vld [vmem:[%s1783_s25 + $0x140] sm:$0xff]  ;;  %396 = vst [vmem:[%s1788_s6 + $0x90] sm:$0xff] %v395_v22  ;;  %398 = vst [vmem:[%s1788_s6 + $0x98] sm:$0xff] %v397_v23  ;;  %v401_v25 = vld [vmem:[%s1783_s25 + $0x150] sm:$0xff] }
  0x41   : > { %400 = vst [vmem:[%s1788_s6 + $0xa0] sm:$0xff] %v399_v24  ;;  %v403_v26 = vld [vmem:[%s1783_s25 + $0x160] sm:$0xff]  ;;  %v405_v27 = vld [vmem:[%s1783_s25 + $0x170] sm:$0xff]  ;;  %402 = vst [vmem:[%s1788_s6 + $0xa8] sm:$0xff] %v401_v25 }
  0x42   : > { %404 = vst [vmem:[%s1788_s6 + $0xb0] sm:$0xff] %v403_v26  ;;  %406 = vst [vmem:[%s1788_s6 + $0xb8] sm:$0xff] %v405_v27  ;;  %v407_v28 = vld [vmem:[%s1783_s25 + $0x180] sm:$0xff]  ;;  %v409_v29 = vld [vmem:[%s1783_s25 + $0x190] sm:$0xff] }
  0x43   : > { %v411_v30 = vld [vmem:[%s1783_s25 + $0x1a0] sm:$0xff]  ;;  %408 = vst [vmem:[%s1788_s6 + $0xc0] sm:$0xff] %v407_v28  ;;  %410 = vst [vmem:[%s1788_s6 + $0xc8] sm:$0xff] %v409_v29  ;;  %v413_v31 = vld [vmem:[%s1783_s25 + $0x1b0] sm:$0xff] }
  0x44   : > { %412 = vst [vmem:[%s1788_s6 + $0xd0] sm:$0xff] %v411_v30  ;;  %v415_v32 = vld [vmem:[%s1783_s25 + $0x1c0] sm:$0xff]  ;;  %v417_v33 = vld [vmem:[%s1783_s25 + $0x1d0] sm:$0xff]  ;;  %414 = vst [vmem:[%s1788_s6 + $0xd8] sm:$0xff] %v413_v31 }
  0x45   : > { %416 = vst [vmem:[%s1788_s6 + $0xe0] sm:$0xff] %v415_v32  ;;  %418 = vst [vmem:[%s1788_s6 + $0xe8] sm:$0xff] %v417_v33  ;;  %v419_v34 = vld [vmem:[%s1783_s25 + $0x1e0] sm:$0xff]  ;;  %v421_v35 = vld [vmem:[%s1783_s25 + $0x1f0] sm:$0xff] }
  0x46   : > { %v423_v36 = vld [vmem:[%s1783_s25 + $0x200] sm:$0xff]  ;;  %420 = vst [vmem:[%s1788_s6 + $0xf0] sm:$0xff] %v419_v34  ;;  %422 = vst [vmem:[%s1788_s6 + $0xf8] sm:$0xff] %v421_v35  ;;  %v425_v37 = vld [vmem:[%s1783_s25 + $0x210] sm:$0xff] }
  0x47   : > { %424 = vst [vmem:[%s1788_s6 + $0x100] sm:$0xff] %v423_v36  ;;  %v427_v38 = vld [vmem:[%s1783_s25 + $0x220] sm:$0xff]  ;;  %v429_v39 = vld [vmem:[%s1783_s25 + $0x230] sm:$0xff]  ;;  %426 = vst [vmem:[%s1788_s6 + $0x108] sm:$0xff] %v425_v37 }
  0x48   : > { %428 = vst [vmem:[%s1788_s6 + $0x110] sm:$0xff] %v427_v38  ;;  %430 = vst [vmem:[%s1788_s6 + $0x118] sm:$0xff] %v429_v39  ;;  %v431_v40 = vld [vmem:[%s1783_s25 + $0x240] sm:$0xff]  ;;  %v433_v41 = vld [vmem:[%s1783_s25 + $0x250] sm:$0xff] }
  0x49   : > { %v435_v42 = vld [vmem:[%s1783_s25 + $0x260] sm:$0xff]  ;;  %432 = vst [vmem:[%s1788_s6 + $0x120] sm:$0xff] %v431_v40  ;;  %434 = vst [vmem:[%s1788_s6 + $0x128] sm:$0xff] %v433_v41  ;;  %v437_v43 = vld [vmem:[%s1783_s25 + $0x270] sm:$0xff] }
  0x4a   : > { %436 = vst [vmem:[%s1788_s6 + $0x130] sm:$0xff] %v435_v42  ;;  %v439_v44 = vld [vmem:[%s1783_s25 + $0x280] sm:$0xff]  ;;  %v441_v45 = vld [vmem:[%s1783_s25 + $0x290] sm:$0xff]  ;;  %438 = vst [vmem:[%s1788_s6 + $0x138] sm:$0xff] %v437_v43 }
  0x4b   : > { %440 = vst [vmem:[%s1788_s6 + $0x140] sm:$0xff] %v439_v44  ;;  %442 = vst [vmem:[%s1788_s6 + $0x148] sm:$0xff] %v441_v45  ;;  %v443_v46 = vld [vmem:[%s1783_s25 + $0x2a0] sm:$0xff]  ;;  %v445_v47 = vld [vmem:[%s1783_s25 + $0x2b0] sm:$0xff] }
  0x4c   : > { %v447_v48 = vld [vmem:[%s1783_s25 + $0x2c0] sm:$0xff]  ;;  %444 = vst [vmem:[%s1788_s6 + $0x150] sm:$0xff] %v443_v46  ;;  %446 = vst [vmem:[%s1788_s6 + $0x158] sm:$0xff] %v445_v47  ;;  %v449_v49 = vld [vmem:[%s1783_s25 + $0x2d0] sm:$0xff] }
  0x4d   : > { %448 = vst [vmem:[%s1788_s6 + $0x160] sm:$0xff] %v447_v48  ;;  %v451_v50 = vld [vmem:[%s1783_s25 + $0x2e0] sm:$0xff]  ;;  %v453_v51 = vld [vmem:[%s1783_s25 + $0x2f0] sm:$0xff]  ;;  %450 = vst [vmem:[%s1788_s6 + $0x168] sm:$0xff] %v449_v49 }
  0x4e   : > { %452 = vst [vmem:[%s1788_s6 + $0x170] sm:$0xff] %v451_v50  ;;  %454 = vst [vmem:[%s1788_s6 + $0x178] sm:$0xff] %v453_v51  ;;  %v455_v52 = vld [vmem:[%s1783_s25 + $0x300] sm:$0xff]  ;;  %v457_v53 = vld [vmem:[%s1783_s25 + $0x310] sm:$0xff] }
  0x4f   : > { %v459_v54 = vld [vmem:[%s1783_s25 + $0x320] sm:$0xff]  ;;  %456 = vst [vmem:[%s1788_s6 + $0x180] sm:$0xff] %v455_v52  ;;  %458 = vst [vmem:[%s1788_s6 + $0x188] sm:$0xff] %v457_v53  ;;  %v461_v55 = vld [vmem:[%s1783_s25 + $0x330] sm:$0xff] }
  0x50   : > { %460 = vst [vmem:[%s1788_s6 + $0x190] sm:$0xff] %v459_v54  ;;  %v463_v56 = vld [vmem:[%s1783_s25 + $0x340] sm:$0xff]  ;;  %v465_v57 = vld [vmem:[%s1783_s25 + $0x350] sm:$0xff]  ;;  %462 = vst [vmem:[%s1788_s6 + $0x198] sm:$0xff] %v461_v55 }
  0x51   : > { %464 = vst [vmem:[%s1788_s6 + $0x1a0] sm:$0xff] %v463_v56  ;;  %466 = vst [vmem:[%s1788_s6 + $0x1a8] sm:$0xff] %v465_v57  ;;  %v467_v58 = vld [vmem:[%s1783_s25 + $0x360] sm:$0xff]  ;;  %v469_v59 = vld [vmem:[%s1783_s25 + $0x370] sm:$0xff] }
  0x52   : > { %v471_v60 = vld [vmem:[%s1783_s25 + $0x380] sm:$0xff]  ;;  %468 = vst [vmem:[%s1788_s6 + $0x1b0] sm:$0xff] %v467_v58  ;;  %470 = vst [vmem:[%s1788_s6 + $0x1b8] sm:$0xff] %v469_v59  ;;  %v473_v61 = vld [vmem:[%s1783_s25 + $0x390] sm:$0xff] }
  0x53   : > { %472 = vst [vmem:[%s1788_s6 + $0x1c0] sm:$0xff] %v471_v60  ;;  %v475_v62 = vld [vmem:[%s1783_s25 + $0x3a0] sm:$0xff]  ;;  %v477_v63 = vld [vmem:[%s1783_s25 + $0x3b0] sm:$0xff]  ;;  %474 = vst [vmem:[%s1788_s6 + $0x1c8] sm:$0xff] %v473_v61 }
  0x54   : > { %476 = vst [vmem:[%s1788_s6 + $0x1d0] sm:$0xff] %v475_v62  ;;  %478 = vst [vmem:[%s1788_s6 + $0x1d8] sm:$0xff] %v477_v63  ;;  %v479_v0 = vld [vmem:[%s1783_s25 + $0x3c0] sm:$0xff]  ;;  %v481_v1 = vld [vmem:[%s1783_s25 + $0x3d0] sm:$0xff] }
  0x55   : > { %v483_v2 = vld [vmem:[%s1783_s25 + $0x3e0] sm:$0xff]  ;;  %480 = vst [vmem:[%s1788_s6 + $0x1e0] sm:$0xff] %v479_v0  ;;  %482 = vst [vmem:[%s1788_s6 + $0x1e8] sm:$0xff] %v481_v1  ;;  %v485_v3 = vld [vmem:[%s1783_s25 + $0x3f0] sm:$0xff] }
  0x56   : > { %484 = vst [vmem:[%s1788_s6 + $0x1f0] sm:$0xff] %v483_v2  ;;  %486 = vst [vmem:[%s1788_s6 + $0x1f8] sm:$0xff] %v485_v3 }
  0x57 PF: > { %p1278_p0 = scmp.ge.s32.totalorder %s1646_s22, 1  ;;  %p499_p1 = scmp.lt.s32.totalorder %s1646_s22, 19 }
  0x59   : > { %p500_p2 = pnand %p1278_p0, %p499_p1 }
  0x5a   : > { %s506_s0 = sand.u32 (!%p500_p2), 1, %s1622_s16   ;;  %s513_s5 = sand.u32 (!%p500_p2), 1, %s1614_s14  }
  0x5b   : > { %503 = sbr.rel (%p500_p2) target bundleno = 413 (0x19d), region = 85  ;;  %s1279_s23 = sshll.u32 (!%p500_p2), %s506_s0, 5 }
  0x5c   : > { %s1280_s28 = sshll.u32 (!%p500_p2), %s513_s5, 9  ;;  %s540_s7 = sand.u32 (!%p500_p2), 1, %s1606_s12  }
  0x5d   : > { %s1282_s11 = sshll.u32 (!%p500_p2), %s1634_s19, 1  ;;  %s1281_s25 = sshll.u32 (!%p500_p2), %s540_s7, 4 }
  0x5e   : > { %p548_p3 = scmp.lt.s32.totalorder (!%p500_p2), %s1282_s11, 3  ;;  %s1927_s27 = scalar_lea.vmem (!%p500_p2), [#allocation3], %s1279_s23 }
  0x5f   : > { %s1929_s6 = scalar_lea.vmem (!%p500_p2), [#allocation4], %s1280_s28  ;;  %s1931_s1 = scalar_lea.vmem (!%p500_p2), [#allocation5], %s1281_s25 }
  0x60   : > { %p1283_p4 = scmp.ne.s32.totalorder (!%p500_p2), %s1630_s18, 0 }
  0x62   : > { %s2082_s11 = smov (!%p548_p3, %s1282_s11), 3  ;;  %557 = sbr.rel (%p1283_p4) target bundleno = 105 (0x69), region = 97 }
  0x63   : > { %s550_s4 = scalar_lea.vmem %s2053_s2, %s2082_s11  ;;  %v1648_v4 = vmov (!%p1283_p4), 0.0  }
  0x64   : > { %558 = vst [vmem:[#allocation2] sm:$0xff] (!%p1283_p4), %v1648_v4  ;;  %559 = vst [vmem:[#allocation2 + $0x8] sm:$0xff] (!%p1283_p4), %v1648_v4 }
  0x65   : > { %560 = vst [vmem:[#allocation2 + $0x10] sm:$0xff] (!%p1283_p4), %v1648_v4  ;;  %561 = vst [vmem:[#allocation2 + $0x18] sm:$0xff] (!%p1283_p4), %v1648_v4 }
  0x69 PF: > { %v1458_v5 = vld [vmem:[%s1929_s6 + $0x4] ss:$8 sps:$4 sm:$0xff]   ;;  %v1462_v7 = vld [vmem:[%s1929_s6] ss:$8 sps:$4 sm:$0xff]   ;;  %v1464_v9 = vld [vmem:[%s1929_s6 + $0x14] ss:$8 sps:$4 sm:$0xff]  }
  0x6a   : > { %v1460_v6 = vld [vmem:[%s1929_s6 + $0x104] ss:$8 sps:$4 sm:$0xff]   ;;  %974 = vmatprep.subr.bf16.mxu1 %v1458_v5  ;;  %v1463_v8 = vld [vmem:[%s1929_s6 + $0x100] ss:$8 sps:$4 sm:$0xff]   ;;  %v1466_v10 = vld [vmem:[%s1929_s6 + $0x114] ss:$8 sps:$4 sm:$0xff]  }
  0x6b   : > { %1017 = vmatprep.subr.bf16.mxu0 %v1460_v6  ;;  %975 = vmatpush1.bf16.msra.mxu1 %v1462_v7  ;;  %v1468_v11 = vld [vmem:[%s1929_s6 + $0x10] ss:$8 sps:$4 sm:$0xff]   ;;  %v1470_v13 = vld [vmem:[%s1929_s6 + $0x24] ss:$8 sps:$4 sm:$0xff]   ;;  %v1474_v15 = vld [vmem:[%s1929_s6 + $0x20] ss:$8 sps:$4 sm:$0xff]  }
  0x6c   : > { %1018 = vmatpush1.bf16.msra.mxu0 %v1463_v8  ;;  %976 = vmatprep.subr.bf16.mxu1 %v1464_v9  ;;  %v1469_v12 = vld [vmem:[%s1929_s6 + $0x110] ss:$8 sps:$4 sm:$0xff]   ;;  %v1472_v14 = vld [vmem:[%s1929_s6 + $0x124] ss:$8 sps:$4 sm:$0xff]   ;;  %v1475_v16 = vld [vmem:[%s1929_s6 + $0x120] ss:$8 sps:$4 sm:$0xff]  }
  0x6d   : > { %1019 = vmatprep.subr.bf16.mxu0 %v1466_v10  ;;  %v1476_v17 = vld [vmem:[%s1929_s6 + $0x34] ss:$8 sps:$4 sm:$0xff]   ;;  %v1480_v19 = vld [vmem:[%s1929_s6 + $0x30] ss:$8 sps:$4 sm:$0xff]   ;;  %v1482_v21 = vld [vmem:[%s1929_s6 + $0x44] ss:$8 sps:$4 sm:$0xff]  }
  0x6e   : > { %v1478_v18 = vld [vmem:[%s1929_s6 + $0x134] ss:$8 sps:$4 sm:$0xff]   ;;  %v1481_v20 = vld [vmem:[%s1929_s6 + $0x130] ss:$8 sps:$4 sm:$0xff]   ;;  %v1484_v22 = vld [vmem:[%s1929_s6 + $0x144] ss:$8 sps:$4 sm:$0xff]  }
  0x6f   : > { %977 = vmatpush1.bf16.msra.mxu1 %v1468_v11  ;;  %v1486_v23 = vld [vmem:[%s1929_s6 + $0x40] ss:$8 sps:$4 sm:$0xff]   ;;  %v1488_v25 = vld [vmem:[%s1929_s6 + $0x54] ss:$8 sps:$4 sm:$0xff]   ;;  %v1492_v27 = vld [vmem:[%s1929_s6 + $0x50] ss:$8 sps:$4 sm:$0xff]  }
  0x70   : > { %1020 = vmatpush1.bf16.msra.mxu0 %v1469_v12  ;;  %978 = vmatprep.subr.bf16.mxu1 %v1470_v13  ;;  %v1487_v24 = vld [vmem:[%s1929_s6 + $0x140] ss:$8 sps:$4 sm:$0xff]   ;;  %v1490_v26 = vld [vmem:[%s1929_s6 + $0x154] ss:$8 sps:$4 sm:$0xff]   ;;  %v1493_v28 = vld [vmem:[%s1929_s6 + $0x150] ss:$8 sps:$4 sm:$0xff]  }
  0x71   : > { %1021 = vmatprep.subr.bf16.mxu0 %v1472_v14  ;;  %v1494_v29 = vld [vmem:[%s1929_s6 + $0x64] ss:$8 sps:$4 sm:$0xff]   ;;  %v1498_v31 = vld [vmem:[%s1929_s6 + $0x60] ss:$8 sps:$4 sm:$0xff]   ;;  %v1500_v33 = vld [vmem:[%s1929_s6 + $0x74] ss:$8 sps:$4 sm:$0xff]  }
  0x72   : > { %v1496_v30 = vld [vmem:[%s1929_s6 + $0x164] ss:$8 sps:$4 sm:$0xff]   ;;  %v1499_v32 = vld [vmem:[%s1929_s6 + $0x160] ss:$8 sps:$4 sm:$0xff]   ;;  %v1502_v34 = vld [vmem:[%s1929_s6 + $0x174] ss:$8 sps:$4 sm:$0xff]  }
  0x73   : > { %979 = vmatpush1.bf16.msra.mxu1 %v1474_v15  ;;  %v1504_v35 = vld [vmem:[%s1929_s6 + $0x70] ss:$8 sps:$4 sm:$0xff]   ;;  %v1506_v37 = vld [vmem:[%s1929_s6 + $0x84] ss:$8 sps:$4 sm:$0xff]   ;;  %v1510_v39 = vld [vmem:[%s1929_s6 + $0x80] ss:$8 sps:$4 sm:$0xff]  }
  0x74   : > { %1022 = vmatpush1.bf16.msra.mxu0 %v1475_v16  ;;  %980 = vmatprep.subr.bf16.mxu1 %v1476_v17  ;;  %v1505_v36 = vld [vmem:[%s1929_s6 + $0x170] ss:$8 sps:$4 sm:$0xff]   ;;  %v1508_v38 = vld [vmem:[%s1929_s6 + $0x184] ss:$8 sps:$4 sm:$0xff]   ;;  %v1511_v40 = vld [vmem:[%s1929_s6 + $0x180] ss:$8 sps:$4 sm:$0xff]  }
  0x75   : > { %1023 = vmatprep.subr.bf16.mxu0 %v1478_v18  ;;  %v1512_v41 = vld [vmem:[%s1929_s6 + $0x94] ss:$8 sps:$4 sm:$0xff]   ;;  %v1516_v43 = vld [vmem:[%s1929_s6 + $0x90] ss:$8 sps:$4 sm:$0xff]   ;;  %v1518_v45 = vld [vmem:[%s1929_s6 + $0xa4] ss:$8 sps:$4 sm:$0xff]  }
  0x76   : > { %v1514_v42 = vld [vmem:[%s1929_s6 + $0x194] ss:$8 sps:$4 sm:$0xff]   ;;  %v1517_v44 = vld [vmem:[%s1929_s6 + $0x190] ss:$8 sps:$4 sm:$0xff]   ;;  %v1520_v46 = vld [vmem:[%s1929_s6 + $0x1a4] ss:$8 sps:$4 sm:$0xff]  }
  0x77   : > { %981 = vmatpush1.bf16.msra.mxu1 %v1480_v19  ;;  %v1522_v47 = vld [vmem:[%s1929_s6 + $0xa0] ss:$8 sps:$4 sm:$0xff]   ;;  %v1524_v49 = vld [vmem:[%s1929_s6 + $0xb4] ss:$8 sps:$4 sm:$0xff]   ;;  %v1528_v51 = vld [vmem:[%s1929_s6 + $0xb0] ss:$8 sps:$4 sm:$0xff]  }
  0x78   : > { %1024 = vmatpush1.bf16.msra.mxu0 %v1481_v20  ;;  %982 = vmatprep.subr.bf16.mxu1 %v1482_v21  ;;  %v1523_v48 = vld [vmem:[%s1929_s6 + $0x1a0] ss:$8 sps:$4 sm:$0xff]   ;;  %v1526_v50 = vld [vmem:[%s1929_s6 + $0x1b4] ss:$8 sps:$4 sm:$0xff]   ;;  %v1529_v53 = vld [vmem:[%s1929_s6 + $0x1b0] ss:$8 sps:$4 sm:$0xff]  }
  0x79   : > { %1025 = vmatprep.subr.bf16.mxu0 %v1484_v22  ;;  %v1556_v52 = vld [vmem:[%s1927_s27 + $0x4] ss:$16 sps:$4 sm:$0xff]   ;;  %v1559_v56 = vld [vmem:[%s1927_s27 + $0xc] ss:$16 sps:$4 sm:$0xff]   ;;  %v1534_v57 = vld [vmem:[%s1929_s6 + $0xc0] ss:$8 sps:$4 sm:$0xff]  }
  0x7a   : > { %v1530_v54 = vld [vmem:[%s1929_s6 + $0xc4] ss:$8 sps:$4 sm:$0xff]   ;;  %1006 = vmatprep.mubr.bf16.mxu1 %v1556_v52  ;;  %1049 = vmatprep.mubr.bf16.mxu0 %v1559_v56  ;;  %v1535_v58 = vld [vmem:[%s1929_s6 + $0x1c0] ss:$8 sps:$4 sm:$0xff]   ;;  %v1536_v59 = vld [vmem:[%s1929_s6 + $0xd4] ss:$8 sps:$4 sm:$0xff]  }
  0x7b   : > { %983 = vmatpush1.bf16.msra.mxu1 %v1486_v23  ;;  %v1532_v55 = vld [vmem:[%s1929_s6 + $0x1c4] ss:$8 sps:$4 sm:$0xff]   ;;  %v1538_v60 = vld [vmem:[%s1929_s6 + $0x1d4] ss:$8 sps:$4 sm:$0xff]   ;;  %v1540_v61 = vld [vmem:[%s1929_s6 + $0xd0] ss:$8 sps:$4 sm:$0xff]  }
  0x7c   : > { %1026 = vmatpush1.bf16.msra.mxu0 %v1487_v24  ;;  %984 = vmatprep.subr.bf16.mxu1 %v1488_v25  ;;  %v1541_v62 = vld [vmem:[%s1929_s6 + $0x1d0] ss:$8 sps:$4 sm:$0xff]   ;;  %v1542_v63 = vld [vmem:[%s1929_s6 + $0xe4] ss:$8 sps:$4 sm:$0xff]   ;;  %v1546_v1 = vld [vmem:[%s1929_s6 + $0xe0] ss:$8 sps:$4 sm:$0xff]  }
  0x7d   : > { %1027 = vmatprep.subr.bf16.mxu0 %v1490_v26  ;;  %v1544_v0 = vld [vmem:[%s1929_s6 + $0x1e4] ss:$8 sps:$4 sm:$0xff]   ;;  %v1547_v2 = vld [vmem:[%s1929_s6 + $0x1e0] ss:$8 sps:$4 sm:$0xff]   ;;  %v1548_v3 = vld [vmem:[%s1929_s6 + $0xf4] ss:$8 sps:$4 sm:$0xff]  }
  0x7e   : > { %v1550_v4 = vld [vmem:[%s1929_s6 + $0x1f4] ss:$8 sps:$4 sm:$0xff]   ;;  %v1552_v5 = vld [vmem:[%s1929_s6 + $0xf0] ss:$8 sps:$4 sm:$0xff]   ;;  %v562_v10 = vld [vmem:[#allocation2] sm:$0xff]  ;;  %p1352_p5 = scmp.ne.s32.totalorder %s1630_s18, 8 }
  0x7f   : > { %985 = vmatpush1.bf16.msra.mxu1 %v1492_v27  ;;  %v1553_v6 = vld [vmem:[%s1929_s6 + $0x1f0] ss:$8 sps:$4 sm:$0xff]   ;;  %v563_v14 = vld [vmem:[#allocation2 + $0x8] sm:$0xff] }
  0x80   : > { %1028 = vmatpush1.bf16.msra.mxu0 %v1493_v28  ;;  %986 = vmatprep.subr.bf16.mxu1 %v1494_v29  ;;  %v1554_v7 = vld [vmem:[%s1927_s27] ss:$16 sps:$4 sm:$0xff]   ;;  %v1557_v8 = vld [vmem:[%s1927_s27 + $0x8] ss:$16 sps:$4 sm:$0xff]   ;;  %v1078_v29 = vlaneseq (!%p1352_p5) }
  0x81   : > { %1029 = vmatprep.subr.bf16.mxu0 %v1496_v30  ;;  %v564_v18 = vld [vmem:[#allocation2 + $0x10] sm:$0xff]  ;;  %v565_v23 = vld [vmem:[#allocation2 + $0x18] sm:$0xff] }
  0x82   : > { %v1079_v30 = vshrl.u32 (!%p1352_p5), %v1078_v29, 7 }
  0x83   : > { %987 = vmatpush1.bf16.msra.mxu1 %v1498_v31  ;;  %v1076_v31 = vld [vmem:[%s550_s4] sm:$0x3] (!%p1352_p5) }
  0x84   : > { %1030 = vmatpush1.bf16.msra.mxu0 %v1499_v32  ;;  %988 = vmatprep.subr.bf16.mxu1 %v1500_v33  ;;  %v1080_v33 = vsub.s32 (!%p1352_p5), 0, %v1079_v30 }
  0x85   : > { %1031 = vmatprep.subr.bf16.mxu0 %v1502_v34  ;;  %v1084_v34 = vsub.s32 (!%p1352_p5), 1, %v1079_v30 }
  0x87   : > { %989 = vmatpush1.bf16.msra.mxu1 %v1504_v35 }
  0x88   : > { %1032 = vmatpush1.bf16.msra.mxu0 %v1505_v36  ;;  %990 = vmatprep.subr.bf16.mxu1 %v1506_v37 }
  0x89   : > { %1033 = vmatprep.subr.bf16.mxu0 %v1508_v38  ;;  %v1081_v38 = vrot.slane (!%p1352_p5), %v1076_v31, %v1080_v33 }
  0x8b   : > { %991 = vmatpush1.bf16.msra.mxu1 %v1510_v39  ;;  %v1085_v39 = vrot.slane (!%p1352_p5), %v1076_v31, %v1084_v34 }
  0x8c   : > { %1034 = vmatpush1.bf16.msra.mxu0 %v1511_v40  ;;  %992 = vmatprep.subr.bf16.mxu1 %v1512_v41 }
  0x8d   : > { %1035 = vmatprep.subr.bf16.mxu0 %v1514_v42 }
  0x8f   : > { %993 = vmatpush1.bf16.msra.mxu1 %v1516_v43 }
  0x90   : > { %1036 = vmatpush1.bf16.msra.mxu0 %v1517_v44  ;;  %994 = vmatprep.subr.bf16.mxu1 %v1518_v45 }
  0x91   : > { %1037 = vmatprep.subr.bf16.mxu0 %v1520_v46 }
  0x93   : > { %995 = vmatpush1.bf16.msra.mxu1 %v1522_v47 }
  0x94   : > { %1038 = vmatpush1.bf16.msra.mxu0 %v1523_v48  ;;  %996 = vmatprep.subr.bf16.mxu1 %v1524_v49 }
  0x95   : > { %1039 = vmatprep.subr.bf16.mxu0 %v1526_v50 }
  0x97   : > { %997 = vmatpush1.bf16.msra.mxu1 %v1528_v51 }
  0x98   : > { %1040 = vmatpush1.bf16.msra.mxu0 %v1529_v53  ;;  %998 = vmatprep.subr.bf16.mxu1 %v1530_v54 }
  0x99   : > { %1041 = vmatprep.subr.bf16.mxu0 %v1532_v55 }
  0x9b   : > { %999 = vmatpush1.bf16.msra.mxu1 %v1534_v57 }
  0x9c   : > { %1042 = vmatpush1.bf16.msra.mxu0 %v1535_v58  ;;  %1000 = vmatprep.subr.bf16.mxu1 %v1536_v59 }
  0x9d   : > { %1043 = vmatprep.subr.bf16.mxu0 %v1538_v60 }
  0x9f   : > { %1001 = vmatpush1.bf16.msra.mxu1 %v1540_v61 }
  0xa0   : > { %1044 = vmatpush1.bf16.msra.mxu0 %v1541_v62  ;;  %1002 = vmatprep.subr.bf16.mxu1 %v1542_v63 }
  0xa1   : > { %1045 = vmatprep.subr.bf16.mxu0 %v1544_v0 }
  0xa3   : > { %1003 = vmatpush1.bf16.msra.mxu1 %v1546_v1 }
  0xa4   : > { %1046 = vmatpush1.bf16.msra.mxu0 %v1547_v2  ;;  %1004 = vmatprep.subr.bf16.mxu1 %v1548_v3 }
  0xa5   : > { %1047 = vmatprep.subr.bf16.mxu0 %v1550_v4 }
  0xa7   : > { %1005 = vmatpush1.bf16.msra.mxu1 %v1552_v5 }
  0xa8   : > { %1048 = vmatpush1.bf16.msra.mxu0 %v1553_v6 }
  0xaa   : > { %1007 = vmatmul.mubr.bf16.vlgmr.msra.gmra.mrb[0].mxu1 %v1554_v7 }
  0xab   : > { %1050 = vmatmul.mubr.bf16.vlgmr.msra.gmra.mrb[0].mxu0 %v1557_v8 }
 0x17d   : > { %v1008_v9 = vpop.f32.mrb[0].mxu1 }
 0x17e   : > { %v1051_v11 = vpop.f32.mrb[0].mxu0  ;;  %v1010_v13 = vpop.f32.mrb[1].mxu1 }
 0x17f   : > { %v1052_v12 = vadd.f32 %v1051_v11, %v1008_v9  ;;  %v1053_v15 = vpop.f32.mrb[1].mxu0  ;;  %v1012_v17 = vpop.f32.mrb[2].mxu1 }
 0x180   : > { %v1054_v16 = vadd.f32 %v1053_v15, %v1010_v13  ;;  %v1055_v19 = vpop.f32.mrb[2].mxu0  ;;  %v1014_v22 = vpop.f32.mrb[3].mxu1  ;;  %1071 = sbr.rel (%p1352_p5) target bundleno = 405 (0x195), region = 101 }
 0x181   : > { %v1060_v20 = vadd.f32 %v1052_v12, %v562_v10  ;;  %v1056_v21 = vadd.f32 %v1055_v19, %v1012_v17  ;;  %v1057_v24 = vpop.f32.mrb[3].mxu0 }
 0x182   : > { %v1061_v25 = vadd.f32 %v1054_v16, %v563_v14  ;;  %v1058_v26 = vadd.f32 %v1057_v24, %v1014_v22 }
 0x183   : > { %1064 = vst [vmem:[#allocation2] sm:$0xff] %v1060_v20  ;;  %v1062_v27 = vadd.f32 %v1056_v21, %v564_v18 }
 0x184   : > { %1065 = vst [vmem:[#allocation2 + $0x8] sm:$0xff] %v1061_v25  ;;  %v1063_v28 = vadd.f32 %v1058_v26, %v565_v23 }
 0x185   : > { %1066 = vst [vmem:[#allocation2 + $0x10] sm:$0xff] %v1062_v27 }
 0x186   : > { %1067 = vst [vmem:[#allocation2 + $0x18] sm:$0xff] %v1063_v28 }
 0x18a   : > { %v1072_v32 = vld [vmem:[#allocation2] sm:$0xff] }
 0x18b   : > { %v1073_v35 = vld [vmem:[#allocation2 + $0x8] sm:$0xff]  ;;  %v1088_v40 = vadd.f32 %v1081_v38, %v1072_v32 }
 0x18c   : > { %v1074_v36 = vld [vmem:[#allocation2 + $0x10] sm:$0xff]  ;;  %v1089_v41 = vadd.f32 %v1085_v39, %v1073_v35 }
 0x18d   : > { %v1075_v37 = vld [vmem:[#allocation2 + $0x18] sm:$0xff]  ;;  %v1090_v42 = vadd.f32 %v1081_v38, %v1074_v36  ;;  %v1092_v44 = vmax.f32 %v1088_v40, 0.0 }
 0x18e   : > { %v1091_v43 = vadd.f32 %v1085_v39, %v1075_v37  ;;  %v1093_v45 = vmax.f32 %v1089_v41, 0.0 }
 0x18f   : > { %v1094_v46 = vmax.f32 %v1090_v42, 0.0 }
 0x190   : > { %v1095_v47 = vmax.f32 %v1091_v43, 0.0  ;;  %v1362_v48 = vpack.c.bf16 %v1093_v45, %v1092_v44 }
 0x192   : > { %v1363_v49 = vpack.c.bf16 %v1095_v47, %v1094_v46  ;;  %1108 = vst [vmem:[%s1931_s1] sm:$0xff] %v1362_v48 }
 0x194   : > { %1109 = vst [vmem:[%s1931_s1 + $0x8] sm:$0xff] %v1363_v49 }
 0x195 PF: > { %1116 = sbr.rel (!%p1763_p12) target bundleno = 413 (0x19d), region = 105  ;;  %s1364_s16 = sshll.u32 (%p1763_p12), %s1634_s19, 3 }
 0x196   : > { %s1122_s5 = scalar_lea.vmem (%p1763_p12), %s2054_s3, %s1364_s16 }
 0x199   : > { %v1152_v50 = vld [vmem:[%s1931_s1] sm:$0xff] (%p1763_p12) }
 0x19a   : > { %1153 = vst [vmem:[%s1122_s5] sm:$0xff] (%p1763_p12), %v1152_v50 }
 0x19b   : > { %v1154_v51 = vld [vmem:[%s1931_s1 + $0x8] sm:$0xff] (%p1763_p12) }
 0x19c   : > { %1155 = vst [vmem:[%s1122_s5 + $0x10] sm:$0xff] %v1154_v51 }
 0x19d PF: > { %s13_s22 = sadd.s32 1, %s1646_s22   ;;  %s2064_s1 = sld [smem:[#allocation6_spill]] }
 0x19e   : > { %p10_p6 = scmp.ge.s32.totalorder %s13_s22, 20   ;;  %s2065_s12 = smov %s1610_s13 }
 0x19f   : > { %s2066_s13 = smov %s1761_s9  ;;  %s2067_s14 = smov %s1618_s15 }
 0x1a0   : > { %s2068_s15 = smov %s1758_s8  ;;  %s2069_s16 = smov %s1626_s17 }
 0x1a1   : > { %s2070_s17 = smov %s1744_s30  ;;  %s2071_s18 = smov %s1638_s20 }
 0x1a2   : > { %s2072_s19 = smov %s1642_s21  ;;  %s2073_s20 = smov %s2076_s24 }
 0x1a3   : > { %s2074_s21 = smov %s2064_s1  ;;  %12 = sbr.rel (!%p10_p6) target bundleno = 9 (0x9), region = 185 }

// kernel: _lambda_.41
= control target key start
LH: loop header
LB: loop body
LE: loop exit
PB: predicated region body
PF: predicated region fallthrough
CT: control target
= control target key end

     0   :  { %s687_s1 = inlined_call_operand.vmem [shape: bf16[512,128], index: 1, kind: input, shape index: {}]   ;;  %s688_s0 = inlined_call_operand.vmem [shape: bf16[16,512], index: 0, kind: input, shape index: {}]   ;;  %s689_s2 = inlined_call_operand.vmem [shape: f32[1,128], index: 2, kind: input, shape index: {}]   ;;  %s690_s3 = inlined_call_operand.vmem [shape: f32[16,128], index: 3, kind: output, shape index: {}]  }
   0x1   :  { %v504_v0 = vld [vmem:[%s687_s1 + $0x40] sm:$0xff]   ;;  %v508_v4 = vld [vmem:[%s687_s1 + $0x48] sm:$0xff]   ;;  %v512_v8 = vld [vmem:[%s687_s1 + $0x50] sm:$0xff]  }
   0x2   :  { %v505_v1 = vld [vmem:[%s687_s1 + $0xc0] sm:$0xff]   ;;  %460 = vmatprep.subr.bf16.mxu0 %v504_v0  ;;  %v509_v5 = vld [vmem:[%s687_s1 + $0xc8] sm:$0xff]   ;;  %v513_v9 = vld [vmem:[%s687_s1 + $0xd0] sm:$0xff]  }
   0x3   :  { %v506_v2 = vld [vmem:[%s687_s1] sm:$0xff]   ;;  %482 = vmatprep.subr.bf16.mxu1 %v505_v1  ;;  %v510_v6 = vld [vmem:[%s687_s1 + $0x8] sm:$0xff]   ;;  %v514_v10 = vld [vmem:[%s687_s1 + $0x10] sm:$0xff]  }
   0x4   :  { %v507_v3 = vld [vmem:[%s687_s1 + $0x80] sm:$0xff]   ;;  %461 = vmatpush3.bf16.msra.mxu0 %v506_v2  ;;  %v511_v7 = vld [vmem:[%s687_s1 + $0x88] sm:$0xff]   ;;  %v515_v11 = vld [vmem:[%s687_s1 + $0x90] sm:$0xff]  }
   0x5   :  { %483 = vmatpush3.bf16.msra.mxu1 %v507_v3  ;;  %462 = vmatprep.subr.bf16.mxu0 %v508_v4  ;;  %v516_v12 = vld [vmem:[%s687_s1 + $0x58] sm:$0xff]   ;;  %v520_v16 = vld [vmem:[%s687_s1 + $0x60] sm:$0xff]   ;;  %v524_v20 = vld [vmem:[%s687_s1 + $0x68] sm:$0xff]  }
   0x6   :  { %484 = vmatprep.subr.bf16.mxu1 %v509_v5  ;;  %v517_v13 = vld [vmem:[%s687_s1 + $0xd8] sm:$0xff]   ;;  %v521_v17 = vld [vmem:[%s687_s1 + $0xe0] sm:$0xff]   ;;  %v525_v21 = vld [vmem:[%s687_s1 + $0xe8] sm:$0xff]  }
   0x7   :  { %v518_v14 = vld [vmem:[%s687_s1 + $0x18] sm:$0xff]   ;;  %v522_v18 = vld [vmem:[%s687_s1 + $0x20] sm:$0xff]   ;;  %v526_v22 = vld [vmem:[%s687_s1 + $0x28] sm:$0xff]  }
   0x8   :  { %463 = vmatpush3.bf16.msra.mxu0 %v510_v6  ;;  %v519_v15 = vld [vmem:[%s687_s1 + $0x98] sm:$0xff]   ;;  %v523_v19 = vld [vmem:[%s687_s1 + $0xa0] sm:$0xff]   ;;  %v527_v23 = vld [vmem:[%s687_s1 + $0xa8] sm:$0xff]  }
   0x9   :  { %485 = vmatpush3.bf16.msra.mxu1 %v511_v7  ;;  %464 = vmatprep.subr.bf16.mxu0 %v512_v8  ;;  %v528_v24 = vld [vmem:[%s687_s1 + $0x70] sm:$0xff]   ;;  %v532_v28 = vld [vmem:[%s687_s1 + $0x78] sm:$0xff]   ;;  %v457_v45 = vld [vmem:[%s689_s2] ss:$0 sm:$0xff] }
   0xa   :  { %486 = vmatprep.subr.bf16.mxu1 %v513_v9  ;;  %v529_v25 = vld [vmem:[%s687_s1 + $0xf0] sm:$0xff]   ;;  %v533_v29 = vld [vmem:[%s687_s1 + $0xf8] sm:$0xff]  }
   0xb   :  { %v530_v26 = vld [vmem:[%s687_s1 + $0x30] sm:$0xff]   ;;  %v534_v30 = vld [vmem:[%s687_s1 + $0x38] sm:$0xff]  }
   0xc   :  { %465 = vmatpush3.bf16.msra.mxu0 %v514_v10  ;;  %v531_v27 = vld [vmem:[%s687_s1 + $0xb0] sm:$0xff]   ;;  %v535_v31 = vld [vmem:[%s687_s1 + $0xb8] sm:$0xff]  }
   0xd   :  { %487 = vmatpush3.bf16.msra.mxu1 %v515_v11  ;;  %466 = vmatprep.subr.bf16.mxu0 %v516_v12  ;;  %v536_v32 = vld [vmem:[%s688_s0] ss:$16 sps:$4 sm:$0xff]   ;;  %v538_v33 = vld [vmem:[%s688_s0 + $0x4] ss:$16 sps:$4 sm:$0xff]   ;;  %v539_v34 = vld [vmem:[%s688_s0 + $0x8] ss:$16 sps:$4 sm:$0xff]  }
   0xe   :  { %488 = vmatprep.subr.bf16.mxu1 %v517_v13  ;;  %v541_v35 = vld [vmem:[%s688_s0 + $0xc] ss:$16 sps:$4 sm:$0xff]   ;;  %335 = vmatprep.mubr.bf16.mxu0 %v538_v33 }
   0xf   :  { %376 = vmatprep.mubr.bf16.mxu1 %v541_v35 }
  0x10   :  { %467 = vmatpush3.bf16.msra.mxu0 %v518_v14 }
  0x11   :  { %489 = vmatpush3.bf16.msra.mxu1 %v519_v15  ;;  %468 = vmatprep.subr.bf16.mxu0 %v520_v16 }
  0x12   :  { %490 = vmatprep.subr.bf16.mxu1 %v521_v17 }
  0x14   :  { %469 = vmatpush3.bf16.msra.mxu0 %v522_v18 }
  0x15   :  { %491 = vmatpush3.bf16.msra.mxu1 %v523_v19  ;;  %470 = vmatprep.subr.bf16.mxu0 %v524_v20 }
  0x16   :  { %492 = vmatprep.subr.bf16.mxu1 %v525_v21 }
  0x18   :  { %471 = vmatpush3.bf16.msra.mxu0 %v526_v22 }
  0x19   :  { %493 = vmatpush3.bf16.msra.mxu1 %v527_v23  ;;  %472 = vmatprep.subr.bf16.mxu0 %v528_v24 }
  0x1a   :  { %494 = vmatprep.subr.bf16.mxu1 %v529_v25 }
  0x1c   :  { %473 = vmatpush3.bf16.msra.mxu0 %v530_v26 }
  0x1d   :  { %495 = vmatpush3.bf16.msra.mxu1 %v531_v27  ;;  %474 = vmatprep.subr.bf16.mxu0 %v532_v28 }
  0x1e   :  { %496 = vmatprep.subr.bf16.mxu1 %v533_v29 }
  0x20   :  { %475 = vmatpush3.bf16.msra.mxu0 %v534_v30 }
  0x21   :  { %497 = vmatpush3.bf16.msra.mxu1 %v535_v31 }
  0x23   :  { %336 = vmatmul.mubr.bf16.vlgmr.msra.gmra.mrb[0].mxu0 %v536_v32 }
  0x24   :  { %377 = vmatmul.mubr.bf16.vlgmr.msra.gmra.mrb[0].mxu1 %v539_v34 }
  0xf6   :  { %v476_v36 = vpop.f32.mrb[0].mxu0 }
  0xf7   :  { %v498_v37 = vpop.f32.mrb[0].mxu1  ;;  %v477_v38 = vpop.f32.mrb[1].mxu0 }
  0xf8   :  { %v478_v39 = vadd.f32 %v477_v38, %v476_v36  ;;  %v499_v40 = vpop.f32.mrb[1].mxu1  ;;  %v479_v41 = vpop.f32.mrb[2].mxu0 }
  0xf9   :  { %v500_v42 = vadd.f32 %v499_v40, %v498_v37  ;;  %v501_v43 = vpop.f32.mrb[2].mxu1  ;;  %v480_v44 = vpop.f32.mrb[3].mxu0 }
  0xfa   :  { %v481_v46 = vadd.f32 %v480_v44, %v479_v41  ;;  %v502_v47 = vpop.f32.mrb[3].mxu1 }
  0xfb   :  { %v379_v48 = vadd.f32 %v500_v42, %v478_v39  ;;  %v503_v49 = vadd.f32 %v502_v47, %v501_v43 }
  0xfd   :  { %v401_v50 = vadd.f32 %v457_v45, %v379_v48  ;;  %v382_v51 = vadd.f32 %v503_v49, %v481_v46 }
  0xff   :  { %v458_v52 = vmul.f32 -1.442695, %v401_v50  ;;  %v402_v53 = vadd.f32 %v457_v45, %v382_v51 }
 0x101   :  { %542 = vpow2.f32 %v458_v52  ;;  %v459_v54 = vmul.f32 -1.442695, %v402_v53 }
 0x103   :  { %544 = vpow2.f32 %v459_v54 }
 0x10b   :  { %v543_v55 = vpop.eup %542 }
 0x10c   :  { %v409_v56 = vadd.f32 1.0, %v543_v55 }
 0x10d   :  { %v545_v57 = vpop.eup %544 }
 0x10e   :  { %546 = vrcp.f32 %v409_v56  ;;  %v410_v58 = vadd.f32 1.0, %v545_v57 }
 0x110   :  { %548 = vrcp.f32 %v410_v58 }
 0x118   :  { %v547_v59 = vpop.eup %546 }
 0x119   :  { %415 = vst [vmem:[%s690_s3] sm:$0xff] %v547_v59 }
 0x11a   :  { %v549_v60 = vpop.eup %548 }
 0x11b   :  { %416 = vst [vmem:[%s690_s3 + $0x8] sm:$0xff] %v549_v60 }

</bundles_post_ra>
